<compile_context>
chip_gen: v6e
topology: v6e:2x2x1
jax: 0.10.0
libtpu: 0.0.40
codegen_flags: <defaults>
</compile_context>

<pallas_src>
import functools

import jax
import jax.numpy as jnp
from jax.experimental import pallas as pl
from jax.experimental.pallas import tpu as pltpu


# ---------------------------------------------------------------------------
# Pallas window-attention core
# ---------------------------------------------------------------------------

def _win_attn_kernel(q_ref, k_ref, v_ref, mask_ref, o_ref, *,
                     num_heads, scale, n_real):
    """One grid step = `sps` samples, all windows, all heads.

    q_ref/k_ref/v_ref: (sps, nW, Npad, H*D) bf16
    mask_ref:          (sps*nW, Npad, Npad) f32 additive mask (Swin shift + key pad)
    o_ref:             (sps, nW, N, H*D) bf16   (only the N real token rows)
    """
    sps, nW, Npad, HD = q_ref.shape
    D = HD // num_heads
    W = sps * nW
    scale_b = jnp.asarray(scale, dtype=q_ref.dtype)
    mask = mask_ref[...]                                   # (W, Npad, Npad) f32

    for h in range(num_heads):
        lo = h * D
        # Lane-slice reads straight from the VMEM input blocks (static offsets).
        qh = (q_ref[:, :, :, lo:lo + D] * scale_b).reshape(W, Npad, D)
        kh = k_ref[:, :, :, lo:lo + D].reshape(W, Npad, D)
        vh = v_ref[:, :, :, lo:lo + D].reshape(W, Npad, D)

        # QK^T batched over windows, contracting head_dim (no explicit k.T relayout).
        s = jnp.einsum('wqd,wkd->wqk', qh, kh,
                       preferred_element_type=jnp.float32) + mask     # (W,Npad,Npad)

        # softmax over keys, in f32; reciprocal on the EUP.
        m = jnp.max(s, axis=-1, keepdims=True)
        p = jnp.exp(s - m)
        denom = jnp.sum(p, axis=-1, keepdims=True)
        a = p * pl.reciprocal(denom, approx=True)

        # PV matmul: bf16 probs on the MXU, f32 accumulation.
        oh = jnp.einsum('wqk,wkd->wqd', a.astype(vh.dtype), vh,
                        preferred_element_type=jnp.float32)           # (W,Npad,D)

        # Write this head's result directly into its lane slice of the output block
        # (drops the padded query rows). No concat, no extra f32 slab kept live.
        o_ref[:, :, :, lo:lo + D] = (
            oh[:, :n_real, :].reshape(sps, nW, n_real, D).astype(o_ref.dtype))


def attention_core_pallas(q, k, v, mask, *, num_heads, scale, num_win):
    """Pallas window attention.

    Args:
      q, k, v: (B_, N, H*D) float32 where B_ = (B*T) * num_win windows.
      mask:    (num_win, N, N) additive float mask (0 / -100), or None.
    Returns:
      (B_, N, H*D) bfloat16.
    """
    B_, N, HD = q.shape
    BT = B_ // num_win

    # >=2 samples per step amortizes the ~600-cycle per-step overhead while keeping
    # grid length >= 2 so the v7x dual TensorCores both get work.
    sps = 2 if (BT % 2 == 0 and BT >= 4) else 1
    n_steps = BT // sps

    # Pad the window token count up to a multiple of 8 sublanes (e.g. 25 -> 32) so
    # score tiles are clean (32, 32) and matmuls are 32x32x32.
    Npad = ((N + 7) // 8) * 8
    pad_n = Npad - N

    def prep(t):
        # pad + bf16 cast fuse into a single elementwise pass; reshape is free
        # (windows of a sample are contiguous in B_).
        if pad_n:
            t = jnp.pad(t, ((0, 0), (0, pad_n), (0, 0)))
        return t.astype(jnp.bfloat16).reshape(BT, num_win, Npad, HD)

    qb, kb, vb = prep(q), prep(k), prep(v)

    # Combined additive mask: Swin shift mask (0 / -100) + key-padding (-1e9).
    if mask is not None:
        m = jnp.pad(mask.astype(jnp.float32), ((0, 0), (0, pad_n), (0, pad_n)))
    else:
        m = jnp.zeros((num_win, Npad, Npad), jnp.float32)
    if pad_n:
        key_pad = jnp.arange(Npad) >= N
        m = jnp.where(key_pad[None, None, :], jnp.float32(-1e9), m)
    m = jnp.tile(m, (sps, 1, 1))                      # (sps*num_win, Npad, Npad)

    blk_in = pl.BlockSpec((sps, num_win, Npad, HD), lambda b: (b, 0, 0, 0))
    blk_out = pl.BlockSpec((sps, num_win, N, HD), lambda b: (b, 0, 0, 0))
    blk_mask = pl.BlockSpec((sps * num_win, Npad, Npad), lambda b: (0, 0, 0))

    kernel = functools.partial(_win_attn_kernel, num_heads=num_heads,
                               scale=scale, n_real=N)

    out = pl.pallas_call(
        kernel,
        out_shape=jax.ShapeDtypeStruct((BT, num_win, N, HD), jnp.bfloat16),
        grid_spec=pltpu.PrefetchScalarGridSpec(
            num_scalar_prefetch=0,
            grid=(n_steps,),
            in_specs=[blk_in, blk_in, blk_in, blk_mask],
            out_specs=blk_out),
        # < 0.5 MiB VMEM per step here; at production sizes re-derive vs 64 MiB on
        # v7x and set vmem_limit_bytes explicitly.
        compiler_params=pltpu.CompilerParams(
            dimension_semantics=("parallel",)),
    )(qb, kb, vb, m)
    return out.reshape(B_, N, HD)


# ---------------------------------------------------------------------------
# Pure-JAX reference attention core (for validation)
# ---------------------------------------------------------------------------

def attention_core_ref(q, k, v, mask, *, num_heads, scale, num_win):
    B_, N, HD = q.shape
    D = HD // num_heads
    qh = jnp.transpose(q.reshape(B_, N, num_heads, D), (0, 2, 1, 3)) * scale
    kh = jnp.transpose(k.reshape(B_, N, num_heads, D), (0, 2, 1, 3))
    vh = jnp.transpose(v.reshape(B_, N, num_heads, D), (0, 2, 1, 3))
    attn = jnp.einsum('bhnd,bhmd->bhnm', qh, kh)
    if mask is not None:
        attn = attn.reshape(B_ // num_win, num_win, num_heads, N, N) + mask[None, :, None]
        attn = attn.reshape(B_, num_heads, N, N)
    attn = jax.nn.softmax(attn, axis=-1)
    out = jnp.einsum('bhnm,bhmd->bhnd', attn, vh)
    return jnp.transpose(out, (0, 2, 1, 3)).reshape(B_, N, HD)


# ---------------------------------------------------------------------------
# Swin block glue (plain JAX, mirrors the PyTorch module)
# ---------------------------------------------------------------------------

def layer_norm(x, gamma, beta, eps=1e-5):
    mu = jnp.mean(x, axis=-1, keepdims=True)
    var = jnp.mean((x - mu) ** 2, axis=-1, keepdims=True)
    return (x - mu) / jnp.sqrt(var + eps) * gamma + beta


def mlp(x, p):
    h = x @ p['fc1_w'] + p['fc1_b']
    h = jax.nn.gelu(h, approximate=False)
    return h @ p['fc2_w'] + p['fc2_b']


def window_partition(x, ws):
    B, H, W, C = x.shape
    x = x.reshape(B, H // ws, ws, W // ws, ws, C)
    return jnp.transpose(x, (0, 1, 3, 2, 4, 5)).reshape(-1, ws, ws, C)


def window_reverse(windows, ws, H, W):
    B = windows.shape[0] // ((H * W) // (ws * ws))
    x = windows.reshape(B, H // ws, W // ws, ws, ws, -1)
    return jnp.transpose(x, (0, 1, 3, 2, 4, 5)).reshape(B, H, W, -1)


def build_shift_mask(H, W, ws, shift):
    """Swin SW-MSA attention mask: (num_windows, ws*ws, ws*ws) with 0 / -100."""
    img_mask = jnp.zeros((1, H, W, 1), dtype=jnp.float32)
    cnt = 0
    slices = (slice(0, -ws), slice(-ws, -shift), slice(-shift, None))
    for hs in slices:
        for wsl in slices:
            img_mask = img_mask.at[:, hs, wsl, :].set(float(cnt))
            cnt += 1
    mask_windows = window_partition(img_mask, ws).reshape(-1, ws * ws)
    attn_mask = mask_windows[:, None, :] - mask_windows[:, :, None]
    return jnp.where(attn_mask != 0, -100.0, 0.0)


def window_attention(xw, p, *, dim, num_heads, mask, num_win, core):
    # xw: (B_, N, dim + guidance_dim)
    q = xw @ p['q_w'] + p['q_b']
    k = xw @ p['k_w'] + p['k_b']
    v = xw[..., :dim] @ p['v_w'] + p['v_b']
    head_dim = dim // num_heads
    scale = head_dim ** (-0.5)
    out = core(q, k, v, mask, num_heads=num_heads, scale=scale, num_win=num_win)
    return out @ p['proj_w'] + p['proj_b']


def swin_block(x, guidance, p, *, dim, input_resolution, num_heads, window_size,
               shift_size, attn_mask, attn_core):
    H, W = input_resolution
    Bt, L, C = x.shape
    shortcut = x
    x = layer_norm(x, p['norm1_g'], p['norm1_b'])
    x = x.reshape(Bt, H, W, C)
    if guidance is not None:
        g = guidance.reshape(Bt, H, W, -1)
        x = jnp.concatenate([x, g], axis=-1)
    if shift_size > 0:
        x = jnp.roll(x, shift=(-shift_size, -shift_size), axis=(1, 2))
    num_win = (H // window_size) * (W // window_size)
    xw = window_partition(x, window_size)
    xw = xw.reshape(-1, window_size * window_size, xw.shape[-1])
    aw = window_attention(xw, p['attn'], dim=dim, num_heads=num_heads,
                          mask=attn_mask, num_win=num_win, core=attn_core)
    aw = aw.reshape(-1, window_size, window_size, C)
    xr = window_reverse(aw, window_size, H, W)
    if shift_size > 0:
        xr = jnp.roll(xr, shift=(shift_size, shift_size), axis=(1, 2))
    x = shortcut + xr.reshape(Bt, H * W, C)
    x = x + mlp(layer_norm(x, p['norm2_g'], p['norm2_b']), p['mlp'])
    return x


def swin_wrapper_forward(x, appearance_guidance, params, *, dim, input_resolution,
                         num_heads, window_size, attn_core):
    """SwinTransformerBlockWrapper.forward: x (B,C,T,H,W), guidance (B,Cg,H,W)."""
    B, C, T, H, W = x.shape
    xf = jnp.transpose(x, (0, 2, 3, 4, 1)).reshape(B * T, H * W, C)

    if appearance_guidance is not None:
        g = jnp.transpose(appearance_guidance, (0, 2, 3, 1)).reshape(B, H * W, -1)
        g = jnp.repeat(g[:, None], T, axis=1).reshape(B * T, H * W, -1)
        g = layer_norm(g, params['guidance_norm_g'], params['guidance_norm_b'])
    else:
        g = None

    # Replicate SwinTransformerBlock's window/shift clamping.
    ws = window_size
    shift = window_size // 2
    if min(H, W) <= ws:
        ws = min(H, W)
        shift = 0
    attn_mask = build_shift_mask(H, W, ws, shift) if shift > 0 else None

    xf = swin_block(xf, g, params['block1'], dim=dim, input_resolution=(H, W),
                    num_heads=num_heads, window_size=ws, shift_size=0,
                    attn_mask=None, attn_core=attn_core)
    xf = swin_block(xf, g, params['block2'], dim=dim, input_resolution=(H, W),
                    num_heads=num_heads, window_size=ws, shift_size=shift,
                    attn_mask=attn_mask, attn_core=attn_core)

    return jnp.transpose(xf.reshape(B, T, H, W, C), (0, 4, 1, 2, 3))


# ---------------------------------------------------------------------------
# Parameter construction
# ---------------------------------------------------------------------------

def _linear_params(key, fan_in, fan_out, scale=0.02):
    kw, kb = jax.random.split(key)
    w = jax.random.normal(kw, (fan_in, fan_out), dtype=jnp.float32) * scale
    b = jax.random.normal(kb, (fan_out,), dtype=jnp.float32) * scale
    return w, b


def init_params(key, *, dim, guidance_dim, mlp_ratio=4):
    keys = jax.random.split(key, 12)

    def block_params(ks):
        qw, qb = _linear_params(ks[0], dim + guidance_dim, dim)
        kw, kb = _linear_params(ks[1], dim + guidance_dim, dim)
        vw, vb = _linear_params(ks[2], dim, dim)
        pw, pb = _linear_params(ks[3], dim, dim)
        f1w, f1b = _linear_params(ks[4], dim, dim * mlp_ratio)
        f2w, f2b = _linear_params(ks[5], dim * mlp_ratio, dim)
        return {
            'norm1_g': jnp.ones((dim,), jnp.float32),
            'norm1_b': jnp.zeros((dim,), jnp.float32),
            'norm2_g': jnp.ones((dim,), jnp.float32),
            'norm2_b': jnp.zeros((dim,), jnp.float32),
            'attn': {'q_w': qw, 'q_b': qb, 'k_w': kw, 'k_b': kb,
                     'v_w': vw, 'v_b': vb, 'proj_w': pw, 'proj_b': pb},
            'mlp': {'fc1_w': f1w, 'fc1_b': f1b, 'fc2_w': f2w, 'fc2_b': f2b},
        }

    return {
        'guidance_norm_g': jnp.ones((guidance_dim,), jnp.float32),
        'guidance_norm_b': jnp.zeros((guidance_dim,), jnp.float32),
        'block1': block_params(keys[0:6]),
        'block2': block_params(keys[6:12]),
    }


# ---------------------------------------------------------------------------
# Self-test
# ---------------------------------------------------------------------------

if __name__ == "__main__":
    # Small but lane-friendly shapes: dim=128 (4 heads x head_dim 32 -> H*D = 128 lanes),
    # guidance_dim=64, 10x10 resolution, window 5 -> 25 tokens/window (padded to 32
    # inside the attention core), 4 windows, B*T=4 (2 samples per grid step).
    B, C, T = 2, 128, 2
    Hres = Wres = 10
    guidance_dim = 64
    nheads = 4
    window_size = 5

    key = jax.random.PRNGKey(0)
    kx, kg, kp = jax.random.split(key, 3)
    x = jax.random.normal(kx, (B, C, T, Hres, Wres), dtype=jnp.float32)
    guidance = jax.random.normal(kg, (B, guidance_dim, Hres, Wres), dtype=jnp.float32)
    params = init_params(kp, dim=C, guidance_dim=guidance_dim)

    fwd_pallas = jax.jit(lambda xx, gg, pp: swin_wrapper_forward(
        xx, gg, pp, dim=C, input_resolution=(Hres, Wres), num_heads=nheads,
        window_size=window_size, attn_core=attention_core_pallas))
    fwd_ref = jax.jit(lambda xx, gg, pp: swin_wrapper_forward(
        xx, gg, pp, dim=C, input_resolution=(Hres, Wres), num_heads=nheads,
        window_size=window_size, attn_core=attention_core_ref))

    out = jax.block_until_ready(fwd_pallas(x, guidance, params))
    ref = jax.block_until_ready(fwd_ref(x, guidance, params))

    assert out.shape == (B, C, T, Hres, Wres)
    assert bool(jnp.all(jnp.isfinite(out)))
    # bf16 MXU feeds / bf16 output + approx reciprocal -> modest tolerance vs f32 ref.
    assert jnp.allclose(out, ref, atol=2e-2, rtol=2e-2)

    print("KERNEL_OK")
</pallas_src>

<mosaic_0001>
module attributes {stable_mosaic.version = 11 : i64} {
  func.func @_win_attn_kernel(%arg0: i32, %arg1: memref<2x4x32x128xbf16, #tpu.memory_space<vmem>>, %arg2: memref<2x4x32x128xbf16, #tpu.memory_space<vmem>>, %arg3: memref<2x4x32x128xbf16, #tpu.memory_space<vmem>>, %arg4: memref<8x32x32xf32, #tpu.memory_space<vmem>>, %arg5: memref<2x4x25x128xbf16, #tpu.memory_space<vmem>>) attributes {dimension_semantics = [#tpu.dimension_semantics<parallel>], iteration_bounds = array<i64: 2>, scalar_prefetch = 0 : i64, scratch_operands = 0 : i64, tpu.core_type = #tpu.core_type<tc>, window_params = [{transform_indices = @transform_0, window_bounds = array<i64: 2, 4, 32, 128>}, {transform_indices = @transform_1, window_bounds = array<i64: 2, 4, 32, 128>}, {transform_indices = @transform_2, window_bounds = array<i64: 2, 4, 32, 128>}, {pipeline_mode = #tpu.pipeline_mode<synchronous>, transform_indices = @transform_3, window_bounds = array<i64: 8, 32, 32>}, {transform_indices = @transform_4, window_bounds = array<i64: 2, 4, 25, 128>}]} {
    %c0 = arith.constant 0 : index
    %c0_0 = arith.constant 0 : index
    %c0_1 = arith.constant 0 : index
    %0 = vector.load %arg4[%c0, %c0_0, %c0_1] : memref<8x32x32xf32, #tpu.memory_space<vmem>>, vector<8x32x32xf32>
    %c0_2 = arith.constant 0 : index
    %c0_3 = arith.constant 0 : index
    %c0_4 = arith.constant 0 : index
    %c0_5 = arith.constant 0 : index
    %1 = vector.load %arg1[%c0_2, %c0_3, %c0_4, %c0_5] : memref<2x4x32x128xbf16, #tpu.memory_space<vmem>>, vector<2x4x32x32xbf16>
    %cst = arith.constant 1.767580e-01 : bf16
    %2 = vector.broadcast %cst : bf16 to vector<2x4x32x32xbf16>
    %3 = arith.mulf %1, %2 : vector<2x4x32x32xbf16>
    %4 = vector.shape_cast %3 : vector<2x4x32x32xbf16> to vector<8x32x32xbf16>
    %c0_6 = arith.constant 0 : index
    %c0_7 = arith.constant 0 : index
    %c0_8 = arith.constant 0 : index
    %c0_9 = arith.constant 0 : index
    %5 = vector.load %arg2[%c0_6, %c0_7, %c0_8, %c0_9] : memref<2x4x32x128xbf16, #tpu.memory_space<vmem>>, vector<2x4x32x32xbf16>
    %6 = vector.shape_cast %5 : vector<2x4x32x32xbf16> to vector<8x32x32xbf16>
    %c0_10 = arith.constant 0 : index
    %c0_11 = arith.constant 0 : index
    %c0_12 = arith.constant 0 : index
    %c0_13 = arith.constant 0 : index
    %7 = vector.load %arg3[%c0_10, %c0_11, %c0_12, %c0_13] : memref<2x4x32x128xbf16, #tpu.memory_space<vmem>>, vector<2x4x32x32xbf16>
    %8 = vector.shape_cast %7 : vector<2x4x32x32xbf16> to vector<8x32x32xbf16>
    "tpu.trace_start"() <{level = 10 : i32, message = "wqd,wkd->wqk"}> : () -> ()
    %cst_14 = arith.constant dense<0.000000e+00> : vector<8x32x32xf32>
    %9 = tpu.matmul %4, %6, %cst_14 {dimension_numbers = #tpu.dot_dimension_numbers<[2], [2], [1], [1], [0, 0, 0, 1, 1, 1], [0], [0]>} : vector<8x32x32xbf16>, vector<8x32x32xbf16>, vector<8x32x32xf32> -> vector<8x32x32xf32>
    "tpu.trace_stop"() : () -> ()
    %10 = arith.addf %9, %0 : vector<8x32x32xf32>
    %cst_15 = arith.constant dense<0xFF800000> : vector<8x32xf32>
    %11 = vector.multi_reduction <maximumf>, %10, %cst_15 [2] : vector<8x32x32xf32> to vector<8x32xf32>
    %12 = vector.shape_cast %11 : vector<8x32xf32> to vector<8x32x1xf32>
    %13 = vector.broadcast %12 : vector<8x32x1xf32> to vector<8x32x32xf32>
    %14 = arith.subf %10, %13 : vector<8x32x32xf32>
    %15 = math.exp %14 : vector<8x32x32xf32>
    %cst_16 = arith.constant dense<0.000000e+00> : vector<8x32xf32>
    %16 = vector.multi_reduction <add>, %15, %cst_16 [2] : vector<8x32x32xf32> to vector<8x32xf32>
    %17 = vector.shape_cast %16 : vector<8x32xf32> to vector<8x32x1xf32>
    %18 = tpu.reciprocal %17 {approx = true} : vector<8x32x1xf32> -> vector<8x32x1xf32>
    %19 = vector.broadcast %18 : vector<8x32x1xf32> to vector<8x32x32xf32>
    %20 = arith.mulf %15, %19 : vector<8x32x32xf32>
    %21 = arith.truncf %20 : vector<8x32x32xf32> to vector<8x32x32xbf16>
    "tpu.trace_start"() <{level = 10 : i32, message = "wqk,wkd->wqd"}> : () -> ()
    %cst_17 = arith.constant dense<0.000000e+00> : vector<8x32x32xf32>
    %22 = tpu.matmul %21, %8, %cst_17 {dimension_numbers = #tpu.dot_dimension_numbers<[2], [1], [1], [2], [0, 0, 0, 1, 1, 2], [0], [0]>} : vector<8x32x32xbf16>, vector<8x32x32xbf16>, vector<8x32x32xf32> -> vector<8x32x32xf32>
    "tpu.trace_stop"() : () -> ()
    %23 = vector.extract_strided_slice %22 {offsets = [0, 0, 0], sizes = [8, 25, 32], strides = [1, 1, 1]} : vector<8x32x32xf32> to vector<8x25x32xf32>
    %24 = vector.shape_cast %23 : vector<8x25x32xf32> to vector<2x4x25x32xf32>
    %25 = arith.truncf %24 : vector<2x4x25x32xf32> to vector<2x4x25x32xbf16>
    %c0_18 = arith.constant 0 : index
    %c0_19 = arith.constant 0 : index
    %c0_20 = arith.constant 0 : index
    %c0_21 = arith.constant 0 : index
    %26 = vector.load %arg5[%c0_18, %c0_19, %c0_20, %c0_21] : memref<2x4x25x128xbf16, #tpu.memory_space<vmem>>, vector<2x4x25x32xbf16>
    tpu.vector_store %arg5[%c0_18, %c0_19, %c0_20, %c0_21], %25 {strides = array<i32>} : memref<2x4x25x128xbf16, #tpu.memory_space<vmem>>, vector<2x4x25x32xbf16>,
    %c0_22 = arith.constant 0 : index
    %c0_23 = arith.constant 0 : index
    %c0_24 = arith.constant 0 : index
    %c32 = arith.constant 32 : index
    %27 = vector.load %arg1[%c0_22, %c0_23, %c0_24, %c32] : memref<2x4x32x128xbf16, #tpu.memory_space<vmem>>, vector<2x4x32x32xbf16>
    %cst_25 = arith.constant 1.767580e-01 : bf16
    %28 = vector.broadcast %cst_25 : bf16 to vector<2x4x32x32xbf16>
    %29 = arith.mulf %27, %28 : vector<2x4x32x32xbf16>
    %30 = vector.shape_cast %29 : vector<2x4x32x32xbf16> to vector<8x32x32xbf16>
    %c0_26 = arith.constant 0 : index
    %c0_27 = arith.constant 0 : index
    %c0_28 = arith.constant 0 : index
    %c32_29 = arith.constant 32 : index
    %31 = vector.load %arg2[%c0_26, %c0_27, %c0_28, %c32_29] : memref<2x4x32x128xbf16, #tpu.memory_space<vmem>>, vector<2x4x32x32xbf16>
    %32 = vector.shape_cast %31 : vector<2x4x32x32xbf16> to vector<8x32x32xbf16>
    %c0_30 = arith.constant 0 : index
    %c0_31 = arith.constant 0 : index
    %c0_32 = arith.constant 0 : index
    %c32_33 = arith.constant 32 : index
    %33 = vector.load %arg3[%c0_30, %c0_31, %c0_32, %c32_33] : memref<2x4x32x128xbf16, #tpu.memory_space<vmem>>, vector<2x4x32x32xbf16>
    %34 = vector.shape_cast %33 : vector<2x4x32x32xbf16> to vector<8x32x32xbf16>
    "tpu.trace_start"() <{level = 10 : i32, message = "wqd,wkd->wqk"}> : () -> ()
    %cst_34 = arith.constant dense<0.000000e+00> : vector<8x32x32xf32>
    %35 = tpu.matmul %30, %32, %cst_34 {dimension_numbers = #tpu.dot_dimension_numbers<[2], [2], [1], [1], [0, 0, 0, 1, 1, 1], [0], [0]>} : vector<8x32x32xbf16>, vector<8x32x32xbf16>, vector<8x32x32xf32> -> vector<8x32x32xf32>
    "tpu.trace_stop"() : () -> ()
    %36 = arith.addf %35, %0 : vector<8x32x32xf32>
    %cst_35 = arith.constant dense<0xFF800000> : vector<8x32xf32>
    %37 = vector.multi_reduction <maximumf>, %36, %cst_35 [2] : vector<8x32x32xf32> to vector<8x32xf32>
    %38 = vector.shape_cast %37 : vector<8x32xf32> to vector<8x32x1xf32>
    %39 = vector.broadcast %38 : vector<8x32x1xf32> to vector<8x32x32xf32>
    %40 = arith.subf %36, %39 : vector<8x32x32xf32>
    %41 = math.exp %40 : vector<8x32x32xf32>
    %cst_36 = arith.constant dense<0.000000e+00> : vector<8x32xf32>
    %42 = vector.multi_reduction <add>, %41, %cst_36 [2] : vector<8x32x32xf32> to vector<8x32xf32>
    %43 = vector.shape_cast %42 : vector<8x32xf32> to vector<8x32x1xf32>
    %44 = tpu.reciprocal %43 {approx = true} : vector<8x32x1xf32> -> vector<8x32x1xf32>
    %45 = vector.broadcast %44 : vector<8x32x1xf32> to vector<8x32x32xf32>
    %46 = arith.mulf %41, %45 : vector<8x32x32xf32>
    %47 = arith.truncf %46 : vector<8x32x32xf32> to vector<8x32x32xbf16>
    "tpu.trace_start"() <{level = 10 : i32, message = "wqk,wkd->wqd"}> : () -> ()
    %cst_37 = arith.constant dense<0.000000e+00> : vector<8x32x32xf32>
    %48 = tpu.matmul %47, %34, %cst_37 {dimension_numbers = #tpu.dot_dimension_numbers<[2], [1], [1], [2], [0, 0, 0, 1, 1, 2], [0], [0]>} : vector<8x32x32xbf16>, vector<8x32x32xbf16>, vector<8x32x32xf32> -> vector<8x32x32xf32>
    "tpu.trace_stop"() : () -> ()
    %49 = vector.extract_strided_slice %48 {offsets = [0, 0, 0], sizes = [8, 25, 32], strides = [1, 1, 1]} : vector<8x32x32xf32> to vector<8x25x32xf32>
    %50 = vector.shape_cast %49 : vector<8x25x32xf32> to vector<2x4x25x32xf32>
    %51 = arith.truncf %50 : vector<2x4x25x32xf32> to vector<2x4x25x32xbf16>
    %c0_38 = arith.constant 0 : index
    %c0_39 = arith.constant 0 : index
    %c0_40 = arith.constant 0 : index
    %c32_41 = arith.constant 32 : index
    %52 = vector.load %arg5[%c0_38, %c0_39, %c0_40, %c32_41] : memref<2x4x25x128xbf16, #tpu.memory_space<vmem>>, vector<2x4x25x32xbf16>
    tpu.vector_store %arg5[%c0_38, %c0_39, %c0_40, %c32_41], %51 {strides = array<i32>} : memref<2x4x25x128xbf16, #tpu.memory_space<vmem>>, vector<2x4x25x32xbf16>,
    %c0_42 = arith.constant 0 : index
    %c0_43 = arith.constant 0 : index
    %c0_44 = arith.constant 0 : index
    %c64 = arith.constant 64 : index
    %53 = vector.load %arg1[%c0_42, %c0_43, %c0_44, %c64] : memref<2x4x32x128xbf16, #tpu.memory_space<vmem>>, vector<2x4x32x32xbf16>
    %cst_45 = arith.constant 1.767580e-01 : bf16
    %54 = vector.broadcast %cst_45 : bf16 to vector<2x4x32x32xbf16>
    %55 = arith.mulf %53, %54 : vector<2x4x32x32xbf16>
    %56 = vector.shape_cast %55 : vector<2x4x32x32xbf16> to vector<8x32x32xbf16>
    %c0_46 = arith.constant 0 : index
    %c0_47 = arith.constant 0 : index
    %c0_48 = arith.constant 0 : index
    %c64_49 = arith.constant 64 : index
    %57 = vector.load %arg2[%c0_46, %c0_47, %c0_48, %c64_49] : memref<2x4x32x128xbf16, #tpu.memory_space<vmem>>, vector<2x4x32x32xbf16>
    %58 = vector.shape_cast %57 : vector<2x4x32x32xbf16> to vector<8x32x32xbf16>
    %c0_50 = arith.constant 0 : index
    %c0_51 = arith.constant 0 : index
    %c0_52 = arith.constant 0 : index
    %c64_53 = arith.constant 64 : index
    %59 = vector.load %arg3[%c0_50, %c0_51, %c0_52, %c64_53] : memref<2x4x32x128xbf16, #tpu.memory_space<vmem>>, vector<2x4x32x32xbf16>
    %60 = vector.shape_cast %59 : vector<2x4x32x32xbf16> to vector<8x32x32xbf16>
    "tpu.trace_start"() <{level = 10 : i32, message = "wqd,wkd->wqk"}> : () -> ()
    %cst_54 = arith.constant dense<0.000000e+00> : vector<8x32x32xf32>
    %61 = tpu.matmul %56, %58, %cst_54 {dimension_numbers = #tpu.dot_dimension_numbers<[2], [2], [1], [1], [0, 0, 0, 1, 1, 1], [0], [0]>} : vector<8x32x32xbf16>, vector<8x32x32xbf16>, vector<8x32x32xf32> -> vector<8x32x32xf32>
    "tpu.trace_stop"() : () -> ()
    %62 = arith.addf %61, %0 : vector<8x32x32xf32>
    %cst_55 = arith.constant dense<0xFF800000> : vector<8x32xf32>
    %63 = vector.multi_reduction <maximumf>, %62, %cst_55 [2] : vector<8x32x32xf32> to vector<8x32xf32>
    %64 = vector.shape_cast %63 : vector<8x32xf32> to vector<8x32x1xf32>
    %65 = vector.broadcast %64 : vector<8x32x1xf32> to vector<8x32x32xf32>
    %66 = arith.subf %62, %65 : vector<8x32x32xf32>
    %67 = math.exp %66 : vector<8x32x32xf32>
    %cst_56 = arith.constant dense<0.000000e+00> : vector<8x32xf32>
    %68 = vector.multi_reduction <add>, %67, %cst_56 [2] : vector<8x32x32xf32> to vector<8x32xf32>
    %69 = vector.shape_cast %68 : vector<8x32xf32> to vector<8x32x1xf32>
    %70 = tpu.reciprocal %69 {approx = true} : vector<8x32x1xf32> -> vector<8x32x1xf32>
    %71 = vector.broadcast %70 : vector<8x32x1xf32> to vector<8x32x32xf32>
    %72 = arith.mulf %67, %71 : vector<8x32x32xf32>
    %73 = arith.truncf %72 : vector<8x32x32xf32> to vector<8x32x32xbf16>
    "tpu.trace_start"() <{level = 10 : i32, message = "wqk,wkd->wqd"}> : () -> ()
    %cst_57 = arith.constant dense<0.000000e+00> : vector<8x32x32xf32>
    %74 = tpu.matmul %73, %60, %cst_57 {dimension_numbers = #tpu.dot_dimension_numbers<[2], [1], [1], [2], [0, 0, 0, 1, 1, 2], [0], [0]>} : vector<8x32x32xbf16>, vector<8x32x32xbf16>, vector<8x32x32xf32> -> vector<8x32x32xf32>
    "tpu.trace_stop"() : () -> ()
    %75 = vector.extract_strided_slice %74 {offsets = [0, 0, 0], sizes = [8, 25, 32], strides = [1, 1, 1]} : vector<8x32x32xf32> to vector<8x25x32xf32>
    %76 = vector.shape_cast %75 : vector<8x25x32xf32> to vector<2x4x25x32xf32>
    %77 = arith.truncf %76 : vector<2x4x25x32xf32> to vector<2x4x25x32xbf16>
    %c0_58 = arith.constant 0 : index
    %c0_59 = arith.constant 0 : index
    %c0_60 = arith.constant 0 : index
    %c64_61 = arith.constant 64 : index
    %78 = vector.load %arg5[%c0_58, %c0_59, %c0_60, %c64_61] : memref<2x4x25x128xbf16, #tpu.memory_space<vmem>>, vector<2x4x25x32xbf16>
    tpu.vector_store %arg5[%c0_58, %c0_59, %c0_60, %c64_61], %77 {strides = array<i32>} : memref<2x4x25x128xbf16, #tpu.memory_space<vmem>>, vector<2x4x25x32xbf16>,
    %c0_62 = arith.constant 0 : index
    %c0_63 = arith.constant 0 : index
    %c0_64 = arith.constant 0 : index
    %c96 = arith.constant 96 : index
    %79 = vector.load %arg1[%c0_62, %c0_63, %c0_64, %c96] : memref<2x4x32x128xbf16, #tpu.memory_space<vmem>>, vector<2x4x32x32xbf16>
    %cst_65 = arith.constant 1.767580e-01 : bf16
    %80 = vector.broadcast %cst_65 : bf16 to vector<2x4x32x32xbf16>
    %81 = arith.mulf %79, %80 : vector<2x4x32x32xbf16>
    %82 = vector.shape_cast %81 : vector<2x4x32x32xbf16> to vector<8x32x32xbf16>
    %c0_66 = arith.constant 0 : index
    %c0_67 = arith.constant 0 : index
    %c0_68 = arith.constant 0 : index
    %c96_69 = arith.constant 96 : index
    %83 = vector.load %arg2[%c0_66, %c0_67, %c0_68, %c96_69] : memref<2x4x32x128xbf16, #tpu.memory_space<vmem>>, vector<2x4x32x32xbf16>
    %84 = vector.shape_cast %83 : vector<2x4x32x32xbf16> to vector<8x32x32xbf16>
    %c0_70 = arith.constant 0 : index
    %c0_71 = arith.constant 0 : index
    %c0_72 = arith.constant 0 : index
    %c96_73 = arith.constant 96 : index
    %85 = vector.load %arg3[%c0_70, %c0_71, %c0_72, %c96_73] : memref<2x4x32x128xbf16, #tpu.memory_space<vmem>>, vector<2x4x32x32xbf16>
    %86 = vector.shape_cast %85 : vector<2x4x32x32xbf16> to vector<8x32x32xbf16>
    "tpu.trace_start"() <{level = 10 : i32, message = "wqd,wkd->wqk"}> : () -> ()
    %cst_74 = arith.constant dense<0.000000e+00> : vector<8x32x32xf32>
    %87 = tpu.matmul %82, %84, %cst_74 {dimension_numbers = #tpu.dot_dimension_numbers<[2], [2], [1], [1], [0, 0, 0, 1, 1, 1], [0], [0]>} : vector<8x32x32xbf16>, vector<8x32x32xbf16>, vector<8x32x32xf32> -> vector<8x32x32xf32>
    "tpu.trace_stop"() : () -> ()
    %88 = arith.addf %87, %0 : vector<8x32x32xf32>
    %cst_75 = arith.constant dense<0xFF800000> : vector<8x32xf32>
    %89 = vector.multi_reduction <maximumf>, %88, %cst_75 [2] : vector<8x32x32xf32> to vector<8x32xf32>
    %90 = vector.shape_cast %89 : vector<8x32xf32> to vector<8x32x1xf32>
    %91 = vector.broadcast %90 : vector<8x32x1xf32> to vector<8x32x32xf32>
    %92 = arith.subf %88, %91 : vector<8x32x32xf32>
    %93 = math.exp %92 : vector<8x32x32xf32>
    %cst_76 = arith.constant dense<0.000000e+00> : vector<8x32xf32>
    %94 = vector.multi_reduction <add>, %93, %cst_76 [2] : vector<8x32x32xf32> to vector<8x32xf32>
    %95 = vector.shape_cast %94 : vector<8x32xf32> to vector<8x32x1xf32>
    %96 = tpu.reciprocal %95 {approx = true} : vector<8x32x1xf32> -> vector<8x32x1xf32>
    %97 = vector.broadcast %96 : vector<8x32x1xf32> to vector<8x32x32xf32>
    %98 = arith.mulf %93, %97 : vector<8x32x32xf32>
    %99 = arith.truncf %98 : vector<8x32x32xf32> to vector<8x32x32xbf16>
    "tpu.trace_start"() <{level = 10 : i32, message = "wqk,wkd->wqd"}> : () -> ()
    %cst_77 = arith.constant dense<0.000000e+00> : vector<8x32x32xf32>
    %100 = tpu.matmul %99, %86, %cst_77 {dimension_numbers = #tpu.dot_dimension_numbers<[2], [1], [1], [2], [0, 0, 0, 1, 1, 2], [0], [0]>} : vector<8x32x32xbf16>, vector<8x32x32xbf16>, vector<8x32x32xf32> -> vector<8x32x32xf32>
    "tpu.trace_stop"() : () -> ()
    %101 = vector.extract_strided_slice %100 {offsets = [0, 0, 0], sizes = [8, 25, 32], strides = [1, 1, 1]} : vector<8x32x32xf32> to vector<8x25x32xf32>
    %102 = vector.shape_cast %101 : vector<8x25x32xf32> to vector<2x4x25x32xf32>
    %103 = arith.truncf %102 : vector<2x4x25x32xf32> to vector<2x4x25x32xbf16>
    %c0_78 = arith.constant 0 : index
    %c0_79 = arith.constant 0 : index
    %c0_80 = arith.constant 0 : index
    %c96_81 = arith.constant 96 : index
    %104 = vector.load %arg5[%c0_78, %c0_79, %c0_80, %c96_81] : memref<2x4x25x128xbf16, #tpu.memory_space<vmem>>, vector<2x4x25x32xbf16>
    tpu.vector_store %arg5[%c0_78, %c0_79, %c0_80, %c96_81], %103 {strides = array<i32>} : memref<2x4x25x128xbf16, #tpu.memory_space<vmem>>, vector<2x4x25x32xbf16>,
    return
  }
  func.func @transform_0(%arg0: i32) -> (i32, i32, i32, i32) {
    %c0_i32 = arith.constant 0 : i32
    %c0_i32_0 = arith.constant 0 : i32
    %c0_i32_1 = arith.constant 0 : i32
    %c0_i32_2 = arith.constant 0 : i32
    return %arg0, %c0_i32, %c0_i32_0, %c0_i32_1 : i32, i32, i32, i32
  }
  func.func @transform_1(%arg0: i32) -> (i32, i32, i32, i32) {
    %c0_i32 = arith.constant 0 : i32
    %c0_i32_0 = arith.constant 0 : i32
    %c0_i32_1 = arith.constant 0 : i32
    %c0_i32_2 = arith.constant 0 : i32
    return %arg0, %c0_i32, %c0_i32_0, %c0_i32_1 : i32, i32, i32, i32
  }
  func.func @transform_2(%arg0: i32) -> (i32, i32, i32, i32) {
    %c0_i32 = arith.constant 0 : i32
    %c0_i32_0 = arith.constant 0 : i32
    %c0_i32_1 = arith.constant 0 : i32
    %c0_i32_2 = arith.constant 0 : i32
    return %arg0, %c0_i32, %c0_i32_0, %c0_i32_1 : i32, i32, i32, i32
  }
  func.func @transform_3(%arg0: i32) -> (i32, i32, i32) {
    %c0_i32 = arith.constant 0 : i32
    %c0_i32_0 = arith.constant 0 : i32
    %c0_i32_1 = arith.constant 0 : i32
    %c0_i32_2 = arith.constant 0 : i32
    return %c0_i32, %c0_i32_0, %c0_i32_1 : i32, i32, i32
  }
  func.func @transform_4(%arg0: i32) -> (i32, i32, i32, i32) {
    %c0_i32 = arith.constant 0 : i32
    %c0_i32_0 = arith.constant 0 : i32
    %c0_i32_1 = arith.constant 0 : i32
    %c0_i32_2 = arith.constant 0 : i32
    return %arg0, %c0_i32, %c0_i32_0, %c0_i32_1 : i32, i32, i32, i32
  }
}

</mosaic_0001>

<bundles_post_ra>
// kernel: _lambda_.2
= control target key start
LH: loop header
LB: loop body
LE: loop exit
PB: predicated region body
PF: predicated region fallthrough
CT: control target
= control target key end

     0   :  { %s10504_s15 = smov 0   ;;  %s13729_s0 = inlined_call_operand.vmem [shape: bf16[4,4,32,128], index: 0, kind: input, shape index: {}]   ;;  %s13730_s1 = inlined_call_operand.vmem [shape: bf16[4,4,32,128], index: 1, kind: input, shape index: {}]   ;;  %s13731_s2 = inlined_call_operand.vmem [shape: bf16[4,4,32,128], index: 2, kind: input, shape index: {}]   ;;  %s13732_s3 = inlined_call_operand.vmem [shape: f32[8,32,32], index: 3, kind: input, shape index: {}]   ;;  %s13733_s4 = inlined_call_operand.vmem [shape: bf16[4,4,25,128], index: 4, kind: output, shape index: {}]  }
   0x1 LB: > { %s8290_s16 = sadd.s32 4294967295, %s10474_s15   ;;  %p8294_p0 = scmp.ge.s32.totalorder %s10474_s15, 1  ;;  %s10474_s15 = sphi %s10504_s15, %s14_s15  }
   0x2   : > { %p188_p1 = scmp.lt.s32.totalorder %s10474_s15, 3 }
   0x4   : > { %p189_p2 = pnand %p8294_p0, %p188_p1 }
   0x6   : > { %192 = sbr.rel (%p189_p2) target bundleno = 2943 (0xb7f), region = 36 }
   0xb   : > { %s8295_s17 = sshll.u32 %s8290_s16, 1  ;;  %vm438_vm0 = vcmask 261120   ;;  %s10476_s26 = smov 96   ;;  %vm2099_vm1 = vcmask 257024   ;;  %vm2103_vm2 = vcmask 253952   ;;  %vm4119_vm5 = vcmask 519424  }
   0xc   : > { %p229_p3 = scmp.lt.s32.totalorder %s8295_s17, 3  ;;  %vm2104_vm3 = vsmask.f32 256  ;;  %s10477_s7 = smov 64   ;;  %vm4123_vm6 = vcmask 516352   ;;  %vm6142_vm8 = vcmask 778752  }
   0xd   : > { %vm11261_vm4 = vmand %vm2103_vm2, %vm2104_vm3  ;;  %s10478_s16 = smov 32   ;;  %vm6138_vm10 = vcmask 781824   ;;  %vm8157_vm11 = vcmask 1044224   ;;  %vm8161_vm12 = vcmask 1041152  }
   0xe   : > { %s13857_s17 = smov (!%p229_p3, %s8295_s17), 3  ;;  %vm13433_vm7 = vmand %vm4123_vm6, %vm2104_vm3 }
   0xf   : > { %s10512_s18 = sshll.u32 %s13857_s17, 6  ;;  %vm13499_vm9 = vmand %vm6142_vm8, %vm2104_vm3 }
  0x10   : > { %s10518_s21 = scalar_lea.vmem %s13730_s1, %s10512_s18  ;;  %s10526_s24 = scalar_lea.vmem %s13729_s0, %s10512_s18  ;;  %vm13648_vm13 = vmand %vm8161_vm12, %vm2104_vm3 }
  0x11   : > { %v9732_v0 = vld [vmem:[%s10518_s21 + $0x8] sm:$0xff]   ;;  %v9733_v1 = vld [vmem:[%s10518_s21 + $0x18] sm:$0xff]   ;;  %v9734_v3 = vld [vmem:[%s10518_s21] sm:$0xff]   ;;  %s10941_s25 = scalar_lea.vmem %s13731_s2, %s10512_s18  ;;  %s11256_s29 = scalar_lea.vmem %s13733_s4, %s10512_s18 }
  0x12   : > { %9657 = vmatprep.subr.msk.bf16.mxu0 %vm438_vm0, %v9732_v0  ;;  %v449_v2 = vsel %vm438_vm0, %v9732_v0, 0  ;;  %9659 = vmatprep.subr.msk.bf16.mxu1 %vm438_vm0, %v9733_v1  ;;  %v530_v4 = vsel %vm438_vm0, %v9733_v1, 0  ;;  %v9735_v5 = vld [vmem:[%s10518_s21 + $0x10] sm:$0xff]   ;;  %v290_v6 = vld [vmem:[%s10526_s24] sm:$0xf]  ;;  %v446_v8 = vsel %vm438_vm0, %v9734_v3, 0 }
  0x13   : > { %9146 = vmatpush3.bf16.xpose.msra.mxu0 %v449_v2  ;;  %9154 = vmatpush3.bf16.xpose.msra.mxu1 %v530_v4  ;;  %v291_v7 = vld [vmem:[%s10526_s24 + $0x4] sm:$0xf]  ;;  %v322_v9 = vmul.bf16 1043676725, %v290_v6  ;;  %v294_v11 = vld [vmem:[%s10526_s24 + $0x10] sm:$0xf] }
  0x14   : > { %9658 = vmatprep.subr.msk.bf16.mxu0 %vm438_vm0, %v9734_v3  ;;  %9660 = vmatprep.subr.msk.bf16.mxu1 %vm438_vm0, %v9735_v5  ;;  %v323_v10 = vmul.bf16 1043676725, %v291_v7  ;;  %v295_v12 = vld [vmem:[%s10526_s24 + $0x14] sm:$0xf]  ;;  %v292_v13 = vld [vmem:[%s10526_s24 + $0x8] sm:$0xf] }
  0x15   : > { %v9736_v14 = vld [vmem:[%s10518_s21 + $0x28] sm:$0xff]   ;;  %v326_v16 = vmul.bf16 1043676725, %v294_v11  ;;  %v327_v17 = vmul.bf16 1043676725, %v295_v12  ;;  %v527_v19 = vsel %vm438_vm0, %v9735_v5, 0 }
  0x16   : > { %v8307_v15 = vcombine.low %v322_v9, %v323_v10  ;;  %v293_v18 = vld [vmem:[%s10526_s24 + $0xc] sm:$0xf]  ;;  %v324_v20 = vmul.bf16 1043676725, %v292_v13  ;;  %v296_v21 = vld [vmem:[%s10526_s24 + $0x18] sm:$0xf] }
  0x17   : > { %v9737_v22 = vld [vmem:[%s10518_s21 + $0x38] sm:$0xff]   ;;  %v8313_v23 = vcombine.low %v326_v16, %v327_v17  ;;  %v325_v24 = vmul.bf16 1043676725, %v293_v18  ;;  %v328_v26 = vmul.bf16 1043676725, %v296_v21  ;;  %v9738_v30 = vld [vmem:[%s10518_s21 + $0x20] sm:$0xff]  }
  0x18   : > { %9149 = vmatprep.mubr.msk.bf16.mxu0 %vm438_vm0, %v8307_v15  ;;  %v297_v25 = vld [vmem:[%s10526_s24 + $0x1c] sm:$0xf]  ;;  %v298_v28 = vld [vmem:[%s10526_s24 + $0x20] sm:$0xf]  ;;  %v9739_v31 = vld [vmem:[%s10518_s21 + $0x30] sm:$0xff]   ;;  %v611_v37 = vsel %vm438_vm0, %v9736_v14, 0 }
  0x19   : > { %9157 = vmatprep.mubr.msk.bf16.mxu1 %vm438_vm0, %v8313_v23  ;;  %v329_v27 = vmul.bf16 1043676725, %v297_v25  ;;  %v8308_v29 = vcombine.low %v324_v20, %v325_v24  ;;  %v299_v32 = vld [vmem:[%s10526_s24 + $0x24] sm:$0xf]  ;;  %v330_v33 = vmul.bf16 1043676725, %v298_v28 }
  0x1a   : > { %v331_v35 = vmul.bf16 1043676725, %v299_v32  ;;  %v302_v36 = vld [vmem:[%s10526_s24 + $0x30] sm:$0xf]  ;;  %v303_v38 = vld [vmem:[%s10526_s24 + $0x34] sm:$0xf] }
  0x1b   : > { %9148 = vmatpush3.bf16.xpose.msra.mxu0 %v446_v8  ;;  %9156 = vmatpush3.bf16.xpose.msra.mxu1 %v527_v19  ;;  %v8314_v34 = vcombine.low %v328_v26, %v329_v27  ;;  %v334_v39 = vmul.bf16 1043676725, %v302_v36  ;;  %v692_v40 = vsel %vm438_vm0, %v9737_v22, 0  ;;  %v335_v42 = vmul.bf16 1043676725, %v303_v38  ;;  %v9740_v46 = vld [vmem:[%s10518_s21 + $0x48] sm:$0xff]  }
  0x1c   : > { %9661 = vmatprep.subr.msk.bf16.mxu0 %vm438_vm0, %v9736_v14  ;;  %9663 = vmatprep.subr.msk.bf16.mxu1 %vm438_vm0, %v9737_v22  ;;  %v8319_v41 = vcombine.low %v330_v33, %v331_v35  ;;  %v608_v43 = vsel %vm438_vm0, %v9738_v30, 0  ;;  %v689_v44 = vsel %vm438_vm0, %v9739_v31, 0  ;;  %v300_v45 = vld [vmem:[%s10526_s24 + $0x28] sm:$0xf]  ;;  %v9741_v47 = vld [vmem:[%s10518_s21 + $0x58] sm:$0xff]   ;;  %v773_v58 = vsel %vm438_vm0, %v9740_v46, 0 }
  0x1d   : > { %v8325_v48 = vcombine.low %v334_v39, %v335_v42  ;;  %v301_v49 = vld [vmem:[%s10526_s24 + $0x2c] sm:$0xf]  ;;  %v304_v50 = vld [vmem:[%s10526_s24 + $0x38] sm:$0xf]  ;;  %v305_v51 = vld [vmem:[%s10526_s24 + $0x3c] sm:$0xf] }
  0x1e   : > { %v332_v52 = vmul.bf16 1043676725, %v300_v45  ;;  %v333_v53 = vmul.bf16 1043676725, %v301_v49  ;;  %v306_v54 = vld [vmem:[%s10526_s24 + $0x40] sm:$0xf] }
  0x1f   : > { %v307_v55 = vld [vmem:[%s10526_s24 + $0x44] sm:$0xf]  ;;  %v336_v56 = vmul.bf16 1043676725, %v304_v50  ;;  %v337_v57 = vmul.bf16 1043676725, %v305_v51 }
  0x20   : > { %v854_v59 = vsel %vm438_vm0, %v9741_v47, 0  ;;  %v9742_v60 = vld [vmem:[%s10518_s21 + $0x40] sm:$0xff]   ;;  %v338_v61 = vmul.bf16 1043676725, %v306_v54  ;;  %v310_v62 = vld [vmem:[%s10526_s24 + $0x50] sm:$0xf]  ;;  %v8320_v13 = vcombine.low %v332_v52, %v333_v53 }
  0x21   : > { %v311_v63 = vld [vmem:[%s10526_s24 + $0x54] sm:$0xf]  ;;  %v339_v1 = vmul.bf16 1043676725, %v307_v55  ;;  %v342_v2 = vmul.bf16 1043676725, %v310_v62  ;;  %v8326_v15 = vcombine.low %v336_v56, %v337_v57 }
  0x22   : > { %9150 = vmatmul.mubr.msk.bf16.vlgmr.msra.gmra.mxu0 %vm438_vm0, %v8308_v29  ;;  %9158 = vmatmul.mubr.msk.bf16.vlgmr.msra.gmra.mxu1 %vm438_vm0, %v8314_v34  ;;  %v9743_v0 = vld [vmem:[%s10518_s21 + $0x50] sm:$0xff]   ;;  %v308_v3 = vld [vmem:[%s10526_s24 + $0x48] sm:$0xf]  ;;  %v343_v4 = vmul.bf16 1043676725, %v311_v63  ;;  %v9745_v8 = vld [vmem:[%s10518_s21 + $0x78] sm:$0xff]  }
  0x23   : > { %9162 = vmatpush3.bf16.xpose.msra.mxu0 %v611_v37  ;;  %9170 = vmatpush3.bf16.xpose.msra.mxu1 %v692_v40  ;;  %v309_v5 = vld [vmem:[%s10526_s24 + $0x4c] sm:$0xf]  ;;  %v312_v6 = vld [vmem:[%s10526_s24 + $0x58] sm:$0xf]  ;;  %v340_v9 = vmul.bf16 1043676725, %v308_v3  ;;  %v8331_v20 = vcombine.low %v338_v61, %v339_v1 }
  0x24   : > { %9662 = vmatprep.subr.msk.bf16.mxu0 %vm438_vm0, %v9738_v30  ;;  %9664 = vmatprep.subr.msk.bf16.mxu1 %vm438_vm0, %v9739_v31  ;;  %v9744_v7 = vld [vmem:[%s10518_s21 + $0x68] sm:$0xff]   ;;  %v341_v10 = vmul.bf16 1043676725, %v309_v5  ;;  %v313_v11 = vld [vmem:[%s10526_s24 + $0x5c] sm:$0xf]  ;;  %v770_v16 = vsel %vm438_vm0, %v9742_v60, 0  ;;  %v8337_v21 = vcombine.low %v342_v2, %v343_v4 }
  0x25   : > { %9165 = vmatprep.mubr.msk.bf16.mxu0 %vm438_vm0, %v8319_v41  ;;  %9173 = vmatprep.mubr.msk.bf16.mxu1 %vm438_vm0, %v8325_v48  ;;  %v344_v12 = vmul.bf16 1043676725, %v312_v6  ;;  %v345_v14 = vmul.bf16 1043676725, %v313_v11  ;;  %v9746_v17 = vld [vmem:[%s10518_s21 + $0x60] sm:$0xff]   ;;  %v851_v18 = vsel %vm438_vm0, %v9743_v0, 0 }
  0x26   : > { %v9747_v19 = vld [vmem:[%s10518_s21 + $0x70] sm:$0xff]   ;;  %v935_v22 = vsel %vm438_vm0, %v9744_v7, 0  ;;  %v1016_v23 = vsel %vm438_vm0, %v9745_v8, 0  ;;  %v314_v24 = vld [vmem:[%s10526_s24 + $0x60] sm:$0xf]  ;;  %v932_v26 = vsel %vm438_vm0, %v9746_v17, 0  ;;  %v8332_v42 = vcombine.low %v340_v9, %v341_v10 }
  0x27   : > { %v315_v25 = vld [vmem:[%s10526_s24 + $0x64] sm:$0xf]  ;;  %v1013_v27 = vsel %vm438_vm0, %v9747_v19, 0  ;;  %v346_v28 = vmul.bf16 1043676725, %v314_v24  ;;  %v260_v48 = vld [vmem:[%s13732_s3 + $0x10] sm:$0xff] }
  0x28   : > { %v347_v29 = vmul.bf16 1043676725, %v315_v25  ;;  %v316_v30 = vld [vmem:[%s10526_s24 + $0x68] sm:$0xf]  ;;  %v317_v31 = vld [vmem:[%s10526_s24 + $0x6c] sm:$0xf] }
  0x29   : > { %v318_v32 = vld [vmem:[%s10526_s24 + $0x70] sm:$0xf]  ;;  %v348_v33 = vmul.bf16 1043676725, %v316_v30  ;;  %v349_v34 = vmul.bf16 1043676725, %v317_v31 }
  0x2a   : > { %v319_v35 = vld [vmem:[%s10526_s24 + $0x74] sm:$0xf]  ;;  %v350_v36 = vmul.bf16 1043676725, %v318_v32  ;;  %v320_v38 = vld [vmem:[%s10526_s24 + $0x78] sm:$0xf] }
  0x2b   : > { %9164 = vmatpush3.bf16.xpose.msra.mxu0 %v608_v43  ;;  %9172 = vmatpush3.bf16.xpose.msra.mxu1 %v689_v44  ;;  %v351_v37 = vmul.bf16 1043676725, %v319_v35  ;;  %v321_v39 = vld [vmem:[%s10526_s24 + $0x7c] sm:$0xf]  ;;  %v352_v40 = vmul.bf16 1043676725, %v320_v38  ;;  %v8338_v43 = vcombine.low %v344_v12, %v345_v14  ;;  %v8343_v44 = vcombine.low %v346_v28, %v347_v29 }
  0x2c   : > { %9665 = vmatprep.subr.msk.bf16.mxu0 %vm438_vm0, %v9740_v46  ;;  %9667 = vmatprep.subr.msk.bf16.mxu1 %vm438_vm0, %v9741_v47  ;;  %v353_v41 = vmul.bf16 1043676725, %v321_v39  ;;  %v8344_v46 = vcombine.low %v348_v33, %v349_v34  ;;  %v264_v50 = vld [vmem:[%s13732_s3 + $0x30] sm:$0xff]  ;;  %v262_v53 = vld [vmem:[%s13732_s3 + $0x20] sm:$0xff]  ;;  %v265_v1 = vld [vmem:[%s13732_s3 + $0x38] sm:$0xff] }
  0x2d   : > { %v8349_v45 = vcombine.low %v350_v36, %v351_v37  ;;  %v259_v5 = vld [vmem:[%s13732_s3 + $0x8] sm:$0xff]  ;;  %v268_v14 = vld [vmem:[%s13732_s3 + $0x50] sm:$0xff]  ;;  %v273_v28 = vld [vmem:[%s13732_s3 + $0x78] sm:$0xff] }
  0x2e   : > { %v8350_v47 = vcombine.low %v352_v40, %v353_v41  ;;  %v263_v9 = vld [vmem:[%s13732_s3 + $0x28] sm:$0xff]  ;;  %v270_v35 = vld [vmem:[%s13732_s3 + $0x60] sm:$0xff] }
  0x2f   : > { %v267_v37 = vld [vmem:[%s13732_s3 + $0x48] sm:$0xff] }
  0x32   : > { %9166 = vmatmul.mubr.msk.bf16.vlgmr.msra.gmra.mxu0 %vm438_vm0, %v8320_v13  ;;  %9174 = vmatmul.mubr.msk.bf16.vlgmr.msra.gmra.mxu1 %vm438_vm0, %v8326_v15  ;;  %v272_v15 = vld [vmem:[%s13732_s3 + $0x70] sm:$0xff] }
  0x33   : > { %9178 = vmatpush3.bf16.xpose.msra.mxu0 %v773_v58  ;;  %9186 = vmatpush3.bf16.xpose.msra.mxu1 %v854_v59  ;;  %v261_v58 = vld [vmem:[%s13732_s3 + $0x18] sm:$0xff]  ;;  %v258_v59 = vld [vmem:[%s13732_s3] sm:$0xff] }
  0x34   : > { %9666 = vmatprep.subr.msk.bf16.mxu0 %vm438_vm0, %v9742_v60  ;;  %9668 = vmatprep.subr.msk.bf16.mxu1 %vm438_vm0, %v9743_v0 }
  0x35   : > { %9181 = vmatprep.mubr.msk.bf16.mxu0 %vm438_vm0, %v8331_v20  ;;  %9189 = vmatprep.mubr.msk.bf16.mxu1 %vm438_vm0, %v8337_v21 }
  0x3b   : > { %9180 = vmatpush3.bf16.xpose.msra.mxu0 %v770_v16  ;;  %9188 = vmatpush3.bf16.xpose.msra.mxu1 %v851_v18 }
  0x3c   : > { %9669 = vmatprep.subr.msk.bf16.mxu0 %vm438_vm0, %v9744_v7  ;;  %9671 = vmatprep.subr.msk.bf16.mxu1 %vm438_vm0, %v9745_v8 }
  0x42   : > { %9182 = vmatmul.mubr.msk.bf16.vlgmr.msra.gmra.mxu0 %vm438_vm0, %v8332_v42  ;;  %9190 = vmatmul.mubr.msk.bf16.vlgmr.msra.gmra.mxu1 %vm438_vm0, %v8338_v43  ;;  %v271_v43 = vld [vmem:[%s13732_s3 + $0x68] sm:$0xff] }
  0x43   : > { %9194 = vmatpush3.bf16.xpose.msra.mxu0 %v935_v22  ;;  %9202 = vmatpush3.bf16.xpose.msra.mxu1 %v1016_v23  ;;  %v269_v23 = vld [vmem:[%s13732_s3 + $0x58] sm:$0xff] }
  0x44   : > { %9670 = vmatprep.subr.msk.bf16.mxu0 %vm438_vm0, %v9746_v17  ;;  %9672 = vmatprep.subr.msk.bf16.mxu1 %vm438_vm0, %v9747_v19 }
  0x45   : > { %9197 = vmatprep.mubr.msk.bf16.mxu0 %vm438_vm0, %v8343_v44  ;;  %9205 = vmatprep.mubr.msk.bf16.mxu1 %vm438_vm0, %v8349_v45  ;;  %v276_v44 = vld [vmem:[%s13732_s3 + $0x90] sm:$0xff] }
  0x4b   : > { %9196 = vmatpush3.bf16.xpose.msra.mxu0 %v932_v26  ;;  %9204 = vmatpush3.bf16.xpose.msra.mxu1 %v1013_v27  ;;  %v266_v26 = vld [vmem:[%s13732_s3 + $0x40] sm:$0xff] }
  0x52   : > { %9198 = vmatmul.mubr.msk.bf16.vlgmr.msra.gmra.mxu0 %vm438_vm0, %v8344_v46  ;;  %9206 = vmatmul.mubr.msk.bf16.vlgmr.msra.gmra.mxu1 %vm438_vm0, %v8350_v47  ;;  %v280_v46 = vld [vmem:[%s13732_s3 + $0xb0] sm:$0xff] }
  0xe2   : > { %v9151_v49 = vpop.f32.mrf.mxu0  ;;  %v9159_v52 = vpop.f32.mrf.mxu1 }
  0xe3   : > { %v10628_v51 = vadd.f32 %v9151_v49, %v260_v48  ;;  %v10633_v55 = vadd.f32 %v9159_v52, %v264_v50 }
  0xe4   : > { %v485_v54 = vpop.f32.mrf.mxu0  ;;  %v566_v56 = vpop.f32.mrf.mxu1 }
  0xe5   : > { %v1073_v57 = vsel %vm438_vm0, %v10628_v51, -inf  ;;  %v10643_v60 = vadd.f32 %v566_v56, %v262_v53  ;;  %v10649_v0 = vadd.f32 %v485_v54, %v258_v59  ;;  %v1085_v3 = vsel %vm438_vm0, %v10633_v55, -inf  ;;  %v277_v56 = vld [vmem:[%s13732_s3 + $0x98] sm:$0xff] }
  0xe6   : > { %1074 = vmax.xlane.f32.xlu0 %v1073_v57  ;;  %v9152_v61 = vpop.f32.mrf.mxu0  ;;  %v9160_v2 = vpop.f32.mrf.mxu1 }
  0xe7   : > { %v10645_v62 = vadd.f32 %v9152_v61, %v261_v58  ;;  %v1079_v63 = vsel %vm438_vm0, %v10643_v60, -inf  ;;  %v10659_v6 = vadd.f32 %v9160_v2, %v265_v1  ;;  %v1067_v11 = vsel %vm438_vm0, %v10649_v0, -inf  ;;  %v274_v61 = vld [vmem:[%s13732_s3 + $0x80] sm:$0xff]  ;;  %v281_v1 = vld [vmem:[%s13732_s3 + $0xb8] sm:$0xff] }
  0xe8   : > { %1080 = vmax.xlane.f32.xlu1 %v1079_v63  ;;  %v488_v4 = vpop.f32.mrf.mxu0  ;;  %v569_v8 = vpop.f32.mrf.mxu1 }
  0xe9   : > { %v1076_v7 = vsel %vm438_vm0, %v10645_v62, -inf  ;;  %v10666_v10 = vadd.f32 %v488_v4, %v259_v5  ;;  %v10670_v12 = vadd.f32 %v569_v8, %v263_v9  ;;  %v1088_v13 = vsel %vm438_vm0, %v10659_v6, -inf  ;;  %v278_v9 = vld [vmem:[%s13732_s3 + $0xa0] sm:$0xff] }
  0xea   : > { %1086 = vmax.xlane.f32.xlu0 %v1085_v3 }
  0xeb   : > { %v1070_v16 = vsel %vm438_vm0, %v10666_v10, -inf  ;;  %v1082_v21 = vsel %vm438_vm0, %v10670_v12, -inf }
  0xec   : > { %1077 = vmax.xlane.f32.xlu1 %v1076_v7 }
  0xee   : > { %1068 = vmax.xlane.f32.xlu0 %v1067_v11 }
  0xf0   : > { %1089 = vmax.xlane.f32.xlu1 %v1088_v13  ;;  %v275_v13 = vld [vmem:[%s13732_s3 + $0x88] sm:$0xff] }
  0xf2   : > { %v9167_v17 = vpop.f32.mrf.mxu0  ;;  %1071 = vmax.xlane.f32.xlu0 %v1070_v16  ;;  %v9175_v19 = vpop.f32.mrf.mxu1 }
  0xf3   : > { %v10682_v18 = vadd.f32 %v9167_v17, %v268_v14  ;;  %v10684_v20 = vadd.f32 %v9175_v19, %v272_v15 }
  0xf4   : > { %v647_v22 = vpop.f32.mrf.mxu0  ;;  %v728_v24 = vpop.f32.mrf.mxu1  ;;  %1083 = vmax.xlane.f32.xlu1 %v1082_v21  ;;  %v279_v21 = vld [vmem:[%s13732_s3 + $0xa8] sm:$0xff] }
  0xf5   : > { %v1097_v25 = vsel %vm438_vm0, %v10682_v18, -inf  ;;  %v1109_v30 = vsel %vm438_vm0, %v10684_v20, -inf  ;;  %v10703_v32 = vadd.f32 %v647_v22, %v266_v26  ;;  %v10715_v38 = vadd.f32 %v728_v24, %v270_v35  ;;  %v284_v22 = vld [vmem:[%s13732_s3 + $0xd0] sm:$0xff]  ;;  %v286_v35 = vld [vmem:[%s13732_s3 + $0xe0] sm:$0xff] }
  0xf6   : > { %v9168_v27 = vpop.f32.mrf.mxu0  ;;  %1098 = vmax.xlane.f32.xlu0 %v1097_v25  ;;  %v9176_v31 = vpop.f32.mrf.mxu1 }
  0xf7   : > { %v10699_v29 = vadd.f32 %v9168_v27, %v269_v23  ;;  %v10705_v33 = vadd.f32 %v9176_v31, %v273_v28  ;;  %v1091_v41 = vsel %vm438_vm0, %v10703_v32, -inf  ;;  %v1103_v48 = vsel %vm438_vm0, %v10715_v38, -inf  ;;  %v282_v27 = vld [vmem:[%s13732_s3 + $0xc0] sm:$0xff] }
  0xf8   : > { %v650_v36 = vpop.f32.mrf.mxu0  ;;  %v731_v42 = vpop.f32.mrf.mxu1 }
  0xf9   : > { %v1100_v34 = vsel %vm438_vm0, %v10699_v29, -inf  ;;  %v10717_v39 = vadd.f32 %v650_v36, %v267_v37  ;;  %v1112_v40 = vsel %vm438_vm0, %v10705_v33, -inf  ;;  %v10729_v45 = vadd.f32 %v731_v42, %v271_v43  ;;  %v289_v42 = vld [vmem:[%s13732_s3 + $0xf8] sm:$0xff] }
  0xfa   : > { %1101 = vmax.xlane.f32.xlu1 %v1100_v34  ;;  %1110 = vmax.xlane.f32.xlu0 %v1109_v30  ;;  %v285_v34 = vld [vmem:[%s13732_s3 + $0xd8] sm:$0xff] }
  0xfb   : > { %v1094_v47 = vsel %vm438_vm0, %v10717_v39, -inf  ;;  %v1106_v58 = vsel %vm438_vm0, %v10729_v45, -inf }
  0xfe   : > { %1113 = vmax.xlane.f32.xlu1 %v1112_v40  ;;  %1092 = vmax.xlane.f32.xlu0 %v1091_v41 }
 0x102   : > { %v9183_v49 = vpop.f32.mrf.mxu0  ;;  %1095 = vmax.xlane.f32.xlu1 %v1094_v47  ;;  %1104 = vmax.xlane.f32.xlu0 %v1103_v48  ;;  %v9191_v52 = vpop.f32.mrf.mxu1 }
 0x103   : > { %v10738_v50 = vadd.f32 %v9183_v49, %v276_v44  ;;  %v10740_v53 = vadd.f32 %v9191_v52, %v280_v46  ;;  %v288_v49 = vld [vmem:[%s13732_s3 + $0xf0] sm:$0xff] }
 0x104   : > { %v809_v54 = vpop.f32.mrf.mxu0  ;;  %v890_v57 = vpop.f32.mrf.mxu1 }
 0x105   : > { %v1121_v59 = vsel %vm438_vm0, %v10738_v50, -inf  ;;  %v1133_v3 = vsel %vm438_vm0, %v10740_v53, -inf  ;;  %v10759_v5 = vadd.f32 %v809_v54, %v274_v61  ;;  %v10771_v14 = vadd.f32 %v890_v57, %v278_v9 }
 0x106   : > { %v9184_v63 = vpop.f32.mrf.mxu0  ;;  %1107 = vmax.xlane.f32.xlu1 %v1106_v58  ;;  %1122 = vmax.xlane.f32.xlu0 %v1121_v59  ;;  %v9192_v4 = vpop.f32.mrf.mxu1 }
 0x107   : > { %v10755_v2 = vadd.f32 %v9184_v63, %v277_v56  ;;  %v10761_v7 = vadd.f32 %v9192_v4, %v281_v1  ;;  %v1115_v17 = vsel %vm438_vm0, %v10759_v5, -inf  ;;  %v1127_v25 = vsel %vm438_vm0, %v10771_v14, -inf  ;;  %v283_v56 = vld [vmem:[%s13732_s3 + $0xc8] sm:$0xff] }
 0x108   : > { %v812_v11 = vpop.f32.mrf.mxu0  ;;  %v893_v19 = vpop.f32.mrf.mxu1 }
 0x109   : > { %v1124_v8 = vsel %vm438_vm0, %v10755_v2, -inf  ;;  %v10773_v15 = vadd.f32 %v812_v11, %v275_v13  ;;  %v1136_v16 = vsel %vm438_vm0, %v10761_v7, -inf  ;;  %v10785_v23 = vadd.f32 %v893_v19, %v279_v21 }
 0x10a   : > { %1125 = vmax.xlane.f32.xlu1 %v1124_v8  ;;  %1134 = vmax.xlane.f32.xlu0 %v1133_v3  ;;  %v287_v3 = vld [vmem:[%s13732_s3 + $0xe8] sm:$0xff] }
 0x10b   : > { %v1118_v24 = vsel %vm438_vm0, %v10773_v15, -inf  ;;  %v1130_v37 = vsel %vm438_vm0, %v10785_v23, -inf }
 0x10e   : > { %1137 = vmax.xlane.f32.xlu1 %v1136_v16  ;;  %1116 = vmax.xlane.f32.xlu0 %v1115_v17 }
 0x112   : > { %v9199_v26 = vpop.f32.mrf.mxu0  ;;  %1119 = vmax.xlane.f32.xlu1 %v1118_v24  ;;  %1128 = vmax.xlane.f32.xlu0 %v1127_v25  ;;  %v9207_v30 = vpop.f32.mrf.mxu1 }
 0x113   : > { %v10794_v28 = vadd.f32 %v9199_v26, %v284_v22  ;;  %v10827_v58 = vadd.f32 %v9207_v30, %v288_v49 }
 0x114   : > { %v971_v31 = vpop.f32.mrf.mxu0  ;;  %v1052_v41 = vpop.f32.mrf.mxu1 }
 0x115   : > { %v10802_v36 = vadd.f32 %v971_v31, %v282_v27  ;;  %v1145_v40 = vsel %vm438_vm0, %v10794_v28, -inf  ;;  %v10813_v46 = vadd.f32 %v1052_v41, %v286_v35  ;;  %v1157_v9 = vsel %vm438_vm0, %v10827_v58, -inf }
 0x116   : > { %v9200_v43 = vpop.f32.mrf.mxu0  ;;  %1131 = vmax.xlane.f32.xlu1 %v1130_v37  ;;  %1146 = vmax.xlane.f32.xlu0 %v1145_v40  ;;  %v9208_v47 = vpop.f32.mrf.mxu1 }
 0x117   : > { %v10811_v44 = vadd.f32 %v9200_v43, %v285_v34  ;;  %v1139_v48 = vsel %vm438_vm0, %v10802_v36, -inf  ;;  %v10820_v52 = vadd.f32 %v9208_v47, %v289_v42  ;;  %v1151_v63 = vsel %vm438_vm0, %v10813_v46, -inf }
 0x118   : > { %v974_v54 = vpop.f32.mrf.mxu0  ;;  %v1055_v1 = vpop.f32.mrf.mxu1 }
 0x119   : > { %v1148_v57 = vsel %vm438_vm0, %v10811_v44, -inf  ;;  %v10829_v59 = vadd.f32 %v974_v54, %v283_v56  ;;  %v1160_v61 = vsel %vm438_vm0, %v10820_v52, -inf  ;;  %v10838_v4 = vadd.f32 %v1055_v1, %v287_v3 }
 0x11a   : > { %1149 = vmax.xlane.f32.xlu1 %v1148_v57  ;;  %1140 = vmax.xlane.f32.xlu0 %v1139_v48 }
 0x11b   : > { %v1142_v8 = vsel %vm438_vm0, %v10829_v59, -inf  ;;  %v1154_v11 = vsel %vm438_vm0, %v10838_v4, -inf }
 0x11e   : > { %1161 = vmax.xlane.f32.xlu1 %v1160_v61  ;;  %1152 = vmax.xlane.f32.xlu0 %v1151_v63 }
 0x122   : > { %1143 = vmax.xlane.f32.xlu1 %v1142_v8  ;;  %1158 = vmax.xlane.f32.xlu0 %v1157_v9 }
 0x126   : > { %1155 = vmax.xlane.f32.xlu1 %v1154_v11 }
 0x16f   : > { %v1075_v13 = vpop.xlane.xlu0 %1074 }
 0x170   : > { %v1165_v16 = vsub.f32 %v10628_v51, %v1075_v13 }
 0x171   : > { %v1081_v19 = vpop.xlane.xlu1 %1080 }
 0x172   : > { %v1199_v17 = vmul.f32 1.442695, %v1165_v16  ;;  %v1167_v24 = vsub.f32 %v10643_v60, %v1081_v19 }
 0x173   : > { %v1087_v21 = vpop.xlane.xlu0 %1086 }
 0x174   : > { %9860 = vpow2.f32 %v1199_v17  ;;  %v1169_v22 = vsub.f32 %v10633_v55, %v1087_v21  ;;  %v1203_v35 = vmul.f32 1.442695, %v1167_v24 }
 0x175   : > { %v1078_v26 = vpop.xlane.xlu1 %1077 }
 0x176   : > { %v1207_v25 = vmul.f32 1.442695, %v1169_v22  ;;  %v1166_v27 = vsub.f32 %v10645_v62, %v1078_v26 }
 0x177   : > { %v1069_v30 = vpop.xlane.xlu0 %1068 }
 0x178   : > { %9862 = vpow2.f32 %v1207_v25  ;;  %v1163_v31 = vsub.f32 %v10649_v0, %v1069_v30  ;;  %v1201_v34 = vmul.f32 1.442695, %v1166_v27 }
 0x179   : > { %v1090_v51 = vpop.xlane.xlu1 %1089 }
 0x17a   : > { %v1195_v37 = vmul.f32 1.442695, %v1163_v31  ;;  %9864 = vpow2.f32 %v1201_v34  ;;  %v1170_v40 = vsub.f32 %v10659_v6, %v1090_v51 }
 0x17b   : > { %v1072_v41 = vpop.xlane.xlu0 %1071 }
 0x17c   : > { %9866 = vpow2.f32 %v1195_v37  ;;  %v1164_v55 = vsub.f32 %v10666_v10, %v1072_v41  ;;  %v1209_v60 = vmul.f32 1.442695, %v1170_v40 }
 0x17d   : > { %9868 = vpow2.f32 %v1203_v35  ;;  %v1084_v43 = vpop.xlane.xlu1 %1083 }
 0x17e   : > { %v1197_v42 = vmul.f32 1.442695, %v1164_v55  ;;  %9870 = vpow2.f32 %v1209_v60  ;;  %v1168_v62 = vsub.f32 %v10670_v12, %v1084_v43 }
 0x17f   : > { %v1099_v47 = vpop.xlane.xlu0 %1098 }
 0x180   : > { %v1173_v0 = vsub.f32 %v10682_v18, %v1099_v47  ;;  %9872 = vpow2.f32 %v1197_v42  ;;  %v1205_v49 = vmul.f32 1.442695, %v1168_v62 }
 0x181   : > { %v10855_v48 = vpop.eup %9860 }
 0x182   : > { %v1215_v54 = vmul.f32 1.442695, %v1173_v0  ;;  %v1265_v6 = vsel %vm438_vm0, %v10855_v48, 0.0 }
 0x183   : > { %v1102_v56 = vpop.xlane.xlu1 %1101  ;;  %1266 = vadd.xlane.f32.xlu0 %v1265_v6  ;;  %v1111_v10 = vpop.xlane.xlu0 %1110 }
 0x184   : > { %9874 = vpow2.f32 %v1215_v54  ;;  %v1174_v57 = vsub.f32 %v10699_v29, %v1102_v56  ;;  %v1177_v61 = vsub.f32 %v10684_v20, %v1111_v10 }
 0x185   : > { %v10861_v12 = vpop.eup %9862  ;;  %9876 = vpow2.f32 %v1205_v49 }
 0x186   : > { %v1217_v18 = vmul.f32 1.442695, %v1174_v57  ;;  %v1223_v63 = vmul.f32 1.442695, %v1177_v61  ;;  %v1277_v1 = vsel %vm438_vm0, %v10861_v12, 0.0 }
 0x187   : > { %v1114_v3 = vpop.xlane.xlu1 %1113  ;;  %1278 = vadd.xlane.f32.xlu0 %v1277_v1  ;;  %v1093_v8 = vpop.xlane.xlu0 %1092 }
 0x188   : > { %v10865_v9 = vpop.eup %9864  ;;  %9878 = vpow2.f32 %v1217_v18  ;;  %v1178_v11 = vsub.f32 %v10705_v33, %v1114_v3  ;;  %v1171_v29 = vsub.f32 %v10703_v32, %v1093_v8 }
 0x189   : > { %v10869_v13 = vpop.eup %9866  ;;  %9880 = vpow2.f32 %v1223_v63  ;;  %v1268_v20 = vsel %vm438_vm0, %v10865_v9, 0.0 }
 0x18a   : > { %v1225_v16 = vmul.f32 1.442695, %v1178_v11  ;;  %v1211_v17 = vmul.f32 1.442695, %v1171_v29  ;;  %1269 = vadd.xlane.f32.xlu1 %v1268_v20  ;;  %v1259_v19 = vsel %vm438_vm0, %v10869_v13, 0.0  ;;  %v10875_v21 = vpop.eup %9868 }
 0x18b   : > { %v1096_v22 = vpop.xlane.xlu1 %1095  ;;  %1260 = vadd.xlane.f32.xlu0 %v1259_v19  ;;  %v1105_v24 = vpop.xlane.xlu0 %1104  ;;  %v1271_v34 = vsel %vm438_vm0, %v10875_v21, 0.0 }
 0x18c   : > { %v10877_v33 = vpop.eup %9870  ;;  %9882 = vpow2.f32 %v1225_v16  ;;  %v1172_v32 = vsub.f32 %v10717_v39, %v1096_v22  ;;  %v1175_v25 = vsub.f32 %v10715_v38, %v1105_v24 }
 0x18d   : > { %9884 = vpow2.f32 %v1211_v17  ;;  %v1280_v26 = vsel %vm438_vm0, %v10877_v33, 0.0  ;;  %v10883_v27 = vpop.eup %9872 }
 0x18e   : > { %v1213_v30 = vmul.f32 1.442695, %v1172_v32  ;;  %v1219_v31 = vmul.f32 1.442695, %v1175_v25  ;;  %1281 = vadd.xlane.f32.xlu1 %v1280_v26  ;;  %v1262_v40 = vsel %vm438_vm0, %v10883_v27, 0.0 }
 0x18f   : > { %v1108_v35 = vpop.xlane.xlu1 %1107  ;;  %1272 = vadd.xlane.f32.xlu0 %v1271_v34  ;;  %v1123_v37 = vpop.xlane.xlu0 %1122 }
 0x190   : > { %9886 = vpow2.f32 %v1213_v30  ;;  %v1176_v39 = vsub.f32 %v10729_v45, %v1108_v35  ;;  %v1181_v38 = vsub.f32 %v10738_v50, %v1123_v37 }
 0x191   : > { %v10889_v51 = vpop.eup %9874  ;;  %9888 = vpow2.f32 %v1219_v31 }
 0x192   : > { %v10893_v41 = vpop.eup %9876  ;;  %v1221_v55 = vmul.f32 1.442695, %v1176_v39  ;;  %v1231_v60 = vmul.f32 1.442695, %v1181_v38  ;;  %1263 = vadd.xlane.f32.xlu1 %v1262_v40  ;;  %v1289_v42 = vsel %vm438_vm0, %v10889_v51, 0.0  ;;  %v9751_v38 = vld [vmem:[%s10941_s25 + $0x8] sm:$0xff]  }
 0x193   : > { %v1126_v43 = vpop.xlane.xlu1 %1125  ;;  %1290 = vadd.xlane.f32.xlu0 %v1289_v42  ;;  %v1135_v62 = vpop.xlane.xlu0 %1134  ;;  %v1274_v0 = vsel %vm438_vm0, %v10893_v41, 0.0  ;;  %9209 = vmatprep.subr.bf16.mxu0 %v9751_v38 }
 0x194   : > { %9890 = vpow2.f32 %v1221_v55  ;;  %v1182_v45 = vsub.f32 %v10755_v2, %v1126_v43  ;;  %v1185_v50 = vsub.f32 %v10740_v53, %v1135_v62  ;;  %9210 = vmatpush3.bf16.msra.mxu0 %v9751_v38  ;;  %v9753_v62 = vld [vmem:[%s10941_s25] sm:$0xff]  }
 0x195   : > { %v10899_v47 = vpop.eup %9878  ;;  %9892 = vpow2.f32 %v1231_v60  ;;  %9211 = vmatprep.subr.bf16.mxu0 %v9753_v62  ;;  %v2152_v38 = vld [vmem:[%s10526_s24 + $0x4] sm:$0xf] }
 0x196   : > { %v10903_v49 = vpop.eup %9880  ;;  %v1233_v54 = vmul.f32 1.442695, %v1182_v45  ;;  %v1239_v6 = vmul.f32 1.442695, %v1185_v50  ;;  %1275 = vadd.xlane.f32.xlu1 %v1274_v0  ;;  %v1292_v18 = vsel %vm438_vm0, %v10899_v47, 0.0  ;;  %v9754_v45 = vld [vmem:[%s10941_s25 + $0x18] sm:$0xff]  }
 0x197   : > { %v1138_v56 = vpop.xlane.xlu1 %1137  ;;  %v1301_v10 = vsel %vm438_vm0, %v10903_v49, 0.0  ;;  %v1117_v57 = vpop.xlane.xlu0 %1116  ;;  %9217 = vmatprep.subr.bf16.mxu1 %v9754_v45 }
 0x198   : > { %9894 = vpow2.f32 %v1233_v54  ;;  %v1186_v2 = vsub.f32 %v10761_v7, %v1138_v56  ;;  %1302 = vadd.xlane.f32.xlu0 %v1301_v10  ;;  %v1179_v53 = vsub.f32 %v10759_v5, %v1117_v57  ;;  %9212 = vmatpush3.bf16.msra.mxu0 %v9753_v62 }
 0x199   : > { %v10909_v61 = vpop.eup %9882  ;;  %9896 = vpow2.f32 %v1239_v6  ;;  %9218 = vmatpush3.bf16.msra.mxu1 %v9754_v45  ;;  %v9750_v45 = vld [vmem:[%s10518_s21 + $0x8] sm:$0xff]  }
 0x19a   : > { %v10913_v63 = vpop.eup %9884  ;;  %v1241_v1 = vmul.f32 1.442695, %v1186_v2  ;;  %v1227_v3 = vmul.f32 1.442695, %v1179_v53  ;;  %1293 = vadd.xlane.f32.xlu1 %v1292_v18  ;;  %v1304_v16 = vsel %vm438_vm0, %v10909_v61, 0.0  ;;  %v9756_v2 = vld [vmem:[%s10941_s25 + $0x10] sm:$0xff]  }
 0x19b   : > { %v1120_v8 = vpop.xlane.xlu1 %1119  ;;  %v1283_v11 = vsel %vm438_vm0, %v10913_v63, 0.0  ;;  %v1129_v29 = vpop.xlane.xlu0 %1128  ;;  %9219 = vmatprep.subr.bf16.mxu1 %v9756_v2 }
 0x19c   : > { %9898 = vpow2.f32 %v1241_v1  ;;  %v1180_v7 = vsub.f32 %v10773_v15, %v1120_v8  ;;  %1284 = vadd.xlane.f32.xlu0 %v1283_v11  ;;  %v1183_v5 = vsub.f32 %v10771_v14, %v1129_v29 }
 0x19d   : > { %v10919_v20 = vpop.eup %9886  ;;  %9900 = vpow2.f32 %v1227_v3  ;;  %9220 = vmatpush3.bf16.msra.mxu1 %v9756_v2  ;;  %v2160_v2 = vld [vmem:[%s10526_s24 + $0x24] sm:$0xf] }
 0x19e   : > { %v10923_v17 = vpop.eup %9888  ;;  %v1229_v19 = vmul.f32 1.442695, %v1180_v7  ;;  %v1235_v22 = vmul.f32 1.442695, %v1183_v5  ;;  %1305 = vadd.xlane.f32.xlu1 %v1304_v16  ;;  %v1286_v30 = vsel %vm438_vm0, %v10919_v20, 0.0  ;;  %v10985_v5 = vld [vmem:[%s10941_s25 + $0x28] sm:$0xff]  }
 0x19f   : > { %v1132_v24 = vpop.xlane.xlu1 %1131  ;;  %v1295_v32 = vsel %vm438_vm0, %v10923_v17, 0.0  ;;  %v1147_v25 = vpop.xlane.xlu0 %1146  ;;  %9225 = vmatprep.subr.bf16.mxu0 %v10985_v5  ;;  %v10989_v16 = vld [vmem:[%s10941_s25 + $0x38] sm:$0xff]  }
 0x1a0   : > { %9902 = vpow2.f32 %v1229_v19  ;;  %v1184_v14 = vsub.f32 %v10785_v23, %v1132_v24  ;;  %1296 = vadd.xlane.f32.xlu0 %v1295_v32  ;;  %v1189_v15 = vsub.f32 %v10794_v28, %v1147_v25  ;;  %9233 = vmatprep.subr.bf16.mxu1 %v10989_v16  ;;  %v9748_v25 = vld [vmem:[%s10518_s21 + $0x18] sm:$0xff]  }
 0x1a1   : > { %v10929_v26 = vpop.eup %9890  ;;  %9904 = vpow2.f32 %v1235_v22 }
 0x1a2   : > { %v10933_v31 = vpop.eup %9892  ;;  %v1237_v34 = vmul.f32 1.442695, %v1184_v14  ;;  %v1247_v35 = vmul.f32 1.442695, %v1189_v15  ;;  %1287 = vadd.xlane.f32.xlu1 %v1286_v30  ;;  %v1298_v28 = vsel %vm438_vm0, %v10929_v26, 0.0 }
 0x1a3   : > { %v1313_v37 = vsel %vm438_vm0, %v10933_v31, 0.0  ;;  %v1141_v39 = vpop.xlane.xlu0 %1140  ;;  %v1150_v15 = vpop.xlane.xlu1 %1149 }
 0x1a4   : > { %9906 = vpow2.f32 %v1237_v34  ;;  %1314 = vadd.xlane.f32.xlu0 %v1313_v37  ;;  %v1187_v0 = vsub.f32 %v10802_v36, %v1141_v39  ;;  %v1190_v30 = vsub.f32 %v10811_v44, %v1150_v15  ;;  %v2151_v44 = vld [vmem:[%s10526_s24] sm:$0xf]  ;;  %v2162_v15 = vld [vmem:[%s10526_s24 + $0x2c] sm:$0xf] }
 0x1a5   : > { %v10943_v23 = vpop.eup %9894  ;;  %9908 = vpow2.f32 %v1247_v35  ;;  %v9749_v35 = vld [vmem:[%s10518_s21] sm:$0xff]  }
 0x1a6   : > { %v10948_v40 = vpop.eup %9896  ;;  %1299 = vadd.xlane.f32.xlu1 %v1298_v28  ;;  %v1316_v43 = vsel %vm438_vm0, %v10943_v23, 0.0  ;;  %v1243_v18 = vmul.f32 1.442695, %v1187_v0  ;;  %v1249_v39 = vmul.f32 1.442695, %v1190_v30 }
 0x1a7   : > { %v1325_v55 = vsel %vm438_vm0, %v10948_v40, 0.0  ;;  %v1153_v60 = vpop.xlane.xlu0 %1152  ;;  %v1162_v37 = vpop.xlane.xlu1 %1161  ;;  %v2183_v0 = vmul.bf16 1043676725, %v2151_v44 }
 0x1a8   : > { %1326 = vadd.xlane.f32.xlu0 %v1325_v55  ;;  %v1191_v1 = vsub.f32 %v10813_v46, %v1153_v60  ;;  %v1194_v60 = vsub.f32 %v10820_v52, %v1162_v37  ;;  %v9763_v37 = vld [vmem:[%s10518_s21 + $0x48] sm:$0xff]  }
 0x1a9   : > { %v10952_v42 = vpop.eup %9898 }
 0x1aa   : > { %v10958_v50 = vpop.eup %9900  ;;  %1317 = vadd.xlane.f32.xlu1 %v1316_v43  ;;  %v1328_v57 = vsel %vm438_vm0, %v10952_v42, 0.0  ;;  %v1251_v29 = vmul.f32 1.442695, %v1191_v1 }
 0x1ab   : > { %v1307_v54 = vsel %vm438_vm0, %v10958_v50, 0.0  ;;  %v1159_v6 = vpop.xlane.xlu0 %1158  ;;  %v1144_v28 = vpop.xlane.xlu1 %1143 }
 0x1ac   : > { %1308 = vadd.xlane.f32.xlu0 %v1307_v54  ;;  %v1193_v56 = vsub.f32 %v10827_v58, %v1159_v6  ;;  %v1188_v43 = vsub.f32 %v10829_v59, %v1144_v28  ;;  %v2184_v54 = vmul.bf16 1043676725, %v2152_v38  ;;  %v2153_v6 = vld [vmem:[%s10526_s24 + $0x8] sm:$0xf]  ;;  %v2194_v28 = vmul.bf16 1043676725, %v2162_v15 }
 0x1ad   : > { %v10964_v10 = vpop.eup %9902 }
 0x1ae   : > { %v10969_v53 = vpop.eup %9904  ;;  %v1255_v36 = vmul.f32 1.442695, %v1193_v56  ;;  %1329 = vadd.xlane.f32.xlu1 %v1328_v57  ;;  %v1310_v8 = vsel %vm438_vm0, %v10964_v10, 0.0  ;;  %v2154_v56 = vld [vmem:[%s10526_s24 + $0xc] sm:$0xf]  ;;  %v8419_v59 = vcombine.low %v2183_v0, %v2184_v54  ;;  %v9766_v0 = vld [vmem:[%s10518_s21 + $0x40] sm:$0xff]  }
 0x1af   : > { %v1319_v3 = vsel %vm438_vm0, %v10969_v53, 0.0  ;;  %v1156_v55 = vpop.xlane.xlu1 %1155  ;;  %v2159_v57 = vld [vmem:[%s10526_s24 + $0x20] sm:$0xf]  ;;  %v1245_v1 = vmul.f32 1.442695, %v1188_v43 }
 0x1b0   : > { %1320 = vadd.xlane.f32.xlu0 %v1319_v3  ;;  %9910 = vpow2.f32 %v1255_v36  ;;  %v1192_v62 = vsub.f32 %v10838_v4, %v1156_v55  ;;  %v2186_v52 = vmul.bf16 1043676725, %v2154_v56  ;;  %v2191_v4 = vmul.bf16 1043676725, %v2159_v57  ;;  %v2167_v43 = vld [vmem:[%s10526_s24 + $0x40] sm:$0xf] }
 0x1b1   : > { %v10974_v58 = vpop.eup %9906  ;;  %9912 = vpow2.f32 %v1243_v18  ;;  %v1257_v18 = vmul.f32 1.442695, %v1194_v60  ;;  %v2199_v54 = vmul.bf16 1043676725, %v2167_v43  ;;  %v2169_v57 = vld [vmem:[%s10526_s24 + $0x48] sm:$0xf] }
 0x1b2   : > { %v10978_v11 = vpop.eup %9908  ;;  %1311 = vadd.xlane.f32.xlu1 %v1310_v8  ;;  %v1322_v7 = vsel %vm438_vm0, %v10974_v58, 0.0  ;;  %9914 = vpow2.f32 %v1251_v29  ;;  %v1253_v3 = vmul.f32 1.442695, %v1192_v62  ;;  %v2185_v8 = vmul.bf16 1043676725, %v2153_v6 }
 0x1b3   : > { %v1337_v46 = vsel %vm438_vm0, %v10978_v11, 0.0  ;;  %9916 = vpow2.f32 %v1249_v39  ;;  %v2192_v29 = vmul.bf16 1043676725, %v2160_v2  ;;  %v2168_v62 = vld [vmem:[%s10526_s24 + $0x44] sm:$0xf] }
 0x1b4   : > { %1338 = vadd.xlane.f32.xlu0 %v1337_v46  ;;  %9918 = vpow2.f32 %v1257_v18  ;;  %v2200_v6 = vmul.bf16 1043676725, %v2168_v62  ;;  %v2170_v2 = vld [vmem:[%s10526_s24 + $0x4c] sm:$0xf] }
 0x1b5   : > { %9920 = vpow2.f32 %v1245_v1  ;;  %v8431_v30 = vcombine.low %v2191_v4, %v2192_v29  ;;  %v9771_v18 = vld [vmem:[%s10518_s21 + $0x68] sm:$0xff]   ;;  %v2201_v1 = vmul.bf16 1043676725, %v2169_v57  ;;  %v2175_v4 = vld [vmem:[%s10526_s24 + $0x60] sm:$0xf] }
 0x1b6   : > { %1323 = vadd.xlane.f32.xlu1 %v1322_v7  ;;  %v9755_v7 = vld [vmem:[%s10518_s21 + $0x28] sm:$0xff]   ;;  %9922 = vpow2.f32 %v1253_v3  ;;  %v8443_v56 = vcombine.low %v2199_v54, %v2200_v6  ;;  %v2202_v3 = vmul.bf16 1043676725, %v2170_v2  ;;  %v2176_v29 = vld [vmem:[%s10526_s24 + $0x64] sm:$0xf] }
 0x1b7   : > { %v2208_v15 = vmul.bf16 1043676725, %v2176_v29 }
 0x1bd   : > { %v10992_v19 = vpop.eup %9910 }
 0x1be   : > { %v1349_v22 = vsel %vm438_vm0, %v10992_v19, 0.0  ;;  %v10996_v24 = vpop.eup %9912 }
 0x1bf   : > { %1350 = vadd.xlane.f32.xlu0 %v1349_v22  ;;  %v1331_v32 = vsel %vm438_vm0, %v10996_v24, 0.0  ;;  %v11001_v14 = vpop.eup %9914  ;;  %v8420_v22 = vcombine.low %v2185_v8, %v2186_v52  ;;  %v2155_v8 = vld [vmem:[%s10526_s24 + $0x10] sm:$0xf]  ;;  %v2156_v52 = vld [vmem:[%s10526_s24 + $0x14] sm:$0xf] }
 0x1c0   : > { %v1343_v34 = vsel %vm438_vm0, %v11001_v14, 0.0  ;;  %v11019_v36 = vpop.eup %9916 }
 0x1c1   : > { %v1340_v46 = vsel %vm438_vm0, %v11019_v36, 0.0 }
 0x1c3   : > { %1332 = vadd.xlane.f32.xlu0 %v1331_v32  ;;  %v9758_v32 = vld [vmem:[%s10518_s21 + $0x20] sm:$0xff]  }
 0x1c7   : > { %2394 = vrot.lane.b32.xlu1 %v9748_v25, %s10476_s26  ;;  %1344 = vadd.xlane.f32.xlu0 %v1343_v34  ;;  %v2161_v25 = vld [vmem:[%s10526_s24 + $0x28] sm:$0xf]  ;;  %v11032_v34 = vpop.eup %9918 }
 0x1c8   : > { %v2193_v39 = vmul.bf16 1043676725, %v2161_v25  ;;  %v11038_v44 = vpop.eup %9920  ;;  %v2207_v25 = vmul.bf16 1043676725, %v2175_v4 }
 0x1c9   : > { %v1334_v38 = vsel %vm438_vm0, %v11038_v44, 0.0  ;;  %v11043_v60 = vpop.eup %9922 }
 0x1ca   : > { %v8432_v55 = vcombine.low %v2193_v39, %v2194_v28  ;;  %v2157_v28 = vld [vmem:[%s10526_s24 + $0x18] sm:$0xf] }
 0x1cb   : > { %2303 = vrot.lane.b32.xlu1 %v9749_v35, %s10476_s26  ;;  %v1352_v35 = vsel %vm438_vm0, %v11032_v34, 0.0  ;;  %v2189_v54 = vmul.bf16 1043676725, %v2157_v28 }
 0x1dd   : > { %2305 = vrot.lane.b32.xlu0 %v9750_v45, %s10476_s26  ;;  %v1346_v45 = vsel %vm438_vm0, %v11043_v60, 0.0 }
 0x1e1   : > { %2289 = vrot.lane.b32.xlu0 %v8419_v59, %s10476_s26  ;;  %v8444_v59 = vcombine.low %v2201_v1, %v2202_v3  ;;  %v2163_v1 = vld [vmem:[%s10526_s24 + $0x30] sm:$0xf]  ;;  %v2164_v3 = vld [vmem:[%s10526_s24 + $0x34] sm:$0xf] }
 0x1e2   : > { %v2195_v4 = vmul.bf16 1043676725, %v2163_v1  ;;  %v2196_v29 = vmul.bf16 1043676725, %v2164_v3 }
 0x1e5   : > { %2483 = vrot.lane.b32.xlu0 %v9755_v7, %s10476_s26  ;;  %v2187_v7 = vmul.bf16 1043676725, %v2155_v8 }
 0x1e9   : > { %2291 = vrot.lane.b32.xlu0 %v8420_v22, %s10476_s26  ;;  %v2188_v22 = vmul.bf16 1043676725, %v2156_v52 }
 0x1eb   : > { %v8425_v39 = vcombine.low %v2187_v7, %v2188_v22  ;;  %v8437_v22 = vcombine.low %v2195_v4, %v2196_v29 }
 0x1ed   : > { %2481 = vrot.lane.b32.xlu0 %v9758_v32, %s10476_s26  ;;  %v9776_v32 = vld [vmem:[%s10518_s21 + $0x60] sm:$0xff]  }
 0x1ef   : > { %1341 = vadd.xlane.f32.xlu1 %v1340_v46  ;;  %v9752_v46 = vld [vmem:[%s10518_s21 + $0x10] sm:$0xff]  }
 0x1f1   : > { %2467 = vrot.lane.b32.xlu0 %v8431_v30, %s10476_s26  ;;  %v2177_v30 = vld [vmem:[%s10526_s24 + $0x68] sm:$0xf] }
 0x1f2   : > { %v2209_v43 = vmul.bf16 1043676725, %v2177_v30  ;;  %v9765_v30 = vld [vmem:[%s10518_s21 + $0x58] sm:$0xff]  }
 0x1f3   : > { %1353 = vadd.xlane.f32.xlu1 %v1352_v35  ;;  %v2178_v35 = vld [vmem:[%s10526_s24 + $0x6c] sm:$0xf] }
 0x1f4   : > { %v2210_v62 = vmul.bf16 1043676725, %v2178_v35 }
 0x1f5   : > { %2661 = vrot.lane.b32.xlu0 %v9763_v37, %s10476_s26 }
 0x1f7   : > { %1335 = vadd.xlane.f32.xlu1 %v1334_v38  ;;  %v2158_v38 = vld [vmem:[%s10526_s24 + $0x1c] sm:$0xf] }
 0x1f8   : > { %v2190_v6 = vmul.bf16 1043676725, %v2158_v38 }
 0x1f9   : > { %2469 = vrot.lane.b32.xlu0 %v8432_v55, %s10476_s26  ;;  %v8455_v55 = vcombine.low %v2207_v25, %v2208_v15  ;;  %v2166_v25 = vld [vmem:[%s10526_s24 + $0x3c] sm:$0xf] }
 0x1fb   : > { %1347 = vadd.xlane.f32.xlu1 %v1346_v45 }
 0x1fd   : > { %2659 = vrot.lane.b32.xlu0 %v9766_v0, %s10476_s26  ;;  %v9757_v0 = vld [vmem:[%s10518_s21 + $0x38] sm:$0xff]  }
 0x201   : > { %2645 = vrot.lane.b32.xlu0 %v8443_v56, %s10476_s26  ;;  %v8456_v56 = vcombine.low %v2209_v43, %v2210_v62  ;;  %v2171_v43 = vld [vmem:[%s10526_s24 + $0x50] sm:$0xf]  ;;  %v2172_v62 = vld [vmem:[%s10526_s24 + $0x54] sm:$0xf] }
 0x205   : > { %2839 = vrot.lane.b32.xlu0 %v9771_v18, %s10476_s26  ;;  %v8426_v18 = vcombine.low %v2189_v54, %v2190_v6 }
 0x209   : > { %2647 = vrot.lane.b32.xlu0 %v8444_v59, %s10476_s26  ;;  %v9760_v59 = vld [vmem:[%s10518_s21 + $0x30] sm:$0xff]  }
 0x20c   : > { %v1267_v37 = vpop.xlane.xlu0 %1266  ;;  %2392 = vrot.lane.b32.xlu1 %v9752_v46, %s10476_s26 }
 0x20d   : > { %2837 = vrot.lane.b32.xlu0 %v9776_v32, %s10476_s26  ;;  %v2165_v32 = vld [vmem:[%s10526_s24 + $0x38] sm:$0xf] }
 0x20e   : > { %v2197_v35 = vmul.bf16 1043676725, %v2165_v32 }
 0x210   : > { %v1279_v45 = vpop.xlane.xlu0 %1278  ;;  %2378 = vrot.lane.b32.xlu1 %v8425_v39, %s10476_s26 }
 0x211   : > { %2823 = vrot.lane.b32.xlu0 %v8455_v55, %s10476_s26 }
 0x213   : > { %v1270_v57 = vpop.xlane.xlu1 %1269 }
 0x214   : > { %v1261_v2 = vpop.xlane.xlu0 %1260  ;;  %2572 = vrot.lane.b32.xlu1 %v9757_v0, %s10476_s26  ;;  %9924 = vrcp.f32 %v1270_v57  ;;  %v2203_v57 = vmul.bf16 1043676725, %v2171_v43 }
 0x215   : > { %2825 = vrot.lane.b32.xlu0 %v8456_v56, %s10476_s26  ;;  %9926 = vrcp.f32 %v1261_v2  ;;  %v9768_v56 = vld [vmem:[%s10518_s21 + $0x50] sm:$0xff]   ;;  %v2204_v2 = vmul.bf16 1043676725, %v2172_v62 }
 0x216   : > { %9928 = vrcp.f32 %v1267_v37  ;;  %v2198_v37 = vmul.bf16 1043676725, %v2166_v25 }
 0x217   : > { %v1282_v8 = vpop.xlane.xlu1 %1281  ;;  %v8449_v25 = vcombine.low %v2203_v57, %v2204_v2 }
 0x218   : > { %v1273_v52 = vpop.xlane.xlu0 %1272  ;;  %2380 = vrot.lane.b32.xlu1 %v8426_v18, %s10476_s26  ;;  %v8438_v38 = vcombine.low %v2197_v35, %v2198_v37 }
 0x21b   : > { %v1264_v46 = vpop.xlane.xlu1 %1263 }
 0x21c   : > { %9930 = vrcp.f32 %v1264_v46  ;;  %v1291_v7 = vpop.xlane.xlu0 %1290  ;;  %2570 = vrot.lane.b32.xlu1 %v9760_v59, %s10476_s26 }
 0x21d   : > { %9932 = vrcp.f32 %v1282_v8 }
 0x21e   : > { %9934 = vrcp.f32 %v1273_v52 }
 0x21f   : > { %9936 = vrcp.f32 %v1279_v45  ;;  %v1276_v15 = vpop.xlane.xlu1 %1275 }
 0x220   : > { %9938 = vrcp.f32 %v1276_v15  ;;  %2556 = vrot.lane.b32.xlu1 %v8437_v22, %s10476_s26 }
 0x221   : > { %v1303_v39 = vpop.xlane.xlu0 %1302  ;;  %v9925_v0 = vpop.eup %9924 }
 0x222   : > { %v9927_v54 = vpop.eup %9926  ;;  %v1390_v3 = vmul.f32 %v9925_v0, %v10865_v9 }
 0x223   : > { %v1294_v28 = vpop.xlane.xlu1 %1293  ;;  %v9929_v45 = vpop.eup %9928  ;;  %v1387_v52 = vmul.f32 %v9927_v54, %v10869_v13  ;;  %v9769_v54 = vld [vmem:[%s10941_s25 + $0x58] sm:$0xff]  }
 0x224   : > { %2750 = vrot.lane.b32.xlu1 %v9765_v30, %s10476_s26  ;;  %9940 = vrcp.f32 %v1294_v28  ;;  %v1389_v46 = vmul.f32 %v9929_v45, %v10855_v48  ;;  %v2173_v28 = vld [vmem:[%s10526_s24 + $0x58] sm:$0xf]  ;;  %v2180_v45 = vld [vmem:[%s10526_s24 + $0x74] sm:$0xf] }
 0x225   : > { %v1285_v55 = vpop.xlane.xlu0 %1284  ;;  %v2205_v43 = vmul.bf16 1043676725, %v2173_v28 }
 0x226   : > { %9942 = vrcp.f32 %v1285_v55  ;;  %v1420_v13 = vpack.c.bf16 %v1390_v3, %v1389_v46  ;;  %v9777_v46 = vld [vmem:[%s10518_s21 + $0x70] sm:$0xff]  }
 0x227   : > { %v1306_v6 = vpop.xlane.xlu1 %1305  ;;  %9944 = vrcp.f32 %v1291_v7 }
 0x228   : > { %2558 = vrot.lane.b32.xlu1 %v8438_v38, %s10476_s26  ;;  %v2174_v38 = vld [vmem:[%s10526_s24 + $0x5c] sm:$0xf] }
 0x229   : > { %v9931_v18 = vpop.eup %9930  ;;  %v1297_v1 = vpop.xlane.xlu0 %1296  ;;  %v2206_v62 = vmul.bf16 1043676725, %v2174_v38 }
 0x22a   : > { %v9933_v8 = vpop.eup %9932  ;;  %v1388_v59 = vmul.f32 %v9931_v18, %v10883_v27  ;;  %v9762_v27 = vld [vmem:[%s10941_s25 + $0x20] sm:$0xff]  }
 0x22b   : > { %v9935_v4 = vpop.eup %9934  ;;  %v1288_v29 = vpop.xlane.xlu1 %1287  ;;  %v1394_v30 = vmul.f32 %v9933_v8, %v10877_v33  ;;  %v8450_v57 = vcombine.low %v2205_v43, %v2206_v62  ;;  %v2212_v8 = vmul.bf16 1043676725, %v2180_v45 }
 0x22c   : > { %v9937_v22 = vpop.eup %9936  ;;  %9946 = vrcp.f32 %v1288_v29  ;;  %v1419_v32 = vpack.c.bf16 %v1388_v59, %v1387_v52  ;;  %2748 = vrot.lane.b32.xlu1 %v9768_v56, %s10476_s26  ;;  %v1391_v48 = vmul.f32 %v9935_v4, %v10875_v21 }
 0x22d   : > { %v9939_v9 = vpop.eup %9938  ;;  %9948 = vrcp.f32 %v1306_v6  ;;  %v1315_v15 = vpop.xlane.xlu0 %1314  ;;  %v1393_v37 = vmul.f32 %v9937_v22, %v10861_v12  ;;  %v9773_v12 = vld [vmem:[%s10518_s21 + $0x78] sm:$0xff]   ;;  %v2179_v6 = vld [vmem:[%s10526_s24 + $0x70] sm:$0xf] }
 0x22e   : > { %9950 = vrcp.f32 %v1297_v1  ;;  %9213 = vmatprep.mubr.msk.bf16.mxu0 %vm438_vm0, %v1419_v32  ;;  %v1392_v7 = vmul.f32 %v9939_v9, %v10893_v41  ;;  %v9764_v41 = vld [vmem:[%s10941_s25 + $0x30] sm:$0xff]   ;;  %v2211_v3 = vmul.bf16 1043676725, %v2179_v6  ;;  %v2181_v22 = vld [vmem:[%s10526_s24 + $0x78] sm:$0xf] }
 0x22f   : > { %9952 = vrcp.f32 %v1303_v39  ;;  %v1300_v35 = vpop.xlane.xlu1 %1299  ;;  %9214 = vmatmul.mubr.msk.bf16.vlgmr.msra.gmra.mxu0 %vm438_vm0, %v1420_v13  ;;  %v1422_v21 = vpack.c.bf16 %v1394_v30, %v1393_v37  ;;  %v11107_v39 = vld [vmem:[%s10941_s25 + $0x48] sm:$0xff]   ;;  %v2182_v30 = vld [vmem:[%s10526_s24 + $0x7c] sm:$0xf]  ;;  %v2213_v37 = vmul.bf16 1043676725, %v2181_v22 }
 0x230   : > { %9954 = vrcp.f32 %v1300_v35  ;;  %v1421_v33 = vpack.c.bf16 %v1392_v7, %v1391_v48  ;;  %9226 = vmatpush3.bf16.msra.mxu0 %v10985_v5  ;;  %2734 = vrot.lane.b32.xlu1 %v8449_v25, %s10476_s26  ;;  %v8461_v48 = vcombine.low %v2211_v3, %v2212_v8  ;;  %v9770_v35 = vld [vmem:[%s10941_s25 + $0x40] sm:$0xff]   ;;  %v2214_v28 = vmul.bf16 1043676725, %v2182_v30 }
 0x231   : > { %v1327_v55 = vpop.xlane.xlu0 %1326  ;;  %9227 = vmatprep.subr.bf16.mxu0 %v9762_v27  ;;  %v9941_v56 = vpop.eup %9940 }
 0x232   : > { %9221 = vmatprep.mubr.msk.bf16.mxu1 %vm438_vm0, %v1421_v33  ;;  %v1398_v52 = vmul.f32 %v9941_v56, %v10899_v47 }
 0x233   : > { %v1318_v0 = vpop.xlane.xlu1 %1317  ;;  %9222 = vmatmul.mubr.msk.bf16.vlgmr.msra.gmra.mxu1 %vm438_vm0, %v1422_v21  ;;  %v9943_v2 = vpop.eup %9942 }
 0x234   : > { %9228 = vmatpush3.bf16.msra.mxu0 %v9762_v27  ;;  %9234 = vmatpush3.bf16.msra.mxu1 %v10989_v16  ;;  %v9945_v1 = vpop.eup %9944  ;;  %9956 = vrcp.f32 %v1318_v0  ;;  %v1395_v4 = vmul.f32 %v9943_v2, %v10913_v63 }
 0x235   : > { %v1309_v5 = vpop.xlane.xlu0 %1308  ;;  %9235 = vmatprep.subr.bf16.mxu1 %v9764_v41  ;;  %9241 = vmatprep.subr.bf16.mxu0 %v11107_v39  ;;  %v1397_v13 = vmul.f32 %v9945_v1, %v10889_v51 }
 0x236   : > { %2928 = vrot.lane.b32.xlu1 %v9773_v12, %s10476_s26  ;;  %9958 = vrcp.f32 %v1309_v5 }
 0x237   : > { %v1330_v18 = vpop.xlane.xlu1 %1329  ;;  %9960 = vrcp.f32 %v1315_v15  ;;  %v1424_v63 = vpack.c.bf16 %v1398_v52, %v1397_v13  ;;  %v9779_v52 = vld [vmem:[%s10941_s25 + $0x60] sm:$0xff]  }
 0x238   : > { %9236 = vmatpush3.bf16.msra.mxu1 %v9764_v41  ;;  %v9772_v41 = vld [vmem:[%s10941_s25 + $0x50] sm:$0xff]  }
 0x239   : > { %v9947_v16 = vpop.eup %9946  ;;  %9249 = vmatprep.subr.bf16.mxu1 %v9769_v54  ;;  %v1321_v25 = vpop.xlane.xlu0 %1320 }
 0x23a   : > { %v9949_v59 = vpop.eup %9948  ;;  %v1396_v29 = vmul.f32 %v9947_v16, %v10919_v20  ;;  %2736 = vrot.lane.b32.xlu1 %v8450_v57, %s10476_s26 }
 0x23b   : > { %v9951_v32 = vpop.eup %9950  ;;  %v1312_v9 = vpop.xlane.xlu1 %1311  ;;  %v1402_v20 = vmul.f32 %v9949_v59, %v10909_v61 }
 0x23c   : > { %v9953_v47 = vpop.eup %9952  ;;  %9962 = vrcp.f32 %v1312_v9  ;;  %v1423_v27 = vpack.c.bf16 %v1396_v29, %v1395_v4  ;;  %v1399_v15 = vmul.f32 %v9951_v32, %v10923_v17  ;;  %v9778_v17 = vld [vmem:[%s10941_s25 + $0x68] sm:$0xff]   ;;  %v9775_v29 = vld [vmem:[%s10941_s25 + $0x70] sm:$0xff]  }
 0x23d   : > { %v9955_v7 = vpop.eup %9954  ;;  %9964 = vrcp.f32 %v1330_v18  ;;  %v1401_v61 = vmul.f32 %v9953_v47, %v10903_v49  ;;  %v9774_v49 = vld [vmem:[%s10941_s25 + $0x78] sm:$0xff]  }
 0x23e   : > { %9966 = vrcp.f32 %v1321_v25  ;;  %9229 = vmatprep.mubr.msk.bf16.mxu0 %vm438_vm0, %v1423_v27  ;;  %v1400_v51 = vmul.f32 %v9955_v7, %v10929_v26  ;;  %2926 = vrot.lane.b32.xlu1 %v9777_v46, %s10476_s26  ;;  %v8462_v26 = vcombine.low %v2213_v37, %v2214_v28 }
 0x23f   : > { %9968 = vrcp.f32 %v1327_v55  ;;  %v1324_v38 = vpop.xlane.xlu1 %1323  ;;  %9230 = vmatmul.mubr.msk.bf16.vlgmr.msra.gmra.mxu0 %vm438_vm0, %v1424_v63  ;;  %v1426_v21 = vpack.c.bf16 %v1402_v20, %v1401_v61  ;;  %v1339_v55 = vpop.xlane.xlu0 %1338 }
 0x240   : > { %9970 = vrcp.f32 %v1324_v38  ;;  %v1425_v33 = vpack.c.bf16 %v1400_v51, %v1399_v15  ;;  %9242 = vmatpush3.bf16.msra.mxu0 %v11107_v39 }
 0x241   : > { %9243 = vmatprep.subr.bf16.mxu0 %v9770_v35  ;;  %v9957_v12 = vpop.eup %9956 }
 0x242   : > { %9237 = vmatprep.mubr.msk.bf16.mxu1 %vm438_vm0, %v1425_v33  ;;  %2912 = vrot.lane.b32.xlu1 %v8461_v48, %s10476_s26  ;;  %v1406_v5 = vmul.f32 %v9957_v12, %v10943_v23 }
 0x243   : > { %9238 = vmatmul.mubr.msk.bf16.vlgmr.msra.gmra.mxu1 %vm438_vm0, %v1426_v21  ;;  %v9959_v39 = vpop.eup %9958 }
 0x244   : > { %9250 = vmatpush3.bf16.msra.mxu1 %v9769_v54  ;;  %9244 = vmatpush3.bf16.msra.mxu0 %v9770_v35  ;;  %v9961_v43 = vpop.eup %9960  ;;  %v1403_v54 = vmul.f32 %v9959_v39, %v10958_v50 }
 0x245   : > { %9251 = vmatprep.subr.bf16.mxu1 %v9772_v41  ;;  %9257 = vmatprep.subr.bf16.mxu0 %v9778_v17  ;;  %v1405_v57 = vmul.f32 %v9961_v43, %v10933_v31 }
 0x246   : > { %2914 = vrot.lane.b32.xlu1 %v8462_v26, %s10476_s26 }
 0x247   : > { %v1428_v8 = vpack.c.bf16 %v1406_v5, %v1405_v57  ;;  %v9781_v5 = vld [vmem:[%s10941_s25 + $0x10] sm:$0xff]   ;;  %v9783_v57 = vld [vmem:[%s10941_s25 + $0x28] sm:$0xff]  }
 0x248   : > { %9252 = vmatpush3.bf16.msra.mxu1 %v9772_v41  ;;  %v1351_v0 = vpop.xlane.xlu0 %1350 }
 0x249   : > { %v9963_v62 = vpop.eup %9962  ;;  %9265 = vmatprep.subr.bf16.mxu1 %v9774_v49 }
 0x24a   : > { %v9965_v6 = vpop.eup %9964  ;;  %v1404_v45 = vmul.f32 %v9963_v62, %v10964_v10  ;;  %v9780_v62 = vld [vmem:[%s10941_s25 + $0x18] sm:$0xff]  }
 0x24b   : > { %v9967_v56 = vpop.eup %9966  ;;  %v1410_v16 = vmul.f32 %v9965_v6, %v10952_v42  ;;  %3442 = vrot.lane.b32.xlu1 %v9780_v62, %s10476_s26  ;;  %v9784_v6 = vld [vmem:[%s10941_s25] sm:$0xff]  }
 0x24c   : > { %v9969_v2 = vpop.eup %9968  ;;  %v1427_v18 = vpack.c.bf16 %v1404_v45, %v1403_v54  ;;  %v1333_v3 = vpop.xlane.xlu0 %1332  ;;  %v1407_v23 = vmul.f32 %v9967_v56, %v10969_v53 }
 0x24d   : > { %v9971_v1 = vpop.eup %9970  ;;  %v1409_v10 = vmul.f32 %v9969_v2, %v10948_v40  ;;  %v2395_v53 = vpop.permute.xlu1 %2394  ;;  %v9787_v2 = vld [vmem:[%s10941_s25 + $0x20] sm:$0xff]  }
 0x24e   : > { %9245 = vmatprep.mubr.msk.bf16.mxu0 %vm438_vm0, %v1427_v18  ;;  %v1408_v50 = vmul.f32 %v9971_v1, %v10974_v58 }
 0x24f   : > { %9246 = vmatmul.mubr.msk.bf16.vlgmr.msra.gmra.mxu0 %vm438_vm0, %v1428_v8  ;;  %v1430_v4 = vpack.c.bf16 %v1410_v16, %v1409_v10  ;;  %3440 = vrot.lane.b32.xlu1 %v9781_v5, %s10476_s26  ;;  %v9789_v8 = vld [vmem:[%s10941_s25 + $0x48] sm:$0xff]  }
 0x250   : > { %v1429_v31 = vpack.c.bf16 %v1408_v50, %v1407_v23  ;;  %9258 = vmatpush3.bf16.msra.mxu0 %v9778_v17  ;;  %v1345_v59 = vpop.xlane.xlu0 %1344  ;;  %v9786_v23 = vld [vmem:[%s10941_s25 + $0x30] sm:$0xff]   ;;  %v9791_v50 = vld [vmem:[%s10941_s25 + $0x40] sm:$0xff]  }
 0x251   : > { %9259 = vmatprep.subr.bf16.mxu0 %v9779_v52  ;;  %v2304_v40 = vpop.permute.xlu1 %2303 }
 0x252   : > { %9253 = vmatprep.mubr.msk.bf16.mxu1 %vm438_vm0, %v1429_v31 }
 0x253   : > { %9254 = vmatmul.mubr.msk.bf16.vlgmr.msra.gmra.mxu1 %vm438_vm0, %v1430_v4  ;;  %3513 = vrot.lane.b32.xlu1 %v9783_v57, %s10476_s26  ;;  %v9788_v4 = vld [vmem:[%s10941_s25 + $0x58] sm:$0xff]  }
 0x254   : > { %9266 = vmatpush3.bf16.msra.mxu1 %v9774_v49  ;;  %9260 = vmatpush3.bf16.msra.mxu0 %v9779_v52  ;;  %v2306_v42 = vpop.permute.xlu0 %2305 }
 0x255   : > { %9267 = vmatprep.subr.bf16.mxu1 %v9775_v29  ;;  %9673 = vmatprep.subr.msk.bf16.mxu0 %vm438_vm0, %v2306_v42  ;;  %v2317_v26 = vsel %vm438_vm0, %v2306_v42, 0 }
 0x258   : > { %9268 = vmatpush3.bf16.msra.mxu1 %v9775_v29  ;;  %v2290_v22 = vpop.permute.xlu0 %2289  ;;  %v9793_v29 = vld [vmem:[%s10941_s25 + $0x68] sm:$0xff]  }
 0x259   : > { %9675 = vmatprep.subr.msk.bf16.mxu1 %vm438_vm0, %v2395_v53 }
 0x25c   : > { %v11158_v9 = vpop.permute.xlu0 %2483 }
 0x25d   : > { %v2495_v18 = vsel %vm438_vm0, %v11158_v9, 0 }
 0x260   : > { %v2292_v30 = vpop.permute.xlu0 %2291 }
 0x264   : > { %v11164_v61 = vpop.permute.xlu0 %2481 }
 0x265   : > { %v2492_v10 = vsel %vm438_vm0, %v11164_v61, 0 }
 0x268   : > { %v2468_v12 = vpop.permute.xlu0 %2467 }
 0x26c   : > { %v2662_v43 = vpop.permute.xlu0 %2661 }
 0x270   : > { %v2470_v56 = vpop.permute.xlu0 %2469 }
 0x274   : > { %v2660_v52 = vpop.permute.xlu0 %2659 }
 0x278   : > { %v1342_v58 = vpop.xlane.xlu1 %1341 }
 0x279   : > { %9972 = vrcp.f32 %v1342_v58  ;;  %v2673_v58 = vsel %vm438_vm0, %v2662_v43, 0 }
 0x27a   : > { %9974 = vrcp.f32 %v1333_v3  ;;  %v9785_v3 = vld [vmem:[%s10941_s25 + $0x38] sm:$0xff]  }
 0x27b   : > { %9976 = vrcp.f32 %v1339_v55  ;;  %3584 = vrot.lane.b32.xlu1 %v9785_v3, %s10476_s26 }
 0x27c   : > { %v1354_v46 = vpop.xlane.xlu1 %1353 }
 0x27f   : > { %3582 = vrot.lane.b32.xlu1 %v9786_v23, %s10476_s26 }
 0x280   : > { %v1336_v32 = vpop.xlane.xlu1 %1335 }
 0x281   : > { %9978 = vrcp.f32 %v1336_v32 }
 0x282   : > { %9980 = vrcp.f32 %v1354_v46 }
 0x283   : > { %9982 = vrcp.f32 %v1345_v59  ;;  %v2646_v59 = vpop.permute.xlu0 %2645  ;;  %3726 = vrot.lane.b32.xlu1 %v9788_v4, %s10476_s26 }
 0x284   : > { %9984 = vrcp.f32 %v1351_v0  ;;  %v1348_v25 = vpop.xlane.xlu1 %1347  ;;  %v9782_v0 = vld [vmem:[%s10941_s25 + $0x8] sm:$0xff]  }
 0x285   : > { %9986 = vrcp.f32 %v1348_v25  ;;  %3371 = vrot.lane.b32.xlu0 %v9782_v0, %s10476_s26 }
 0x286   : > { %v9973_v47 = vpop.eup %9972 }
 0x287   : > { %v9975_v27 = vpop.eup %9974  ;;  %v1414_v20 = vmul.f32 %v9973_v47, %v11019_v36  ;;  %v2840_v46 = vpop.permute.xlu0 %2839 }
 0x288   : > { %v2393_v13 = vpop.permute.xlu1 %2392  ;;  %v9977_v7 = vpop.eup %9976  ;;  %v1411_v37 = vmul.f32 %v9975_v27, %v10996_v24 }
 0x289   : > { %v1413_v28 = vmul.f32 %v9977_v7, %v10978_v11  ;;  %v2403_v54 = vsel %vm438_vm0, %v2393_v13, 0  ;;  %3369 = vrot.lane.b32.xlu0 %v9784_v6, %s10476_s26  ;;  %v2851_v7 = vsel %vm438_vm0, %v2840_v46, 0 }
 0x28b   : > { %v1432_v17 = vpack.c.bf16 %v1414_v20, %v1413_v28 }
 0x28c   : > { %v2379_v48 = vpop.permute.xlu1 %2378 }
 0x28d   : > { %3511 = vrot.lane.b32.xlu0 %v9787_v2, %s10476_s26 }
 0x28e   : > { %v9979_v63 = vpop.eup %9978 }
 0x28f   : > { %v9981_v35 = vpop.eup %9980  ;;  %v1412_v15 = vmul.f32 %v9979_v63, %v11038_v44 }
 0x290   : > { %v9983_v51 = vpop.eup %9982  ;;  %v2573_v38 = vpop.permute.xlu1 %2572  ;;  %v1418_v55 = vmul.f32 %v9981_v35, %v11032_v34 }
 0x291   : > { %v9985_v33 = vpop.eup %9984  ;;  %v1431_v21 = vpack.c.bf16 %v1412_v15, %v1411_v37  ;;  %v1415_v24 = vmul.f32 %v9983_v51, %v11001_v14  ;;  %v2406_v14 = vsel %vm438_vm0, %v2395_v53, 0  ;;  %v2584_v16 = vsel %vm438_vm0, %v2573_v38, 0  ;;  %3655 = vrot.lane.b32.xlu0 %v9789_v8, %s10476_s26 }
 0x292   : > { %v9987_v41 = vpop.eup %9986  ;;  %v1417_v11 = vmul.f32 %v9985_v33, %v10992_v19 }
 0x293   : > { %9261 = vmatprep.mubr.msk.bf16.mxu0 %vm438_vm0, %v1431_v21  ;;  %v1416_v36 = vmul.f32 %v9987_v41, %v11043_v60  ;;  %v2314_v60 = vsel %vm438_vm0, %v2304_v40, 0 }
 0x294   : > { %9262 = vmatmul.mubr.msk.bf16.vlgmr.msra.gmra.mxu0 %vm438_vm0, %v1432_v17  ;;  %v2381_v44 = vpop.permute.xlu1 %2380  ;;  %v1434_v34 = vpack.c.bf16 %v1418_v55, %v1417_v11  ;;  %v10373_v17 = vld [vmem:[%s13732_s3 + $0x30] sm:$0xff] }
 0x295   : > { %9274 = vmatpush3.bf16.xpose.msra.mxu0 %v2317_v26  ;;  %v1433_v49 = vpack.c.bf16 %v1416_v36, %v1415_v24  ;;  %9277 = vmatprep.mubr.msk.bf16.mxu0 %vm438_vm0, %v2290_v22  ;;  %v9792_v22 = vld [vmem:[%s10941_s25 + $0x78] sm:$0xff]   ;;  %v2106_v26 = vld [vmem:[%s11256_s29 + $0xc] sm:$0x1] }
 0x296   : > { %9674 = vmatprep.subr.msk.bf16.mxu0 %vm438_vm0, %v2304_v40  ;;  %3653 = vrot.lane.b32.xlu0 %v9791_v50, %s10476_s26  ;;  %v9790_v40 = vld [vmem:[%s10941_s25 + $0x50] sm:$0xff]   ;;  %v2124_v50 = vld [vmem:[%s11256_s29 + $0x3c] sm:$0x1] }
 0x297   : > { %9269 = vmatprep.mubr.msk.bf16.mxu1 %vm438_vm0, %v1433_v49  ;;  %3724 = vrot.lane.b32.xlu1 %v9790_v40, %s10476_s26 }
 0x298   : > { %9270 = vmatmul.mubr.msk.bf16.vlgmr.msra.gmra.mxu1 %vm438_vm0, %v1434_v34  ;;  %v2571_v19 = vpop.permute.xlu1 %2570 }
 0x299   : > { %9282 = vmatpush3.bf16.xpose.msra.mxu1 %v2406_v14  ;;  %9285 = vmatprep.mubr.msk.bf16.mxu1 %vm438_vm0, %v2379_v48  ;;  %v2581_v42 = vsel %vm438_vm0, %v2571_v19, 0 }
 0x29a   : > { %9676 = vmatprep.subr.msk.bf16.mxu1 %vm438_vm0, %v2393_v13  ;;  %3797 = vrot.lane.b32.xlu0 %v9793_v29, %s10476_s26  ;;  %v2670_v13 = vsel %vm438_vm0, %v2660_v52, 0 }
 0x29b   : > { %3868 = vrot.lane.b32.xlu1 %v9792_v22, %s10476_s26 }
 0x29c   : > { %v2557_v39 = vpop.permute.xlu1 %2556 }
 0x29d   : > { %9276 = vmatpush3.bf16.xpose.msra.mxu0 %v2314_v60 }
 0x29e   : > { %9677 = vmatprep.subr.msk.bf16.mxu0 %vm438_vm0, %v11158_v9  ;;  %v2648_v9 = vpop.permute.xlu0 %2647 }
 0x2a0   : > { %v2751_v45 = vpop.permute.xlu1 %2750 }
 0x2a1   : > { %9284 = vmatpush3.bf16.xpose.msra.mxu1 %v2403_v54  ;;  %v2762_v32 = vsel %vm438_vm0, %v2751_v45, 0 }
 0x2a2   : > { %9679 = vmatprep.subr.msk.bf16.mxu1 %vm438_vm0, %v2573_v38  ;;  %v2838_v47 = vpop.permute.xlu0 %2837 }
 0x2a3   : > { %v2848_v37 = vsel %vm438_vm0, %v2838_v47, 0 }
 0x2a4   : > { %9278 = vmatmul.mubr.msk.bf16.vlgmr.msra.gmra.mxu0 %vm438_vm0, %v2292_v30  ;;  %v2559_v1 = vpop.permute.xlu1 %2558 }
 0x2a5   : > { %9290 = vmatpush3.bf16.xpose.msra.mxu0 %v2495_v18  ;;  %9293 = vmatprep.mubr.msk.bf16.mxu0 %vm438_vm0, %v2468_v12 }
 0x2a6   : > { %9678 = vmatprep.subr.msk.bf16.mxu0 %vm438_vm0, %v11164_v61  ;;  %v2824_v63 = vpop.permute.xlu0 %2823 }
 0x2a8   : > { %9286 = vmatmul.mubr.msk.bf16.vlgmr.msra.gmra.mxu1 %vm438_vm0, %v2381_v44  ;;  %v2749_v31 = vpop.permute.xlu1 %2748 }
 0x2a9   : > { %9298 = vmatpush3.bf16.xpose.msra.mxu1 %v2584_v16  ;;  %9301 = vmatprep.mubr.msk.bf16.mxu1 %vm438_vm0, %v2557_v39  ;;  %v2759_v27 = vsel %vm438_vm0, %v2749_v31, 0 }
 0x2aa   : > { %9680 = vmatprep.subr.msk.bf16.mxu1 %vm438_vm0, %v2571_v19  ;;  %v2826_v51 = vpop.permute.xlu0 %2825  ;;  %v2112_v19 = vld [vmem:[%s11256_s29 + $0x1c] sm:$0x1] }
 0x2ac   : > { %v2735_v53 = vpop.permute.xlu1 %2734 }
 0x2ad   : > { %9292 = vmatpush3.bf16.xpose.msra.mxu0 %v2492_v10 }
 0x2ae   : > { %9681 = vmatprep.subr.msk.bf16.mxu0 %vm438_vm0, %v2662_v43 }
 0x2b0   : > { %v2929_v25 = vpop.permute.xlu1 %2928 }
 0x2b1   : > { %9300 = vmatpush3.bf16.xpose.msra.mxu1 %v2581_v42  ;;  %v2940_v20 = vsel %vm438_vm0, %v2929_v25, 0 }
 0x2b2   : > { %9683 = vmatprep.subr.msk.bf16.mxu1 %vm438_vm0, %v2751_v45 }
 0x2b4   : > { %9294 = vmatmul.mubr.msk.bf16.vlgmr.msra.gmra.mxu0 %vm438_vm0, %v2470_v56  ;;  %v2737_v30 = vpop.permute.xlu1 %2736  ;;  %v2118_v56 = vld [vmem:[%s11256_s29 + $0x2c] sm:$0x1] }
 0x2b5   : > { %9306 = vmatpush3.bf16.xpose.msra.mxu0 %v2673_v58  ;;  %9309 = vmatprep.mubr.msk.bf16.mxu0 %vm438_vm0, %v2646_v59 }
 0x2b6   : > { %9682 = vmatprep.subr.msk.bf16.mxu0 %vm438_vm0, %v2660_v52 }
 0x2b8   : > { %9302 = vmatmul.mubr.msk.bf16.vlgmr.msra.gmra.mxu1 %vm438_vm0, %v2559_v1  ;;  %v2927_v48 = vpop.permute.xlu1 %2926 }
 0x2b9   : > { %9314 = vmatpush3.bf16.xpose.msra.mxu1 %v2762_v32  ;;  %9317 = vmatprep.mubr.msk.bf16.mxu1 %vm438_vm0, %v2735_v53  ;;  %v2937_v15 = vsel %vm438_vm0, %v2927_v48, 0 }
 0x2ba   : > { %9684 = vmatprep.subr.msk.bf16.mxu1 %vm438_vm0, %v2749_v31 }
 0x2bc   : > { %v2913_v35 = vpop.permute.xlu1 %2912 }
 0x2bd   : > { %9308 = vmatpush3.bf16.xpose.msra.mxu0 %v2670_v13 }
 0x2be   : > { %9685 = vmatprep.subr.msk.bf16.mxu0 %vm438_vm0, %v2840_v46 }
 0x2c0   : > { %v2915_v28 = vpop.permute.xlu1 %2914 }
 0x2c1   : > { %9316 = vmatpush3.bf16.xpose.msra.mxu1 %v2759_v27 }
 0x2c2   : > { %9687 = vmatprep.subr.msk.bf16.mxu1 %vm438_vm0, %v2929_v25  ;;  %v2130_v25 = vld [vmem:[%s11256_s29 + $0x4c] sm:$0x1] }
 0x2c4   : > { %9310 = vmatmul.mubr.msk.bf16.vlgmr.msra.gmra.mxu0 %vm438_vm0, %v2648_v9 }
 0x2c5   : > { %9322 = vmatpush3.bf16.xpose.msra.mxu0 %v2851_v7  ;;  %9325 = vmatprep.mubr.msk.bf16.mxu0 %vm438_vm0, %v2824_v63  ;;  %v2136_v63 = vld [vmem:[%s11256_s29 + $0x5c] sm:$0x1] }
 0x2c6   : > { %9686 = vmatprep.subr.msk.bf16.mxu0 %vm438_vm0, %v2838_v47 }
 0x2c8   : > { %9318 = vmatmul.mubr.msk.bf16.vlgmr.msra.gmra.mxu1 %vm438_vm0, %v2737_v30 }
 0x2c9   : > { %9330 = vmatpush3.bf16.xpose.msra.mxu1 %v2940_v20  ;;  %9333 = vmatprep.mubr.msk.bf16.mxu1 %vm438_vm0, %v2913_v35 }
 0x2ca   : > { %9688 = vmatprep.subr.msk.bf16.mxu1 %vm438_vm0, %v2927_v48 }
 0x2cd   : > { %9324 = vmatpush3.bf16.xpose.msra.mxu0 %v2848_v37 }
 0x2d1   : > { %9332 = vmatpush3.bf16.xpose.msra.mxu1 %v2937_v15  ;;  %v3443_v15 = vpop.permute.xlu1 %3442 }
 0x2d2   : > { %9345 = vmatprep.subr.bf16.mxu1 %v3443_v15 }
 0x2d4   : > { %9326 = vmatmul.mubr.msk.bf16.vlgmr.msra.gmra.mxu0 %vm438_vm0, %v2826_v51 }
 0x2d8   : > { %9334 = vmatmul.mubr.msk.bf16.vlgmr.msra.gmra.mxu1 %vm438_vm0, %v2915_v28  ;;  %v3441_v28 = vpop.permute.xlu1 %3440 }
 0x2d9   : > { %9346 = vmatpush3.bf16.msra.mxu1 %v3443_v15  ;;  %v10381_v15 = vld [vmem:[%s13732_s3 + $0x58] sm:$0xff] }
 0x2da   : > { %9347 = vmatprep.subr.bf16.mxu1 %v3441_v28 }
 0x2dd   : > { %9348 = vmatpush3.bf16.msra.mxu1 %v3441_v28 }
 0x2ef   : > { %v9215_v38 = vpop.f32.mrf.mxu0 }
 0x2f0   : > { %v8763_v61 = vpack.c.bf16 %v9215_v38, %v9215_v38 }
 0x2f1   : > { %v1487_v33 = vpop.f32.mrf.mxu0 }
 0x2f2   : > { %2102 = vst.msk [vmem:[%s11256_s29 + $0x8] sm:$0xf] %vm2099_vm1, %v8763_v61  ;;  %v8761_v21 = vpack.c.bf16 %v1487_v33, %v1487_v33  ;;  %v11323_v61 = vpop.permute.xlu1 %3513 }
 0x2f3   : > { %v9216_v41 = vpop.f32.mrf.mxu0  ;;  %v9223_v55 = vpop.f32.mrf.mxu1 }
 0x2f4   : > { %2100 = vst.msk [vmem:[%s11256_s29] sm:$0xf] %vm2099_vm1, %v8761_v21  ;;  %v8764_v24 = vpack.c.bf16 %v9216_v41, %v9216_v41  ;;  %v8767_v36 = vpack.c.bf16 %v9223_v55, %v9223_v55 }
 0x2f5   : > { %v1490_v11 = vpop.f32.mrf.mxu0  ;;  %v1554_v44 = vpop.f32.mrf.mxu1 }
 0x2f6   : > { %v2107_v49 = vsel %vm11261_vm4, %v8764_v24, %v2106_v26  ;;  %2111 = vst.msk [vmem:[%s11256_s29 + $0x18] sm:$0xf] %vm2099_vm1, %v8767_v36  ;;  %v8762_v34 = vpack.c.bf16 %v1490_v11, %v1490_v11  ;;  %v8765_v12 = vpack.c.bf16 %v1554_v44, %v1554_v44  ;;  %v11326_v33 = vpop.permute.xlu1 %3584 }
 0x2f7   : > { %2108 = vst [vmem:[%s11256_s29 + $0xc] sm:$0x1] %v2107_v49  ;;  %v9224_v14 = vpop.f32.mrf.mxu1  ;;  %v3372_v51 = vpop.permute.xlu0 %3371  ;;  %9361 = vmatprep.subr.bf16.mxu1 %v11326_v33  ;;  %v2142_v49 = vld [vmem:[%s11256_s29 + $0x6c] sm:$0x1] }
 0x2f8   : > { %2101 = vst.msk [vmem:[%s11256_s29 + $0x4] sm:$0xf] %vm2099_vm1, %v8762_v34  ;;  %2109 = vst.msk [vmem:[%s11256_s29 + $0x10] sm:$0xf] %vm2099_vm1, %v8765_v12  ;;  %v8768_v60 = vpack.c.bf16 %v9224_v14, %v9224_v14  ;;  %9337 = vmatprep.subr.bf16.mxu0 %v3372_v51 }
 0x2f9   : > { %v1557_v39 = vpop.f32.mrf.mxu1  ;;  %9338 = vmatpush3.bf16.msra.mxu0 %v3372_v51 }
 0x2fa   : > { %v2113_v43 = vsel %vm11261_vm4, %v8768_v60, %v2112_v19  ;;  %v8766_v62 = vpack.c.bf16 %v1557_v39, %v1557_v39 }
 0x2fb   : > { %2114 = vst [vmem:[%s11256_s29 + $0x1c] sm:$0x1] %v2113_v43  ;;  %v3370_v38 = vpop.permute.xlu0 %3369 }
 0x2fc   : > { %2110 = vst.msk [vmem:[%s11256_s29 + $0x14] sm:$0xf] %vm2099_vm1, %v8766_v62  ;;  %9339 = vmatprep.subr.bf16.mxu0 %v3370_v38  ;;  %v2148_v62 = vld [vmem:[%s11256_s29 + $0x7c] sm:$0x1] }
 0x2fd   : > { %9340 = vmatpush3.bf16.msra.mxu0 %v3370_v38  ;;  %v10382_v38 = vld [vmem:[%s13732_s3 + $0x70] sm:$0xff] }
 0x2fe   : > { %9353 = vmatprep.subr.bf16.mxu0 %v11323_v61 }
 0x2ff   : > { %v9231_v0 = vpop.f32.mrf.mxu0 }
 0x300   : > { %v8771_v5 = vpack.c.bf16 %v9231_v0, %v9231_v0 }
 0x301   : > { %v1621_v6 = vpop.f32.mrf.mxu0 }
 0x302   : > { %2117 = vst.msk [vmem:[%s11256_s29 + $0x28] sm:$0xf] %vm2099_vm1, %v8771_v5  ;;  %v8769_v54 = vpack.c.bf16 %v1621_v6, %v1621_v6 }
 0x303   : > { %v9232_v45 = vpop.f32.mrf.mxu0  ;;  %v9239_v57 = vpop.f32.mrf.mxu1 }
 0x304   : > { %2115 = vst.msk [vmem:[%s11256_s29 + $0x20] sm:$0xf] %vm2099_vm1, %v8769_v54  ;;  %v8772_v2 = vpack.c.bf16 %v9232_v45, %v9232_v45  ;;  %v8775_v18 = vpack.c.bf16 %v9239_v57, %v9239_v57  ;;  %v10372_v45 = vld [vmem:[%s13732_s3 + $0x10] sm:$0xff] }
 0x305   : > { %v1624_v1 = vpop.f32.mrf.mxu0  ;;  %v1688_v3 = vpop.f32.mrf.mxu1 }
 0x306   : > { %v2119_v8 = vsel %vm11261_vm4, %v8772_v2, %v2118_v56  ;;  %2123 = vst.msk [vmem:[%s11256_s29 + $0x38] sm:$0xf] %vm2099_vm1, %v8775_v18  ;;  %v8770_v16 = vpack.c.bf16 %v1624_v1, %v1624_v1  ;;  %v8773_v52 = vpack.c.bf16 %v1688_v3, %v1688_v3 }
 0x307   : > { %2120 = vst [vmem:[%s11256_s29 + $0x2c] sm:$0x1] %v2119_v8  ;;  %v9240_v23 = vpop.f32.mrf.mxu1  ;;  %v10374_v8 = vld [vmem:[%s13732_s3 + $0x18] sm:$0xff] }
 0x308   : > { %2116 = vst.msk [vmem:[%s11256_s29 + $0x24] sm:$0xf] %vm2099_vm1, %v8770_v16  ;;  %2121 = vst.msk [vmem:[%s11256_s29 + $0x30] sm:$0xf] %vm2099_vm1, %v8773_v52  ;;  %v8776_v10 = vpack.c.bf16 %v9240_v23, %v9240_v23  ;;  %v10375_v23 = vld [vmem:[%s13732_s3] sm:$0xff] }
 0x309   : > { %v1691_v31 = vpop.f32.mrf.mxu1 }
 0x30a   : > { %v2125_v59 = vsel %vm11261_vm4, %v8776_v10, %v2124_v50  ;;  %v8774_v4 = vpack.c.bf16 %v1691_v31, %v1691_v31 }
 0x30b   : > { %2126 = vst [vmem:[%s11256_s29 + $0x3c] sm:$0x1] %v2125_v59 }
 0x30c   : > { %2122 = vst.msk [vmem:[%s11256_s29 + $0x34] sm:$0xf] %vm2099_vm1, %v8774_v4 }
 0x30f   : > { %v9247_v29 = vpop.f32.mrf.mxu0 }
 0x310   : > { %v8779_v42 = vpack.c.bf16 %v9247_v29, %v9247_v29  ;;  %v10376_v29 = vld [vmem:[%s13732_s3 + $0x38] sm:$0xff] }
 0x311   : > { %v1755_v53 = vpop.f32.mrf.mxu0 }
 0x312   : > { %2129 = vst.msk [vmem:[%s11256_s29 + $0x48] sm:$0xf] %vm2099_vm1, %v8779_v42  ;;  %v8777_v40 = vpack.c.bf16 %v1755_v53, %v1755_v53  ;;  %v10377_v53 = vld [vmem:[%s13732_s3 + $0x8] sm:$0xff] }
 0x313   : > { %v9248_v58 = vpop.f32.mrf.mxu0  ;;  %v9255_v46 = vpop.f32.mrf.mxu1 }
 0x314   : > { %2127 = vst.msk [vmem:[%s11256_s29 + $0x40] sm:$0xf] %vm2099_vm1, %v8777_v40  ;;  %v8780_v22 = vpack.c.bf16 %v9248_v58, %v9248_v58  ;;  %v8783_v32 = vpack.c.bf16 %v9255_v46, %v9255_v46  ;;  %v10378_v58 = vld [vmem:[%s13732_s3 + $0x20] sm:$0xff] }
 0x315   : > { %v1758_v9 = vpop.f32.mrf.mxu0  ;;  %v1822_v13 = vpop.f32.mrf.mxu1 }
 0x316   : > { %v2131_v30 = vsel %vm11261_vm4, %v8780_v22, %v2130_v25  ;;  %2135 = vst.msk [vmem:[%s11256_s29 + $0x58] sm:$0xf] %vm2099_vm1, %v8783_v32  ;;  %v8778_v47 = vpack.c.bf16 %v1758_v9, %v1758_v9  ;;  %v8781_v27 = vpack.c.bf16 %v1822_v13, %v1822_v13  ;;  %v10379_v9 = vld [vmem:[%s13732_s3 + $0x28] sm:$0xff] }
 0x317   : > { %2132 = vst [vmem:[%s11256_s29 + $0x4c] sm:$0x1] %v2131_v30  ;;  %v9256_v48 = vpop.f32.mrf.mxu1 }
 0x318   : > { %2128 = vst.msk [vmem:[%s11256_s29 + $0x44] sm:$0xf] %vm2099_vm1, %v8778_v47  ;;  %2133 = vst.msk [vmem:[%s11256_s29 + $0x50] sm:$0xf] %vm2099_vm1, %v8781_v27  ;;  %v8784_v7 = vpack.c.bf16 %v9256_v48, %v9256_v48 }
 0x319   : > { %v1825_v20 = vpop.f32.mrf.mxu1 }
 0x31a   : > { %v2137_v35 = vsel %vm11261_vm4, %v8784_v7, %v2136_v63  ;;  %v8782_v37 = vpack.c.bf16 %v1825_v20, %v1825_v20  ;;  %v10380_v7 = vld [vmem:[%s13732_s3 + $0x50] sm:$0xff] }
 0x31b   : > { %2138 = vst [vmem:[%s11256_s29 + $0x5c] sm:$0x1] %v2137_v35 }
 0x31c   : > { %2134 = vst.msk [vmem:[%s11256_s29 + $0x54] sm:$0xf] %vm2099_vm1, %v8782_v37 }
 0x354   : > { %v9263_v21 = vpop.f32.mrf.mxu0 }
 0x355   : > { %v8787_v41 = vpack.c.bf16 %v9263_v21, %v9263_v21 }
 0x356   : > { %v1889_v26 = vpop.f32.mrf.mxu0 }
 0x357   : > { %2141 = vst.msk [vmem:[%s11256_s29 + $0x68] sm:$0xf] %vm2099_vm1, %v8787_v41  ;;  %v8785_v55 = vpack.c.bf16 %v1889_v26, %v1889_v26 }
 0x358   : > { %v9264_v24 = vpop.f32.mrf.mxu0  ;;  %v9271_v36 = vpop.f32.mrf.mxu1 }
 0x359   : > { %2139 = vst.msk [vmem:[%s11256_s29 + $0x60] sm:$0xf] %vm2099_vm1, %v8785_v55  ;;  %v8788_v11 = vpack.c.bf16 %v9264_v24, %v9264_v24  ;;  %v8791_v44 = vpack.c.bf16 %v9271_v36, %v9271_v36  ;;  %v10383_v36 = vld [vmem:[%s13732_s3 + $0x78] sm:$0xff] }
 0x35a   : > { %v1892_v34 = vpop.f32.mrf.mxu0  ;;  %v1956_v12 = vpop.f32.mrf.mxu1 }
 0x35b   : > { %v2143_v14 = vsel %vm11261_vm4, %v8788_v11, %v2142_v49  ;;  %2147 = vst.msk [vmem:[%s11256_s29 + $0x78] sm:$0xf] %vm2099_vm1, %v8791_v44  ;;  %v8786_v19 = vpack.c.bf16 %v1892_v34, %v1892_v34  ;;  %v8789_v60 = vpack.c.bf16 %v1956_v12, %v1956_v12  ;;  %v10384_v44 = vld [vmem:[%s13732_s3 + $0x40] sm:$0xff]  ;;  %v10385_v34 = vld [vmem:[%s13732_s3 + $0x48] sm:$0xff] }
 0x35c   : > { %2144 = vst [vmem:[%s11256_s29 + $0x6c] sm:$0x1] %v2143_v14  ;;  %v9272_v39 = vpop.f32.mrf.mxu1 }
 0x35d   : > { %2140 = vst.msk [vmem:[%s11256_s29 + $0x64] sm:$0xf] %vm2099_vm1, %v8786_v19  ;;  %2145 = vst.msk [vmem:[%s11256_s29 + $0x70] sm:$0xf] %vm2099_vm1, %v8789_v60  ;;  %v8792_v43 = vpack.c.bf16 %v9272_v39, %v9272_v39  ;;  %v10386_v39 = vld [vmem:[%s13732_s3 + $0x60] sm:$0xff] }
 0x35e   : > { %v1959_v0 = vpop.f32.mrf.mxu1 }
 0x35f   : > { %v2149_v5 = vsel %vm11261_vm4, %v8792_v43, %v2148_v62  ;;  %v8790_v6 = vpack.c.bf16 %v1959_v0, %v1959_v0  ;;  %v10387_v62 = vld [vmem:[%s13732_s3 + $0x68] sm:$0xff] }
 0x360   : > { %2150 = vst [vmem:[%s11256_s29 + $0x7c] sm:$0x1] %v2149_v5 }
 0x361   : > { %2146 = vst.msk [vmem:[%s11256_s29 + $0x74] sm:$0xf] %vm2099_vm1, %v8790_v6 }
 0x364   : > { %v9279_v54 = vpop.f32.mrf.mxu0 }
 0x365   : > { %v11352_v56 = vadd.f32 %v10372_v45, %v9279_v54 }
 0x366   : > { %v2353_v57 = vpop.f32.mrf.mxu0 }
 0x367   : > { %v2997_v2 = vsel %vm438_vm0, %v11352_v56, -inf  ;;  %v11369_v50 = vadd.f32 %v10375_v23, %v2353_v57  ;;  %v10388_v57 = vld [vmem:[%s13732_s3 + $0x90] sm:$0xff] }
 0x368   : > { %v9287_v18 = vpop.f32.mrf.mxu1  ;;  %2998 = vmax.xlane.f32.xlu0 %v2997_v2  ;;  %v9280_v1 = vpop.f32.mrf.mxu0 }
 0x369   : > { %v11359_v3 = vadd.f32 %v10373_v17, %v9287_v18  ;;  %v11364_v16 = vadd.f32 %v10374_v8, %v9280_v1  ;;  %v2991_v32 = vsel %vm438_vm0, %v11369_v50, -inf }
 0x36a   : > { %v2442_v52 = vpop.f32.mrf.mxu1  ;;  %v2356_v59 = vpop.f32.mrf.mxu0 }
 0x36b   : > { %v3009_v10 = vsel %vm438_vm0, %v11359_v3, -inf  ;;  %v3000_v31 = vsel %vm438_vm0, %v11364_v16, -inf  ;;  %v11383_v40 = vadd.f32 %v10377_v53, %v2356_v59  ;;  %v11388_v46 = vadd.f32 %v10378_v58, %v2442_v52  ;;  %v10389_v52 = vld [vmem:[%s13732_s3 + $0x98] sm:$0xff] }
 0x36c   : > { %v9288_v4 = vpop.f32.mrf.mxu1  ;;  %3010 = vmax.xlane.f32.xlu0 %v3009_v10  ;;  %3001 = vmax.xlane.f32.xlu1 %v3000_v31  ;;  %v10390_v31 = vld [vmem:[%s13732_s3 + $0xb0] sm:$0xff] }
 0x36d   : > { %v11378_v42 = vadd.f32 %v10376_v29, %v9288_v4  ;;  %v2994_v30 = vsel %vm438_vm0, %v11383_v40, -inf  ;;  %v3003_v47 = vsel %vm438_vm0, %v11388_v46, -inf }
 0x36e   : > { %v2445_v25 = vpop.f32.mrf.mxu1 }
 0x36f   : > { %v3012_v22 = vsel %vm438_vm0, %v11378_v42, -inf  ;;  %v11397_v13 = vadd.f32 %v10379_v9, %v2445_v25  ;;  %v10392_v25 = vld [vmem:[%s13732_s3 + $0x80] sm:$0xff] }
 0x370   : > { %3013 = vmax.xlane.f32.xlu1 %v3012_v22  ;;  %2992 = vmax.xlane.f32.xlu0 %v2991_v32  ;;  %v10391_v22 = vld [vmem:[%s13732_s3 + $0xb8] sm:$0xff] }
 0x371   : > { %v3006_v20 = vsel %vm438_vm0, %v11397_v13, -inf }
 0x374   : > { %2995 = vmax.xlane.f32.xlu1 %v2994_v30  ;;  %3004 = vmax.xlane.f32.xlu0 %v3003_v47  ;;  %v9295_v27 = vpop.f32.mrf.mxu0  ;;  %v10393_v30 = vld [vmem:[%s13732_s3 + $0x88] sm:$0xff] }
 0x375   : > { %v11406_v63 = vadd.f32 %v10380_v7, %v9295_v27 }
 0x376   : > { %v2531_v48 = vpop.f32.mrf.mxu0 }
 0x377   : > { %v3021_v41 = vsel %vm438_vm0, %v11406_v63, -inf  ;;  %v11432_v49 = vadd.f32 %v10384_v44, %v2531_v48 }
 0x378   : > { %v9303_v35 = vpop.f32.mrf.mxu1  ;;  %3007 = vmax.xlane.f32.xlu0 %v3006_v20  ;;  %v9296_v37 = vpop.f32.mrf.mxu0  ;;  %v10394_v20 = vld [vmem:[%s13732_s3 + $0xa0] sm:$0xff] }
 0x379   : > { %v11413_v51 = vadd.f32 %v10381_v15, %v9296_v37  ;;  %v11418_v21 = vadd.f32 %v10382_v38, %v9303_v35  ;;  %v3015_v6 = vsel %vm438_vm0, %v11432_v49, -inf  ;;  %v10395_v37 = vld [vmem:[%s13732_s3 + $0xa8] sm:$0xff] }
 0x37a   : > { %v2620_v28 = vpop.f32.mrf.mxu1  ;;  %v2534_v55 = vpop.f32.mrf.mxu0 }
 0x37b   : > { %v3024_v26 = vsel %vm438_vm0, %v11413_v51, -inf  ;;  %v11437_v12 = vadd.f32 %v10385_v34, %v2534_v55  ;;  %v3033_v14 = vsel %vm438_vm0, %v11418_v21, -inf  ;;  %v11446_v43 = vadd.f32 %v10386_v39, %v2620_v28  ;;  %v10397_v34 = vld [vmem:[%s13732_s3 + $0xf0] sm:$0xff] }
 0x37c   : > { %v9304_v24 = vpop.f32.mrf.mxu1  ;;  %3022 = vmax.xlane.f32.xlu0 %v3021_v41  ;;  %3025 = vmax.xlane.f32.xlu1 %v3024_v26  ;;  %v10396_v26 = vld [vmem:[%s13732_s3 + $0xd0] sm:$0xff] }
 0x37d   : > { %v11427_v11 = vadd.f32 %v10383_v36, %v9304_v24  ;;  %v3018_v5 = vsel %vm438_vm0, %v11437_v12, -inf  ;;  %v3027_v1 = vsel %vm438_vm0, %v11446_v43, -inf }
 0x37e   : > { %v2623_v60 = vpop.f32.mrf.mxu1 }
 0x37f   : > { %v3036_v19 = vsel %vm438_vm0, %v11427_v11, -inf  ;;  %v11451_v0 = vadd.f32 %v10387_v62, %v2623_v60  ;;  %v10398_v62 = vld [vmem:[%s13732_s3 + $0xc0] sm:$0xff] }
 0x380   : > { %3034 = vmax.xlane.f32.xlu0 %v3033_v14  ;;  %3037 = vmax.xlane.f32.xlu1 %v3036_v19 }
 0x381   : > { %v3030_v18 = vsel %vm438_vm0, %v11451_v0, -inf }
 0x384   : > { %3019 = vmax.xlane.f32.xlu1 %v3018_v5  ;;  %3016 = vmax.xlane.f32.xlu0 %v3015_v6  ;;  %v9311_v54 = vpop.f32.mrf.mxu0 }
 0x385   : > { %v11460_v2 = vadd.f32 %v10388_v57, %v9311_v54  ;;  %v10399_v54 = vld [vmem:[%s13732_s3 + $0xe0] sm:$0xff] }
 0x386   : > { %v2709_v45 = vpop.f32.mrf.mxu0 }
 0x387   : > { %v3045_v4 = vsel %vm438_vm0, %v11460_v2, -inf  ;;  %v11488_v9 = vadd.f32 %v10392_v25, %v2709_v45 }
 0x388   : > { %v9319_v17 = vpop.f32.mrf.mxu1  ;;  %3031 = vmax.xlane.f32.xlu1 %v3030_v18  ;;  %3028 = vmax.xlane.f32.xlu0 %v3027_v1  ;;  %v9312_v8 = vpop.f32.mrf.mxu0  ;;  %v9794_v1 = vld [vmem:[%s10941_s25 + $0x70] sm:$0xff]  }
 0x389   : > { %v11469_v23 = vadd.f32 %v10389_v52, %v9312_v8  ;;  %v11474_v59 = vadd.f32 %v10390_v31, %v9319_v17  ;;  %v3039_v38 = vsel %vm438_vm0, %v11488_v9, -inf  ;;  %v9795_v17 = vld [vmem:[%s10941_s25 + $0x60] sm:$0xff]   ;;  %v10400_v52 = vld [vmem:[%s13732_s3 + $0xd8] sm:$0xff] }
 0x38a   : > { %v2798_v10 = vpop.f32.mrf.mxu1  ;;  %v2712_v53 = vpop.f32.mrf.mxu0 }
 0x38b   : > { %v3048_v29 = vsel %vm438_vm0, %v11469_v23, -inf  ;;  %v11493_v47 = vadd.f32 %v10393_v30, %v2712_v53  ;;  %v3057_v27 = vsel %vm438_vm0, %v11474_v59, -inf  ;;  %v11502_v35 = vadd.f32 %v10394_v20, %v2798_v10 }
 0x38c   : > { %v9320_v58 = vpop.f32.mrf.mxu1  ;;  %3046 = vmax.xlane.f32.xlu0 %v3045_v4  ;;  %3049 = vmax.xlane.f32.xlu1 %v3048_v29  ;;  %v10401_v4 = vld [vmem:[%s13732_s3 + $0xf8] sm:$0xff] }
 0x38d   : > { %v11483_v32 = vadd.f32 %v10391_v22, %v9320_v58  ;;  %v3042_v28 = vsel %vm438_vm0, %v11493_v47, -inf  ;;  %v3051_v36 = vsel %vm438_vm0, %v11502_v35, -inf  ;;  %v10402_v22 = vld [vmem:[%s13732_s3 + $0xc8] sm:$0xff] }
 0x38e   : > { %v2801_v7 = vpop.f32.mrf.mxu1 }
 0x38f   : > { %v3060_v48 = vsel %vm438_vm0, %v11483_v32, -inf  ;;  %v11507_v15 = vadd.f32 %v10395_v37, %v2801_v7 }
 0x390   : > { %3058 = vmax.xlane.f32.xlu0 %v3057_v27  ;;  %3061 = vmax.xlane.f32.xlu1 %v3060_v48  ;;  %v10403_v48 = vld [vmem:[%s13732_s3 + $0xe8] sm:$0xff] }
 0x391   : > { %v3054_v24 = vsel %vm438_vm0, %v11507_v15, -inf }
 0x394   : > { %3043 = vmax.xlane.f32.xlu1 %v3042_v28  ;;  %3040 = vmax.xlane.f32.xlu0 %v3039_v38  ;;  %v9327_v41 = vpop.f32.mrf.mxu0  ;;  %v11577_v28 = vpop.permute.xlu0 %3511 }
 0x395   : > { %v11516_v55 = vadd.f32 %v10396_v26, %v9327_v41  ;;  %v11579_v38 = vpop.permute.xlu1 %3582 }
 0x396   : > { %v2887_v60 = vpop.f32.mrf.mxu0 }
 0x397   : > { %v3069_v19 = vsel %vm438_vm0, %v11516_v55, -inf  ;;  %v11534_v5 = vadd.f32 %v10398_v62, %v2887_v60 }
 0x398   : > { %3055 = vmax.xlane.f32.xlu1 %v3054_v24  ;;  %3052 = vmax.xlane.f32.xlu0 %v3051_v36  ;;  %v9335_v44 = vpop.f32.mrf.mxu1  ;;  %v9328_v8 = vpop.f32.mrf.mxu0 }
 0x399   : > { %v11525_v14 = vadd.f32 %v10397_v34, %v9335_v44  ;;  %v3063_v57 = vsel %vm438_vm0, %v11534_v5, -inf  ;;  %v11552_v10 = vadd.f32 %v10400_v52, %v9328_v8  ;;  %v11581_v41 = vpop.permute.xlu0 %3655  ;;  %v11583_v26 = vpop.permute.xlu1 %3726 }
 0x39a   : > { %v2976_v6 = vpop.f32.mrf.mxu1  ;;  %v2890_v58 = vpop.f32.mrf.mxu0 }
 0x39b   : > { %v3081_v39 = vsel %vm438_vm0, %v11525_v14, -inf  ;;  %v11539_v45 = vadd.f32 %v10399_v54, %v2976_v6  ;;  %v3072_v53 = vsel %vm438_vm0, %v11552_v10, -inf  ;;  %v11564_v25 = vadd.f32 %v10402_v22, %v2890_v58 }
 0x39c   : > { %3070 = vmax.xlane.f32.xlu0 %v3069_v19  ;;  %v9336_v31 = vpop.f32.mrf.mxu1 }
 0x39d   : > { %v3075_v18 = vsel %vm438_vm0, %v11539_v45, -inf  ;;  %v11557_v29 = vadd.f32 %v10401_v4, %v9336_v31  ;;  %v3066_v20 = vsel %vm438_vm0, %v11564_v25, -inf  ;;  %v11585_v24 = vpop.permute.xlu0 %3653  ;;  %v11587_v36 = vpop.permute.xlu1 %3724 }
 0x39e   : > { %v2979_v27 = vpop.f32.mrf.mxu1 }
 0x39f   : > { %v3084_v30 = vsel %vm438_vm0, %v11557_v29, -inf  ;;  %v11571_v7 = vadd.f32 %v10403_v48, %v2979_v27 }
 0x3a0   : > { %3082 = vmax.xlane.f32.xlu0 %v3081_v39 }
 0x3a1   : > { %v3078_v37 = vsel %vm438_vm0, %v11571_v7, -inf  ;;  %v11589_v44 = vpop.permute.xlu0 %3797  ;;  %v11591_v34 = vpop.permute.xlu1 %3868 }
 0x3a4   : > { %3064 = vmax.xlane.f32.xlu0 %v3063_v57 }
 0x3a8   : > { %3076 = vmax.xlane.f32.xlu0 %v3075_v18 }
 0x3a9   : > { %3866 = vrot.lane.b32.xlu1 %v9794_v1, %s10476_s26 }
 0x3be   : > { %3795 = vrot.lane.b32.xlu0 %v9795_v17, %s10476_s26 }
 0x3cd   : > { %3073 = vmax.xlane.f32.xlu1 %v3072_v53 }
 0x3d1   : > { %3085 = vmax.xlane.f32.xlu1 %v3084_v30 }
 0x3d5   : > { %3067 = vmax.xlane.f32.xlu1 %v3066_v20 }
 0x3d9   : > { %3079 = vmax.xlane.f32.xlu1 %v3078_v37 }
 0x3f1   : > { %v2999_v19 = vpop.xlane.xlu0 %2998 }
 0x3f2   : > { %v3089_v60 = vsub.f32 %v11352_v56, %v2999_v19 }
 0x3f4   : > { %v3123_v39 = vmul.f32 1.442695, %v3089_v60 }
 0x3f5   : > { %v3002_v62 = vpop.xlane.xlu1 %3001  ;;  %v3011_v6 = vpop.xlane.xlu0 %3010 }
 0x3f6   : > { %9988 = vpow2.f32 %v3123_v39  ;;  %v3090_v54 = vsub.f32 %v11364_v16, %v3002_v62  ;;  %v3093_v57 = vsub.f32 %v11359_v3, %v3011_v6 }
 0x3f8   : > { %v3125_v18 = vmul.f32 1.442695, %v3090_v54  ;;  %v3131_v1 = vmul.f32 1.442695, %v3093_v57 }
 0x3f9   : > { %v3014_v17 = vpop.xlane.xlu1 %3013  ;;  %v2993_v8 = vpop.xlane.xlu0 %2992 }
 0x3fa   : > { %9990 = vpow2.f32 %v3125_v18  ;;  %v3094_v52 = vsub.f32 %v11378_v42, %v3014_v17  ;;  %v3087_v31 = vsub.f32 %v11369_v50, %v2993_v8 }
 0x3fb   : > { %9992 = vpow2.f32 %v3131_v1 }
 0x3fc   : > { %v3133_v4 = vmul.f32 1.442695, %v3094_v52  ;;  %v3119_v56 = vmul.f32 1.442695, %v3087_v31 }
 0x3fd   : > { %v2996_v53 = vpop.xlane.xlu1 %2995  ;;  %v3005_v58 = vpop.xlane.xlu0 %3004 }
 0x3fe   : > { %9994 = vpow2.f32 %v3133_v4  ;;  %v3088_v22 = vsub.f32 %v11383_v40, %v2996_v53  ;;  %v3091_v16 = vsub.f32 %v11388_v46, %v3005_v58 }
 0x3ff   : > { %9996 = vpow2.f32 %v3119_v56 }
 0x400   : > { %v3121_v3 = vmul.f32 1.442695, %v3088_v22  ;;  %v3127_v30 = vmul.f32 1.442695, %v3091_v16 }
 0x401   : > { %v3008_v27 = vpop.xlane.xlu0 %3007 }
 0x402   : > { %9998 = vpow2.f32 %v3121_v3  ;;  %v3092_v48 = vsub.f32 %v11397_v13, %v3008_v27 }
 0x403   : > { %v11601_v42 = vpop.eup %9988  ;;  %10000 = vpow2.f32 %v3127_v30 }
 0x404   : > { %v3129_v50 = vmul.f32 1.442695, %v3092_v48  ;;  %v3189_v20 = vsel %vm438_vm0, %v11601_v42, 0.0 }
 0x405   : > { %v3026_v37 = vpop.xlane.xlu1 %3025  ;;  %3190 = vadd.xlane.f32.xlu0 %v3189_v20  ;;  %v3023_v19 = vpop.xlane.xlu0 %3022 }
 0x406   : > { %10002 = vpow2.f32 %v3129_v50  ;;  %v3098_v40 = vsub.f32 %v11413_v51, %v3026_v37  ;;  %v3097_v46 = vsub.f32 %v11406_v63, %v3023_v19 }
 0x407   : > { %v11607_v60 = vpop.eup %9990 }
 0x408   : > { %v11609_v39 = vpop.eup %9992  ;;  %v3141_v13 = vmul.f32 1.442695, %v3098_v40  ;;  %v3139_v62 = vmul.f32 1.442695, %v3097_v46  ;;  %v3192_v6 = vsel %vm438_vm0, %v11607_v60, 0.0 }
 0x409   : > { %v3038_v54 = vpop.xlane.xlu1 %3037  ;;  %3193 = vadd.xlane.f32.xlu1 %v3192_v6  ;;  %v3201_v57 = vsel %vm438_vm0, %v11609_v39, 0.0  ;;  %v3035_v18 = vpop.xlane.xlu0 %3034 }
 0x40a   : > { %10004 = vpow2.f32 %v3141_v13  ;;  %v3102_v51 = vsub.f32 %v11427_v11, %v3038_v54  ;;  %3202 = vadd.xlane.f32.xlu0 %v3201_v57  ;;  %v3101_v63 = vsub.f32 %v11418_v21, %v3035_v18 }
 0x40b   : > { %v11617_v1 = vpop.eup %9994  ;;  %10006 = vpow2.f32 %v3139_v62 }
 0x40c   : > { %v11619_v17 = vpop.eup %9996  ;;  %v3149_v8 = vmul.f32 1.442695, %v3102_v51  ;;  %v3147_v52 = vmul.f32 1.442695, %v3101_v63  ;;  %v3204_v31 = vsel %vm438_vm0, %v11617_v1, 0.0 }
 0x40d   : > { %v3020_v4 = vpop.xlane.xlu1 %3019  ;;  %3205 = vadd.xlane.f32.xlu1 %v3204_v31  ;;  %v3183_v56 = vsel %vm438_vm0, %v11619_v17, 0.0  ;;  %v3017_v53 = vpop.xlane.xlu0 %3016 }
 0x40e   : > { %10008 = vpow2.f32 %v3149_v8  ;;  %v3096_v11 = vsub.f32 %v11437_v12, %v3020_v4  ;;  %3184 = vadd.xlane.f32.xlu0 %v3183_v56  ;;  %v3095_v21 = vsub.f32 %v11432_v49, %v3017_v53 }
 0x40f   : > { %v11627_v58 = vpop.eup %9998  ;;  %10010 = vpow2.f32 %v3147_v52 }
 0x410   : > { %v11629_v22 = vpop.eup %10000  ;;  %v3137_v16 = vmul.f32 1.442695, %v3096_v11  ;;  %v3135_v3 = vmul.f32 1.442695, %v3095_v21  ;;  %v3186_v30 = vsel %vm438_vm0, %v11627_v58, 0.0 }
 0x411   : > { %v3032_v27 = vpop.xlane.xlu1 %3031  ;;  %3187 = vadd.xlane.f32.xlu1 %v3186_v30  ;;  %v3195_v48 = vsel %vm438_vm0, %v11629_v22, 0.0  ;;  %v3029_v50 = vpop.xlane.xlu0 %3028 }
 0x412   : > { %10012 = vpow2.f32 %v3137_v16  ;;  %v3100_v12 = vsub.f32 %v11451_v0, %v3032_v27  ;;  %3196 = vadd.xlane.f32.xlu0 %v3195_v48  ;;  %v3099_v49 = vsub.f32 %v11446_v43, %v3029_v50 }
 0x413   : > { %v11637_v20 = vpop.eup %10002  ;;  %10014 = vpow2.f32 %v3135_v3 }
 0x414   : > { %v3145_v37 = vmul.f32 1.442695, %v3100_v12  ;;  %v3143_v19 = vmul.f32 1.442695, %v3099_v49  ;;  %v3198_v40 = vsel %vm438_vm0, %v11637_v20, 0.0 }
 0x415   : > { %v3050_v46 = vpop.xlane.xlu1 %3049  ;;  %3199 = vadd.xlane.f32.xlu1 %v3198_v40  ;;  %v3047_v13 = vpop.xlane.xlu0 %3046 }
 0x416   : > { %10016 = vpow2.f32 %v3145_v37  ;;  %v3106_v62 = vsub.f32 %v11469_v23, %v3050_v46  ;;  %v3105_v6 = vsub.f32 %v11460_v2, %v3047_v13 }
 0x417   : > { %v11643_v0 = vpop.eup %10004  ;;  %10018 = vpow2.f32 %v3143_v19 }
 0x418   : > { %v11645_v43 = vpop.eup %10006  ;;  %v3157_v54 = vmul.f32 1.442695, %v3106_v62  ;;  %v3155_v57 = vmul.f32 1.442695, %v3105_v6  ;;  %v3216_v18 = vsel %vm438_vm0, %v11643_v0, 0.0 }
 0x419   : > { %v3062_v51 = vpop.xlane.xlu1 %3061  ;;  %3217 = vadd.xlane.f32.xlu1 %v3216_v18  ;;  %v3213_v63 = vsel %vm438_vm0, %v11645_v43, 0.0  ;;  %v3059_v8 = vpop.xlane.xlu0 %3058 }
 0x41a   : > { %10020 = vpow2.f32 %v3157_v54  ;;  %v3110_v23 = vsub.f32 %v11483_v32, %v3062_v51  ;;  %3214 = vadd.xlane.f32.xlu0 %v3213_v63  ;;  %v3109_v2 = vsub.f32 %v11474_v59, %v3059_v8 }
 0x41b   : > { %v11653_v52 = vpop.eup %10008  ;;  %10022 = vpow2.f32 %v3155_v57 }
 0x41c   : > { %v11655_v31 = vpop.eup %10010  ;;  %v3165_v4 = vmul.f32 1.442695, %v3110_v23  ;;  %v3163_v56 = vmul.f32 1.442695, %v3109_v2  ;;  %v3228_v53 = vsel %vm438_vm0, %v11653_v52, 0.0 }
 0x41d   : > { %v3044_v11 = vpop.xlane.xlu1 %3043  ;;  %3229 = vadd.xlane.f32.xlu1 %v3228_v53  ;;  %v3225_v21 = vsel %vm438_vm0, %v11655_v31, 0.0  ;;  %v3041_v16 = vpop.xlane.xlu0 %3040 }
 0x41e   : > { %10024 = vpow2.f32 %v3165_v4  ;;  %v3104_v32 = vsub.f32 %v11493_v47, %v3044_v11  ;;  %3226 = vadd.xlane.f32.xlu0 %v3225_v21  ;;  %v3103_v59 = vsub.f32 %v11488_v9, %v3041_v16 }
 0x41f   : > { %v11663_v3 = vpop.eup %10012  ;;  %10026 = vpow2.f32 %v3163_v56 }
 0x420   : > { %v11665_v30 = vpop.eup %10014  ;;  %v3153_v27 = vmul.f32 1.442695, %v3104_v32  ;;  %v3151_v48 = vmul.f32 1.442695, %v3103_v59  ;;  %v3210_v50 = vsel %vm438_vm0, %v11663_v3, 0.0 }
 0x421   : > { %v3056_v12 = vpop.xlane.xlu1 %3055  ;;  %3211 = vadd.xlane.f32.xlu1 %v3210_v50  ;;  %v3207_v49 = vsel %vm438_vm0, %v11665_v30, 0.0  ;;  %v3053_v37 = vpop.xlane.xlu0 %3052 }
 0x422   : > { %10028 = vpow2.f32 %v3153_v27  ;;  %v3108_v47 = vsub.f32 %v11507_v15, %v3056_v12  ;;  %3208 = vadd.xlane.f32.xlu0 %v3207_v49  ;;  %v3107_v9 = vsub.f32 %v11502_v35, %v3053_v37 }
 0x423   : > { %v11673_v19 = vpop.eup %10016  ;;  %10030 = vpow2.f32 %v3151_v48 }
 0x424   : > { %v11675_v40 = vpop.eup %10018  ;;  %v3161_v46 = vmul.f32 1.442695, %v3108_v47  ;;  %v3159_v13 = vmul.f32 1.442695, %v3107_v9  ;;  %v3222_v62 = vsel %vm438_vm0, %v11673_v19, 0.0 }
 0x425   : > { %3223 = vadd.xlane.f32.xlu1 %v3222_v62  ;;  %v3219_v6 = vsel %vm438_vm0, %v11675_v40, 0.0  ;;  %v3071_v54 = vpop.xlane.xlu0 %3070 }
 0x426   : > { %10032 = vpow2.f32 %v3161_v46  ;;  %3220 = vadd.xlane.f32.xlu0 %v3219_v6  ;;  %v3113_v15 = vsub.f32 %v11516_v55, %v3071_v54 }
 0x427   : > { %v11682_v35 = vpop.eup %10020  ;;  %10034 = vpow2.f32 %v3159_v13 }
 0x428   : > { %v11684_v57 = vpop.eup %10022  ;;  %v3171_v18 = vmul.f32 1.442695, %v3113_v15  ;;  %v3240_v51 = vsel %vm438_vm0, %v11682_v35, 0.0 }
 0x429   : > { %3241 = vadd.xlane.f32.xlu1 %v3240_v51  ;;  %v3237_v63 = vsel %vm438_vm0, %v11684_v57, 0.0  ;;  %v3083_v8 = vpop.xlane.xlu0 %3082 }
 0x42a   : > { %10036 = vpow2.f32 %v3171_v18  ;;  %3238 = vadd.xlane.f32.xlu0 %v3237_v63  ;;  %v3117_v23 = vsub.f32 %v11525_v14, %v3083_v8  ;;  %v11733_v18 = vpop.permute.xlu1 %3866 }
 0x42b   : > { %v11691_v2 = vpop.eup %10024 }
 0x42c   : > { %v11693_v55 = vpop.eup %10026  ;;  %v3179_v4 = vmul.f32 1.442695, %v3117_v23  ;;  %v3252_v56 = vsel %vm438_vm0, %v11691_v2, 0.0 }
 0x42d   : > { %3253 = vadd.xlane.f32.xlu1 %v3252_v56  ;;  %v3249_v53 = vsel %vm438_vm0, %v11693_v55, 0.0  ;;  %v3065_v11 = vpop.xlane.xlu0 %3064 }
 0x42e   : > { %10038 = vpow2.f32 %v3179_v4  ;;  %3250 = vadd.xlane.f32.xlu0 %v3249_v53  ;;  %v3111_v21 = vsub.f32 %v11534_v5, %v3065_v11 }
 0x42f   : > { %v11700_v16 = vpop.eup %10028 }
 0x430   : > { %v11702_v14 = vpop.eup %10030  ;;  %v3167_v32 = vmul.f32 1.442695, %v3111_v21  ;;  %v3234_v59 = vsel %vm438_vm0, %v11700_v16, 0.0 }
 0x431   : > { %3235 = vadd.xlane.f32.xlu1 %v3234_v59  ;;  %v3231_v27 = vsel %vm438_vm0, %v11702_v14, 0.0  ;;  %v3077_v48 = vpop.xlane.xlu0 %3076 }
 0x432   : > { %10040 = vpow2.f32 %v3167_v32  ;;  %3232 = vadd.xlane.f32.xlu0 %v3231_v27  ;;  %v3115_v50 = vsub.f32 %v11539_v45, %v3077_v48  ;;  %v9796_v48 = vld [vmem:[%s10518_s21 + $0x18] sm:$0xff]  }
 0x433   : > { %v11709_v12 = vpop.eup %10032 }
 0x434   : > { %v11711_v5 = vpop.eup %10034  ;;  %v3175_v49 = vmul.f32 1.442695, %v3115_v50  ;;  %v3246_v37 = vsel %vm438_vm0, %v11709_v12, 0.0  ;;  %v9797_v50 = vld [vmem:[%s10518_s21 + $0x8] sm:$0xff]  }
 0x435   : > { %3247 = vadd.xlane.f32.xlu1 %v3246_v37  ;;  %v3243_v47 = vsel %vm438_vm0, %v11711_v5, 0.0  ;;  %v4171_v37 = vld [vmem:[%s10526_s24 + $0x4] sm:$0xf] }
 0x436   : > { %10042 = vpow2.f32 %v3175_v49  ;;  %3244 = vadd.xlane.f32.xlu0 %v3243_v47  ;;  %v4170_v49 = vld [vmem:[%s10526_s24] sm:$0xf] }
 0x437   : > { %v11717_v9 = vpop.eup %10036 }
 0x438   : > { %v3261_v46 = vsel %vm438_vm0, %v11717_v9, 0.0 }
 0x43a   : > { %3262 = vadd.xlane.f32.xlu0 %v3261_v46  ;;  %v11755_v46 = vpop.permute.xlu0 %3795 }
 0x43b   : > { %v11721_v45 = vpop.eup %10038 }
 0x43c   : > { %v3273_v13 = vsel %vm438_vm0, %v11721_v45, 0.0 }
 0x43e   : > { %3274 = vadd.xlane.f32.xlu0 %v3273_v13  ;;  %v9798_v13 = vld [vmem:[%s10518_s21] sm:$0xff]  }
 0x43f   : > { %v11725_v62 = vpop.eup %10040 }
 0x440   : > { %v3255_v6 = vsel %vm438_vm0, %v11725_v62, 0.0 }
 0x441   : > { %3256 = vadd.xlane.f32.xlu1 %v3255_v6  ;;  %v4202_v6 = vmul.bf16 1043676725, %v4170_v49 }
 0x443   : > { %v11729_v54 = vpop.eup %10042 }
 0x444   : > { %v3267_v15 = vsel %vm438_vm0, %v11729_v54, 0.0 }
 0x445   : > { %3268 = vadd.xlane.f32.xlu0 %v3267_v15  ;;  %v4203_v15 = vmul.bf16 1043676725, %v4171_v37  ;;  %v9801_v37 = vld [vmem:[%s10518_s21 + $0x20] sm:$0xff]  }
 0x456   : > { %v3074_v51 = vpop.xlane.xlu1 %3073 }
 0x457   : > { %v3114_v63 = vsub.f32 %v11552_v10, %v3074_v51 }
 0x459   : > { %v3173_v8 = vmul.f32 1.442695, %v3114_v63  ;;  %v8531_v63 = vcombine.low %v4202_v6, %v4203_v15 }
 0x45a   : > { %v3086_v23 = vpop.xlane.xlu1 %3085 }
 0x45b   : > { %10044 = vpow2.f32 %v3173_v8  ;;  %v3118_v4 = vsub.f32 %v11557_v29, %v3086_v23  ;;  %v4172_v8 = vld [vmem:[%s10526_s24 + $0x8] sm:$0xf]  ;;  %v4173_v23 = vld [vmem:[%s10526_s24 + $0xc] sm:$0xf] }
 0x45d   : > { %v3181_v56 = vmul.f32 1.442695, %v3118_v4 }
 0x45e   : > { %v3068_v53 = vpop.xlane.xlu1 %3067 }
 0x45f   : > { %10046 = vpow2.f32 %v3181_v56  ;;  %v3112_v11 = vsub.f32 %v11564_v25, %v3068_v53  ;;  %v9799_v53 = vld [vmem:[%s10518_s21 + $0x28] sm:$0xff]  }
 0x461   : > { %v3169_v21 = vmul.f32 1.442695, %v3112_v11  ;;  %v4204_v11 = vmul.bf16 1043676725, %v4172_v8  ;;  %v4181_v8 = vld [vmem:[%s10526_s24 + $0x2c] sm:$0xf] }
 0x462   : > { %v3080_v47 = vpop.xlane.xlu1 %3079 }
 0x463   : > { %10048 = vpow2.f32 %v3169_v21  ;;  %v3116_v51 = vsub.f32 %v11571_v7, %v3080_v47  ;;  %v4205_v21 = vmul.bf16 1043676725, %v4173_v23 }
 0x465   : > { %v3177_v4 = vmul.f32 1.442695, %v3116_v51  ;;  %v8532_v7 = vcombine.low %v4204_v11, %v4205_v21  ;;  %v4213_v11 = vmul.bf16 1043676725, %v4181_v8 }
 0x467   : > { %10050 = vpow2.f32 %v3177_v4 }
 0x468   : > { %v11738_v32 = vpop.eup %10044 }
 0x469   : > { %v3264_v10 = vsel %vm438_vm0, %v11738_v32, 0.0 }
 0x46a   : > { %3265 = vadd.xlane.f32.xlu1 %v3264_v10 }
 0x46c   : > { %v11742_v59 = vpop.eup %10046 }
 0x46d   : > { %v3276_v29 = vsel %vm438_vm0, %v11742_v59, 0.0 }
 0x46e   : > { %3277 = vadd.xlane.f32.xlu1 %v3276_v29 }
 0x470   : > { %v11746_v27 = vpop.eup %10048 }
 0x471   : > { %v3258_v25 = vsel %vm438_vm0, %v11746_v27, 0.0 }
 0x472   : > { %3259 = vadd.xlane.f32.xlu0 %v3258_v25  ;;  %v4178_v25 = vld [vmem:[%s10526_s24 + $0x20] sm:$0xf] }
 0x473   : > { %v4210_v47 = vmul.bf16 1043676725, %v4178_v25 }
 0x474   : > { %v11773_v4 = vpop.eup %10050 }
 0x47f   : > { %4413 = vrot.lane.b32.xlu1 %v9796_v48, %s10477_s7  ;;  %v4179_v48 = vld [vmem:[%s10526_s24 + $0x24] sm:$0xf] }
 0x488   : > { %4324 = vrot.lane.b32.xlu0 %v9797_v50, %s10477_s7 }
 0x48c   : > { %4322 = vrot.lane.b32.xlu0 %v9798_v13, %s10477_s7  ;;  %v4211_v13 = vmul.bf16 1043676725, %v4179_v48  ;;  %v4186_v48 = vld [vmem:[%s10526_s24 + $0x40] sm:$0xf] }
 0x48e   : > { %v3191_v56 = vpop.xlane.xlu0 %3190  ;;  %v8543_v51 = vcombine.low %v4210_v47, %v4211_v13 }
 0x490   : > { %4308 = vrot.lane.b32.xlu0 %v8531_v63, %s10477_s7  ;;  %v4180_v63 = vld [vmem:[%s10526_s24 + $0x28] sm:$0xf] }
 0x492   : > { %v3194_v10 = vpop.xlane.xlu1 %3193 }
 0x493   : > { %v3203_v29 = vpop.xlane.xlu0 %3202  ;;  %10052 = vrcp.f32 %v3194_v10  ;;  %v3270_v10 = vsel %vm438_vm0, %v11773_v4, 0.0 }
 0x494   : > { %4502 = vrot.lane.b32.xlu0 %v9799_v53, %s10477_s7  ;;  %v4212_v53 = vmul.bf16 1043676725, %v4180_v63  ;;  %v4218_v63 = vmul.bf16 1043676725, %v4186_v48 }
 0x496   : > { %v3206_v50 = vpop.xlane.xlu1 %3205 }
 0x497   : > { %v3185_v49 = vpop.xlane.xlu0 %3184 }
 0x498   : > { %4310 = vrot.lane.b32.xlu0 %v8532_v7, %s10477_s7  ;;  %10054 = vrcp.f32 %v3185_v49 }
 0x499   : > { %10056 = vrcp.f32 %v3191_v56  ;;  %v9803_v56 = vld [vmem:[%s10518_s21 + $0x48] sm:$0xff]  }
 0x49a   : > { %v3188_v6 = vpop.xlane.xlu1 %3187 }
 0x49b   : > { %10058 = vrcp.f32 %v3188_v6  ;;  %v3197_v15 = vpop.xlane.xlu0 %3196 }
 0x49c   : > { %10060 = vrcp.f32 %v3206_v50  ;;  %4500 = vrot.lane.b32.xlu0 %v9801_v37, %s10477_s7  ;;  %v4187_v50 = vld [vmem:[%s10526_s24 + $0x44] sm:$0xf] }
 0x49d   : > { %10062 = vrcp.f32 %v3197_v15  ;;  %v4219_v8 = vmul.bf16 1043676725, %v4187_v50 }
 0x49e   : > { %10064 = vrcp.f32 %v3203_v29  ;;  %v3200_v23 = vpop.xlane.xlu1 %3199  ;;  %v8544_v29 = vcombine.low %v4212_v53, %v4213_v11 }
 0x49f   : > { %10066 = vrcp.f32 %v3200_v23 }
 0x4a0   : > { %4486 = vrot.lane.b32.xlu0 %v8543_v51, %s10477_s7  ;;  %v10053_v25 = vpop.eup %10052  ;;  %v9805_v51 = vld [vmem:[%s10518_s21 + $0x40] sm:$0xff]  }
 0x4a1   : > { %v3314_v15 = vmul.f32 %v10053_v25, %v11607_v60 }
 0x4a2   : > { %v3218_v21 = vpop.xlane.xlu1 %3217 }
 0x4a3   : > { %v3215_v7 = vpop.xlane.xlu0 %3214  ;;  %3271 = vadd.xlane.f32.xlu1 %v3270_v10  ;;  %10068 = vrcp.f32 %v3218_v21 }
 0x4a4   : > { %4680 = vrot.lane.b32.xlu0 %v9803_v56, %s10477_s7  ;;  %10070 = vrcp.f32 %v3215_v7 }
 0x4a5   : > { %v10055_v49 = vpop.eup %10054 }
 0x4a6   : > { %v3230_v37 = vpop.xlane.xlu1 %3229  ;;  %v10057_v47 = vpop.eup %10056  ;;  %v3311_v56 = vmul.f32 %v10055_v49, %v11619_v17  ;;  %v4174_v49 = vld [vmem:[%s10526_s24 + $0x10] sm:$0xf] }
 0x4a7   : > { %v3227_v13 = vpop.xlane.xlu0 %3226  ;;  %10072 = vrcp.f32 %v3230_v37  ;;  %v3313_v21 = vmul.f32 %v10057_v47, %v11601_v42  ;;  %v4175_v37 = vld [vmem:[%s10526_s24 + $0x14] sm:$0xf] }
 0x4a8   : > { %v10059_v6 = vpop.eup %10058  ;;  %4488 = vrot.lane.b32.xlu0 %v8544_v29, %s10477_s7 }
 0x4a9   : > { %v10061_v23 = vpop.eup %10060  ;;  %v3312_v53 = vmul.f32 %v10059_v6, %v11627_v58  ;;  %v3344_v48 = vpack.c.bf16 %v3314_v15, %v3313_v21  ;;  %v8555_v58 = vcombine.low %v4218_v63, %v4219_v8  ;;  %v4189_v15 = vld [vmem:[%s10526_s24 + $0x4c] sm:$0xf]  ;;  %v4207_v63 = vmul.bf16 1043676725, %v4175_v37  ;;  %v9800_v8 = vld [vmem:[%s10518_s21 + $0x10] sm:$0xff]  }
 0x4aa   : > { %v10063_v11 = vpop.eup %10062  ;;  %v3212_v10 = vpop.xlane.xlu1 %3211  ;;  %v3318_v17 = vmul.f32 %v10061_v23, %v11617_v1  ;;  %v4188_v1 = vld [vmem:[%s10526_s24 + $0x48] sm:$0xf] }
 0x4ab   : > { %v10065_v7 = vpop.eup %10064  ;;  %10074 = vrcp.f32 %v3212_v10  ;;  %v3209_v60 = vpop.xlane.xlu0 %3208  ;;  %v3343_v25 = vpack.c.bf16 %v3312_v53, %v3311_v56  ;;  %v3315_v42 = vmul.f32 %v10063_v11, %v11629_v22  ;;  %v4220_v23 = vmul.bf16 1043676725, %v4188_v1  ;;  %v4176_v10 = vld [vmem:[%s10526_s24 + $0x18] sm:$0xf]  ;;  %v9810_v1 = vld [vmem:[%s10518_s21 + $0x60] sm:$0xff]  }
 0x4ac   : > { %v10067_v29 = vpop.eup %10066  ;;  %10076 = vrcp.f32 %v3209_v60  ;;  %4678 = vrot.lane.b32.xlu0 %v9805_v51, %s10477_s7  ;;  %v3317_v6 = vmul.f32 %v10065_v7, %v11609_v39  ;;  %v9807_v39 = vld [vmem:[%s10518_s21 + $0x68] sm:$0xff]   ;;  %v4221_v56 = vmul.bf16 1043676725, %v4189_v15  ;;  %v4177_v60 = vld [vmem:[%s10526_s24 + $0x1c] sm:$0xf] }
 0x4ad   : > { %10078 = vrcp.f32 %v3227_v13  ;;  %9341 = vmatprep.mubr.msk.bf16.mxu0 %vm438_vm0, %v3343_v25  ;;  %v3316_v50 = vmul.f32 %v10067_v29, %v11637_v20  ;;  %v4206_v20 = vmul.bf16 1043676725, %v4174_v49  ;;  %v4209_v37 = vmul.bf16 1043676725, %v4177_v60 }
 0x4ae   : > { %v3224_v47 = vpop.xlane.xlu1 %3223  ;;  %9342 = vmatmul.mubr.msk.bf16.vlgmr.msra.gmra.mxu0 %vm438_vm0, %v3344_v48  ;;  %v3346_v22 = vpack.c.bf16 %v3318_v17, %v3317_v6  ;;  %v8556_v25 = vcombine.low %v4220_v23, %v4221_v56  ;;  %v4208_v48 = vmul.bf16 1043676725, %v4176_v10  ;;  %v4194_v17 = vld [vmem:[%s10526_s24 + $0x60] sm:$0xf]  ;;  %v9802_v6 = vld [vmem:[%s10518_s21 + $0x38] sm:$0xff]  }
 0x4af   : > { %10080 = vrcp.f32 %v3224_v47  ;;  %9354 = vmatpush3.bf16.msra.mxu0 %v11323_v61  ;;  %v3221_v13 = vpop.xlane.xlu0 %3220  ;;  %v3345_v51 = vpack.c.bf16 %v3316_v50, %v3315_v42  ;;  %v8537_v7 = vcombine.low %v4206_v20, %v4207_v63  ;;  %v4196_v20 = vld [vmem:[%s10526_s24 + $0x68] sm:$0xf]  ;;  %v4197_v63 = vld [vmem:[%s10526_s24 + $0x6c] sm:$0xf] }
 0x4b0   : > { %10082 = vrcp.f32 %v3221_v13  ;;  %9355 = vmatprep.subr.bf16.mxu0 %v11577_v28  ;;  %4664 = vrot.lane.b32.xlu0 %v8555_v58, %s10477_s7  ;;  %v10069_v11 = vpop.eup %10068  ;;  %v4195_v58 = vld [vmem:[%s10526_s24 + $0x64] sm:$0xf]  ;;  %v8538_v23 = vcombine.low %v4208_v48, %v4209_v37  ;;  %v4229_v60 = vmul.bf16 1043676725, %v4197_v63  ;;  %v4190_v63 = vld [vmem:[%s10526_s24 + $0x50] sm:$0xf] }
 0x4b1   : > { %9349 = vmatprep.mubr.msk.bf16.mxu1 %vm438_vm0, %v3345_v51  ;;  %v10071_v21 = vpop.eup %10070  ;;  %v3322_v49 = vmul.f32 %v10069_v11, %v11643_v0  ;;  %v4226_v51 = vmul.bf16 1043676725, %v4194_v17  ;;  %v4227_v0 = vmul.bf16 1043676725, %v4195_v58 }
 0x4b2   : > { %v3242_v53 = vpop.xlane.xlu1 %3241  ;;  %9350 = vmatmul.mubr.msk.bf16.vlgmr.msra.gmra.mxu1 %vm438_vm0, %v3346_v22  ;;  %v3321_v50 = vmul.f32 %v10071_v21, %v11645_v43 }
 0x4b3   : > { %9356 = vmatpush3.bf16.msra.mxu0 %v11577_v28  ;;  %9362 = vmatpush3.bf16.msra.mxu1 %v11326_v33  ;;  %v3239_v61 = vpop.xlane.xlu0 %3238  ;;  %10084 = vrcp.f32 %v3242_v53  ;;  %v8567_v21 = vcombine.low %v4226_v51, %v4227_v0 }
 0x4b4   : > { %9363 = vmatprep.subr.bf16.mxu1 %v11579_v38  ;;  %9369 = vmatprep.subr.bf16.mxu0 %v11581_v41  ;;  %v10073_v29 = vpop.eup %10072  ;;  %10086 = vrcp.f32 %v3239_v61 }
 0x4b5   : > { %4411 = vrot.lane.b32.xlu1 %v9800_v8, %s10477_s7  ;;  %4858 = vrot.lane.b32.xlu0 %v9807_v39, %s10477_s7  ;;  %v3348_v39 = vpack.c.bf16 %v3322_v49, %v3321_v50  ;;  %v4184_v50 = vld [vmem:[%s10526_s24 + $0x38] sm:$0xf]  ;;  %v4185_v49 = vld [vmem:[%s10526_s24 + $0x3c] sm:$0xf] }
 0x4b6   : > { %v3254_v28 = vpop.xlane.xlu1 %3253 }
 0x4b7   : > { %9364 = vmatpush3.bf16.msra.mxu1 %v11579_v38  ;;  %v3251_v33 = vpop.xlane.xlu0 %3250  ;;  %10088 = vrcp.f32 %v3254_v28 }
 0x4b8   : > { %v10075_v42 = vpop.eup %10074  ;;  %9377 = vmatprep.subr.bf16.mxu1 %v11583_v26 }
 0x4b9   : > { %v10077_v47 = vpop.eup %10076  ;;  %v3320_v38 = vmul.f32 %v10075_v42, %v11663_v3  ;;  %4397 = vrot.lane.b32.xlu1 %v8537_v7, %s10477_s7  ;;  %4666 = vrot.lane.b32.xlu0 %v8556_v25, %s10477_s7  ;;  %v4228_v7 = vmul.bf16 1043676725, %v4196_v20  ;;  %v4183_v25 = vld [vmem:[%s10526_s24 + $0x34] sm:$0xf] }
 0x4ba   : > { %v10079_v15 = vpop.eup %10078  ;;  %v3236_v13 = vpop.xlane.xlu1 %3235  ;;  %v3319_v43 = vmul.f32 %v10077_v47, %v11665_v30  ;;  %v3326_v30 = vmul.f32 %v10073_v29, %v11653_v52 }
 0x4bb   : > { %10090 = vrcp.f32 %v3236_v13  ;;  %v3233_v22 = vpop.xlane.xlu0 %3232  ;;  %v3325_v61 = vmul.f32 %v10079_v15, %v11655_v31  ;;  %v4182_v31 = vld [vmem:[%s10526_s24 + $0x30] sm:$0xf]  ;;  %v8568_v48 = vcombine.low %v4228_v7, %v4229_v60  ;;  %v9806_v15 = vld [vmem:[%s10518_s21 + $0x58] sm:$0xff]   ;;  %v4216_v13 = vmul.bf16 1043676725, %v4184_v50 }
 0x4bc   : > { %v10081_v8 = vpop.eup %10080  ;;  %10092 = vrcp.f32 %v3233_v22  ;;  %v3347_v3 = vpack.c.bf16 %v3320_v38, %v3319_v43  ;;  %v4214_v29 = vmul.bf16 1043676725, %v4182_v31  ;;  %v4217_v43 = vmul.bf16 1043676725, %v4185_v49  ;;  %v4200_v7 = vld [vmem:[%s10526_s24 + $0x78] sm:$0xf] }
 0x4bd   : > { %v10083_v56 = vpop.eup %10082  ;;  %10094 = vrcp.f32 %v3251_v33  ;;  %v3324_v53 = vmul.f32 %v10081_v8, %v11673_v19  ;;  %4591 = vrot.lane.b32.xlu1 %v9802_v6, %s10477_s7  ;;  %4856 = vrot.lane.b32.xlu0 %v9810_v1, %s10477_s7  ;;  %v3350_v28 = vpack.c.bf16 %v3326_v30, %v3325_v61  ;;  %v4215_v33 = vmul.bf16 1043676725, %v4183_v25  ;;  %v4191_v8 = vld [vmem:[%s10526_s24 + $0x54] sm:$0xf]  ;;  %v4201_v60 = vld [vmem:[%s10526_s24 + $0x7c] sm:$0xf] }
 0x4be   : > { %9357 = vmatprep.mubr.msk.bf16.mxu0 %vm438_vm0, %v3347_v3  ;;  %v3248_v11 = vpop.xlane.xlu1 %3247  ;;  %v3323_v10 = vmul.f32 %v10083_v56, %v11675_v40  ;;  %v9804_v40 = vld [vmem:[%s10518_s21 + $0x30] sm:$0xff]   ;;  %v8550_v20 = vcombine.low %v4216_v13, %v4217_v43  ;;  %v4223_v3 = vmul.bf16 1043676725, %v4191_v8  ;;  %v9809_v56 = vld [vmem:[%s10518_s21 + $0x78] sm:$0xff]   ;;  %v4233_v31 = vmul.bf16 1043676725, %v4201_v60 }
 0x4bf   : > { %10096 = vrcp.f32 %v3248_v11  ;;  %9358 = vmatmul.mubr.msk.bf16.vlgmr.msra.gmra.mxu0 %vm438_vm0, %v3348_v39  ;;  %v3245_v19 = vpop.xlane.xlu0 %3244  ;;  %v8549_v58 = vcombine.low %v4214_v29, %v4215_v33  ;;  %v4192_v39 = vld [vmem:[%s10526_s24 + $0x58] sm:$0xf]  ;;  %v4199_v30 = vld [vmem:[%s10526_s24 + $0x74] sm:$0xf] }
 0x4c0   : > { %9370 = vmatpush3.bf16.msra.mxu0 %v11581_v41  ;;  %10098 = vrcp.f32 %v3245_v19  ;;  %v3349_v52 = vpack.c.bf16 %v3324_v53, %v3323_v10  ;;  %v10085_v41 = vpop.eup %10084  ;;  %v4224_v53 = vmul.bf16 1043676725, %v4192_v39  ;;  %v9811_v11 = vld [vmem:[%s10518_s21 + $0x70] sm:$0xff]   ;;  %v4232_v19 = vmul.bf16 1043676725, %v4200_v7 }
 0x4c1   : > { %9371 = vmatprep.subr.bf16.mxu0 %v11585_v24  ;;  %4399 = vrot.lane.b32.xlu1 %v8538_v23, %s10477_s7  ;;  %v10087_v17 = vpop.eup %10086  ;;  %v3330_v38 = vmul.f32 %v10085_v41, %v11682_v35  ;;  %v4193_v23 = vld [vmem:[%s10526_s24 + $0x5c] sm:$0xf] }
 0x4c2   : > { %9365 = vmatprep.mubr.msk.bf16.mxu1 %vm438_vm0, %v3349_v52  ;;  %4842 = vrot.lane.b32.xlu0 %v8567_v21, %s10477_s7  ;;  %v3329_v47 = vmul.f32 %v10087_v17, %v11684_v57  ;;  %v4225_v61 = vmul.bf16 1043676725, %v4193_v23  ;;  %v4231_v21 = vmul.bf16 1043676725, %v4199_v30  ;;  %v8574_v25 = vcombine.low %v4232_v19, %v4233_v31 }
 0x4c3   : > { %9366 = vmatmul.mubr.msk.bf16.vlgmr.msra.gmra.mxu1 %vm438_vm0, %v3350_v28  ;;  %v3263_v52 = vpop.xlane.xlu0 %3262 }
 0x4c4   : > { %9372 = vmatpush3.bf16.msra.mxu0 %v11585_v24  ;;  %9378 = vmatpush3.bf16.msra.mxu1 %v11583_v26  ;;  %v10089_v42 = vpop.eup %10088  ;;  %v3352_v22 = vpack.c.bf16 %v3330_v38, %v3329_v47 }
 0x4c5   : > { %9379 = vmatprep.subr.bf16.mxu1 %v11587_v36  ;;  %9385 = vmatprep.subr.bf16.mxu0 %v11589_v44  ;;  %v3334_v35 = vmul.f32 %v10089_v42, %v11691_v2  ;;  %v9808_v2 = vld [vmem:[%s10518_s21 + $0x50] sm:$0xff]  }
 0x4c6   : > { %4589 = vrot.lane.b32.xlu1 %v9804_v40, %s10477_s7  ;;  %4844 = vrot.lane.b32.xlu0 %v8568_v48, %s10477_s7 }
 0x4c7   : > { %v11895_v40 = vpop.xlane.xlu0 %3274 }
 0x4c8   : > { %v10091_v37 = vpop.eup %10090  ;;  %9380 = vmatpush3.bf16.msra.mxu1 %v11587_v36 }
 0x4c9   : > { %v10093_v24 = vpop.eup %10092  ;;  %9393 = vmatprep.subr.bf16.mxu1 %v11591_v34  ;;  %v3328_v26 = vmul.f32 %v10091_v37, %v11700_v16 }
 0x4ca   : > { %v10095_v6 = vpop.eup %10094  ;;  %v3327_v1 = vmul.f32 %v10093_v24, %v11702_v14  ;;  %4575 = vrot.lane.b32.xlu1 %v8549_v58, %s10477_s7  ;;  %v3257_v28 = vpop.xlane.xlu1 %3256 }
 0x4cb   : > { %v3333_v57 = vmul.f32 %v10095_v6, %v11693_v55 }
 0x4cc   : > { %v10097_v36 = vpop.eup %10096  ;;  %v3351_v51 = vpack.c.bf16 %v3328_v26, %v3327_v1 }
 0x4cd   : > { %v10099_v0 = vpop.eup %10098  ;;  %v3332_v16 = vmul.f32 %v10097_v36, %v11709_v12  ;;  %v3354_v55 = vpack.c.bf16 %v3334_v35, %v3333_v57  ;;  %v9813_v57 = vld [vmem:[%s10941_s25 + $0x10] sm:$0xff]   ;;  %v9817_v35 = vld [vmem:[%s10941_s25] sm:$0xff]  }
 0x4ce   : > { %9373 = vmatprep.mubr.msk.bf16.mxu0 %vm438_vm0, %v3351_v51  ;;  %v3331_v14 = vmul.f32 %v10099_v0, %v11711_v5  ;;  %4769 = vrot.lane.b32.xlu1 %v9806_v15, %s10477_s7  ;;  %v4222_v5 = vmul.bf16 1043676725, %v4190_v63  ;;  %v11897_v33 = vpop.xlane.xlu0 %3268  ;;  %v9819_v63 = vld [vmem:[%s10941_s25 + $0x20] sm:$0xff]  }
 0x4cf   : > { %9374 = vmatmul.mubr.msk.bf16.vlgmr.msra.gmra.mxu0 %vm438_vm0, %v3352_v22  ;;  %v9815_v22 = vld [vmem:[%s10941_s25 + $0x8] sm:$0xff]  }
 0x4d0   : > { %9386 = vmatpush3.bf16.msra.mxu0 %v11589_v44  ;;  %v3353_v12 = vpack.c.bf16 %v3332_v16, %v3331_v14  ;;  %v8561_v44 = vcombine.low %v4222_v5, %v4223_v3  ;;  %5390 = vrot.lane.b32.xlu0 %v9815_v22, %s10477_s7  ;;  %v9818_v5 = vld [vmem:[%s10941_s25 + $0x30] sm:$0xff]   ;;  %v9823_v3 = vld [vmem:[%s10941_s25 + $0x40] sm:$0xff]  }
 0x4d1   : > { %9387 = vmatprep.subr.bf16.mxu0 %v11755_v46 }
 0x4d2   : > { %9381 = vmatprep.mubr.msk.bf16.mxu1 %vm438_vm0, %v3353_v12  ;;  %4577 = vrot.lane.b32.xlu1 %v8550_v20, %s10477_s7  ;;  %v9814_v20 = vld [vmem:[%s10941_s25 + $0x28] sm:$0xff]   ;;  %v9816_v12 = vld [vmem:[%s10941_s25 + $0x38] sm:$0xff]  }
 0x4d3   : > { %9382 = vmatmul.mubr.msk.bf16.vlgmr.msra.gmra.mxu1 %vm438_vm0, %v3354_v55 }
 0x4d4   : > { %9388 = vmatpush3.bf16.msra.mxu0 %v11755_v46  ;;  %9394 = vmatpush3.bf16.msra.mxu1 %v11591_v34  ;;  %v8562_v34 = vcombine.low %v4224_v53, %v4225_v61  ;;  %v4198_v46 = vld [vmem:[%s10526_s24 + $0x70] sm:$0xf]  ;;  %v9825_v53 = vld [vmem:[%s10941_s25 + $0x68] sm:$0xff]  }
 0x4d5   : > { %9395 = vmatprep.subr.bf16.mxu1 %v11733_v18  ;;  %v4230_v10 = vmul.bf16 1043676725, %v4198_v46  ;;  %5388 = vrot.lane.b32.xlu0 %v9817_v35, %s10477_s7 }
 0x4d6   : > { %4767 = vrot.lane.b32.xlu1 %v9808_v2, %s10477_s7  ;;  %v9821_v2 = vld [vmem:[%s10941_s25 + $0x48] sm:$0xff]  }
 0x4d8   : > { %9396 = vmatpush3.bf16.msra.mxu1 %v11733_v18  ;;  %v8573_v18 = vcombine.low %v4230_v10, %v4231_v21  ;;  %v9824_v10 = vld [vmem:[%s10941_s25 + $0x78] sm:$0xff]  }
 0x4d9   : > { %5530 = vrot.lane.b32.xlu0 %v9819_v63, %s10477_s7 }
 0x4da   : > { %4753 = vrot.lane.b32.xlu1 %v8561_v44, %s10477_s7 }
 0x4dd   : > { %5674 = vrot.lane.b32.xlu0 %v9821_v2, %s10477_s7 }
 0x4de   : > { %4947 = vrot.lane.b32.xlu1 %v9809_v56, %s10477_s7  ;;  %v9820_v56 = vld [vmem:[%s10941_s25 + $0x58] sm:$0xff]  }
 0x4e1   : > { %5672 = vrot.lane.b32.xlu0 %v9823_v3, %s10477_s7 }
 0x4e2   : > { %4755 = vrot.lane.b32.xlu1 %v8562_v34, %s10477_s7  ;;  %v9822_v34 = vld [vmem:[%s10941_s25 + $0x50] sm:$0xff]  }
 0x4e5   : > { %5816 = vrot.lane.b32.xlu0 %v9825_v53, %s10477_s7 }
 0x4e6   : > { %4945 = vrot.lane.b32.xlu1 %v9811_v11, %s10477_s7 }
 0x4ea   : > { %4931 = vrot.lane.b32.xlu1 %v8573_v18, %s10477_s7 }
 0x4ee   : > { %4933 = vrot.lane.b32.xlu1 %v8574_v25, %s10477_s7 }
 0x4f3   : > { %v3266_v29 = vpop.xlane.xlu1 %3265 }
 0x4f4   : > { %10100 = vrcp.f32 %v3266_v29 }
 0x4f5   : > { %10102 = vrcp.f32 %v3257_v28 }
 0x4f6   : > { %10104 = vrcp.f32 %v3263_v52 }
 0x4f7   : > { %v3278_v48 = vpop.xlane.xlu1 %3277 }
 0x4fb   : > { %v11899_v41 = vpop.permute.xlu1 %4413  ;;  %v3260_v17 = vpop.xlane.xlu0 %3259 }
 0x4fc   : > { %10106 = vrcp.f32 %v3260_v17  ;;  %9691 = vmatprep.subr.msk.bf16.mxu1 %vm438_vm0, %v11899_v41 }
 0x4fd   : > { %10108 = vrcp.f32 %v3278_v48 }
 0x4fe   : > { %10110 = vrcp.f32 %v11897_v33 }
 0x4ff   : > { %v4325_v58 = vpop.permute.xlu0 %4324  ;;  %10112 = vrcp.f32 %v11895_v40 }
 0x500   : > { %9689 = vmatprep.subr.msk.bf16.mxu0 %vm438_vm0, %v4325_v58  ;;  %v4336_v36 = vsel %vm438_vm0, %v4325_v58, 0 }
 0x501   : > { %v10101_v50 = vpop.eup %10100 }
 0x502   : > { %v10103_v49 = vpop.eup %10102  ;;  %v3338_v47 = vmul.f32 %v10101_v50, %v11738_v32 }
 0x503   : > { %v4323_v42 = vpop.permute.xlu0 %4322  ;;  %v10105_v24 = vpop.eup %10104  ;;  %v3335_v38 = vmul.f32 %v10103_v49, %v11725_v62 }
 0x504   : > { %v3337_v1 = vmul.f32 %v10105_v24, %v11717_v9  ;;  %v4333_v62 = vsel %vm438_vm0, %v4323_v42, 0 }
 0x506   : > { %v3356_v43 = vpack.c.bf16 %v3338_v47, %v3337_v1 }
 0x507   : > { %v4309_v37 = vpop.permute.xlu0 %4308 }
 0x509   : > { %v10107_v26 = vpop.eup %10106 }
 0x50a   : > { %v3336_v6 = vmul.f32 %v10107_v26, %v11746_v27  ;;  %v9812_v27 = vld [vmem:[%s10941_s25 + $0x18] sm:$0xff]   ;;  %v10109_v21 = vpop.eup %10108 }
 0x50b   : > { %v4503_v15 = vpop.permute.xlu0 %4502  ;;  %5461 = vrot.lane.b32.xlu1 %v9812_v27, %s10477_s7  ;;  %v10111_v7 = vpop.eup %10110  ;;  %v3342_v25 = vmul.f32 %v10109_v21, %v11742_v59  ;;  %v4425_v59 = vsel %vm438_vm0, %v11899_v41, 0 }
 0x50c   : > { %v3355_v13 = vpack.c.bf16 %v3336_v6, %v3335_v38  ;;  %v4514_v16 = vsel %vm438_vm0, %v4503_v15, 0  ;;  %v10113_v19 = vpop.eup %10112  ;;  %v3339_v52 = vmul.f32 %v10111_v7, %v11729_v54 }
 0x50d   : > { %v3341_v40 = vmul.f32 %v10113_v19, %v11721_v45 }
 0x50e   : > { %9389 = vmatprep.mubr.msk.bf16.mxu0 %vm438_vm0, %v3355_v13 }
 0x50f   : > { %9390 = vmatmul.mubr.msk.bf16.vlgmr.msra.gmra.mxu0 %vm438_vm0, %v3356_v43  ;;  %v4311_v51 = vpop.permute.xlu0 %4310  ;;  %5459 = vrot.lane.b32.xlu1 %v9813_v57, %s10477_s7  ;;  %v3358_v58 = vpack.c.bf16 %v3342_v25, %v3341_v40 }
 0x510   : > { %9402 = vmatpush3.bf16.xpose.msra.mxu0 %v4336_v36  ;;  %9405 = vmatprep.mubr.msk.bf16.mxu0 %vm438_vm0, %v4309_v37 }
 0x511   : > { %9690 = vmatprep.subr.msk.bf16.mxu0 %vm438_vm0, %v4323_v42 }
 0x513   : > { %v4501_v9 = vpop.permute.xlu0 %4500  ;;  %5532 = vrot.lane.b32.xlu1 %v9814_v20, %s10477_s7 }
 0x514   : > { %v4511_v8 = vsel %vm438_vm0, %v4501_v9, 0 }
 0x517   : > { %v4487_v32 = vpop.permute.xlu0 %4486  ;;  %5603 = vrot.lane.b32.xlu1 %v9816_v12, %s10477_s7 }
 0x518   : > { %9404 = vmatpush3.bf16.xpose.msra.mxu0 %v4333_v62 }
 0x519   : > { %9693 = vmatprep.subr.msk.bf16.mxu0 %vm438_vm0, %v4503_v15 }
 0x51b   : > { %v4681_v0 = vpop.permute.xlu0 %4680  ;;  %5601 = vrot.lane.b32.xlu1 %v9818_v5, %s10477_s7 }
 0x51c   : > { %v4692_v23 = vsel %vm438_vm0, %v4681_v0, 0 }
 0x51f   : > { %9406 = vmatmul.mubr.msk.bf16.vlgmr.msra.gmra.mxu0 %vm438_vm0, %v4311_v51  ;;  %v4489_v14 = vpop.permute.xlu0 %4488  ;;  %5745 = vrot.lane.b32.xlu1 %v9820_v56, %s10477_s7 }
 0x520   : > { %9418 = vmatpush3.bf16.xpose.msra.mxu0 %v4514_v16  ;;  %9421 = vmatprep.mubr.msk.bf16.mxu0 %vm438_vm0, %v4487_v32 }
 0x521   : > { %9694 = vmatprep.subr.msk.bf16.mxu0 %vm438_vm0, %v4501_v9 }
 0x523   : > { %v4679_v55 = vpop.permute.xlu0 %4678  ;;  %5743 = vrot.lane.b32.xlu1 %v9822_v34, %s10477_s7 }
 0x524   : > { %v4689_v11 = vsel %vm438_vm0, %v4679_v55, 0 }
 0x527   : > { %v4665_v39 = vpop.permute.xlu0 %4664  ;;  %5887 = vrot.lane.b32.xlu1 %v9824_v10, %s10477_s7  ;;  %v10404_v10 = vld [vmem:[%s13732_s3 + $0x10] sm:$0xff] }
 0x528   : > { %9420 = vmatpush3.bf16.xpose.msra.mxu0 %v4511_v8 }
 0x529   : > { %9697 = vmatprep.subr.msk.bf16.mxu0 %vm438_vm0, %v4681_v0 }
 0x52b   : > { %v4859_v46 = vpop.permute.xlu0 %4858 }
 0x52c   : > { %v3272_v44 = vpop.xlane.xlu1 %3271  ;;  %v4870_v17 = vsel %vm438_vm0, %v4859_v46, 0 }
 0x52d   : > { %10114 = vrcp.f32 %v3272_v44 }
 0x52f   : > { %9422 = vmatmul.mubr.msk.bf16.vlgmr.msra.gmra.mxu0 %vm438_vm0, %v4489_v14  ;;  %v4667_v18 = vpop.permute.xlu0 %4666 }
 0x530   : > { %v4412_v61 = vpop.permute.xlu1 %4411  ;;  %9434 = vmatpush3.bf16.xpose.msra.mxu0 %v4692_v23  ;;  %9437 = vmatprep.mubr.msk.bf16.mxu0 %vm438_vm0, %v4665_v39 }
 0x531   : > { %9698 = vmatprep.subr.msk.bf16.mxu0 %vm438_vm0, %v4679_v55  ;;  %v4422_v50 = vsel %vm438_vm0, %v4412_v61, 0 }
 0x533   : > { %v4857_v33 = vpop.permute.xlu0 %4856 }
 0x534   : > { %v4398_v30 = vpop.permute.xlu1 %4397  ;;  %v4867_v42 = vsel %vm438_vm0, %v4857_v33, 0 }
 0x537   : > { %v4843_v45 = vpop.permute.xlu0 %4842 }
 0x538   : > { %v4592_v60 = vpop.permute.xlu1 %4591  ;;  %9436 = vmatpush3.bf16.xpose.msra.mxu0 %v4689_v11 }
 0x539   : > { %9701 = vmatprep.subr.msk.bf16.mxu0 %vm438_vm0, %v4859_v46  ;;  %v4603_v24 = vsel %vm438_vm0, %v4592_v60, 0 }
 0x53a   : > { %v10115_v31 = vpop.eup %10114 }
 0x53b   : > { %v3340_v28 = vmul.f32 %v10115_v31, %v11773_v4  ;;  %v4845_v41 = vpop.permute.xlu0 %4844  ;;  %v10405_v31 = vld [vmem:[%s13732_s3 + $0x18] sm:$0xff] }
 0x53c   : > { %v4400_v29 = vpop.permute.xlu1 %4399 }
 0x53d   : > { %v3357_v48 = vpack.c.bf16 %v3340_v28, %v3339_v52 }
 0x53f   : > { %9397 = vmatprep.mubr.msk.bf16.mxu1 %vm438_vm0, %v3357_v48  ;;  %9438 = vmatmul.mubr.msk.bf16.vlgmr.msra.gmra.mxu0 %vm438_vm0, %v4667_v18 }
 0x540   : > { %9398 = vmatmul.mubr.msk.bf16.vlgmr.msra.gmra.mxu1 %vm438_vm0, %v3358_v58  ;;  %v4590_v54 = vpop.permute.xlu1 %4589  ;;  %9450 = vmatpush3.bf16.xpose.msra.mxu0 %v4870_v17 }
 0x541   : > { %9410 = vmatpush3.bf16.xpose.msra.mxu1 %v4425_v59  ;;  %9413 = vmatprep.mubr.msk.bf16.mxu1 %vm438_vm0, %v4398_v30  ;;  %v4600_v47 = vsel %vm438_vm0, %v4590_v54, 0 }
 0x542   : > { %9692 = vmatprep.subr.msk.bf16.mxu1 %vm438_vm0, %v4412_v61  ;;  %9702 = vmatprep.subr.msk.bf16.mxu0 %vm438_vm0, %v4857_v33  ;;  %v5391_v55 = vpop.permute.xlu0 %5390 }
 0x543   : > { %9453 = vmatprep.mubr.msk.bf16.mxu0 %vm438_vm0, %v4843_v45 }
 0x544   : > { %v4576_v4 = vpop.permute.xlu1 %4575 }
 0x547   : > { %v5389_v3 = vpop.permute.xlu0 %5388 }
 0x548   : > { %v4770_v49 = vpop.permute.xlu1 %4769  ;;  %9452 = vmatpush3.bf16.xpose.msra.mxu0 %v4867_v42 }
 0x549   : > { %9412 = vmatpush3.bf16.xpose.msra.mxu1 %v4422_v50  ;;  %v4781_v6 = vsel %vm438_vm0, %v4770_v49, 0  ;;  %9465 = vmatprep.subr.bf16.mxu0 %v5391_v55 }
 0x54a   : > { %9695 = vmatprep.subr.msk.bf16.mxu1 %vm438_vm0, %v4592_v60 }
 0x54c   : > { %v4578_v37 = vpop.permute.xlu1 %4577 }
 0x54f   : > { %9454 = vmatmul.mubr.msk.bf16.vlgmr.msra.gmra.mxu0 %vm438_vm0, %v4845_v41 }
 0x550   : > { %9414 = vmatmul.mubr.msk.bf16.vlgmr.msra.gmra.mxu1 %vm438_vm0, %v4400_v29  ;;  %v4768_v26 = vpop.permute.xlu1 %4767  ;;  %9466 = vmatpush3.bf16.msra.mxu0 %v5391_v55 }
 0x551   : > { %9426 = vmatpush3.bf16.xpose.msra.mxu1 %v4603_v24  ;;  %9429 = vmatprep.mubr.msk.bf16.mxu1 %vm438_vm0, %v4576_v4  ;;  %v4778_v13 = vsel %vm438_vm0, %v4768_v26, 0 }
 0x552   : > { %9696 = vmatprep.subr.msk.bf16.mxu1 %vm438_vm0, %v4590_v54  ;;  %9467 = vmatprep.subr.bf16.mxu0 %v5389_v3 }
 0x554   : > { %v4754_v38 = vpop.permute.xlu1 %4753  ;;  %9468 = vmatpush3.bf16.msra.mxu0 %v5389_v3 }
 0x558   : > { %v4948_v1 = vpop.permute.xlu1 %4947 }
 0x559   : > { %9428 = vmatpush3.bf16.xpose.msra.mxu1 %v4600_v47  ;;  %v4959_v36 = vsel %vm438_vm0, %v4948_v1, 0  ;;  %v10407_v47 = vld [vmem:[%s13732_s3] sm:$0xff] }
 0x55a   : > { %9699 = vmatprep.subr.msk.bf16.mxu1 %vm438_vm0, %v4770_v49 }
 0x55c   : > { %v4756_v15 = vpop.permute.xlu1 %4755 }
 0x560   : > { %9430 = vmatmul.mubr.msk.bf16.vlgmr.msra.gmra.mxu1 %vm438_vm0, %v4578_v37  ;;  %v4946_v43 = vpop.permute.xlu1 %4945  ;;  %v10406_v37 = vld [vmem:[%s13732_s3 + $0x30] sm:$0xff] }
 0x561   : > { %9442 = vmatpush3.bf16.xpose.msra.mxu1 %v4781_v6  ;;  %9445 = vmatprep.mubr.msk.bf16.mxu1 %vm438_vm0, %v4754_v38  ;;  %v4956_v9 = vsel %vm438_vm0, %v4946_v43, 0 }
 0x562   : > { %9700 = vmatprep.subr.msk.bf16.mxu1 %vm438_vm0, %v4768_v26 }
 0x564   : > { %v4932_v51 = vpop.permute.xlu1 %4931 }
 0x568   : > { %v4934_v62 = vpop.permute.xlu1 %4933 }
 0x569   : > { %9444 = vmatpush3.bf16.xpose.msra.mxu1 %v4778_v13  ;;  %v10408_v13 = vld [vmem:[%s13732_s3 + $0x38] sm:$0xff] }
 0x56a   : > { %9703 = vmatprep.subr.msk.bf16.mxu1 %vm438_vm0, %v4948_v1 }
 0x56e   : > { %v11993_v32 = vpop.f32.mrf.mxu0 }
 0x56f   : > { %13740 = vst [vmem:[#allocation2_spill] sm:$0xff] %v11993_v32 }
 0x570   : > { %9446 = vmatmul.mubr.msk.bf16.vlgmr.msra.gmra.mxu1 %vm438_vm0, %v4756_v15  ;;  %v11995_v27 = vpop.f32.mrf.mxu0 }
 0x571   : > { %9458 = vmatpush3.bf16.xpose.msra.mxu1 %v4959_v36  ;;  %9461 = vmatprep.mubr.msk.bf16.mxu1 %vm438_vm0, %v4932_v51  ;;  %13741 = vst [vmem:[#allocation3_spill] sm:$0xff] %v11995_v27  ;;  %v10409_v36 = vld [vmem:[%s13732_s3 + $0x8] sm:$0xff] }
 0x572   : > { %9704 = vmatprep.subr.msk.bf16.mxu1 %vm438_vm0, %v4946_v43  ;;  %v11997_v0 = vpop.f32.mrf.mxu0  ;;  %v12027_v53 = vpop.f32.mrf.mxu1 }
 0x573   : > { %13742 = vst [vmem:[#allocation4_spill] sm:$0xff] %v11997_v0  ;;  %13754 = vst [vmem:[#allocation16_spill] sm:$0xff] %v12027_v53 }
 0x574   : > { %v11999_v22 = vpop.f32.mrf.mxu0  ;;  %v12031_v34 = vpop.f32.mrf.mxu1 }
 0x575   : > { %13743 = vst [vmem:[#allocation5_spill] sm:$0xff] %v11999_v22  ;;  %13756 = vst [vmem:[#allocation18_spill] sm:$0xff] %v12031_v34 }
 0x576   : > { %v12035_v11 = vpop.f32.mrf.mxu1 }
 0x577   : > { %13758 = vst [vmem:[#allocation20_spill] sm:$0xff] %v12035_v11  ;;  %v9831_v11 = vld [vmem:[%s10518_s21 + $0x28] sm:$0xff]  }
 0x578   : > { %v12044_v19 = vpop.f32.mrf.mxu1 }
 0x579   : > { %9460 = vmatpush3.bf16.xpose.msra.mxu1 %v4956_v9  ;;  %13759 = vst [vmem:[#allocation21_spill] sm:$0xff] %v12044_v19  ;;  %v10410_v9 = vld [vmem:[%s13732_s3 + $0x20] sm:$0xff] }
 0x57d   : > { %v5462_v8 = vpop.permute.xlu1 %5461 }
 0x57e   : > { %9473 = vmatprep.subr.bf16.mxu1 %v5462_v8 }
 0x57f   : > { %v12001_v16 = vpop.f32.mrf.mxu0 }
 0x580   : > { %9462 = vmatmul.mubr.msk.bf16.vlgmr.msra.gmra.mxu1 %vm438_vm0, %v4934_v62  ;;  %13744 = vst [vmem:[#allocation6_spill] sm:$0xff] %v12001_v16 }
 0x581   : > { %v12003_v57 = vpop.f32.mrf.mxu0  ;;  %9474 = vmatpush3.bf16.msra.mxu1 %v5462_v8  ;;  %v5460_v2 = vpop.permute.xlu1 %5459 }
 0x582   : > { %13745 = vst [vmem:[#allocation7_spill] sm:$0xff] %v12003_v57  ;;  %9475 = vmatprep.subr.bf16.mxu1 %v5460_v2 }
 0x583   : > { %v12005_v35 = vpop.f32.mrf.mxu0  ;;  %v12051_v52 = vpop.f32.mrf.mxu1 }
 0x584   : > { %13746 = vst [vmem:[#allocation8_spill] sm:$0xff] %v12005_v35  ;;  %13760 = vst [vmem:[#allocation22_spill] sm:$0xff] %v12051_v52 }
 0x585   : > { %v12007_v14 = vpop.f32.mrf.mxu0  ;;  %9476 = vmatpush3.bf16.msra.mxu1 %v5460_v2  ;;  %v12019_v39 = vpop.permute.xlu1 %5532 }
 0x586   : > { %13747 = vst [vmem:[#allocation9_spill] sm:$0xff] %v12007_v14  ;;  %9481 = vmatprep.subr.bf16.mxu0 %v12019_v39  ;;  %v12055_v40 = vpop.f32.mrf.mxu1 }
 0x587   : > { %13761 = vst [vmem:[#allocation23_spill] sm:$0xff] %v12055_v40 }
 0x588   : > { %v12057_v29 = vpop.f32.mrf.mxu1 }
 0x589   : > { %v12024_v56 = vpop.permute.xlu1 %5603  ;;  %13762 = vst [vmem:[#allocation24_spill] sm:$0xff] %v12057_v29 }
 0x58a   : > { %9489 = vmatprep.subr.bf16.mxu1 %v12024_v56  ;;  %v12059_v33 = vpop.f32.mrf.mxu1 }
 0x58b   : > { %13763 = vst [vmem:[#allocation25_spill] sm:$0xff] %v12059_v33 }
 0x58f   : > { %v12009_v20 = vpop.f32.mrf.mxu0 }
 0x590   : > { %13748 = vst [vmem:[#allocation10_spill] sm:$0xff] %v12009_v20 }
 0x591   : > { %v12011_v63 = vpop.f32.mrf.mxu0 }
 0x592   : > { %13749 = vst [vmem:[#allocation11_spill] sm:$0xff] %v12011_v63  ;;  %v10432_v63 = vld [vmem:[%s13732_s3 + $0xd8] sm:$0xff] }
 0x593   : > { %v12013_v12 = vpop.f32.mrf.mxu0  ;;  %v12061_v48 = vpop.f32.mrf.mxu1 }
 0x594   : > { %13750 = vst [vmem:[#allocation12_spill] sm:$0xff] %v12013_v12  ;;  %13764 = vst [vmem:[#allocation26_spill] sm:$0xff] %v12061_v48  ;;  %v10433_v12 = vld [vmem:[%s13732_s3 + $0xf8] sm:$0xff] }
 0x595   : > { %v12015_v5 = vpop.f32.mrf.mxu0  ;;  %v12063_v17 = vpop.f32.mrf.mxu1 }
 0x596   : > { %13751 = vst [vmem:[#allocation13_spill] sm:$0xff] %v12015_v5  ;;  %13765 = vst [vmem:[#allocation27_spill] sm:$0xff] %v12063_v17 }
 0x597   : > { %v12065_v58 = vpop.f32.mrf.mxu1 }
 0x598   : > { %13766 = vst [vmem:[#allocation28_spill] sm:$0xff] %v12065_v58 }
 0x599   : > { %v12067_v59 = vpop.f32.mrf.mxu1 }
 0x59a   : > { %13767 = vst [vmem:[#allocation29_spill] sm:$0xff] %v12067_v59 }
 0x5cf   : > { %v12017_v44 = vpop.f32.mrf.mxu0 }
 0x5d0   : > { %13752 = vst [vmem:[#allocation14_spill] sm:$0xff] %v12017_v44 }
 0x5d1   : > { %v12022_v23 = vpop.f32.mrf.mxu0 }
 0x5d2   : > { %13753 = vst [vmem:[#allocation15_spill] sm:$0xff] %v12022_v23 }
 0x5d3   : > { %v12029_v61 = vpop.f32.mrf.mxu0 }
 0x5d4   : > { %13755 = vst [vmem:[#allocation17_spill] sm:$0xff] %v12029_v61 }
 0x5d5   : > { %v12033_v46 = vpop.f32.mrf.mxu0 }
 0x5d6   : > { %13757 = vst [vmem:[#allocation19_spill] sm:$0xff] %v12033_v46  ;;  %v9826_v46 = vld [vmem:[%s10941_s25 + $0x70] sm:$0xff]  }
 0x5df   : > { %v9407_v30 = vpop.f32.mrf.mxu0 }
 0x5e0   : > { %v12040_v21 = vadd.f32 %v10404_v10, %v9407_v30  ;;  %v10411_v30 = vld [vmem:[%s13732_s3 + $0x58] sm:$0xff] }
 0x5e1   : > { %v4372_v7 = vpop.f32.mrf.mxu0 }
 0x5e2   : > { %v5016_v60 = vsel %vm438_vm0, %v12040_v21, -inf  ;;  %v12085_v38 = vadd.f32 %v10407_v47, %v4372_v7  ;;  %v10412_v7 = vld [vmem:[%s13732_s3 + $0x28] sm:$0xff] }
 0x5e3   : > { %5017 = vmax.xlane.f32.xlu0 %v5016_v60  ;;  %v9408_v18 = vpop.f32.mrf.mxu0 }
 0x5e4   : > { %v12049_v25 = vadd.f32 %v10405_v31, %v9408_v18  ;;  %v5010_v55 = vsel %vm438_vm0, %v12085_v38, -inf }
 0x5e5   : > { %v4375_v50 = vpop.f32.mrf.mxu0 }
 0x5e6   : > { %v5019_v28 = vsel %vm438_vm0, %v12049_v25, -inf  ;;  %v12097_v51 = vadd.f32 %v10409_v36, %v4375_v50  ;;  %v10413_v50 = vld [vmem:[%s13732_s3 + $0x50] sm:$0xff] }
 0x5e7   : > { %5020 = vmax.xlane.f32.xlu1 %v5019_v28 }
 0x5e8   : > { %v5013_v18 = vsel %vm438_vm0, %v12097_v51, -inf }
 0x5ef   : > { %v9423_v41 = vpop.f32.mrf.mxu0 }
 0x5f1   : > { %v4550_v15 = vpop.f32.mrf.mxu0 }
 0x5f3   : > { %v9424_v3 = vpop.f32.mrf.mxu0 }
 0x5f4   : > { %v12111_v10 = vadd.f32 %v10411_v30, %v9424_v3  ;;  %v10417_v30 = vld [vmem:[%s13732_s3 + $0x48] sm:$0xff] }
 0x5f5   : > { %v4553_v36 = vpop.f32.mrf.mxu0 }
 0x5f6   : > { %v5043_v28 = vsel %vm438_vm0, %v12111_v10, -inf }
 0x600   : > { %v12069_v54 = vpop.f32.mrf.mxu1 }
 0x601   : > { %13768 = vst [vmem:[#allocation30_spill] sm:$0xff] %v12069_v54 }
 0x602   : > { %v12071_v45 = vpop.f32.mrf.mxu1 }
 0x603   : > { %13769 = vst [vmem:[#allocation31_spill] sm:$0xff] %v12071_v45 }
 0x604   : > { %v12073_v4 = vpop.f32.mrf.mxu1 }
 0x605   : > { %13770 = vst [vmem:[#allocation32_spill] sm:$0xff] %v12073_v4 }
 0x606   : > { %v12075_v42 = vpop.f32.mrf.mxu1 }
 0x607   : > { %13771 = vst [vmem:[#allocation33_spill] sm:$0xff] %v12075_v42 }
 0x610   : > { %v9415_v49 = vpop.f32.mrf.mxu1 }
 0x611   : > { %v12080_v24 = vadd.f32 %v10406_v37, %v9415_v49  ;;  %v12127_v49 = vadd.f32 %v10413_v50, %v9423_v41  ;;  %v10415_v41 = vld [vmem:[%s13732_s3 + $0x78] sm:$0xff] }
 0x612   : > { %v4461_v26 = vpop.f32.mrf.mxu1 }
 0x613   : > { %v5028_v6 = vsel %vm438_vm0, %v12080_v24, -inf  ;;  %v12102_v62 = vadd.f32 %v10410_v9, %v4461_v26 }
 0x614   : > { %v9416_v1 = vpop.f32.mrf.mxu1  ;;  %5029 = vmax.xlane.f32.xlu0 %v5028_v6  ;;  %v10414_v6 = vld [vmem:[%s13732_s3 + $0x70] sm:$0xff] }
 0x615   : > { %v12092_v43 = vadd.f32 %v10408_v13, %v9416_v1  ;;  %v5022_v31 = vsel %vm438_vm0, %v12102_v62, -inf  ;;  %v5040_v13 = vsel %vm438_vm0, %v12127_v49, -inf }
 0x616   : > { %v4464_v2 = vpop.f32.mrf.mxu1 }
 0x617   : > { %v5031_v8 = vsel %vm438_vm0, %v12092_v43, -inf  ;;  %v12116_v60 = vadd.f32 %v10412_v7, %v4464_v2  ;;  %v10416_v2 = vld [vmem:[%s13732_s3 + $0x40] sm:$0xff]  ;;  %v12151_v7 = vadd.f32 %v10417_v30, %v4553_v36 }
 0x618   : > { %5032 = vmax.xlane.f32.xlu1 %v5031_v8  ;;  %5011 = vmax.xlane.f32.xlu0 %v5010_v55  ;;  %v9439_v55 = vpop.f32.mrf.mxu0  ;;  %v12146_v3 = vadd.f32 %v10416_v2, %v4550_v15  ;;  %v10418_v15 = vld [vmem:[%s13732_s3 + $0x60] sm:$0xff]  ;;  %v10421_v2 = vld [vmem:[%s13732_s3 + $0x98] sm:$0xff] }
 0x619   : > { %v5025_v37 = vsel %vm438_vm0, %v12116_v60, -inf }
 0x61a   : > { %v4728_v50 = vpop.f32.mrf.mxu0  ;;  %v5034_v36 = vsel %vm438_vm0, %v12146_v3, -inf }
 0x61c   : > { %5014 = vmax.xlane.f32.xlu1 %v5013_v18  ;;  %5023 = vmax.xlane.f32.xlu0 %v5022_v31 }
 0x620   : > { %v9431_v26 = vpop.f32.mrf.mxu1  ;;  %5026 = vmax.xlane.f32.xlu0 %v5025_v37  ;;  %5044 = vmax.xlane.f32.xlu1 %v5043_v28 }
 0x621   : > { %v12134_v1 = vadd.f32 %v10414_v6, %v9431_v26  ;;  %v10419_v26 = vld [vmem:[%s13732_s3 + $0x68] sm:$0xff] }
 0x622   : > { %v4639_v47 = vpop.f32.mrf.mxu1 }
 0x623   : > { %v5052_v18 = vsel %vm438_vm0, %v12134_v1, -inf  ;;  %v12160_v37 = vadd.f32 %v10418_v15, %v4639_v47  ;;  %v10420_v47 = vld [vmem:[%s13732_s3 + $0x90] sm:$0xff] }
 0x624   : > { %v9432_v9 = vpop.f32.mrf.mxu1  ;;  %5041 = vmax.xlane.f32.xlu0 %v5040_v13  ;;  %v5037_v13 = vsel %vm438_vm0, %v12151_v7, -inf }
 0x625   : > { %v12141_v8 = vadd.f32 %v10415_v41, %v9432_v9  ;;  %v9440_v9 = vpop.f32.mrf.mxu0  ;;  %v12174_v41 = vadd.f32 %v10420_v47, %v9439_v55  ;;  %v10422_v55 = vld [vmem:[%s13732_s3 + $0xb0] sm:$0xff] }
 0x626   : > { %v4642_v28 = vpop.f32.mrf.mxu1  ;;  %v12179_v30 = vadd.f32 %v10421_v2, %v9440_v9  ;;  %v10423_v2 = vld [vmem:[%s13732_s3 + $0xb8] sm:$0xff] }
 0x627   : > { %v5055_v31 = vsel %vm438_vm0, %v12141_v8, -inf  ;;  %v12165_v6 = vadd.f32 %v10419_v26, %v4642_v28  ;;  %v4731_v9 = vpop.f32.mrf.mxu0 }
 0x628   : > { %5053 = vmax.xlane.f32.xlu0 %v5052_v18  ;;  %5056 = vmax.xlane.f32.xlu1 %v5055_v31  ;;  %v5046_v31 = vsel %vm438_vm0, %v12160_v37, -inf }
 0x629   : > { %v5049_v18 = vsel %vm438_vm0, %v12165_v6, -inf }
 0x62c   : > { %5038 = vmax.xlane.f32.xlu1 %v5037_v13  ;;  %5035 = vmax.xlane.f32.xlu0 %v5034_v36  ;;  %v5064_v13 = vsel %vm438_vm0, %v12174_v41, -inf  ;;  %v5067_v36 = vsel %vm438_vm0, %v12179_v30, -inf }
 0x630   : > { %v9447_v28 = vpop.f32.mrf.mxu1  ;;  %5050 = vmax.xlane.f32.xlu1 %v5049_v18  ;;  %5047 = vmax.xlane.f32.xlu0 %v5046_v31  ;;  %v10424_v31 = vld [vmem:[%s13732_s3 + $0x80] sm:$0xff] }
 0x631   : > { %v12188_v26 = vadd.f32 %v10422_v55, %v9447_v28  ;;  %v12202_v28 = vadd.f32 %v10424_v31, %v4728_v50  ;;  %v10425_v55 = vld [vmem:[%s13732_s3 + $0x88] sm:$0xff]  ;;  %v10426_v50 = vld [vmem:[%s13732_s3 + $0xa0] sm:$0xff] }
 0x632   : > { %v4817_v15 = vpop.f32.mrf.mxu1  ;;  %v12207_v42 = vadd.f32 %v10425_v55, %v4731_v9  ;;  %v10427_v9 = vld [vmem:[%s13732_s3 + $0xa8] sm:$0xff] }
 0x633   : > { %v12216_v31 = vadd.f32 %v10426_v50, %v4817_v15 }
 0x634   : > { %v9448_v47 = vpop.f32.mrf.mxu1  ;;  %5065 = vmax.xlane.f32.xlu0 %v5064_v13  ;;  %5068 = vmax.xlane.f32.xlu1 %v5067_v36  ;;  %v5076_v13 = vsel %vm438_vm0, %v12188_v26, -inf  ;;  %v5061_v54 = vsel %vm438_vm0, %v12207_v42, -inf }
 0x635   : > { %v12197_v18 = vadd.f32 %v10423_v2, %v9448_v47  ;;  %v9455_v2 = vpop.f32.mrf.mxu0 }
 0x636   : > { %v4820_v47 = vpop.f32.mrf.mxu1 }
 0x637   : > { %v5079_v36 = vsel %vm438_vm0, %v12197_v18, -inf  ;;  %v12221_v55 = vadd.f32 %v10427_v9, %v4820_v47  ;;  %v5070_v47 = vsel %vm438_vm0, %v12216_v31, -inf }
 0x638   : > { %5077 = vmax.xlane.f32.xlu0 %v5076_v13  ;;  %5080 = vmax.xlane.f32.xlu1 %v5079_v36  ;;  %v5058_v13 = vsel %vm438_vm0, %v12202_v28, -inf  ;;  %v10428_v36 = vld [vmem:[%s13732_s3 + $0xd0] sm:$0xff] }
 0x639   : > { %v12230_v15 = vadd.f32 %v10428_v36, %v9455_v2  ;;  %v5073_v50 = vsel %vm438_vm0, %v12221_v55, -inf  ;;  %v4906_v36 = vpop.f32.mrf.mxu0 }
 0x63b   : > { %v5088_v2 = vsel %vm438_vm0, %v12230_v15, -inf  ;;  %v9456_v17 = vpop.f32.mrf.mxu0 }
 0x63c   : > { %5062 = vmax.xlane.f32.xlu1 %v5061_v54  ;;  %5059 = vmax.xlane.f32.xlu0 %v5058_v13  ;;  %v10429_v54 = vld [vmem:[%s13732_s3 + $0xf0] sm:$0xff]  ;;  %v12283_v5 = vadd.f32 %v10432_v63, %v9456_v17 }
 0x640   : > { %5074 = vmax.xlane.f32.xlu1 %v5073_v50  ;;  %5071 = vmax.xlane.f32.xlu0 %v5070_v47  ;;  %v9463_v9 = vpop.f32.mrf.mxu1  ;;  %v10430_v50 = vld [vmem:[%s13732_s3 + $0xc0] sm:$0xff] }
 0x641   : > { %v12239_v13 = vadd.f32 %v10429_v54, %v9463_v9  ;;  %v12248_v47 = vadd.f32 %v10430_v50, %v4906_v36  ;;  %v10431_v9 = vld [vmem:[%s13732_s3 + $0xe0] sm:$0xff]  ;;  %v12261_v36 = vpop.permute.xlu0 %5530 }
 0x642   : > { %v4995_v45 = vpop.f32.mrf.mxu1 }
 0x643   : > { %v5100_v44 = vsel %vm438_vm0, %v12239_v13, -inf  ;;  %v12253_v54 = vadd.f32 %v10431_v9, %v4995_v45  ;;  %v9827_v9 = vld [vmem:[%s10941_s25 + $0x60] sm:$0xff]  }
 0x644   : > { %5089 = vmax.xlane.f32.xlu0 %v5088_v2  ;;  %v5082_v2 = vsel %vm438_vm0, %v12248_v47, -inf  ;;  %v9464_v4 = vpop.f32.mrf.mxu1 }
 0x645   : > { %v5094_v23 = vsel %vm438_vm0, %v12253_v54, -inf  ;;  %v12265_v50 = vpop.permute.xlu0 %5674  ;;  %v12289_v58 = vadd.f32 %v10433_v12, %v9464_v4  ;;  %v10435_v12 = vld [vmem:[%s13732_s3 + $0xe8] sm:$0xff] }
 0x648   : > { %5101 = vmax.xlane.f32.xlu0 %v5100_v44  ;;  %v12263_v44 = vpop.permute.xlu1 %5601 }
 0x649   : > { %v12269_v45 = vpop.permute.xlu0 %5672 }
 0x64c   : > { %5083 = vmax.xlane.f32.xlu0 %v5082_v2  ;;  %v12267_v59 = vpop.permute.xlu1 %5745 }
 0x64d   : > { %v12275_v2 = vpop.permute.xlu0 %5816 }
 0x650   : > { %5095 = vmax.xlane.f32.xlu0 %v5094_v23  ;;  %v12272_v48 = vpop.permute.xlu1 %5743 }
 0x651   : > { %5885 = vrot.lane.b32.xlu1 %v9826_v46, %s10477_s7 }
 0x654   : > { %v12277_v23 = vpop.permute.xlu1 %5887 }
 0x666   : > { %5814 = vrot.lane.b32.xlu0 %v9827_v9, %s10477_s7 }
 0x66c   : > { %v5018_v46 = vpop.xlane.xlu0 %5017 }
 0x66d   : > { %v5108_v20 = vsub.f32 %v12040_v21, %v5018_v46  ;;  %v5091_v21 = vsel %vm438_vm0, %v12283_v5, -inf  ;;  %v4909_v46 = vpop.f32.mrf.mxu0 }
 0x66f   : > { %v5142_v52 = vmul.f32 1.442695, %v5108_v20  ;;  %v10434_v20 = vld [vmem:[%s13732_s3 + $0xc8] sm:$0xff] }
 0x670   : > { %v5021_v33 = vpop.xlane.xlu1 %5020  ;;  %v12296_v63 = vadd.f32 %v10434_v20, %v4909_v46 }
 0x671   : > { %v5109_v61 = vsub.f32 %v12049_v25, %v5021_v33  ;;  %10116 = vpow2.f32 %v5142_v52  ;;  %v4998_v25 = vpop.f32.mrf.mxu1 }
 0x672   : > { %v12303_v52 = vadd.f32 %v10435_v12, %v4998_v25  ;;  %v5085_v33 = vsel %vm438_vm0, %v12296_v63, -inf }
 0x673   : > { %v5144_v9 = vmul.f32 1.442695, %v5109_v61  ;;  %v5103_v61 = vsel %vm438_vm0, %v12289_v58, -inf }
 0x674   : > { %v5097_v17 = vsel %vm438_vm0, %v12303_v52, -inf }
 0x675   : > { %10118 = vpow2.f32 %v5144_v9  ;;  %5092 = vmax.xlane.f32.xlu1 %v5091_v21 }
 0x679   : > { %5104 = vmax.xlane.f32.xlu1 %v5103_v61 }
 0x67d   : > { %5086 = vmax.xlane.f32.xlu1 %v5085_v33 }
 0x67e   : > { %v12309_v4 = vpop.eup %10116 }
 0x67f   : > { %v5208_v46 = vsel %vm438_vm0, %v12309_v4, 0.0 }
 0x681   : > { %5098 = vmax.xlane.f32.xlu1 %v5097_v17 }
 0x682   : > { %v12311_v9 = vpop.eup %10118 }
 0x683   : > { %v5211_v21 = vsel %vm438_vm0, %v12311_v9, 0.0 }
 0x685   : > { %5212 = vadd.xlane.f32.xlu1 %v5211_v21  ;;  %5209 = vadd.xlane.f32.xlu0 %v5208_v46 }
 0x69d   : > { %v5030_v20 = vpop.xlane.xlu0 %5029 }
 0x69e   : > { %v5112_v61 = vsub.f32 %v12080_v24, %v5030_v20 }
 0x6a0   : > { %v5150_v25 = vmul.f32 1.442695, %v5112_v61 }
 0x6a1   : > { %v5033_v12 = vpop.xlane.xlu1 %5032  ;;  %v5012_v33 = vpop.xlane.xlu0 %5011 }
 0x6a2   : > { %10120 = vpow2.f32 %v5150_v25  ;;  %v5113_v16 = vsub.f32 %v12092_v43, %v5033_v12  ;;  %v5106_v17 = vsub.f32 %v12085_v38, %v5012_v33 }
 0x6a4   : > { %v5152_v40 = vmul.f32 1.442695, %v5113_v16  ;;  %v5138_v35 = vmul.f32 1.442695, %v5106_v17 }
 0x6a5   : > { %v5015_v29 = vpop.xlane.xlu1 %5014  ;;  %v5024_v57 = vpop.xlane.xlu0 %5023 }
 0x6a6   : > { %10122 = vpow2.f32 %v5152_v40  ;;  %v5107_v14 = vsub.f32 %v12097_v51, %v5015_v29  ;;  %v5110_v21 = vsub.f32 %v12102_v62, %v5024_v57 }
 0x6a7   : > { %10124 = vpow2.f32 %v5138_v35 }
 0x6a8   : > { %v5140_v46 = vmul.f32 1.442695, %v5107_v14  ;;  %v5146_v24 = vmul.f32 1.442695, %v5110_v21 }
 0x6a9   : > { %v5045_v20 = vpop.xlane.xlu1 %5044  ;;  %v5027_v61 = vpop.xlane.xlu0 %5026 }
 0x6aa   : > { %10126 = vpow2.f32 %v5140_v46  ;;  %v5117_v25 = vsub.f32 %v12111_v10, %v5045_v20  ;;  %v5111_v43 = vsub.f32 %v12116_v60, %v5027_v61 }
 0x6ab   : > { %10128 = vpow2.f32 %v5146_v24 }
 0x6ac   : > { %v5148_v16 = vmul.f32 1.442695, %v5111_v43  ;;  %v5160_v38 = vmul.f32 1.442695, %v5117_v25 }
 0x6ad   : > { %v5042_v12 = vpop.xlane.xlu0 %5041 }
 0x6ae   : > { %v5116_v40 = vsub.f32 %v12127_v49, %v5042_v12  ;;  %10130 = vpow2.f32 %v5148_v16 }
 0x6af   : > { %v12325_v33 = vpop.eup %10120  ;;  %10132 = vpow2.f32 %v5160_v38 }
 0x6b0   : > { %v5158_v57 = vmul.f32 1.442695, %v5116_v40  ;;  %v5220_v35 = vsel %vm438_vm0, %v12325_v33, 0.0 }
 0x6b1   : > { %v5057_v14 = vpop.xlane.xlu1 %5056  ;;  %5221 = vadd.xlane.f32.xlu0 %v5220_v35  ;;  %v5054_v29 = vpop.xlane.xlu0 %5053 }
 0x6b2   : > { %10134 = vpow2.f32 %v5158_v57  ;;  %v5121_v51 = vsub.f32 %v12141_v8, %v5057_v14  ;;  %v5120_v62 = vsub.f32 %v12134_v1, %v5054_v29 }
 0x6b3   : > { %v12331_v10 = vpop.eup %10122 }
 0x6b4   : > { %v12333_v60 = vpop.eup %10124  ;;  %v5168_v49 = vmul.f32 1.442695, %v5121_v51  ;;  %v5166_v17 = vmul.f32 1.442695, %v5120_v62  ;;  %v5223_v21 = vsel %vm438_vm0, %v12331_v10, 0.0 }
 0x6b5   : > { %v5039_v46 = vpop.xlane.xlu1 %5038  ;;  %5224 = vadd.xlane.f32.xlu1 %v5223_v21  ;;  %v5202_v24 = vsel %vm438_vm0, %v12333_v60, 0.0  ;;  %v5036_v20 = vpop.xlane.xlu0 %5035 }
 0x6b6   : > { %10136 = vpow2.f32 %v5168_v49  ;;  %v5115_v8 = vsub.f32 %v12151_v7, %v5039_v46  ;;  %5203 = vadd.xlane.f32.xlu0 %v5202_v24  ;;  %v5114_v1 = vsub.f32 %v12146_v3, %v5036_v20 }
 0x6b7   : > { %v12341_v61 = vpop.eup %10126  ;;  %10138 = vpow2.f32 %v5166_v17 }
 0x6b8   : > { %v12343_v25 = vpop.eup %10128  ;;  %v5156_v43 = vmul.f32 1.442695, %v5115_v8  ;;  %v5154_v16 = vmul.f32 1.442695, %v5114_v1  ;;  %v5205_v38 = vsel %vm438_vm0, %v12341_v61, 0.0 }
 0x6b9   : > { %v5051_v12 = vpop.xlane.xlu1 %5050  ;;  %5206 = vadd.xlane.f32.xlu1 %v5205_v38  ;;  %v5214_v40 = vsel %vm438_vm0, %v12343_v25, 0.0  ;;  %v5048_v57 = vpop.xlane.xlu0 %5047 }
 0x6ba   : > { %10140 = vpow2.f32 %v5156_v43  ;;  %v5119_v7 = vsub.f32 %v12165_v6, %v5051_v12  ;;  %5215 = vadd.xlane.f32.xlu0 %v5214_v40  ;;  %v5118_v3 = vsub.f32 %v12160_v37, %v5048_v57 }
 0x6bb   : > { %10142 = vpow2.f32 %v5154_v16  ;;  %v12351_v35 = vpop.eup %10130 }
 0x6bc   : > { %v5164_v14 = vmul.f32 1.442695, %v5119_v7  ;;  %v5162_v29 = vmul.f32 1.442695, %v5118_v3  ;;  %v5217_v62 = vsel %vm438_vm0, %v12351_v35, 0.0  ;;  %v12355_v17 = vpop.eup %10132 }
 0x6bd   : > { %v5069_v51 = vpop.xlane.xlu1 %5068  ;;  %v5066_v49 = vpop.xlane.xlu0 %5065  ;;  %5218 = vadd.xlane.f32.xlu1 %v5217_v62  ;;  %v5235_v1 = vsel %vm438_vm0, %v12355_v17, 0.0 }
 0x6be   : > { %10144 = vpow2.f32 %v5164_v14  ;;  %v5125_v21 = vsub.f32 %v12179_v30, %v5069_v51  ;;  %v5124_v6 = vsub.f32 %v12174_v41, %v5066_v49 }
 0x6bf   : > { %v12359_v46 = vpop.eup %10134  ;;  %10146 = vpow2.f32 %v5162_v29 }
 0x6c0   : > { %v5176_v37 = vmul.f32 1.442695, %v5125_v21  ;;  %v5174_v24 = vmul.f32 1.442695, %v5124_v6  ;;  %v5232_v20 = vsel %vm438_vm0, %v12359_v46, 0.0 }
 0x6c1   : > { %v5081_v8 = vpop.xlane.xlu1 %5080  ;;  %5233 = vadd.xlane.f32.xlu0 %v5232_v20  ;;  %v5078_v43 = vpop.xlane.xlu0 %5077  ;;  %5236 = vadd.xlane.f32.xlu1 %v5235_v1 }
 0x6c2   : > { %10148 = vpow2.f32 %v5176_v37  ;;  %v5129_v30 = vsub.f32 %v12197_v18, %v5081_v8  ;;  %v5128_v41 = vsub.f32 %v12188_v26, %v5078_v43 }
 0x6c3   : > { %v12367_v16 = vpop.eup %10136  ;;  %10150 = vpow2.f32 %v5174_v24 }
 0x6c4   : > { %v12369_v38 = vpop.eup %10138  ;;  %v5184_v12 = vmul.f32 1.442695, %v5129_v30  ;;  %v5182_v40 = vmul.f32 1.442695, %v5128_v41  ;;  %v5247_v57 = vsel %vm438_vm0, %v12367_v16, 0.0 }
 0x6c5   : > { %v5063_v7 = vpop.xlane.xlu1 %5062  ;;  %v5244_v3 = vsel %vm438_vm0, %v12369_v38, 0.0  ;;  %v5060_v14 = vpop.xlane.xlu0 %5059  ;;  %5248 = vadd.xlane.f32.xlu1 %v5247_v57 }
 0x6c6   : > { %10152 = vpow2.f32 %v5184_v12  ;;  %v5123_v18 = vsub.f32 %v12207_v42, %v5063_v7  ;;  %5245 = vadd.xlane.f32.xlu0 %v5244_v3  ;;  %v5122_v26 = vsub.f32 %v12202_v28, %v5060_v14 }
 0x6c7   : > { %v12377_v29 = vpop.eup %10140  ;;  %10154 = vpow2.f32 %v5182_v40 }
 0x6c8   : > { %v12379_v51 = vpop.eup %10142  ;;  %v5172_v62 = vmul.f32 1.442695, %v5123_v18  ;;  %v5170_v49 = vmul.f32 1.442695, %v5122_v26  ;;  %v5229_v21 = vsel %vm438_vm0, %v12377_v29, 0.0 }
 0x6c9   : > { %v5075_v6 = vpop.xlane.xlu1 %5074  ;;  %v5226_v37 = vsel %vm438_vm0, %v12379_v51, 0.0  ;;  %v5072_v24 = vpop.xlane.xlu0 %5071  ;;  %5230 = vadd.xlane.f32.xlu1 %v5229_v21 }
 0x6ca   : > { %10156 = vpow2.f32 %v5172_v62  ;;  %v5127_v42 = vsub.f32 %v12221_v55, %v5075_v6  ;;  %5227 = vadd.xlane.f32.xlu0 %v5226_v37  ;;  %v5126_v28 = vsub.f32 %v12216_v31, %v5072_v24 }
 0x6cb   : > { %v12387_v20 = vpop.eup %10144  ;;  %10158 = vpow2.f32 %v5170_v49 }
 0x6cc   : > { %v12389_v8 = vpop.eup %10146  ;;  %v5180_v1 = vmul.f32 1.442695, %v5127_v42  ;;  %v5178_v43 = vmul.f32 1.442695, %v5126_v28  ;;  %v5241_v30 = vsel %vm438_vm0, %v12387_v20, 0.0 }
 0x6cd   : > { %v5238_v41 = vsel %vm438_vm0, %v12389_v8, 0.0  ;;  %v5090_v12 = vpop.xlane.xlu0 %5089  ;;  %5242 = vadd.xlane.f32.xlu1 %v5241_v30 }
 0x6ce   : > { %10160 = vpow2.f32 %v5180_v1  ;;  %5239 = vadd.xlane.f32.xlu0 %v5238_v41  ;;  %v5132_v55 = vsub.f32 %v12230_v15, %v5090_v12 }
 0x6cf   : > { %v12396_v31 = vpop.eup %10148  ;;  %10162 = vpow2.f32 %v5178_v43 }
 0x6d0   : > { %v12398_v40 = vpop.eup %10150  ;;  %v5190_v57 = vmul.f32 1.442695, %v5132_v55  ;;  %v5259_v7 = vsel %vm438_vm0, %v12396_v31, 0.0 }
 0x6d1   : > { %v5256_v3 = vsel %vm438_vm0, %v12398_v40, 0.0  ;;  %v5102_v14 = vpop.xlane.xlu0 %5101  ;;  %5260 = vadd.xlane.f32.xlu1 %v5259_v7 }
 0x6d2   : > { %10164 = vpow2.f32 %v5190_v57  ;;  %5257 = vadd.xlane.f32.xlu0 %v5256_v3  ;;  %v5136_v18 = vsub.f32 %v12239_v13, %v5102_v14 }
 0x6d3   : > { %v12405_v26 = vpop.eup %10152 }
 0x6d4   : > { %v12407_v15 = vpop.eup %10154  ;;  %v5198_v62 = vmul.f32 1.442695, %v5136_v18  ;;  %v5271_v49 = vsel %vm438_vm0, %v12405_v26, 0.0 }
 0x6d5   : > { %v5268_v21 = vsel %vm438_vm0, %v12407_v15, 0.0  ;;  %v5084_v6 = vpop.xlane.xlu0 %5083  ;;  %5272 = vadd.xlane.f32.xlu1 %v5271_v49 }
 0x6d6   : > { %10166 = vpow2.f32 %v5198_v62  ;;  %5269 = vadd.xlane.f32.xlu0 %v5268_v21  ;;  %v5130_v37 = vsub.f32 %v12248_v47, %v5084_v6  ;;  %v12447_v6 = vpop.permute.xlu1 %5885 }
 0x6d7   : > { %v12414_v24 = vpop.eup %10156 }
 0x6d8   : > { %v12416_v13 = vpop.eup %10158  ;;  %v5186_v42 = vmul.f32 1.442695, %v5130_v37  ;;  %v5253_v28 = vsel %vm438_vm0, %v12414_v24, 0.0 }
 0x6d9   : > { %v5250_v1 = vsel %vm438_vm0, %v12416_v13, 0.0  ;;  %v5096_v43 = vpop.xlane.xlu0 %5095  ;;  %5254 = vadd.xlane.f32.xlu1 %v5253_v28 }
 0x6da   : > { %10168 = vpow2.f32 %v5186_v42  ;;  %5251 = vadd.xlane.f32.xlu0 %v5250_v1  ;;  %v5134_v30 = vsub.f32 %v12253_v54, %v5096_v43 }
 0x6db   : > { %v12423_v41 = vpop.eup %10160 }
 0x6dc   : > { %v12425_v47 = vpop.eup %10162  ;;  %v5194_v12 = vmul.f32 1.442695, %v5134_v30  ;;  %v5265_v55 = vsel %vm438_vm0, %v12423_v41, 0.0 }
 0x6dd   : > { %v5262_v57 = vsel %vm438_vm0, %v12425_v47, 0.0  ;;  %5266 = vadd.xlane.f32.xlu1 %v5265_v55 }
 0x6de   : > { %10170 = vpow2.f32 %v5194_v12  ;;  %5263 = vadd.xlane.f32.xlu0 %v5262_v57 }
 0x6df   : > { %v12431_v7 = vpop.eup %10164 }
 0x6e0   : > { %v5280_v3 = vsel %vm438_vm0, %v12431_v7, 0.0 }
 0x6e2   : > { %5281 = vadd.xlane.f32.xlu0 %v5280_v3 }
 0x6e3   : > { %v12435_v54 = vpop.eup %10166 }
 0x6e4   : > { %13772 = vst [vmem:[#allocation34_spill] sm:$0xff] %v12435_v54  ;;  %v5292_v14 = vsel %vm438_vm0, %v12435_v54, 0.0 }
 0x6e6   : > { %5293 = vadd.xlane.f32.xlu0 %v5292_v14 }
 0x6e7   : > { %v12439_v18 = vpop.eup %10168 }
 0x6e8   : > { %v5274_v62 = vsel %vm438_vm0, %v12439_v18, 0.0 }
 0x6e9   : > { %5275 = vadd.xlane.f32.xlu1 %v5274_v62 }
 0x6eb   : > { %v12443_v49 = vpop.eup %10170 }
 0x6ec   : > { %v5286_v21 = vsel %vm438_vm0, %v12443_v49, 0.0 }
 0x6ed   : > { %5287 = vadd.xlane.f32.xlu0 %v5286_v21  ;;  %v9828_v21 = vld [vmem:[%s10518_s21 + $0x18] sm:$0xff]  }
 0x6fe   : > { %v5093_v37 = vpop.xlane.xlu1 %5092 }
 0x6ff   : > { %v5133_v42 = vsub.f32 %v12283_v5, %v5093_v37  ;;  %v9829_v37 = vld [vmem:[%s10518_s21 + $0x8] sm:$0xff]  }
 0x701   : > { %v5192_v28 = vmul.f32 1.442695, %v5133_v42  ;;  %v6189_v42 = vld [vmem:[%s10526_s24] sm:$0xf] }
 0x702   : > { %v5105_v1 = vpop.xlane.xlu1 %5104 }
 0x703   : > { %10172 = vpow2.f32 %v5192_v28  ;;  %v5137_v43 = vsub.f32 %v12289_v58, %v5105_v1  ;;  %v6190_v28 = vld [vmem:[%s10526_s24 + $0x4] sm:$0xf] }
 0x705   : > { %v5200_v30 = vmul.f32 1.442695, %v5137_v43  ;;  %v12469_v43 = vpop.permute.xlu0 %5814 }
 0x706   : > { %v5087_v12 = vpop.xlane.xlu1 %5086 }
 0x707   : > { %10174 = vpow2.f32 %v5200_v30  ;;  %v5131_v55 = vsub.f32 %v12296_v63, %v5087_v12  ;;  %v9830_v30 = vld [vmem:[%s10518_s21] sm:$0xff]   ;;  %v6221_v12 = vmul.bf16 1043676725, %v6189_v42 }
 0x709   : > { %v5188_v57 = vmul.f32 1.442695, %v5131_v55  ;;  %v6222_v55 = vmul.bf16 1043676725, %v6190_v28 }
 0x70a   : > { %v5099_v1 = vpop.xlane.xlu1 %5098 }
 0x70b   : > { %10176 = vpow2.f32 %v5188_v57  ;;  %v5135_v57 = vsub.f32 %v12303_v52, %v5099_v1  ;;  %v6197_v1 = vld [vmem:[%s10526_s24 + $0x20] sm:$0xf] }
 0x70e   : > { %v5210_v53 = vpop.xlane.xlu0 %5209  ;;  %v5213_v42 = vpop.xlane.xlu1 %5212 }
 0x710   : > { %v12452_v3 = vpop.eup %10172 }
 0x711   : > { %v5283_v5 = vsel %vm438_vm0, %v12452_v3, 0.0 }
 0x712   : > { %5284 = vadd.xlane.f32.xlu1 %v5283_v5  ;;  %v8643_v5 = vcombine.low %v6221_v12, %v6222_v55 }
 0x714   : > { %v12456_v14 = vpop.eup %10174 }
 0x715   : > { %v5295_v58 = vsel %vm438_vm0, %v12456_v14, 0.0 }
 0x716   : > { %5296 = vadd.xlane.f32.xlu1 %v5295_v58  ;;  %v6191_v58 = vld [vmem:[%s10526_s24 + $0x8] sm:$0xf] }
 0x717   : > { %v6223_v34 = vmul.bf16 1043676725, %v6191_v58 }
 0x718   : > { %v12460_v62 = vpop.eup %10176 }
 0x719   : > { %v5277_v63 = vsel %vm438_vm0, %v12460_v62, 0.0 }
 0x71a   : > { %5278 = vadd.xlane.f32.xlu0 %v5277_v63  ;;  %v6192_v63 = vld [vmem:[%s10526_s24 + $0xc] sm:$0xf] }
 0x727   : > { %6432 = vrot.lane.b32.xlu1 %v9828_v21, %s10478_s16  ;;  %v5196_v21 = vmul.f32 1.442695, %v5135_v57  ;;  %v9834_v57 = vld [vmem:[%s10518_s21 + $0x20] sm:$0xff]  }
 0x729   : > { %10178 = vpow2.f32 %v5196_v21 }
 0x72a   : > { %10180 = vrcp.f32 %v5213_v42 }
 0x72b   : > { %10182 = vrcp.f32 %v5210_v53 }
 0x730   : > { %6343 = vrot.lane.b32.xlu0 %v9829_v37, %s10478_s16  ;;  %v6224_v37 = vmul.bf16 1043676725, %v6192_v63 }
 0x732   : > { %v8644_v52 = vcombine.low %v6223_v34, %v6224_v37  ;;  %v6200_v37 = vld [vmem:[%s10526_s24 + $0x2c] sm:$0xf] }
 0x734   : > { %6341 = vrot.lane.b32.xlu0 %v9830_v30, %s10478_s16  ;;  %v6198_v30 = vld [vmem:[%s10526_s24 + $0x24] sm:$0xf] }
 0x735   : > { %v6230_v58 = vmul.bf16 1043676725, %v6198_v30  ;;  %v6232_v30 = vmul.bf16 1043676725, %v6200_v37 }
 0x736   : > { %v12487_v42 = vpop.eup %10178 }
 0x738   : > { %6327 = vrot.lane.b32.xlu0 %v8643_v5, %s10478_s16  ;;  %v6229_v5 = vmul.bf16 1043676725, %v6197_v1 }
 0x73a   : > { %v5222_v28 = vpop.xlane.xlu0 %5221  ;;  %v8655_v34 = vcombine.low %v6229_v5, %v6230_v58  ;;  %v10181_v5 = vpop.eup %10180 }
 0x73b   : > { %v5333_v0 = vmul.f32 %v10181_v5, %v12311_v9 }
 0x73c   : > { %6521 = vrot.lane.b32.xlu0 %v9831_v11, %s10478_s16  ;;  %v6199_v11 = vld [vmem:[%s10526_s24 + $0x28] sm:$0xf] }
 0x73d   : > { %v6231_v1 = vmul.bf16 1043676725, %v6199_v11 }
 0x73e   : > { %v5225_v12 = vpop.xlane.xlu1 %5224 }
 0x73f   : > { %v5204_v55 = vpop.xlane.xlu0 %5203  ;;  %v8656_v58 = vcombine.low %v6231_v1, %v6232_v30 }
 0x740   : > { %6329 = vrot.lane.b32.xlu0 %v8644_v52, %s10478_s16  ;;  %10184 = vrcp.f32 %v5204_v55  ;;  %v9836_v52 = vld [vmem:[%s10518_s21 + $0x48] sm:$0xff]  }
 0x742   : > { %v5207_v63 = vpop.xlane.xlu1 %5206 }
 0x743   : > { %10186 = vrcp.f32 %v5207_v63  ;;  %v5216_v21 = vpop.xlane.xlu0 %5215  ;;  %v10183_v63 = vpop.eup %10182 }
 0x744   : > { %6519 = vrot.lane.b32.xlu0 %v9834_v57, %s10478_s16  ;;  %10188 = vrcp.f32 %v5225_v12  ;;  %v5289_v57 = vsel %vm438_vm0, %v12487_v42, 0.0  ;;  %v5332_v37 = vmul.f32 %v10183_v63, %v12309_v4  ;;  %v6207_v63 = vld [vmem:[%s10526_s24 + $0x48] sm:$0xf] }
 0x745   : > { %10190 = vrcp.f32 %v5216_v21  ;;  %v6206_v21 = vld [vmem:[%s10526_s24 + $0x44] sm:$0xf] }
 0x746   : > { %10192 = vrcp.f32 %v5222_v28  ;;  %v5219_v53 = vpop.xlane.xlu1 %5218  ;;  %v6205_v28 = vld [vmem:[%s10526_s24 + $0x40] sm:$0xf]  ;;  %v6238_v27 = vmul.bf16 1043676725, %v6206_v21  ;;  %v5363_v9 = vpack.c.bf16 %v5333_v0, %v5332_v37  ;;  %v6193_v0 = vld [vmem:[%s10526_s24 + $0x10] sm:$0xf] }
 0x747   : > { %10194 = vrcp.f32 %v5219_v53  ;;  %v6237_v32 = vmul.bf16 1043676725, %v6205_v28  ;;  %v6208_v21 = vld [vmem:[%s10526_s24 + $0x4c] sm:$0xf] }
 0x748   : > { %6505 = vrot.lane.b32.xlu0 %v8655_v34, %s10478_s16 }
 0x749   : > { %v8667_v5 = vcombine.low %v6237_v32, %v6238_v27 }
 0x74a   : > { %v5234_v55 = vpop.xlane.xlu0 %5233  ;;  %v5237_v12 = vpop.xlane.xlu1 %5236 }
 0x74b   : > { %5290 = vadd.xlane.f32.xlu1 %v5289_v57  ;;  %10196 = vrcp.f32 %v5234_v55  ;;  %v9838_v57 = vld [vmem:[%s10518_s21 + $0x40] sm:$0xff]  }
 0x74c   : > { %6699 = vrot.lane.b32.xlu0 %v9836_v52, %s10478_s16  ;;  %10198 = vrcp.f32 %v5237_v12 }
 0x74d   : > { %v10185_v53 = vpop.eup %10184 }
 0x74e   : > { %v5249_v19 = vpop.xlane.xlu1 %5248  ;;  %v5330_v52 = vmul.f32 %v10185_v53, %v12333_v60 }
 0x74f   : > { %v5246_v34 = vpop.xlane.xlu0 %5245  ;;  %10200 = vrcp.f32 %v5249_v19 }
 0x750   : > { %v10187_v11 = vpop.eup %10186  ;;  %6507 = vrot.lane.b32.xlu0 %v8656_v58, %s10478_s16 }
 0x751   : > { %v5331_v1 = vmul.f32 %v10187_v11, %v12341_v61  ;;  %v10189_v30 = vpop.eup %10188 }
 0x752   : > { %v10191_v22 = vpop.eup %10190  ;;  %v5231_v54 = vpop.xlane.xlu1 %5230  ;;  %v5337_v60 = vmul.f32 %v10189_v30, %v12331_v10  ;;  %v6196_v30 = vld [vmem:[%s10526_s24 + $0x1c] sm:$0xf] }
 0x753   : > { %v5228_v28 = vpop.xlane.xlu0 %5227  ;;  %v5362_v55 = vpack.c.bf16 %v5331_v1, %v5330_v52  ;;  %v10193_v4 = vpop.eup %10192  ;;  %10202 = vrcp.f32 %v5231_v54  ;;  %v5334_v19 = vmul.f32 %v10191_v22, %v12343_v25  ;;  %v6194_v54 = vld [vmem:[%s10526_s24 + $0x14] sm:$0xf]  ;;  %v6195_v1 = vld [vmem:[%s10526_s24 + $0x18] sm:$0xf] }
 0x754   : > { %6697 = vrot.lane.b32.xlu0 %v9838_v57, %s10478_s16  ;;  %v10195_v12 = vpop.eup %10194  ;;  %10204 = vrcp.f32 %v5228_v28  ;;  %v5336_v27 = vmul.f32 %v10193_v4, %v12325_v33  ;;  %v9832_v25 = vld [vmem:[%s10518_s21 + $0x10] sm:$0xff]   ;;  %v6226_v53 = vmul.bf16 1043676725, %v6194_v54  ;;  %v6239_v33 = vmul.bf16 1043676725, %v6207_v63  ;;  %v9842_v63 = vld [vmem:[%s10518_s21 + $0x60] sm:$0xff]  }
 0x755   : > { %9469 = vmatprep.mubr.msk.bf16.mxu0 %vm438_vm0, %v5362_v55  ;;  %10206 = vrcp.f32 %v5246_v34  ;;  %v5335_v61 = vmul.f32 %v10195_v12, %v12351_v35  ;;  %v6225_v35 = vmul.bf16 1043676725, %v6193_v0  ;;  %v6240_v34 = vmul.bf16 1043676725, %v6208_v21  ;;  %v6213_v28 = vld [vmem:[%s10526_s24 + $0x60] sm:$0xf] }
 0x756   : > { %9470 = vmatmul.mubr.msk.bf16.vlgmr.msra.gmra.mxu0 %vm438_vm0, %v5363_v9  ;;  %v5243_v58 = vpop.xlane.xlu1 %5242  ;;  %v5365_v22 = vpack.c.bf16 %v5337_v60, %v5336_v27  ;;  %v6227_v12 = vmul.bf16 1043676725, %v6195_v1  ;;  %v6228_v60 = vmul.bf16 1043676725, %v6196_v30 }
 0x757   : > { %9482 = vmatpush3.bf16.msra.mxu0 %v12019_v39  ;;  %v5240_v32 = vpop.xlane.xlu0 %5239  ;;  %10208 = vrcp.f32 %v5243_v58  ;;  %v5364_v10 = vpack.c.bf16 %v5335_v61, %v5334_v19  ;;  %v9840_v39 = vld [vmem:[%s10518_s21 + $0x68] sm:$0xff]   ;;  %v8649_v52 = vcombine.low %v6225_v35, %v6226_v53  ;;  %v8668_v4 = vcombine.low %v6239_v33, %v6240_v34  ;;  %v9833_v58 = vld [vmem:[%s10518_s21 + $0x38] sm:$0xff]  }
 0x758   : > { %9483 = vmatprep.subr.bf16.mxu0 %v12261_v36  ;;  %6683 = vrot.lane.b32.xlu0 %v8667_v5, %s10478_s16  ;;  %10210 = vrcp.f32 %v5240_v32  ;;  %v10197_v57 = vpop.eup %10196  ;;  %v6245_v19 = vmul.bf16 1043676725, %v6213_v28  ;;  %v6216_v35 = vld [vmem:[%s10526_s24 + $0x6c] sm:$0xf] }
 0x759   : > { %9477 = vmatprep.mubr.msk.bf16.mxu1 %vm438_vm0, %v5364_v10  ;;  %v10199_v55 = vpop.eup %10198  ;;  %v5340_v0 = vmul.f32 %v10197_v57, %v12359_v46  ;;  %v6248_v28 = vmul.bf16 1043676725, %v6216_v35 }
 0x75a   : > { %v5261_v11 = vpop.xlane.xlu1 %5260  ;;  %9478 = vmatmul.mubr.msk.bf16.vlgmr.msra.gmra.mxu1 %vm438_vm0, %v5365_v22  ;;  %v5341_v54 = vmul.f32 %v10199_v55, %v12355_v17  ;;  %v8650_v17 = vcombine.low %v6227_v12, %v6228_v60  ;;  %v6201_v55 = vld [vmem:[%s10526_s24 + $0x30] sm:$0xf]  ;;  %v6203_v60 = vld [vmem:[%s10526_s24 + $0x38] sm:$0xf] }
 0x75b   : > { %9484 = vmatpush3.bf16.msra.mxu0 %v12261_v36  ;;  %v5258_v37 = vpop.xlane.xlu0 %5257  ;;  %9490 = vmatpush3.bf16.msra.mxu1 %v12024_v56  ;;  %v6214_v36 = vld [vmem:[%s10526_s24 + $0x64] sm:$0xf]  ;;  %10212 = vrcp.f32 %v5261_v11 }
 0x75c   : > { %9497 = vmatprep.subr.bf16.mxu0 %v12265_v50  ;;  %9491 = vmatprep.subr.bf16.mxu1 %v12263_v44  ;;  %v10201_v56 = vpop.eup %10200  ;;  %v6246_v32 = vmul.bf16 1043676725, %v6214_v36  ;;  %10214 = vrcp.f32 %v5258_v37  ;;  %v5367_v33 = vpack.c.bf16 %v5341_v54, %v5340_v0 }
 0x75d   : > { %6430 = vrot.lane.b32.xlu1 %v9832_v25, %s10478_s16  ;;  %6877 = vrot.lane.b32.xlu0 %v9840_v39, %s10478_s16  ;;  %v6215_v25 = vld [vmem:[%s10526_s24 + $0x68] sm:$0xf] }
 0x75e   : > { %v5273_v9 = vpop.xlane.xlu1 %5272  ;;  %v6247_v30 = vmul.bf16 1043676725, %v6215_v25  ;;  %v6210_v25 = vld [vmem:[%s10526_s24 + $0x54] sm:$0xf] }
 0x75f   : > { %v5270_v5 = vpop.xlane.xlu0 %5269  ;;  %9492 = vmatpush3.bf16.msra.mxu1 %v12263_v44  ;;  %10216 = vrcp.f32 %v5273_v9  ;;  %v6242_v35 = vmul.bf16 1043676725, %v6210_v25  ;;  %v9848_v25 = vld [vmem:[%s10941_s25 + $0x38] sm:$0xff]  }
 0x760   : > { %v10203_v61 = vpop.eup %10202  ;;  %9505 = vmatprep.subr.bf16.mxu1 %v12267_v59  ;;  %v8680_v9 = vcombine.low %v6247_v30, %v6248_v28 }
 0x761   : > { %6416 = vrot.lane.b32.xlu1 %v8649_v52, %s10478_s16  ;;  %v10205_v27 = vpop.eup %10204  ;;  %v5339_v44 = vmul.f32 %v10203_v61, %v12377_v29  ;;  %6685 = vrot.lane.b32.xlu0 %v8668_v4, %s10478_s16  ;;  %v8679_v29 = vcombine.low %v6245_v19, %v6246_v32  ;;  %v6233_v4 = vmul.bf16 1043676725, %v6201_v55  ;;  %v6204_v19 = vld [vmem:[%s10526_s24 + $0x3c] sm:$0xf] }
 0x762   : > { %v10207_v21 = vpop.eup %10206  ;;  %v5255_v10 = vpop.xlane.xlu1 %5254  ;;  %v5338_v46 = vmul.f32 %v10205_v27, %v12379_v51  ;;  %v5345_v51 = vmul.f32 %v10201_v56, %v12367_v16  ;;  %v9837_v27 = vld [vmem:[%s10518_s21 + $0x58] sm:$0xff]  }
 0x763   : > { %v5252_v22 = vpop.xlane.xlu0 %5251  ;;  %10218 = vrcp.f32 %v5255_v10  ;;  %v5344_v37 = vmul.f32 %v10207_v21, %v12369_v38 }
 0x764   : > { %v10209_v53 = vpop.eup %10208  ;;  %10220 = vrcp.f32 %v5252_v22  ;;  %v5366_v39 = vpack.c.bf16 %v5339_v44, %v5338_v46  ;;  %v6235_v44 = vmul.bf16 1043676725, %v6203_v60 }
 0x765   : > { %6610 = vrot.lane.b32.xlu1 %v9833_v58, %s10478_s16  ;;  %v10211_v34 = vpop.eup %10210  ;;  %10222 = vrcp.f32 %v5270_v5  ;;  %v5343_v11 = vmul.f32 %v10209_v53, %v12387_v20  ;;  %6875 = vrot.lane.b32.xlu0 %v9842_v63, %s10478_s16  ;;  %v6202_v20 = vld [vmem:[%s10526_s24 + $0x34] sm:$0xf]  ;;  %v5369_v38 = vpack.c.bf16 %v5345_v51, %v5344_v37  ;;  %v6236_v63 = vmul.bf16 1043676725, %v6204_v19  ;;  %v6211_v53 = vld [vmem:[%s10526_s24 + $0x58] sm:$0xf] }
 0x766   : > { %9485 = vmatprep.mubr.msk.bf16.mxu0 %vm438_vm0, %v5366_v39  ;;  %v5267_v57 = vpop.xlane.xlu1 %5266  ;;  %v5342_v1 = vmul.f32 %v10211_v34, %v12389_v8  ;;  %v9835_v8 = vld [vmem:[%s10518_s21 + $0x30] sm:$0xff]   ;;  %v6234_v36 = vmul.bf16 1043676725, %v6202_v20  ;;  %v6212_v39 = vld [vmem:[%s10526_s24 + $0x5c] sm:$0xf] }
 0x767   : > { %v5264_v52 = vpop.xlane.xlu0 %5263  ;;  %10224 = vrcp.f32 %v5267_v57  ;;  %9486 = vmatmul.mubr.msk.bf16.vlgmr.msra.gmra.mxu0 %vm438_vm0, %v5367_v33  ;;  %v8662_v46 = vcombine.low %v6235_v44, %v6236_v63  ;;  %v9841_v33 = vld [vmem:[%s10518_s21 + $0x78] sm:$0xff]   ;;  %v6244_v34 = vmul.bf16 1043676725, %v6212_v39  ;;  %v9843_v37 = vld [vmem:[%s10518_s21 + $0x70] sm:$0xff]  }
 0x768   : > { %9498 = vmatpush3.bf16.msra.mxu0 %v12265_v50  ;;  %10226 = vrcp.f32 %v5264_v52  ;;  %v5368_v16 = vpack.c.bf16 %v5343_v11, %v5342_v1  ;;  %v10213_v50 = vpop.eup %10212  ;;  %v8661_v56 = vcombine.low %v6233_v4, %v6234_v36  ;;  %v6218_v11 = vld [vmem:[%s10526_s24 + $0x74] sm:$0xf]  ;;  %v6219_v52 = vld [vmem:[%s10526_s24 + $0x78] sm:$0xf]  ;;  %v6220_v1 = vld [vmem:[%s10526_s24 + $0x7c] sm:$0xf] }
 0x769   : > { %6418 = vrot.lane.b32.xlu1 %v8650_v17, %s10478_s16  ;;  %9499 = vmatprep.subr.bf16.mxu0 %v12269_v45  ;;  %v10215_v5 = vpop.eup %10214  ;;  %v5349_v54 = vmul.f32 %v10213_v50, %v12396_v31  ;;  %v6209_v17 = vld [vmem:[%s10526_s24 + $0x50] sm:$0xf]  ;;  %v6250_v57 = vmul.bf16 1043676725, %v6218_v11  ;;  %v6251_v30 = vmul.bf16 1043676725, %v6219_v52 }
 0x76a   : > { %6861 = vrot.lane.b32.xlu0 %v8679_v29, %s10478_s16  ;;  %9493 = vmatprep.mubr.msk.bf16.mxu1 %vm438_vm0, %v5368_v16  ;;  %v5348_v0 = vmul.f32 %v10215_v5, %v12398_v40  ;;  %v6243_v29 = vmul.bf16 1043676725, %v6211_v53  ;;  %v6252_v28 = vmul.bf16 1043676725, %v6220_v1  ;;  %v9852_v39 = vld [vmem:[%s10941_s25 + $0x58] sm:$0xff]  }
 0x76b   : > { %9494 = vmatmul.mubr.msk.bf16.vlgmr.msra.gmra.mxu1 %vm438_vm0, %v5369_v38  ;;  %v5282_v20 = vpop.xlane.xlu0 %5281 }
 0x76c   : > { %9500 = vmatpush3.bf16.msra.mxu0 %v12269_v45  ;;  %9506 = vmatpush3.bf16.msra.mxu1 %v12267_v59  ;;  %v10217_v12 = vpop.eup %10216  ;;  %v5371_v22 = vpack.c.bf16 %v5349_v54, %v5348_v0  ;;  %v8686_v55 = vcombine.low %v6251_v30, %v6252_v28 }
 0x76d   : > { %9507 = vmatprep.subr.bf16.mxu1 %v12272_v48  ;;  %9513 = vmatprep.subr.bf16.mxu0 %v12275_v2  ;;  %v5353_v31 = vmul.f32 %v10217_v12, %v12405_v26  ;;  %v9839_v26 = vld [vmem:[%s10518_s21 + $0x50] sm:$0xff]  }
 0x76e   : > { %6608 = vrot.lane.b32.xlu1 %v9835_v8, %s10478_s16  ;;  %6863 = vrot.lane.b32.xlu0 %v8680_v9, %s10478_s16 }
 0x76f   : > { %v12609_v38 = vpop.xlane.xlu0 %5293 }
 0x770   : > { %v10219_v61 = vpop.eup %10218  ;;  %9508 = vmatpush3.bf16.msra.mxu1 %v12272_v48 }
 0x771   : > { %v10221_v45 = vpop.eup %10220  ;;  %9521 = vmatprep.subr.bf16.mxu1 %v12277_v23  ;;  %v5347_v59 = vmul.f32 %v10219_v61, %v12414_v24 }
 0x772   : > { %v10223_v58 = vpop.eup %10222  ;;  %v5346_v32 = vmul.f32 %v10221_v45, %v12416_v13  ;;  %6594 = vrot.lane.b32.xlu1 %v8661_v56, %s10478_s16  ;;  %v5276_v16 = vpop.xlane.xlu1 %5275 }
 0x773   : > { %v5352_v40 = vmul.f32 %v10223_v58, %v12407_v15 }
 0x774   : > { %v10225_v48 = vpop.eup %10224  ;;  %v5370_v21 = vpack.c.bf16 %v5347_v59, %v5346_v32 }
 0x775   : > { %v10227_v10 = vpop.eup %10226  ;;  %v5351_v24 = vmul.f32 %v10225_v48, %v12423_v41  ;;  %v5373_v15 = vpack.c.bf16 %v5353_v31, %v5352_v40  ;;  %v9849_v40 = vld [vmem:[%s10941_s25] sm:$0xff]   ;;  %v9846_v31 = vld [vmem:[%s10941_s25 + $0x28] sm:$0xff]  }
 0x776   : > { %9501 = vmatprep.mubr.msk.bf16.mxu0 %vm438_vm0, %v5370_v21  ;;  %v5350_v13 = vmul.f32 %v10227_v10, %v12425_v47  ;;  %6788 = vrot.lane.b32.xlu1 %v9837_v27, %s10478_s16  ;;  %v6241_v47 = vmul.bf16 1043676725, %v6209_v17  ;;  %v12611_v4 = vpop.xlane.xlu0 %5287  ;;  %v9847_v10 = vld [vmem:[%s10941_s25 + $0x8] sm:$0xff]  }
 0x777   : > { %9502 = vmatmul.mubr.msk.bf16.vlgmr.msra.gmra.mxu0 %vm438_vm0, %v5371_v22  ;;  %7409 = vrot.lane.b32.xlu0 %v9847_v10, %s10478_s16 }
 0x778   : > { %9514 = vmatpush3.bf16.msra.mxu0 %v12275_v2  ;;  %v5372_v41 = vpack.c.bf16 %v5351_v24, %v5350_v13  ;;  %v8673_v2 = vcombine.low %v6241_v47, %v6242_v35  ;;  %v9845_v24 = vld [vmem:[%s10941_s25 + $0x10] sm:$0xff]   ;;  %v9855_v47 = vld [vmem:[%s10941_s25 + $0x40] sm:$0xff]  }
 0x779   : > { %9515 = vmatprep.subr.bf16.mxu0 %v12469_v43 }
 0x77a   : > { %9509 = vmatprep.mubr.msk.bf16.mxu1 %vm438_vm0, %v5372_v41  ;;  %6596 = vrot.lane.b32.xlu1 %v8662_v46, %s10478_s16  ;;  %v9851_v46 = vld [vmem:[%s10941_s25 + $0x20] sm:$0xff]  }
 0x77b   : > { %9510 = vmatmul.mubr.msk.bf16.vlgmr.msra.gmra.mxu1 %vm438_vm0, %v5373_v15  ;;  %7407 = vrot.lane.b32.xlu0 %v9849_v40, %s10478_s16  ;;  %v9853_v15 = vld [vmem:[%s10941_s25 + $0x48] sm:$0xff]  }
 0x77c   : > { %9516 = vmatpush3.bf16.msra.mxu0 %v12469_v43  ;;  %9522 = vmatpush3.bf16.msra.mxu1 %v12277_v23  ;;  %v8674_v23 = vcombine.low %v6243_v29, %v6244_v34  ;;  %v6217_v43 = vld [vmem:[%s10526_s24 + $0x70] sm:$0xf] }
 0x77d   : > { %9523 = vmatprep.subr.bf16.mxu1 %v12447_v6  ;;  %v6249_v51 = vmul.bf16 1043676725, %v6217_v43  ;;  %v9854_v29 = vld [vmem:[%s10941_s25 + $0x50] sm:$0xff]  }
 0x77e   : > { %6786 = vrot.lane.b32.xlu1 %v9839_v26, %s10478_s16  ;;  %v9850_v26 = vld [vmem:[%s10941_s25 + $0x30] sm:$0xff]  }
 0x77f   : > { %7549 = vrot.lane.b32.xlu0 %v9851_v46, %s10478_s16 }
 0x780   : > { %9524 = vmatpush3.bf16.msra.mxu1 %v12447_v6  ;;  %v8685_v6 = vcombine.low %v6249_v51, %v6250_v57 }
 0x782   : > { %6772 = vrot.lane.b32.xlu1 %v8673_v2, %s10478_s16 }
 0x783   : > { %7693 = vrot.lane.b32.xlu0 %v9853_v15, %s10478_s16 }
 0x786   : > { %6966 = vrot.lane.b32.xlu1 %v9841_v33, %s10478_s16 }
 0x787   : > { %7691 = vrot.lane.b32.xlu0 %v9855_v47, %s10478_s16 }
 0x78a   : > { %6774 = vrot.lane.b32.xlu1 %v8674_v23, %s10478_s16 }
 0x78e   : > { %6964 = vrot.lane.b32.xlu1 %v9843_v37, %s10478_s16 }
 0x792   : > { %6950 = vrot.lane.b32.xlu1 %v8685_v6, %s10478_s16 }
 0x796   : > { %6952 = vrot.lane.b32.xlu1 %v8686_v55, %s10478_s16  ;;  %v13773_v55 = vld [vmem:[#allocation34_spill] sm:$0xff] }
 0x79b   : > { %v5285_v8 = vpop.xlane.xlu1 %5284 }
 0x79c   : > { %10228 = vrcp.f32 %v5285_v8 }
 0x79d   : > { %10230 = vrcp.f32 %v5276_v16 }
 0x79e   : > { %10232 = vrcp.f32 %v5282_v20 }
 0x79f   : > { %v5297_v36 = vpop.xlane.xlu1 %5296 }
 0x7a3   : > { %v12613_v9 = vpop.permute.xlu1 %6432  ;;  %v5279_v50 = vpop.xlane.xlu0 %5278 }
 0x7a4   : > { %10234 = vrcp.f32 %v5279_v50  ;;  %9707 = vmatprep.subr.msk.bf16.mxu1 %vm438_vm0, %v12613_v9 }
 0x7a5   : > { %10236 = vrcp.f32 %v5297_v36 }
 0x7a6   : > { %10238 = vrcp.f32 %v12611_v4 }
 0x7a7   : > { %v6344_v5 = vpop.permute.xlu0 %6343  ;;  %10240 = vrcp.f32 %v12609_v38 }
 0x7a8   : > { %9705 = vmatprep.subr.msk.bf16.mxu0 %vm438_vm0, %v6344_v5  ;;  %v6355_v63 = vsel %vm438_vm0, %v6344_v5, 0 }
 0x7a9   : > { %v10229_v12 = vpop.eup %10228 }
 0x7aa   : > { %v10231_v60 = vpop.eup %10230  ;;  %v5357_v59 = vmul.f32 %v10229_v12, %v12452_v3 }
 0x7ab   : > { %v6342_v56 = vpop.permute.xlu0 %6341  ;;  %v10233_v61 = vpop.eup %10232  ;;  %v5354_v0 = vmul.f32 %v10231_v60, %v12439_v18 }
 0x7ac   : > { %v5356_v58 = vmul.f32 %v10233_v61, %v12431_v7  ;;  %v6352_v18 = vsel %vm438_vm0, %v6342_v56, 0 }
 0x7ae   : > { %v5375_v44 = vpack.c.bf16 %v5357_v59, %v5356_v58 }
 0x7af   : > { %v6328_v19 = vpop.permute.xlu0 %6327 }
 0x7b1   : > { %v10235_v45 = vpop.eup %10234 }
 0x7b2   : > { %v5355_v54 = vmul.f32 %v10235_v45, %v12460_v62  ;;  %v9844_v62 = vld [vmem:[%s10941_s25 + $0x18] sm:$0xff]   ;;  %v10237_v11 = vpop.eup %10236 }
 0x7b3   : > { %v6522_v32 = vpop.permute.xlu0 %6521  ;;  %7480 = vrot.lane.b32.xlu1 %v9844_v62, %s10478_s16  ;;  %v10239_v37 = vpop.eup %10238  ;;  %v5361_v6 = vmul.f32 %v10237_v11, %v12456_v14  ;;  %v6444_v14 = vsel %vm438_vm0, %v12613_v9, 0  ;;  %v10436_v11 = vld [vmem:[%s13732_s3 + $0x10] sm:$0xff] }
 0x7b4   : > { %v5374_v27 = vpack.c.bf16 %v5355_v54, %v5354_v0  ;;  %v6533_v22 = vsel %vm438_vm0, %v6522_v32, 0  ;;  %v10241_v52 = vpop.eup %10240  ;;  %v5358_v30 = vmul.f32 %v10239_v37, %v12443_v49 }
 0x7b5   : > { %v5360_v20 = vmul.f32 %v10241_v52, %v13773_v55 }
 0x7b6   : > { %9517 = vmatprep.mubr.msk.bf16.mxu0 %vm438_vm0, %v5374_v27 }
 0x7b7   : > { %9518 = vmatmul.mubr.msk.bf16.vlgmr.msra.gmra.mxu0 %vm438_vm0, %v5375_v44  ;;  %v6330_v48 = vpop.permute.xlu0 %6329  ;;  %7478 = vrot.lane.b32.xlu1 %v9845_v24, %s10478_s16  ;;  %v5377_v36 = vpack.c.bf16 %v5361_v6, %v5360_v20  ;;  %v10437_v6 = vld [vmem:[%s13732_s3 + $0x18] sm:$0xff] }
 0x7b8   : > { %9530 = vmatpush3.bf16.xpose.msra.mxu0 %v6355_v63  ;;  %9533 = vmatprep.mubr.msk.bf16.mxu0 %vm438_vm0, %v6328_v19 }
 0x7b9   : > { %9706 = vmatprep.subr.msk.bf16.mxu0 %vm438_vm0, %v6342_v56 }
 0x7bb   : > { %v6520_v7 = vpop.permute.xlu0 %6519  ;;  %7551 = vrot.lane.b32.xlu1 %v9846_v31, %s10478_s16 }
 0x7bc   : > { %v6530_v17 = vsel %vm438_vm0, %v6520_v7, 0 }
 0x7bf   : > { %v6506_v3 = vpop.permute.xlu0 %6505  ;;  %7622 = vrot.lane.b32.xlu1 %v9848_v25, %s10478_s16 }
 0x7c0   : > { %9532 = vmatpush3.bf16.xpose.msra.mxu0 %v6352_v18 }
 0x7c1   : > { %9709 = vmatprep.subr.msk.bf16.mxu0 %vm438_vm0, %v6522_v32 }
 0x7c3   : > { %v6700_v21 = vpop.permute.xlu0 %6699  ;;  %7620 = vrot.lane.b32.xlu1 %v9850_v26, %s10478_s16 }
 0x7c4   : > { %v6711_v53 = vsel %vm438_vm0, %v6700_v21, 0 }
 0x7c7   : > { %9534 = vmatmul.mubr.msk.bf16.vlgmr.msra.gmra.mxu0 %vm438_vm0, %v6330_v48  ;;  %v6508_v13 = vpop.permute.xlu0 %6507  ;;  %7764 = vrot.lane.b32.xlu1 %v9852_v39, %s10478_s16 }
 0x7c8   : > { %9546 = vmatpush3.bf16.xpose.msra.mxu0 %v6533_v22  ;;  %9549 = vmatprep.mubr.msk.bf16.mxu0 %vm438_vm0, %v6506_v3 }
 0x7c9   : > { %9710 = vmatprep.subr.msk.bf16.mxu0 %vm438_vm0, %v6520_v7 }
 0x7cb   : > { %v6698_v41 = vpop.permute.xlu0 %6697  ;;  %7762 = vrot.lane.b32.xlu1 %v9854_v29, %s10478_s16 }
 0x7cc   : > { %v6708_v43 = vsel %vm438_vm0, %v6698_v41, 0 }
 0x7cf   : > { %v6684_v2 = vpop.permute.xlu0 %6683 }
 0x7d0   : > { %9548 = vmatpush3.bf16.xpose.msra.mxu0 %v6530_v17 }
 0x7d1   : > { %9713 = vmatprep.subr.msk.bf16.mxu0 %vm438_vm0, %v6700_v21 }
 0x7d3   : > { %v6878_v34 = vpop.permute.xlu0 %6877 }
 0x7d4   : > { %v5291_v35 = vpop.xlane.xlu1 %5290  ;;  %v6889_v4 = vsel %vm438_vm0, %v6878_v34, 0 }
 0x7d5   : > { %10242 = vrcp.f32 %v5291_v35 }
 0x7d7   : > { %9550 = vmatmul.mubr.msk.bf16.vlgmr.msra.gmra.mxu0 %vm438_vm0, %v6508_v13  ;;  %v6686_v57 = vpop.permute.xlu0 %6685 }
 0x7d8   : > { %v6431_v33 = vpop.permute.xlu1 %6430  ;;  %9562 = vmatpush3.bf16.xpose.msra.mxu0 %v6711_v53  ;;  %9565 = vmatprep.mubr.msk.bf16.mxu0 %vm438_vm0, %v6684_v2 }
 0x7d9   : > { %9714 = vmatprep.subr.msk.bf16.mxu0 %vm438_vm0, %v6698_v41  ;;  %v6441_v56 = vsel %vm438_vm0, %v6431_v33, 0 }
 0x7db   : > { %v6876_v38 = vpop.permute.xlu0 %6875 }
 0x7dc   : > { %v6417_v23 = vpop.permute.xlu1 %6416  ;;  %v6886_v5 = vsel %vm438_vm0, %v6876_v38, 0 }
 0x7e0   : > { %v6611_v51 = vpop.permute.xlu1 %6610  ;;  %9564 = vmatpush3.bf16.xpose.msra.mxu0 %v6708_v43 }
 0x7e1   : > { %9717 = vmatprep.subr.msk.bf16.mxu0 %vm438_vm0, %v6878_v34  ;;  %v6622_v19 = vsel %vm438_vm0, %v6611_v51, 0 }
 0x7e2   : > { %v10243_v1 = vpop.eup %10242 }
 0x7e3   : > { %v5359_v28 = vmul.f32 %v10243_v1, %v12487_v42  ;;  %v6862_v42 = vpop.permute.xlu0 %6861 }
 0x7e4   : > { %v6419_v16 = vpop.permute.xlu1 %6418 }
 0x7e5   : > { %v5376_v8 = vpack.c.bf16 %v5359_v28, %v5358_v30 }
 0x7e7   : > { %9525 = vmatprep.mubr.msk.bf16.mxu1 %vm438_vm0, %v5376_v8  ;;  %9566 = vmatmul.mubr.msk.bf16.vlgmr.msra.gmra.mxu0 %vm438_vm0, %v6686_v57  ;;  %v6864_v9 = vpop.permute.xlu0 %6863 }
 0x7e8   : > { %9526 = vmatmul.mubr.msk.bf16.vlgmr.msra.gmra.mxu1 %vm438_vm0, %v5377_v36  ;;  %v6609_v49 = vpop.permute.xlu1 %6608  ;;  %9578 = vmatpush3.bf16.xpose.msra.mxu0 %v6889_v4 }
 0x7e9   : > { %9538 = vmatpush3.bf16.xpose.msra.mxu1 %v6444_v14  ;;  %9541 = vmatprep.mubr.msk.bf16.mxu1 %vm438_vm0, %v6417_v23  ;;  %v6619_v45 = vsel %vm438_vm0, %v6609_v49, 0 }
 0x7ea   : > { %9708 = vmatprep.subr.msk.bf16.mxu1 %vm438_vm0, %v6431_v33  ;;  %9718 = vmatprep.subr.msk.bf16.mxu0 %vm438_vm0, %v6876_v38 }
 0x7eb   : > { %9581 = vmatprep.mubr.msk.bf16.mxu0 %vm438_vm0, %v6862_v42  ;;  %v7410_v41 = vpop.permute.xlu0 %7409 }
 0x7ec   : > { %v6595_v50 = vpop.permute.xlu1 %6594 }
 0x7ef   : > { %v7408_v47 = vpop.permute.xlu0 %7407 }
 0x7f0   : > { %v6789_v12 = vpop.permute.xlu1 %6788  ;;  %9580 = vmatpush3.bf16.xpose.msra.mxu0 %v6886_v5 }
 0x7f1   : > { %9540 = vmatpush3.bf16.xpose.msra.mxu1 %v6441_v56  ;;  %v6800_v0 = vsel %vm438_vm0, %v6789_v12, 0  ;;  %9593 = vmatprep.subr.bf16.mxu0 %v7410_v41 }
 0x7f2   : > { %9711 = vmatprep.subr.msk.bf16.mxu1 %vm438_vm0, %v6611_v51 }
 0x7f4   : > { %v6597_v60 = vpop.permute.xlu1 %6596 }
 0x7f7   : > { %9582 = vmatmul.mubr.msk.bf16.vlgmr.msra.gmra.mxu0 %vm438_vm0, %v6864_v9 }
 0x7f8   : > { %9542 = vmatmul.mubr.msk.bf16.vlgmr.msra.gmra.mxu1 %vm438_vm0, %v6419_v16  ;;  %v6787_v61 = vpop.permute.xlu1 %6786  ;;  %9594 = vmatpush3.bf16.msra.mxu0 %v7410_v41 }
 0x7f9   : > { %9554 = vmatpush3.bf16.xpose.msra.mxu1 %v6622_v19  ;;  %9557 = vmatprep.mubr.msk.bf16.mxu1 %vm438_vm0, %v6595_v50  ;;  %v6797_v58 = vsel %vm438_vm0, %v6787_v61, 0 }
 0x7fa   : > { %9712 = vmatprep.subr.msk.bf16.mxu1 %vm438_vm0, %v6609_v49  ;;  %9595 = vmatprep.subr.bf16.mxu0 %v7408_v47 }
 0x7fc   : > { %v6773_v59 = vpop.permute.xlu1 %6772  ;;  %9596 = vmatpush3.bf16.msra.mxu0 %v7408_v47 }
 0x800   : > { %v6967_v54 = vpop.permute.xlu1 %6966 }
 0x801   : > { %9556 = vmatpush3.bf16.xpose.msra.mxu1 %v6619_v45  ;;  %v6978_v44 = vsel %vm438_vm0, %v6967_v54, 0 }
 0x802   : > { %9715 = vmatprep.subr.msk.bf16.mxu1 %vm438_vm0, %v6789_v12 }
 0x804   : > { %v6775_v32 = vpop.permute.xlu1 %6774 }
 0x808   : > { %9558 = vmatmul.mubr.msk.bf16.vlgmr.msra.gmra.mxu1 %vm438_vm0, %v6597_v60  ;;  %v6965_v27 = vpop.permute.xlu1 %6964  ;;  %v10438_v60 = vld [vmem:[%s13732_s3 + $0x30] sm:$0xff] }
 0x809   : > { %9570 = vmatpush3.bf16.xpose.msra.mxu1 %v6800_v0  ;;  %9573 = vmatprep.mubr.msk.bf16.mxu1 %vm438_vm0, %v6773_v59  ;;  %v6975_v48 = vsel %vm438_vm0, %v6965_v27, 0  ;;  %v10439_v59 = vld [vmem:[%s13732_s3] sm:$0xff] }
 0x80a   : > { %9716 = vmatprep.subr.msk.bf16.mxu1 %vm438_vm0, %v6787_v61 }
 0x80c   : > { %v6951_v63 = vpop.permute.xlu1 %6950 }
 0x810   : > { %v6953_v7 = vpop.permute.xlu1 %6952 }
 0x811   : > { %9572 = vmatpush3.bf16.xpose.msra.mxu1 %v6797_v58 }
 0x812   : > { %9719 = vmatprep.subr.msk.bf16.mxu1 %vm438_vm0, %v6967_v54 }
 0x816   : > { %v12703_v18 = vpop.f32.mrf.mxu0 }
 0x818   : > { %9574 = vmatmul.mubr.msk.bf16.vlgmr.msra.gmra.mxu1 %vm438_vm0, %v6775_v32  ;;  %v12705_v3 = vpop.f32.mrf.mxu0  ;;  %v10440_v32 = vld [vmem:[%s13732_s3 + $0x38] sm:$0xff] }
 0x819   : > { %9586 = vmatpush3.bf16.xpose.msra.mxu1 %v6978_v44  ;;  %9589 = vmatprep.mubr.msk.bf16.mxu1 %vm438_vm0, %v6951_v63  ;;  %v10441_v63 = vld [vmem:[%s13732_s3 + $0x8] sm:$0xff] }
 0x81a   : > { %9720 = vmatprep.subr.msk.bf16.mxu1 %vm438_vm0, %v6965_v27  ;;  %v12707_v62 = vpop.f32.mrf.mxu0  ;;  %v12731_v2 = vpop.f32.mrf.mxu1 }
 0x81c   : > { %v12709_v21 = vpop.f32.mrf.mxu0  ;;  %v12738_v33 = vpop.f32.mrf.mxu1 }
 0x81e   : > { %v12745_v43 = vpop.f32.mrf.mxu1 }
 0x820   : > { %v12754_v1 = vpop.f32.mrf.mxu1 }
 0x821   : > { %9588 = vmatpush3.bf16.xpose.msra.mxu1 %v6975_v48  ;;  %13783 = vst [vmem:[#allocation43_spill] sm:$0xff] %v12754_v1 }
 0x825   : > { %v7481_v25 = vpop.permute.xlu1 %7480 }
 0x826   : > { %9601 = vmatprep.subr.bf16.mxu1 %v7481_v25 }
 0x827   : > { %v12711_v10 = vpop.f32.mrf.mxu0 }
 0x828   : > { %9590 = vmatmul.mubr.msk.bf16.vlgmr.msra.gmra.mxu1 %vm438_vm0, %v6953_v7  ;;  %13774 = vst [vmem:[#allocation34_spill] sm:$0xff] %v12711_v10  ;;  %v10442_v7 = vld [vmem:[%s13732_s3 + $0x20] sm:$0xff] }
 0x829   : > { %v12713_v22 = vpop.f32.mrf.mxu0  ;;  %9602 = vmatpush3.bf16.msra.mxu1 %v7481_v25  ;;  %v7479_v26 = vpop.permute.xlu1 %7478 }
 0x82a   : > { %13775 = vst [vmem:[#allocation35_spill] sm:$0xff] %v12713_v22  ;;  %9603 = vmatprep.subr.bf16.mxu1 %v7479_v26 }
 0x82b   : > { %v12715_v24 = vpop.f32.mrf.mxu0  ;;  %v12761_v28 = vpop.f32.mrf.mxu1 }
 0x82c   : > { %13784 = vst [vmem:[#allocation44_spill] sm:$0xff] %v12761_v28 }
 0x82d   : > { %v12717_v40 = vpop.f32.mrf.mxu0  ;;  %9604 = vmatpush3.bf16.msra.mxu1 %v7479_v26  ;;  %v12733_v53 = vpop.permute.xlu1 %7551 }
 0x82e   : > { %13776 = vst [vmem:[#allocation36_spill] sm:$0xff] %v12717_v40  ;;  %9609 = vmatprep.subr.bf16.mxu0 %v12733_v53  ;;  %v12765_v20 = vpop.f32.mrf.mxu1 }
 0x82f   : > { %13785 = vst [vmem:[#allocation45_spill] sm:$0xff] %v12765_v20 }
 0x830   : > { %v12767_v16 = vpop.f32.mrf.mxu1 }
 0x831   : > { %v12740_v29 = vpop.permute.xlu1 %7622 }
 0x832   : > { %9617 = vmatprep.subr.bf16.mxu1 %v12740_v29  ;;  %v12769_v38 = vpop.f32.mrf.mxu1 }
 0x833   : > { %13786 = vst [vmem:[#allocation46_spill] sm:$0xff] %v12769_v38 }
 0x837   : > { %v12719_v31 = vpop.f32.mrf.mxu0 }
 0x838   : > { %13777 = vst [vmem:[#allocation37_spill] sm:$0xff] %v12719_v31 }
 0x839   : > { %v12721_v13 = vpop.f32.mrf.mxu0 }
 0x83a   : > { %13778 = vst [vmem:[#allocation38_spill] sm:$0xff] %v12721_v13  ;;  %v9857_v13 = vld [vmem:[%s10941_s25 + $0x68] sm:$0xff]  }
 0x83b   : > { %v12723_v46 = vpop.f32.mrf.mxu0  ;;  %v12771_v8 = vpop.f32.mrf.mxu1 }
 0x83c   : > { %13787 = vst [vmem:[#allocation47_spill] sm:$0xff] %v12771_v8 }
 0x83d   : > { %v12725_v17 = vpop.f32.mrf.mxu0  ;;  %v12773_v4 = vpop.f32.mrf.mxu1 }
 0x83e   : > { %13779 = vst [vmem:[#allocation39_spill] sm:$0xff] %v12725_v17  ;;  %13788 = vst [vmem:[#allocation48_spill] sm:$0xff] %v12773_v4 }
 0x83f   : > { %v12775_v36 = vpop.f32.mrf.mxu1 }
 0x841   : > { %v12777_v14 = vpop.f32.mrf.mxu1 }
 0x842   : > { %13789 = vst [vmem:[#allocation49_spill] sm:$0xff] %v12777_v14 }
 0x877   : > { %v12727_v15 = vpop.f32.mrf.mxu0 }
 0x878   : > { %13780 = vst [vmem:[#allocation40_spill] sm:$0xff] %v12727_v15  ;;  %v10458_v15 = vld [vmem:[%s13732_s3 + $0xa0] sm:$0xff] }
 0x879   : > { %v12729_v35 = vpop.f32.mrf.mxu0 }
 0x87a   : > { %13781 = vst [vmem:[#allocation41_spill] sm:$0xff] %v12729_v35 }
 0x87b   : > { %v12735_v39 = vpop.f32.mrf.mxu0 }
 0x87d   : > { %v12742_v34 = vpop.f32.mrf.mxu0 }
 0x87e   : > { %13782 = vst [vmem:[#allocation42_spill] sm:$0xff] %v12742_v34 }
 0x887   : > { %v9535_v23 = vpop.f32.mrf.mxu0 }
 0x888   : > { %v12750_v37 = vadd.f32 %v10436_v11, %v9535_v23  ;;  %v10443_v23 = vld [vmem:[%s13732_s3 + $0x58] sm:$0xff] }
 0x889   : > { %v6391_v51 = vpop.f32.mrf.mxu0 }
 0x88a   : > { %v7035_v57 = vsel %vm438_vm0, %v12750_v37, -inf  ;;  %v12795_v0 = vadd.f32 %v10439_v59, %v6391_v51  ;;  %v10444_v51 = vld [vmem:[%s13732_s3 + $0x28] sm:$0xff]  ;;  %v10446_v59 = vld [vmem:[%s13732_s3 + $0x70] sm:$0xff] }
 0x88b   : > { %7036 = vmax.xlane.f32.xlu0 %v7035_v57  ;;  %v9536_v52 = vpop.f32.mrf.mxu0 }
 0x88c   : > { %v12759_v30 = vadd.f32 %v10437_v6, %v9536_v52  ;;  %v7029_v26 = vsel %vm438_vm0, %v12795_v0, -inf }
 0x88d   : > { %v6394_v5 = vpop.f32.mrf.mxu0 }
 0x88e   : > { %v7038_v55 = vsel %vm438_vm0, %v12759_v30, -inf  ;;  %v12807_v48 = vadd.f32 %v10441_v63, %v6394_v5 }
 0x88f   : > { %7039 = vmax.xlane.f32.xlu1 %v7038_v55  ;;  %v10445_v55 = vld [vmem:[%s13732_s3 + $0x50] sm:$0xff] }
 0x890   : > { %v7032_v52 = vsel %vm438_vm0, %v12807_v48, -inf }
 0x897   : > { %v9551_v12 = vpop.f32.mrf.mxu0 }
 0x898   : > { %v12835_v5 = vadd.f32 %v10445_v55, %v9551_v12 }
 0x899   : > { %v6569_v45 = vpop.f32.mrf.mxu0 }
 0x89b   : > { %v9552_v44 = vpop.f32.mrf.mxu0 }
 0x89c   : > { %v12821_v11 = vadd.f32 %v10443_v23, %v9552_v44 }
 0x89d   : > { %v6572_v12 = vpop.f32.mrf.mxu0 }
 0x8a7   : > { %v9567_v63 = vpop.f32.mrf.mxu0 }
 0x8a8   : > { %v12779_v49 = vpop.f32.mrf.mxu1 }
 0x8a9   : > { %13790 = vst [vmem:[#allocation50_spill] sm:$0xff] %v12779_v49 }
 0x8aa   : > { %v12781_v42 = vpop.f32.mrf.mxu1 }
 0x8ab   : > { %13791 = vst [vmem:[#allocation51_spill] sm:$0xff] %v12781_v42 }
 0x8ac   : > { %v12783_v50 = vpop.f32.mrf.mxu1 }
 0x8ae   : > { %v12785_v56 = vpop.f32.mrf.mxu1 }
 0x8af   : > { %13792 = vst [vmem:[#allocation52_spill] sm:$0xff] %v12785_v56 }
 0x8b8   : > { %v9543_v9 = vpop.f32.mrf.mxu1 }
 0x8b9   : > { %v12790_v19 = vadd.f32 %v10438_v60, %v9543_v9  ;;  %v7062_v9 = vsel %vm438_vm0, %v12821_v11, -inf }
 0x8ba   : > { %v6480_v61 = vpop.f32.mrf.mxu1 }
 0x8bb   : > { %v7047_v54 = vsel %vm438_vm0, %v12790_v19, -inf  ;;  %v12812_v25 = vadd.f32 %v10442_v7, %v6480_v61  ;;  %v10447_v7 = vld [vmem:[%s13732_s3 + $0x78] sm:$0xff] }
 0x8bc   : > { %v9544_v58 = vpop.f32.mrf.mxu1  ;;  %7048 = vmax.xlane.f32.xlu0 %v7047_v54 }
 0x8bd   : > { %v12802_v27 = vadd.f32 %v10440_v32, %v9544_v58  ;;  %v7041_v6 = vsel %vm438_vm0, %v12812_v25, -inf  ;;  %v7059_v58 = vsel %vm438_vm0, %v12835_v5, -inf }
 0x8be   : > { %v6483_v47 = vpop.f32.mrf.mxu1 }
 0x8bf   : > { %v7050_v41 = vsel %vm438_vm0, %v12802_v27, -inf  ;;  %v12826_v57 = vadd.f32 %v10444_v51, %v6483_v47  ;;  %v10448_v47 = vld [vmem:[%s13732_s3 + $0x40] sm:$0xff]  ;;  %v10449_v51 = vld [vmem:[%s13732_s3 + $0x48] sm:$0xff] }
 0x8c0   : > { %7051 = vmax.xlane.f32.xlu1 %v7050_v41  ;;  %7030 = vmax.xlane.f32.xlu0 %v7029_v26  ;;  %v12858_v23 = vadd.f32 %v10448_v47, %v6569_v45  ;;  %v10451_v45 = vld [vmem:[%s13732_s3 + $0x68] sm:$0xff] }
 0x8c1   : > { %v7044_v60 = vsel %vm438_vm0, %v12826_v57, -inf }
 0x8c4   : > { %7033 = vmax.xlane.f32.xlu1 %v7032_v52  ;;  %7042 = vmax.xlane.f32.xlu0 %v7041_v6  ;;  %v12863_v52 = vadd.f32 %v10449_v51, %v6572_v12  ;;  %v7053_v12 = vsel %vm438_vm0, %v12858_v23, -inf }
 0x8c8   : > { %v9559_v61 = vpop.f32.mrf.mxu1  ;;  %7045 = vmax.xlane.f32.xlu0 %v7044_v60  ;;  %7063 = vmax.xlane.f32.xlu1 %v7062_v9  ;;  %v6747_v9 = vpop.f32.mrf.mxu0  ;;  %v10450_v60 = vld [vmem:[%s13732_s3 + $0x60] sm:$0xff] }
 0x8c9   : > { %v12844_v54 = vadd.f32 %v10446_v59, %v9559_v61 }
 0x8ca   : > { %v6658_v32 = vpop.f32.mrf.mxu1 }
 0x8cb   : > { %v7071_v26 = vsel %vm438_vm0, %v12844_v54, -inf  ;;  %v12870_v61 = vadd.f32 %v10450_v60, %v6658_v32  ;;  %v10452_v32 = vld [vmem:[%s13732_s3 + $0x90] sm:$0xff] }
 0x8cc   : > { %v9560_v44 = vpop.f32.mrf.mxu1  ;;  %7060 = vmax.xlane.f32.xlu0 %v7059_v58  ;;  %v7056_v58 = vsel %vm438_vm0, %v12863_v52, -inf }
 0x8cd   : > { %v12851_v41 = vadd.f32 %v10447_v7, %v9560_v44  ;;  %v9568_v44 = vpop.f32.mrf.mxu0  ;;  %v12884_v7 = vadd.f32 %v10452_v32, %v9567_v63  ;;  %v10454_v63 = vld [vmem:[%s13732_s3 + $0xb0] sm:$0xff] }
 0x8ce   : > { %v6661_v55 = vpop.f32.mrf.mxu1 }
 0x8cf   : > { %v7074_v6 = vsel %vm438_vm0, %v12851_v41, -inf  ;;  %v12875_v59 = vadd.f32 %v10451_v45, %v6661_v55  ;;  %v7083_v45 = vsel %vm438_vm0, %v12884_v7, -inf }
 0x8d0   : > { %7072 = vmax.xlane.f32.xlu0 %v7071_v26  ;;  %7075 = vmax.xlane.f32.xlu1 %v7074_v6  ;;  %v10453_v26 = vld [vmem:[%s13732_s3 + $0x98] sm:$0xff]  ;;  %v7065_v6 = vsel %vm438_vm0, %v12870_v61, -inf }
 0x8d1   : > { %v12889_v47 = vadd.f32 %v10453_v26, %v9568_v44  ;;  %v7068_v51 = vsel %vm438_vm0, %v12875_v59, -inf }
 0x8d4   : > { %7057 = vmax.xlane.f32.xlu1 %v7056_v58  ;;  %7054 = vmax.xlane.f32.xlu0 %v7053_v12  ;;  %v7086_v58 = vsel %vm438_vm0, %v12889_v47, -inf  ;;  %v6750_v12 = vpop.f32.mrf.mxu0 }
 0x8d6   : > { %v9583_v26 = vpop.f32.mrf.mxu0 }
 0x8d8   : > { %v9575_v55 = vpop.f32.mrf.mxu1  ;;  %7069 = vmax.xlane.f32.xlu1 %v7068_v51  ;;  %7066 = vmax.xlane.f32.xlu0 %v7065_v6  ;;  %v10455_v51 = vld [vmem:[%s13732_s3 + $0xb8] sm:$0xff] }
 0x8d9   : > { %v12898_v60 = vadd.f32 %v10454_v63, %v9575_v55  ;;  %v10456_v63 = vld [vmem:[%s13732_s3 + $0x80] sm:$0xff] }
 0x8da   : > { %v6836_v44 = vpop.f32.mrf.mxu1  ;;  %v12914_v56 = vadd.f32 %v10456_v63, %v6747_v9  ;;  %v10459_v9 = vld [vmem:[%s13732_s3 + $0xa8] sm:$0xff] }
 0x8db   : > { %v7095_v55 = vsel %vm438_vm0, %v12898_v60, -inf  ;;  %v12926_v42 = vadd.f32 %v10458_v15, %v6836_v44  ;;  %v10460_v15 = vld [vmem:[%s13732_s3 + $0xd0] sm:$0xff] }
 0x8dc   : > { %v9576_v32 = vpop.f32.mrf.mxu1  ;;  %7084 = vmax.xlane.f32.xlu0 %v7083_v45  ;;  %7087 = vmax.xlane.f32.xlu1 %v7086_v58  ;;  %v10457_v45 = vld [vmem:[%s13732_s3 + $0x88] sm:$0xff]  ;;  %v12940_v44 = vadd.f32 %v10460_v15, %v9583_v26  ;;  %v10462_v26 = vld [vmem:[%s13732_s3 + $0xf0] sm:$0xff] }
 0x8dd   : > { %v12907_v6 = vadd.f32 %v10455_v51, %v9576_v32  ;;  %v12919_v58 = vadd.f32 %v10457_v45, %v6750_v12  ;;  %v6925_v51 = vpop.f32.mrf.mxu0  ;;  %v10461_v45 = vld [vmem:[%s13732_s3 + $0xd8] sm:$0xff] }
 0x8de   : > { %v6839_v32 = vpop.f32.mrf.mxu1  ;;  %v7107_v35 = vsel %vm438_vm0, %v12940_v44, -inf }
 0x8df   : > { %v7098_v49 = vsel %vm438_vm0, %v12907_v6, -inf  ;;  %v12931_v63 = vadd.f32 %v10459_v9, %v6839_v32  ;;  %v7080_v12 = vsel %vm438_vm0, %v12919_v58, -inf }
 0x8e0   : > { %7096 = vmax.xlane.f32.xlu0 %v7095_v55  ;;  %7099 = vmax.xlane.f32.xlu1 %v7098_v49  ;;  %v7077_v55 = vsel %vm438_vm0, %v12914_v56, -inf  ;;  %v9584_v49 = vpop.f32.mrf.mxu0 }
 0x8e1   : > { %v12945_v32 = vadd.f32 %v10461_v45, %v9584_v49  ;;  %v7092_v9 = vsel %vm438_vm0, %v12931_v63, -inf }
 0x8e2   : > { %v6928_v34 = vpop.f32.mrf.mxu0 }
 0x8e3   : > { %v7110_v49 = vsel %vm438_vm0, %v12945_v32, -inf }
 0x8e4   : > { %7081 = vmax.xlane.f32.xlu1 %v7080_v12  ;;  %7078 = vmax.xlane.f32.xlu0 %v7077_v55  ;;  %v7089_v12 = vsel %vm438_vm0, %v12926_v42, -inf }
 0x8e8   : > { %v9591_v55 = vpop.f32.mrf.mxu1  ;;  %7093 = vmax.xlane.f32.xlu1 %v7092_v9  ;;  %7090 = vmax.xlane.f32.xlu0 %v7089_v12  ;;  %v10463_v9 = vld [vmem:[%s13732_s3 + $0xf8] sm:$0xff] }
 0x8e9   : > { %v12954_v15 = vadd.f32 %v10462_v26, %v9591_v55  ;;  %v10464_v26 = vld [vmem:[%s13732_s3 + $0xc0] sm:$0xff] }
 0x8ea   : > { %v7014_v45 = vpop.f32.mrf.mxu1  ;;  %v12970_v8 = vadd.f32 %v10464_v26, %v6925_v51  ;;  %v10467_v51 = vld [vmem:[%s13732_s3 + $0xe8] sm:$0xff] }
 0x8eb   : > { %v7119_v55 = vsel %vm438_vm0, %v12954_v15, -inf }
 0x8ec   : > { %v9592_v14 = vpop.f32.mrf.mxu1  ;;  %7108 = vmax.xlane.f32.xlu0 %v7107_v35  ;;  %7111 = vmax.xlane.f32.xlu1 %v7110_v49  ;;  %v10465_v35 = vld [vmem:[%s13732_s3 + $0xc8] sm:$0xff] }
 0x8ed   : > { %v12963_v12 = vadd.f32 %v10463_v9, %v9592_v14  ;;  %v12975_v49 = vadd.f32 %v10465_v35, %v6928_v34  ;;  %v10466_v9 = vld [vmem:[%s13732_s3 + $0xe0] sm:$0xff]  ;;  %v12997_v35 = vpop.permute.xlu0 %7549 }
 0x8ee   : > { %v7017_v14 = vpop.f32.mrf.mxu1  ;;  %v12982_v4 = vadd.f32 %v10466_v9, %v7014_v45  ;;  %v13000_v9 = vpop.permute.xlu1 %7620 }
 0x8ef   : > { %v7122_v31 = vsel %vm438_vm0, %v12963_v12, -inf  ;;  %v12987_v34 = vadd.f32 %v10467_v51, %v7017_v14  ;;  %v7104_v26 = vsel %vm438_vm0, %v12975_v49, -inf  ;;  %v9856_v14 = vld [vmem:[%s10941_s25 + $0x78] sm:$0xff]  }
 0x8f0   : > { %7120 = vmax.xlane.f32.xlu0 %v7119_v55  ;;  %7123 = vmax.xlane.f32.xlu1 %v7122_v31  ;;  %v7101_v55 = vsel %vm438_vm0, %v12970_v8, -inf  ;;  %v7113_v45 = vsel %vm438_vm0, %v12982_v4, -inf }
 0x8f1   : > { %v7116_v31 = vsel %vm438_vm0, %v12987_v34, -inf  ;;  %v13003_v51 = vpop.permute.xlu0 %7693 }
 0x8f4   : > { %7105 = vmax.xlane.f32.xlu1 %v7104_v26  ;;  %7102 = vmax.xlane.f32.xlu0 %v7101_v55  ;;  %v13006_v26 = vpop.permute.xlu1 %7764 }
 0x8f5   : > { %13793 = vst [vmem:[#allocation53_spill] sm:$0xff] %v13006_v26  ;;  %v13009_v55 = vpop.permute.xlu0 %7691 }
 0x8f6   : > { %13794 = vst [vmem:[#allocation54_spill] sm:$0xff] %v13009_v55 }
 0x8f8   : > { %7117 = vmax.xlane.f32.xlu1 %v7116_v31  ;;  %7114 = vmax.xlane.f32.xlu0 %v7113_v45  ;;  %v13011_v17 = vpop.permute.xlu1 %7762 }
 0x8f9   : > { %13795 = vst [vmem:[#allocation55_spill] sm:$0xff] %v13011_v17 }
 0x909   : > { %7906 = vrot.lane.b32.xlu1 %v9856_v14, %s10478_s16 }
 0x90e   : > { %7835 = vrot.lane.b32.xlu0 %v9857_v13, %s10478_s16 }
 0x914   : > { %v7037_v31 = vpop.xlane.xlu0 %7036 }
 0x915   : > { %v7127_v45 = vsub.f32 %v12750_v37, %v7037_v31 }
 0x917   : > { %v7161_v38 = vmul.f32 1.442695, %v7127_v45 }
 0x918   : > { %v7040_v28 = vpop.xlane.xlu1 %7039 }
 0x919   : > { %v7128_v10 = vsub.f32 %v12759_v30, %v7040_v28  ;;  %10244 = vpow2.f32 %v7161_v38 }
 0x91b   : > { %v7163_v20 = vmul.f32 1.442695, %v7128_v10 }
 0x91d   : > { %10246 = vpow2.f32 %v7163_v20 }
 0x926   : > { %v13015_v14 = vpop.eup %10244 }
 0x927   : > { %v7227_v17 = vsel %vm438_vm0, %v13015_v14, 0.0 }
 0x92a   : > { %v13017_v22 = vpop.eup %10246 }
 0x92b   : > { %v7230_v13 = vsel %vm438_vm0, %v13017_v22, 0.0 }
 0x92d   : > { %7231 = vadd.xlane.f32.xlu1 %v7230_v13  ;;  %7228 = vadd.xlane.f32.xlu0 %v7227_v17 }
 0x945   : > { %v7049_v37 = vpop.xlane.xlu0 %7048 }
 0x946   : > { %v7131_v31 = vsub.f32 %v12790_v19, %v7049_v37 }
 0x948   : > { %v7169_v45 = vmul.f32 1.442695, %v7131_v31 }
 0x949   : > { %v7052_v30 = vpop.xlane.xlu1 %7051  ;;  %v7031_v10 = vpop.xlane.xlu0 %7030 }
 0x94a   : > { %10248 = vpow2.f32 %v7169_v45  ;;  %v7132_v28 = vsub.f32 %v12802_v27, %v7052_v30  ;;  %v7125_v20 = vsub.f32 %v12795_v0, %v7031_v10 }
 0x94c   : > { %v7171_v38 = vmul.f32 1.442695, %v7132_v28  ;;  %v7157_v55 = vmul.f32 1.442695, %v7125_v20 }
 0x94d   : > { %v7034_v40 = vpop.xlane.xlu1 %7033  ;;  %v7043_v1 = vpop.xlane.xlu0 %7042 }
 0x94e   : > { %10250 = vpow2.f32 %v7171_v38  ;;  %v7126_v26 = vsub.f32 %v12807_v48, %v7034_v40  ;;  %v7129_v17 = vsub.f32 %v12812_v25, %v7043_v1 }
 0x94f   : > { %10252 = vpow2.f32 %v7157_v55 }
 0x950   : > { %v7159_v13 = vmul.f32 1.442695, %v7126_v26  ;;  %v7165_v19 = vmul.f32 1.442695, %v7129_v17 }
 0x951   : > { %v7064_v37 = vpop.xlane.xlu1 %7063  ;;  %v7046_v31 = vpop.xlane.xlu0 %7045 }
 0x952   : > { %10254 = vpow2.f32 %v7159_v13  ;;  %v7136_v45 = vsub.f32 %v12821_v11, %v7064_v37  ;;  %v7130_v27 = vsub.f32 %v12826_v57, %v7046_v31 }
 0x953   : > { %10256 = vpow2.f32 %v7165_v19 }
 0x954   : > { %v7167_v0 = vmul.f32 1.442695, %v7130_v27  ;;  %v7179_v30 = vmul.f32 1.442695, %v7136_v45 }
 0x955   : > { %v7061_v10 = vpop.xlane.xlu0 %7060 }
 0x956   : > { %v7135_v28 = vsub.f32 %v12835_v5, %v7061_v10  ;;  %10258 = vpow2.f32 %v7167_v0 }
 0x957   : > { %v13031_v20 = vpop.eup %10248  ;;  %10260 = vpow2.f32 %v7179_v30 }
 0x958   : > { %v7177_v40 = vmul.f32 1.442695, %v7135_v28  ;;  %v7239_v1 = vsel %vm438_vm0, %v13031_v20, 0.0 }
 0x959   : > { %v7076_v48 = vpop.xlane.xlu1 %7075  ;;  %7240 = vadd.xlane.f32.xlu0 %v7239_v1  ;;  %v7073_v25 = vpop.xlane.xlu0 %7072 }
 0x95a   : > { %10262 = vpow2.f32 %v7177_v40  ;;  %v7140_v11 = vsub.f32 %v12851_v41, %v7076_v48  ;;  %v7139_v57 = vsub.f32 %v12844_v54, %v7073_v25 }
 0x95b   : > { %v13037_v26 = vpop.eup %10250 }
 0x95c   : > { %v13039_v55 = vpop.eup %10252  ;;  %v7187_v5 = vmul.f32 1.442695, %v7140_v11  ;;  %v7185_v38 = vmul.f32 1.442695, %v7139_v57  ;;  %v7242_v17 = vsel %vm438_vm0, %v13037_v26, 0.0 }
 0x95d   : > { %v7058_v13 = vpop.xlane.xlu1 %7057  ;;  %7243 = vadd.xlane.f32.xlu1 %v7242_v17  ;;  %v7221_v19 = vsel %vm438_vm0, %v13039_v55, 0.0  ;;  %v7055_v37 = vpop.xlane.xlu0 %7054 }
 0x95e   : > { %10264 = vpow2.f32 %v7187_v5  ;;  %v7134_v41 = vsub.f32 %v12863_v52, %v7058_v13  ;;  %7222 = vadd.xlane.f32.xlu0 %v7221_v19  ;;  %v7133_v54 = vsub.f32 %v12858_v23, %v7055_v37 }
 0x95f   : > { %v13047_v31 = vpop.eup %10254  ;;  %10266 = vpow2.f32 %v7185_v38 }
 0x960   : > { %v13049_v45 = vpop.eup %10256  ;;  %v7175_v27 = vmul.f32 1.442695, %v7134_v41  ;;  %v7173_v0 = vmul.f32 1.442695, %v7133_v54  ;;  %v7224_v30 = vsel %vm438_vm0, %v13047_v31, 0.0 }
 0x961   : > { %v7070_v10 = vpop.xlane.xlu1 %7069  ;;  %7225 = vadd.xlane.f32.xlu1 %v7224_v30  ;;  %v7233_v28 = vsel %vm438_vm0, %v13049_v45, 0.0  ;;  %v7067_v40 = vpop.xlane.xlu0 %7066 }
 0x962   : > { %10268 = vpow2.f32 %v7175_v27  ;;  %v7138_v52 = vsub.f32 %v12875_v59, %v7070_v10  ;;  %7234 = vadd.xlane.f32.xlu0 %v7233_v28  ;;  %v7137_v23 = vsub.f32 %v12870_v61, %v7067_v40 }
 0x963   : > { %10270 = vpow2.f32 %v7173_v0  ;;  %v13057_v1 = vpop.eup %10258 }
 0x964   : > { %v7183_v48 = vmul.f32 1.442695, %v7138_v52  ;;  %v7181_v25 = vmul.f32 1.442695, %v7137_v23  ;;  %v7236_v57 = vsel %vm438_vm0, %v13057_v1, 0.0  ;;  %v13061_v38 = vpop.eup %10260 }
 0x965   : > { %v7088_v11 = vpop.xlane.xlu1 %7087  ;;  %v7085_v5 = vpop.xlane.xlu0 %7084  ;;  %7237 = vadd.xlane.f32.xlu1 %v7236_v57  ;;  %v7254_v54 = vsel %vm438_vm0, %v13061_v38, 0.0 }
 0x966   : > { %10272 = vpow2.f32 %v7183_v48  ;;  %v7144_v17 = vsub.f32 %v12889_v47, %v7088_v11  ;;  %v7143_v59 = vsub.f32 %v12884_v7, %v7085_v5 }
 0x967   : > { %v13065_v13 = vpop.eup %10262  ;;  %10274 = vpow2.f32 %v7181_v25 }
 0x968   : > { %v7195_v61 = vmul.f32 1.442695, %v7144_v17  ;;  %v7193_v19 = vmul.f32 1.442695, %v7143_v59  ;;  %v7251_v37 = vsel %vm438_vm0, %v13065_v13, 0.0 }
 0x969   : > { %v7100_v41 = vpop.xlane.xlu1 %7099  ;;  %7252 = vadd.xlane.f32.xlu0 %v7251_v37  ;;  %v7097_v27 = vpop.xlane.xlu0 %7096  ;;  %7255 = vadd.xlane.f32.xlu1 %v7254_v54 }
 0x96a   : > { %10276 = vpow2.f32 %v7195_v61  ;;  %v7148_v47 = vsub.f32 %v12907_v6, %v7100_v41  ;;  %v7147_v7 = vsub.f32 %v12898_v60, %v7097_v27 }
 0x96b   : > { %v13073_v0 = vpop.eup %10264  ;;  %10278 = vpow2.f32 %v7193_v19 }
 0x96c   : > { %v13075_v30 = vpop.eup %10266  ;;  %v7203_v10 = vmul.f32 1.442695, %v7148_v47  ;;  %v7201_v28 = vmul.f32 1.442695, %v7147_v7  ;;  %v7266_v40 = vsel %vm438_vm0, %v13073_v0, 0.0 }
 0x96d   : > { %v7082_v52 = vpop.xlane.xlu1 %7081  ;;  %v7263_v23 = vsel %vm438_vm0, %v13075_v30, 0.0  ;;  %v7079_v48 = vpop.xlane.xlu0 %7078  ;;  %7267 = vadd.xlane.f32.xlu1 %v7266_v40 }
 0x96e   : > { %10280 = vpow2.f32 %v7203_v10  ;;  %v7142_v6 = vsub.f32 %v12919_v58, %v7082_v52  ;;  %7264 = vadd.xlane.f32.xlu0 %v7263_v23  ;;  %v7141_v60 = vsub.f32 %v12914_v56, %v7079_v48 }
 0x96f   : > { %v13083_v25 = vpop.eup %10268  ;;  %10282 = vpow2.f32 %v7201_v28 }
 0x970   : > { %v13085_v11 = vpop.eup %10270  ;;  %v7191_v57 = vmul.f32 1.442695, %v7142_v6  ;;  %v7189_v5 = vmul.f32 1.442695, %v7141_v60  ;;  %v7248_v17 = vsel %vm438_vm0, %v13083_v25, 0.0 }
 0x971   : > { %v7094_v59 = vpop.xlane.xlu1 %7093  ;;  %v7245_v61 = vsel %vm438_vm0, %v13085_v11, 0.0  ;;  %v7091_v19 = vpop.xlane.xlu0 %7090  ;;  %7249 = vadd.xlane.f32.xlu1 %v7248_v17 }
 0x972   : > { %10284 = vpow2.f32 %v7191_v57  ;;  %v7146_v58 = vsub.f32 %v12931_v63, %v7094_v59  ;;  %7246 = vadd.xlane.f32.xlu0 %v7245_v61  ;;  %v7145_v56 = vsub.f32 %v12926_v42, %v7091_v19 }
 0x973   : > { %v13093_v37 = vpop.eup %10272  ;;  %10286 = vpow2.f32 %v7189_v5 }
 0x974   : > { %v13095_v41 = vpop.eup %10274  ;;  %v7199_v54 = vmul.f32 1.442695, %v7146_v58  ;;  %v7197_v27 = vmul.f32 1.442695, %v7145_v56  ;;  %v7260_v47 = vsel %vm438_vm0, %v13093_v37, 0.0 }
 0x975   : > { %v7112_v7 = vpop.xlane.xlu1 %7111  ;;  %v7257_v10 = vsel %vm438_vm0, %v13095_v41, 0.0  ;;  %v7109_v28 = vpop.xlane.xlu0 %7108  ;;  %7261 = vadd.xlane.f32.xlu1 %v7260_v47 }
 0x976   : > { %10288 = vpow2.f32 %v7199_v54  ;;  %7258 = vadd.xlane.f32.xlu0 %v7257_v10  ;;  %v7151_v42 = vsub.f32 %v12940_v44, %v7109_v28  ;;  %v7152_v61 = vsub.f32 %v12945_v32, %v7112_v7 }
 0x977   : > { %v13102_v63 = vpop.eup %10276  ;;  %10290 = vpow2.f32 %v7197_v27 }
 0x978   : > { %v13104_v40 = vpop.eup %10278  ;;  %v7209_v52 = vmul.f32 1.442695, %v7151_v42  ;;  %v7278_v23 = vsel %vm438_vm0, %v13102_v63, 0.0  ;;  %v7211_v7 = vmul.f32 1.442695, %v7152_v61 }
 0x979   : > { %v7124_v48 = vpop.xlane.xlu1 %7123  ;;  %v7275_v6 = vsel %vm438_vm0, %v13104_v40, 0.0  ;;  %v7121_v60 = vpop.xlane.xlu0 %7120  ;;  %7279 = vadd.xlane.f32.xlu1 %v7278_v23 }
 0x97a   : > { %7276 = vadd.xlane.f32.xlu0 %v7275_v6  ;;  %v7155_v57 = vsub.f32 %v12954_v15, %v7121_v60  ;;  %10292 = vpow2.f32 %v7209_v52  ;;  %v7156_v47 = vsub.f32 %v12963_v12, %v7124_v48 }
 0x97b   : > { %v13111_v5 = vpop.eup %10280 }
 0x97c   : > { %v13113_v44 = vpop.eup %10282  ;;  %v7217_v17 = vmul.f32 1.442695, %v7155_v57  ;;  %v7290_v59 = vsel %vm438_vm0, %v13111_v5, 0.0  ;;  %v7219_v48 = vmul.f32 1.442695, %v7156_v47 }
 0x97d   : > { %v7106_v19 = vpop.xlane.xlu1 %7105  ;;  %v7287_v58 = vsel %vm438_vm0, %v13113_v44, 0.0  ;;  %v7103_v56 = vpop.xlane.xlu0 %7102  ;;  %7291 = vadd.xlane.f32.xlu1 %v7290_v59 }
 0x97e   : > { %7288 = vadd.xlane.f32.xlu0 %v7287_v58  ;;  %v7149_v15 = vsub.f32 %v12970_v8, %v7103_v56  ;;  %10294 = vpow2.f32 %v7217_v17  ;;  %v7150_v28 = vsub.f32 %v12975_v49, %v7106_v19 }
 0x97f   : > { %v13121_v54 = vpop.eup %10284 }
 0x980   : > { %v13123_v27 = vpop.eup %10286  ;;  %v7205_v10 = vmul.f32 1.442695, %v7149_v15  ;;  %v7272_v32 = vsel %vm438_vm0, %v13121_v54, 0.0  ;;  %v7207_v49 = vmul.f32 1.442695, %v7150_v28 }
 0x981   : > { %v7269_v42 = vsel %vm438_vm0, %v13123_v27, 0.0  ;;  %v7115_v52 = vpop.xlane.xlu0 %7114  ;;  %v7118_v23 = vpop.xlane.xlu1 %7117  ;;  %7273 = vadd.xlane.f32.xlu1 %v7272_v32 }
 0x982   : > { %7270 = vadd.xlane.f32.xlu0 %v7269_v42  ;;  %v7153_v8 = vsub.f32 %v12982_v4, %v7115_v52  ;;  %10296 = vpow2.f32 %v7205_v10  ;;  %v7154_v17 = vsub.f32 %v12987_v34, %v7118_v23 }
 0x983   : > { %v13132_v6 = vpop.eup %10288  ;;  %10298 = vpow2.f32 %v7211_v7 }
 0x984   : > { %v13134_v12 = vpop.eup %10290  ;;  %v7213_v60 = vmul.f32 1.442695, %v7153_v8  ;;  %v7284_v57 = vsel %vm438_vm0, %v13132_v6, 0.0  ;;  %v7215_v61 = vmul.f32 1.442695, %v7154_v17 }
 0x985   : > { %v7281_v59 = vsel %vm438_vm0, %v13134_v12, 0.0  ;;  %7285 = vadd.xlane.f32.xlu1 %v7284_v57  ;;  %v9859_v57 = vld [vmem:[%s10941_s25 + $0x60] sm:$0xff]  }
 0x986   : > { %7282 = vadd.xlane.f32.xlu0 %v7281_v59  ;;  %10300 = vpow2.f32 %v7213_v60  ;;  %v9858_v60 = vld [vmem:[%s10941_s25 + $0x70] sm:$0xff]   ;;  %v13797_v59 = vld [vmem:[#allocation3_spill] sm:$0xff] }
 0x987   : > { %v13141_v4 = vpop.eup %10292  ;;  %10302 = vpow2.f32 %v7219_v48 }
 0x988   : > { %10304 = vpow2.f32 %v7207_v49  ;;  %v7299_v19 = vsel %vm438_vm0, %v13141_v4, 0.0  ;;  %v13796_v49 = vld [vmem:[#allocation5_spill] sm:$0xff] }
 0x989   : > { %10306 = vpow2.f32 %v7215_v61  ;;  %v8794_v17 = vpack.c.bf16 %v13796_v49, %v13796_v49  ;;  %v8793_v61 = vpack.c.bf16 %v13797_v59, %v13797_v59  ;;  %v13803_v49 = vld [vmem:[#allocation16_spill] sm:$0xff]  ;;  %v13804_v59 = vld [vmem:[#allocation9_spill] sm:$0xff] }
 0x98a   : > { %7300 = vadd.xlane.f32.xlu0 %v7299_v19  ;;  %v13798_v19 = vld [vmem:[#allocation4_spill] sm:$0xff] }
 0x98b   : > { %v13145_v58 = vpop.eup %10294 }
 0x98c   : > { %v7311_v34 = vsel %vm438_vm0, %v13145_v58, 0.0 }
 0x98e   : > { %7312 = vadd.xlane.f32.xlu0 %v7311_v34  ;;  %v8796_v34 = vpack.c.bf16 %v13798_v19, %v13798_v19  ;;  %v13805_v19 = vld [vmem:[#allocation7_spill] sm:$0xff] }
 0x98f   : > { %v13149_v56 = vpop.eup %10296 }
 0x990   : > { %v7293_v15 = vsel %vm438_vm0, %v13149_v56, 0.0  ;;  %v13153_v47 = vpop.eup %10298 }
 0x991   : > { %7294 = vadd.xlane.f32.xlu1 %v7293_v15  ;;  %v7302_v7 = vsel %vm438_vm0, %v13153_v47, 0.0  ;;  %v13799_v15 = vld [vmem:[#allocation2_spill] sm:$0xff] }
 0x993   : > { %v13155_v10 = vpop.eup %10300 }
 0x994   : > { %v13157_v32 = vpop.eup %10302  ;;  %v7305_v28 = vsel %vm438_vm0, %v13155_v10, 0.0 }
 0x995   : > { %v13163_v42 = vpop.eup %10304  ;;  %7303 = vadd.xlane.f32.xlu1 %v7302_v7  ;;  %7306 = vadd.xlane.f32.xlu0 %v7305_v28  ;;  %v7314_v52 = vsel %vm438_vm0, %v13157_v32, 0.0  ;;  %v8795_v7 = vpack.c.bf16 %v13799_v15, %v13799_v15  ;;  %v13800_v28 = vld [vmem:[#allocation21_spill] sm:$0xff]  ;;  %v13806_v15 = vld [vmem:[#allocation24_spill] sm:$0xff] }
 0x996   : > { %v7296_v23 = vsel %vm438_vm0, %v13163_v42, 0.0  ;;  %v13169_v8 = vpop.eup %10306 }
 0x997   : > { %v7308_v48 = vsel %vm438_vm0, %v13169_v8, 0.0 }
 0x999   : > { %7315 = vadd.xlane.f32.xlu1 %v7314_v52  ;;  %7297 = vadd.xlane.f32.xlu0 %v7296_v23  ;;  %v8798_v52 = vpack.c.bf16 %v13800_v28, %v13800_v28  ;;  %v13801_v23 = vld [vmem:[#allocation18_spill] sm:$0xff]  ;;  %v13807_v28 = vld [vmem:[#allocation8_spill] sm:$0xff] }
 0x99d   : > { %7309 = vadd.xlane.f32.xlu1 %v7308_v48  ;;  %v8797_v48 = vpack.c.bf16 %v13801_v23, %v13801_v23  ;;  %v13808_v23 = vld [vmem:[#allocation23_spill] sm:$0xff] }
 0x9ae   : > { %7904 = vrot.lane.b32.xlu1 %v9858_v60, %s10478_s16  ;;  %v13802_v60 = vld [vmem:[#allocation20_spill] sm:$0xff] }
 0x9af   : > { %7833 = vrot.lane.b32.xlu0 %v9859_v57, %s10478_s16  ;;  %v8800_v57 = vpack.c.bf16 %v13802_v60, %v13802_v60  ;;  %v13809_v60 = vld [vmem:[#allocation6_spill] sm:$0xff] }
 0x9b2   : > { %4025 = vrot.lane.b32.xlu1 %v8794_v17, %s10478_s16  ;;  %v8799_v17 = vpack.c.bf16 %v13803_v49, %v13803_v49  ;;  %v13810_v49 = vld [vmem:[#allocation28_spill] sm:$0xff] }
 0x9b3   : > { %4023 = vrot.lane.b32.xlu0 %v8793_v61, %s10478_s16  ;;  %v8802_v61 = vpack.c.bf16 %v13804_v59, %v13804_v59  ;;  %v13811_v59 = vld [vmem:[#allocation12_spill] sm:$0xff] }
 0x9b6   : > { %4029 = vrot.lane.b32.xlu1 %v8796_v34, %s10478_s16  ;;  %v8801_v34 = vpack.c.bf16 %v13805_v19, %v13805_v19  ;;  %v13812_v19 = vld [vmem:[#allocation32_spill] sm:$0xff] }
 0x9b7   : > { %4027 = vrot.lane.b32.xlu0 %v8795_v7, %s10478_s16  ;;  %v8808_v7 = vpack.c.bf16 %v13806_v15, %v13806_v15  ;;  %v13813_v15 = vld [vmem:[#allocation17_spill] sm:$0xff] }
 0x9ba   : > { %4033 = vrot.lane.b32.xlu1 %v8798_v52, %s10478_s16  ;;  %v8804_v52 = vpack.c.bf16 %v13807_v28, %v13807_v28  ;;  %v8828_v28 = vpack.c.bf16 %v12707_v62, %v12707_v62  ;;  %v8844_v62 = vpack.c.bf16 %v12723_v46, %v12723_v46  ;;  %v13815_v46 = vld [vmem:[#allocation22_spill] sm:$0xff] }
 0x9bb   : > { %4031 = vrot.lane.b32.xlu0 %v8797_v48, %s10478_s16  ;;  %v8805_v48 = vpack.c.bf16 %v13808_v23, %v13808_v23 }
 0x9be   : > { %4037 = vrot.lane.b32.xlu1 %v8800_v57, %s10478_s16  ;;  %v8803_v57 = vpack.c.bf16 %v13809_v60, %v13809_v60  ;;  %v8836_v60 = vpack.c.bf16 %v12715_v24, %v12715_v24  ;;  %v8852_v24 = vpack.c.bf16 %v12735_v39, %v12735_v39 }
 0x9bf   : > { %4035 = vrot.lane.b32.xlu0 %v8799_v17, %s10478_s16  ;;  %v8816_v17 = vpack.c.bf16 %v13810_v49, %v13810_v49  ;;  %v8840_v49 = vpack.c.bf16 %v12767_v16, %v12767_v16  ;;  %v8807_v16 = vpack.c.bf16 %v13815_v46, %v13815_v46 }
 0x9c2   : > { %4041 = vrot.lane.b32.xlu1 %v8802_v61, %s10478_s16  ;;  %v8812_v61 = vpack.c.bf16 %v13811_v59, %v13811_v59 }
 0x9c3   : > { %4039 = vrot.lane.b32.xlu0 %v8801_v34, %s10478_s16  ;;  %v8824_v34 = vpack.c.bf16 %v13812_v19, %v13812_v19 }
 0x9c6   : > { %4053 = vrot.lane.b32.xlu1 %v8808_v7, %s10478_s16  ;;  %v8820_v7 = vpack.c.bf16 %v13813_v15, %v13813_v15 }
 0x9c7   : > { %4045 = vrot.lane.b32.xlu0 %v8804_v52, %s10478_s16  ;;  %v13814_v52 = vld [vmem:[#allocation25_spill] sm:$0xff] }
 0x9c8   : > { %v8806_v23 = vpack.c.bf16 %v13814_v52, %v13814_v52 }
 0x9ca   : > { %4047 = vrot.lane.b32.xlu1 %v8805_v48, %s10478_s16  ;;  %v13236_v48 = vpop.permute.xlu0 %7835 }
 0x9cb   : > { %4043 = vrot.lane.b32.xlu0 %v8803_v57, %s10478_s16  ;;  %v8832_v57 = vpack.c.bf16 %v12745_v43, %v12745_v43  ;;  %v8848_v43 = vpack.c.bf16 %v12775_v36, %v12775_v36  ;;  %v13816_v36 = vld [vmem:[#allocation13_spill] sm:$0xff] }
 0x9ce   : > { %4069 = vrot.lane.b32.xlu1 %v8816_v17, %s10478_s16  ;;  %v13249_v17 = vpop.permute.xlu1 %7906  ;;  %v7229_v59 = vpop.xlane.xlu0 %7228 }
 0x9cf   : > { %4061 = vrot.lane.b32.xlu0 %v8812_v61, %s10478_s16 }
 0x9d2   : > { %4085 = vrot.lane.b32.xlu1 %v8824_v34, %s10478_s16  ;;  %v7232_v61 = vpop.xlane.xlu1 %7231  ;;  %v8856_v34 = vpack.c.bf16 %v12783_v50, %v12783_v50 }
 0x9d3   : > { %4077 = vrot.lane.b32.xlu0 %v8820_v7, %s10478_s16  ;;  %10308 = vrcp.f32 %v7232_v61  ;;  %v8810_v7 = vpack.c.bf16 %v13816_v36, %v13816_v36  ;;  %v13821_v61 = vld [vmem:[#allocation29_spill] sm:$0xff] }
 0x9d4   : > { %10310 = vrcp.f32 %v7229_v59  ;;  %v8814_v46 = vpack.c.bf16 %v13821_v61, %v13821_v61 }
 0x9d6   : > { %6048 = vrot.lane.b32.xlu1 %v8828_v28, %s10477_s7  ;;  %v13817_v28 = vld [vmem:[#allocation11_spill] sm:$0xff] }
 0x9d7   : > { %4049 = vrot.lane.b32.xlu0 %v8806_v23, %s10478_s16  ;;  %v8809_v52 = vpack.c.bf16 %v13817_v28, %v13817_v28  ;;  %v13823_v28 = vld [vmem:[#allocation15_spill] sm:$0xff] }
 0x9da   : > { %6064 = vrot.lane.b32.xlu1 %v8836_v60, %s10477_s7  ;;  %v13818_v60 = vld [vmem:[#allocation27_spill] sm:$0xff] }
 0x9db   : > { %6056 = vrot.lane.b32.xlu0 %v8832_v57, %s10477_s7  ;;  %v8813_v57 = vpack.c.bf16 %v13818_v60, %v13818_v60 }
 0x9de   : > { %6080 = vrot.lane.b32.xlu1 %v8844_v62, %s10477_s7  ;;  %v13819_v62 = vld [vmem:[#allocation10_spill] sm:$0xff] }
 0x9df   : > { %6072 = vrot.lane.b32.xlu0 %v8840_v49, %s10477_s7  ;;  %v8811_v49 = vpack.c.bf16 %v13819_v62, %v13819_v62 }
 0x9e2   : > { %v7241_v19 = vpop.xlane.xlu0 %7240  ;;  %6096 = vrot.lane.b32.xlu1 %v8852_v24, %s10477_s7  ;;  %v13820_v24 = vld [vmem:[#allocation26_spill] sm:$0xff] }
 0x9e3   : > { %6088 = vrot.lane.b32.xlu0 %v8848_v43, %s10477_s7  ;;  %v8815_v43 = vpack.c.bf16 %v13820_v24, %v13820_v24 }
 0x9e6   : > { %v7244_v15 = vpop.xlane.xlu1 %7243  ;;  %4051 = vrot.lane.b32.xlu1 %v8807_v16, %s10478_s16 }
 0x9e7   : > { %v7223_v39 = vpop.xlane.xlu0 %7222  ;;  %6104 = vrot.lane.b32.xlu0 %v8856_v34, %s10477_s7 }
 0x9e8   : > { %10312 = vrcp.f32 %v7223_v39  ;;  %v13822_v39 = vld [vmem:[#allocation19_spill] sm:$0xff] }
 0x9e9   : > { %v8818_v36 = vpack.c.bf16 %v13822_v39, %v13822_v39 }
 0x9ea   : > { %v7226_v23 = vpop.xlane.xlu1 %7225  ;;  %4057 = vrot.lane.b32.xlu1 %v8810_v7, %s10478_s16 }
 0x9eb   : > { %10314 = vrcp.f32 %v7226_v23  ;;  %v7235_v50 = vpop.xlane.xlu0 %7234  ;;  %4055 = vrot.lane.b32.xlu0 %v8809_v52, %s10478_s16  ;;  %v8817_v52 = vpack.c.bf16 %v13823_v28, %v13823_v28  ;;  %v13827_v28 = vld [vmem:[#allocation33_spill] sm:$0xff] }
 0x9ec   : > { %10316 = vrcp.f32 %v7244_v15  ;;  %v10309_v15 = vpop.eup %10308 }
 0x9ed   : > { %10318 = vrcp.f32 %v7235_v50 }
 0x9ee   : > { %10320 = vrcp.f32 %v7241_v19  ;;  %v7238_v59 = vpop.xlane.xlu1 %7237  ;;  %4063 = vrot.lane.b32.xlu1 %v8813_v57, %s10478_s16  ;;  %v10311_v19 = vpop.eup %10310  ;;  %v7352_v57 = vmul.f32 %v10309_v15, %v13017_v22 }
 0x9ef   : > { %10322 = vrcp.f32 %v7238_v59  ;;  %4059 = vrot.lane.b32.xlu0 %v8811_v49, %s10478_s16  ;;  %v7351_v62 = vmul.f32 %v10311_v19, %v13015_v14  ;;  %v13824_v49 = vld [vmem:[#allocation31_spill] sm:$0xff] }
 0x9f0   : > { %v8821_v59 = vpack.c.bf16 %v13824_v49, %v13824_v49  ;;  %v8826_v49 = vpack.c.bf16 %v12709_v21, %v12709_v21  ;;  %v8829_v21 = vpack.c.bf16 %v12738_v33, %v12738_v33  ;;  %v8831_v33 = vpack.c.bf16 %v12731_v2, %v12731_v2 }
 0x9f2   : > { %v7253_v16 = vpop.xlane.xlu0 %7252  ;;  %v7256_v34 = vpop.xlane.xlu1 %7255  ;;  %4067 = vrot.lane.b32.xlu1 %v8815_v43, %s10478_s16 }
 0x9f3   : > { %4065 = vrot.lane.b32.xlu0 %v8814_v46, %s10478_s16  ;;  %10324 = vrcp.f32 %v7253_v16  ;;  %v13825_v46 = vld [vmem:[#allocation14_spill] sm:$0xff] }
 0x9f4   : > { %10326 = vrcp.f32 %v7256_v34  ;;  %v8819_v39 = vpack.c.bf16 %v13825_v46, %v13825_v46  ;;  %v7382_v34 = vpack.c.bf16 %v7352_v57, %v7351_v62 }
 0x9f5   : > { %v10313_v7 = vpop.eup %10312 }
 0x9f6   : > { %v7268_v23 = vpop.xlane.xlu1 %7267  ;;  %4073 = vrot.lane.b32.xlu1 %v8818_v36, %s10478_s16  ;;  %v7349_v24 = vmul.f32 %v10313_v7, %v13039_v55  ;;  %v13826_v55 = vld [vmem:[#allocation30_spill] sm:$0xff] }
 0x9f7   : > { %v7265_v50 = vpop.xlane.xlu0 %7264  ;;  %4071 = vrot.lane.b32.xlu0 %v8817_v52, %s10478_s16  ;;  %10328 = vrcp.f32 %v7268_v23  ;;  %v8822_v52 = vpack.c.bf16 %v13827_v28, %v13827_v28 }
 0x9f8   : > { %v10315_v60 = vpop.eup %10314 }
 0x9f9   : > { %v7350_v43 = vmul.f32 %v10315_v60, %v13047_v31  ;;  %v10317_v61 = vpop.eup %10316  ;;  %v8823_v31 = vpack.c.bf16 %v13826_v55, %v13826_v55 }
 0x9fa   : > { %v10319_v36 = vpop.eup %10318  ;;  %v7250_v22 = vpop.xlane.xlu1 %7249  ;;  %4079 = vrot.lane.b32.xlu1 %v8821_v59, %s10478_s16  ;;  %v7356_v7 = vmul.f32 %v10317_v61, %v13037_v26 }
 0x9fb   : > { %v7247_v14 = vpop.xlane.xlu0 %7246  ;;  %v7381_v16 = vpack.c.bf16 %v7350_v43, %v7349_v24  ;;  %v10321_v15 = vpop.eup %10320  ;;  %10330 = vrcp.f32 %v7250_v22  ;;  %4075 = vrot.lane.b32.xlu0 %v8819_v39, %s10478_s16  ;;  %v7353_v23 = vmul.f32 %v10319_v36, %v13049_v45  ;;  %v13828_v36 = vld [vmem:[#allocation53_spill] sm:$0xff] }
 0x9fc   : > { %v10323_v19 = vpop.eup %10322  ;;  %10332 = vrcp.f32 %v7247_v14  ;;  %v7355_v57 = vmul.f32 %v10321_v15, %v13031_v20  ;;  %v8825_v20 = vpack.c.bf16 %v12705_v3, %v12705_v3  ;;  %v8827_v3 = vpack.c.bf16 %v12703_v18, %v12703_v18 }
 0x9fd   : > { %9597 = vmatprep.mubr.msk.bf16.mxu0 %vm438_vm0, %v7381_v16  ;;  %10334 = vrcp.f32 %v7265_v50  ;;  %v7354_v60 = vmul.f32 %v10323_v19, %v13057_v1  ;;  %v13829_v16 = vld [vmem:[#allocation43_spill] sm:$0xff] }
 0x9fe   : > { %9598 = vmatmul.mubr.msk.bf16.vlgmr.msra.gmra.mxu0 %vm438_vm0, %v7382_v34  ;;  %v7262_v62 = vpop.xlane.xlu1 %7261  ;;  %4083 = vrot.lane.b32.xlu1 %v8823_v31, %s10478_s16  ;;  %v7384_v45 = vpack.c.bf16 %v7356_v7, %v7355_v57  ;;  %v13830_v34 = vld [vmem:[#allocation36_spill] sm:$0xff] }
 0x9ff   : > { %9610 = vmatpush3.bf16.msra.mxu0 %v12733_v53  ;;  %v7259_v26 = vpop.xlane.xlu0 %7258  ;;  %10336 = vrcp.f32 %v7262_v62  ;;  %4081 = vrot.lane.b32.xlu0 %v8822_v52, %s10478_s16  ;;  %v7383_v50 = vpack.c.bf16 %v7354_v60, %v7353_v23  ;;  %v8834_v19 = vpack.c.bf16 %v13830_v34, %v13830_v34  ;;  %v13831_v23 = vld [vmem:[#allocation35_spill] sm:$0xff] }
 0xa00   : > { %9611 = vmatprep.subr.bf16.mxu0 %v12997_v35  ;;  %10338 = vrcp.f32 %v7259_v26  ;;  %v10325_v59 = vpop.eup %10324  ;;  %v13833_v26 = vld [vmem:[#allocation54_spill] sm:$0xff] }
 0xa01   : > { %9605 = vmatprep.mubr.msk.bf16.mxu1 %vm438_vm0, %v7383_v50  ;;  %v10327_v24 = vpop.eup %10326  ;;  %v7359_v39 = vmul.f32 %v10325_v59, %v13065_v13 }
 0xa02   : > { %v7280_v1 = vpop.xlane.xlu1 %7279  ;;  %6044 = vrot.lane.b32.xlu1 %v8826_v49, %s10477_s7  ;;  %9606 = vmatmul.mubr.msk.bf16.vlgmr.msra.gmra.mxu1 %vm438_vm0, %v7384_v45  ;;  %v7360_v46 = vmul.f32 %v10327_v24, %v13061_v38  ;;  %v13835_v45 = vld [vmem:[#allocation44_spill] sm:$0xff]  ;;  %v13837_v24 = vld [vmem:[#allocation46_spill] sm:$0xff] }
 0xa03   : > { %v7277_v53 = vpop.xlane.xlu0 %7276  ;;  %9612 = vmatpush3.bf16.msra.mxu0 %v12997_v35  ;;  %9618 = vmatpush3.bf16.msra.mxu1 %v12740_v29  ;;  %10340 = vrcp.f32 %v7280_v1 }
 0xa04   : > { %6042 = vrot.lane.b32.xlu0 %v8825_v20, %s10477_s7  ;;  %9619 = vmatprep.subr.bf16.mxu1 %v13000_v9  ;;  %v10329_v61 = vpop.eup %10328  ;;  %10342 = vrcp.f32 %v7277_v53  ;;  %v7386_v55 = vpack.c.bf16 %v7360_v46, %v7359_v39  ;;  %v8839_v20 = vpack.c.bf16 %v13835_v45, %v13835_v45  ;;  %v13836_v53 = vld [vmem:[#allocation55_spill] sm:$0xff]  ;;  %v13848_v45 = vld [vmem:[#allocation50_spill] sm:$0xff] }
 0xa05   : > { %9625 = vmatprep.subr.bf16.mxu0 %v13003_v51  ;;  %v7364_v7 = vmul.f32 %v10329_v61, %v13073_v0  ;;  %v13832_v0 = vld [vmem:[#allocation45_spill] sm:$0xff] }
 0xa06   : > { %v7292_v43 = vpop.xlane.xlu1 %7291  ;;  %6050 = vrot.lane.b32.xlu1 %v8829_v21, %s10477_s7 }
 0xa07   : > { %v7289_v35 = vpop.xlane.xlu0 %7288  ;;  %9620 = vmatpush3.bf16.msra.mxu1 %v13000_v9  ;;  %v8830_v9 = vpack.c.bf16 %v13829_v16, %v13829_v16  ;;  %10344 = vrcp.f32 %v7292_v43  ;;  %v13839_v16 = vld [vmem:[#allocation38_spill] sm:$0xff] }
 0xa08   : > { %v10331_v29 = vpop.eup %10330  ;;  %6046 = vrot.lane.b32.xlu0 %v8827_v3, %s10477_s7  ;;  %9633 = vmatprep.subr.bf16.mxu1 %v13828_v36  ;;  %v8838_v3 = vpack.c.bf16 %v13837_v24, %v13837_v24  ;;  %v13849_v24 = vld [vmem:[#allocation52_spill] sm:$0xff] }
 0xa09   : > { %v10333_v18 = vpop.eup %10332  ;;  %v7358_v22 = vmul.f32 %v10331_v29, %v13083_v25 }
 0xa0a   : > { %v10335_v14 = vpop.eup %10334  ;;  %v7274_v15 = vpop.xlane.xlu1 %7273  ;;  %6054 = vrot.lane.b32.xlu1 %v8831_v33, %s10477_s7  ;;  %v7357_v38 = vmul.f32 %v10333_v18, %v13085_v11  ;;  %v8833_v11 = vpack.c.bf16 %v13831_v23, %v13831_v23  ;;  %v13843_v23 = vld [vmem:[#allocation49_spill] sm:$0xff] }
 0xa0b   : > { %v7271_v2 = vpop.xlane.xlu0 %7270  ;;  %10346 = vrcp.f32 %v7274_v15  ;;  %v7363_v28 = vmul.f32 %v10335_v14, %v13075_v30  ;;  %v8837_v30 = vpack.c.bf16 %v13832_v0, %v13832_v0  ;;  %v13845_v0 = vld [vmem:[#allocation41_spill] sm:$0xff] }
 0xa0c   : > { %v10337_v13 = vpop.eup %10336  ;;  %10348 = vrcp.f32 %v7271_v2  ;;  %6052 = vrot.lane.b32.xlu0 %v8830_v9, %s10477_s7  ;;  %v7385_v25 = vpack.c.bf16 %v7358_v22, %v7357_v38  ;;  %v8841_v9 = vpack.c.bf16 %v13839_v16, %v13839_v16 }
 0xa0d   : > { %v10339_v31 = vpop.eup %10338  ;;  %10350 = vrcp.f32 %v7289_v35  ;;  %v7362_v52 = vmul.f32 %v10337_v13, %v13093_v37  ;;  %v7388_v50 = vpack.c.bf16 %v7364_v7, %v7363_v28  ;;  %v13838_v35 = vld [vmem:[#allocation39_spill] sm:$0xff] }
 0xa0e   : > { %9613 = vmatprep.mubr.msk.bf16.mxu0 %vm438_vm0, %v7385_v25  ;;  %v7286_v60 = vpop.xlane.xlu1 %7285  ;;  %6060 = vrot.lane.b32.xlu1 %v8834_v19, %s10477_s7  ;;  %v7361_v62 = vmul.f32 %v10339_v31, %v13095_v41  ;;  %v13834_v41 = vld [vmem:[#allocation34_spill] sm:$0xff]  ;;  %v8842_v61 = vpack.c.bf16 %v13838_v35, %v13838_v35  ;;  %v13841_v31 = vld [vmem:[#allocation37_spill] sm:$0xff] }
 0xa0f   : > { %v7283_v57 = vpop.xlane.xlu0 %7282  ;;  %10352 = vrcp.f32 %v7286_v60  ;;  %9614 = vmatmul.mubr.msk.bf16.vlgmr.msra.gmra.mxu0 %vm438_vm0, %v7386_v55  ;;  %v8835_v49 = vpack.c.bf16 %v13834_v41, %v13834_v41  ;;  %v8843_v7 = vpack.c.bf16 %v13841_v31, %v13841_v31  ;;  %v13844_v60 = vld [vmem:[#allocation42_spill] sm:$0xff]  ;;  %v13847_v41 = vld [vmem:[#allocation40_spill] sm:$0xff] }
 0xa10   : > { %9626 = vmatpush3.bf16.msra.mxu0 %v13003_v51  ;;  %10354 = vrcp.f32 %v7283_v57  ;;  %6058 = vrot.lane.b32.xlu0 %v8833_v11, %s10477_s7  ;;  %v7387_v37 = vpack.c.bf16 %v7362_v52, %v7361_v62  ;;  %v10341_v1 = vpop.eup %10340  ;;  %v8846_v11 = vpack.c.bf16 %v13843_v23, %v13843_v23 }
 0xa11   : > { %9627 = vmatprep.subr.bf16.mxu0 %v13833_v26  ;;  %v10343_v59 = vpop.eup %10342  ;;  %v7368_v33 = vmul.f32 %v10341_v1, %v13102_v63  ;;  %v13840_v63 = vld [vmem:[#allocation48_spill] sm:$0xff] }
 0xa12   : > { %9621 = vmatprep.mubr.msk.bf16.mxu1 %vm438_vm0, %v7387_v37  ;;  %6066 = vrot.lane.b32.xlu1 %v8837_v30, %s10477_s7  ;;  %v7367_v46 = vmul.f32 %v10343_v59, %v13104_v40  ;;  %v8845_v40 = vpack.c.bf16 %v13840_v63, %v13840_v63  ;;  %v8849_v30 = vpack.c.bf16 %v13845_v0, %v13845_v0  ;;  %v13846_v37 = vld [vmem:[#allocation51_spill] sm:$0xff] }
 0xa13   : > { %9622 = vmatmul.mubr.msk.bf16.vlgmr.msra.gmra.mxu1 %vm438_vm0, %v7388_v50  ;;  %v7301_v51 = vpop.xlane.xlu0 %7300 }
 0xa14   : > { %9628 = vmatpush3.bf16.msra.mxu0 %v13833_v26  ;;  %9634 = vmatpush3.bf16.msra.mxu1 %v13828_v36  ;;  %v10345_v21 = vpop.eup %10344  ;;  %v7390_v34 = vpack.c.bf16 %v7368_v33, %v7367_v46  ;;  %10356 = vrcp.f32 %v7301_v51  ;;  %v8853_v26 = vpack.c.bf16 %v13846_v37, %v13846_v37  ;;  %v4125_v46 = vld [vmem:[%s11256_s29 + $0xc] sm:$0x1] }
 0xa15   : > { %6062 = vrot.lane.b32.xlu0 %v8835_v49, %s10477_s7  ;;  %9635 = vmatprep.subr.bf16.mxu1 %v13836_v53  ;;  %v7372_v13 = vmul.f32 %v10345_v21, %v13111_v5  ;;  %v13842_v5 = vld [vmem:[#allocation47_spill] sm:$0xff]  ;;  %v8851_v49 = vpack.c.bf16 %v13847_v41, %v13847_v41 }
 0xa16   : > { %9641 = vmatprep.subr.bf16.mxu0 %v13236_v48  ;;  %6070 = vrot.lane.b32.xlu1 %v8839_v20, %s10477_s7  ;;  %v8855_v20 = vpack.c.bf16 %v13848_v45, %v13848_v45 }
 0xa17   : > { %v7313_v18 = vpop.xlane.xlu0 %7312 }
 0xa18   : > { %v10347_v43 = vpop.eup %10346  ;;  %9636 = vmatpush3.bf16.msra.mxu1 %v13836_v53 }
 0xa19   : > { %v10349_v29 = vpop.eup %10348  ;;  %6068 = vrot.lane.b32.xlu0 %v8838_v3, %s10477_s7  ;;  %9649 = vmatprep.subr.bf16.mxu1 %v13249_v17  ;;  %v7366_v39 = vmul.f32 %v10347_v43, %v13121_v54  ;;  %v8854_v3 = vpack.c.bf16 %v13849_v24, %v13849_v24 }
 0xa1a   : > { %v10351_v36 = vpop.eup %10350  ;;  %6076 = vrot.lane.b32.xlu1 %v8842_v61, %s10477_s7  ;;  %v7295_v22 = vpop.xlane.xlu1 %7294  ;;  %v7365_v14 = vmul.f32 %v10349_v29, %v13123_v27 }
 0xa1b   : > { %v7371_v54 = vmul.f32 %v10351_v36, %v13113_v44  ;;  %v8847_v44 = vpack.c.bf16 %v13842_v5, %v13842_v5 }
 0xa1c   : > { %v10353_v15 = vpop.eup %10352  ;;  %v7389_v2 = vpack.c.bf16 %v7366_v39, %v7365_v14 }
 0xa1d   : > { %v10355_v38 = vpop.eup %10354  ;;  %6074 = vrot.lane.b32.xlu0 %v8841_v9, %s10477_s7  ;;  %v7370_v19 = vmul.f32 %v10353_v15, %v13132_v6  ;;  %v7392_v28 = vpack.c.bf16 %v7372_v13, %v7371_v54 }
 0xa1e   : > { %9629 = vmatprep.mubr.msk.bf16.mxu0 %vm438_vm0, %v7389_v2  ;;  %6082 = vrot.lane.b32.xlu1 %v8845_v40, %s10477_s7  ;;  %v7304_v27 = vpop.xlane.xlu1 %7303  ;;  %v7307_v25 = vpop.xlane.xlu0 %7306  ;;  %v7369_v55 = vmul.f32 %v10355_v38, %v13134_v12 }
 0xa1f   : > { %9630 = vmatmul.mubr.msk.bf16.vlgmr.msra.gmra.mxu0 %vm438_vm0, %v7390_v34  ;;  %10358 = vrcp.f32 %v7304_v27 }
 0xa20   : > { %9642 = vmatpush3.bf16.msra.mxu0 %v13236_v48  ;;  %v7391_v6 = vpack.c.bf16 %v7370_v19, %v7369_v55  ;;  %10360 = vrcp.f32 %v7295_v22  ;;  %v8850_v48 = vpack.c.bf16 %v13844_v60, %v13844_v60  ;;  %v4137_v19 = vld [vmem:[%s11256_s29 + $0x2c] sm:$0x1]  ;;  %v4143_v55 = vld [vmem:[%s11256_s29 + $0x3c] sm:$0x1] }
 0xa21   : > { %6078 = vrot.lane.b32.xlu0 %v8843_v7, %s10477_s7  ;;  %v10357_v51 = vpop.eup %10356 }
 0xa22   : > { %9637 = vmatprep.mubr.msk.bf16.mxu1 %vm438_vm0, %v7391_v6  ;;  %6086 = vrot.lane.b32.xlu1 %v8847_v44, %s10477_s7  ;;  %v7316_v12 = vpop.xlane.xlu1 %7315  ;;  %v7298_v52 = vpop.xlane.xlu0 %7297  ;;  %v7375_v16 = vmul.f32 %v10357_v51, %v13141_v4  ;;  %v4149_v6 = vld [vmem:[%s11256_s29 + $0x4c] sm:$0x1] }
 0xa23   : > { %10362 = vrcp.f32 %v7316_v12  ;;  %9638 = vmatmul.mubr.msk.bf16.vlgmr.msra.gmra.mxu1 %vm438_vm0, %v7392_v28 }
 0xa24   : > { %9650 = vmatpush3.bf16.msra.mxu1 %v13249_v17  ;;  %10364 = vrcp.f32 %v7298_v52  ;;  %v4155_v52 = vld [vmem:[%s11256_s29 + $0x5c] sm:$0x1] }
 0xa25   : > { %10366 = vrcp.f32 %v7307_v25  ;;  %6084 = vrot.lane.b32.xlu0 %v8846_v11, %s10477_s7  ;;  %v4161_v11 = vld [vmem:[%s11256_s29 + $0x6c] sm:$0x1] }
 0xa26   : > { %10368 = vrcp.f32 %v7313_v18  ;;  %6092 = vrot.lane.b32.xlu1 %v8850_v48, %s10477_s7  ;;  %v7310_v57 = vpop.xlane.xlu1 %7309  ;;  %v7834_v62 = vpop.permute.xlu0 %7833 }
 0xa27   : > { %10370 = vrcp.f32 %v7310_v57  ;;  %9643 = vmatprep.subr.bf16.mxu0 %v7834_v62 }
 0xa28   : > { %9644 = vmatpush3.bf16.msra.mxu0 %v7834_v62  ;;  %v4167_v62 = vld [vmem:[%s11256_s29 + $0x7c] sm:$0x1] }
 0xa29   : > { %6090 = vrot.lane.b32.xlu0 %v8849_v30, %s10477_s7 }
 0xa2a   : > { %6098 = vrot.lane.b32.xlu1 %v8853_v26, %s10477_s7  ;;  %v7905_v17 = vpop.permute.xlu1 %7904  ;;  %v4024_v50 = vpop.permute.xlu0 %4023 }
 0xa2b   : > { %4120 = vst.msk [vmem:[%s11256_s29] sm:$0xf] %vm4119_vm5, %v4024_v50  ;;  %9651 = vmatprep.subr.bf16.mxu1 %v7905_v17 }
 0xa2c   : > { %9652 = vmatpush3.bf16.msra.mxu1 %v7905_v17  ;;  %v10359_v1 = vpop.eup %10358 }
 0xa2d   : > { %6094 = vrot.lane.b32.xlu0 %v8851_v49, %s10477_s7  ;;  %v10361_v21 = vpop.eup %10360  ;;  %v7376_v29 = vmul.f32 %v10359_v1, %v13153_v47 }
 0xa2e   : > { %6102 = vrot.lane.b32.xlu1 %v8855_v20, %s10477_s7  ;;  %v4026_v53 = vpop.permute.xlu1 %4025  ;;  %v4028_v59 = vpop.permute.xlu0 %4027  ;;  %v7373_v18 = vmul.f32 %v10361_v21, %v13149_v56 }
 0xa2f   : > { %4121 = vst.msk [vmem:[%s11256_s29 + $0x4] sm:$0xf] %vm4119_vm5, %v4026_v53  ;;  %4122 = vst.msk [vmem:[%s11256_s29 + $0x8] sm:$0xf] %vm4119_vm5, %v4028_v59  ;;  %v7394_v40 = vpack.c.bf16 %v7376_v29, %v7375_v16 }
 0xa30   : > { %v10363_v43 = vpop.eup %10362 }
 0xa31   : > { %v10365_v61 = vpop.eup %10364  ;;  %6100 = vrot.lane.b32.xlu0 %v8854_v3, %s10477_s7  ;;  %v7380_v15 = vmul.f32 %v10363_v43, %v13157_v32 }
 0xa32   : > { %v10367_v33 = vpop.eup %10366  ;;  %v4030_v39 = vpop.permute.xlu1 %4029  ;;  %v7374_v22 = vmul.f32 %v10365_v61, %v13163_v42 }
 0xa33   : > { %v4032_v36 = vpop.permute.xlu0 %4031  ;;  %v10369_v14 = vpop.eup %10368  ;;  %v4126_v9 = vsel %vm13433_vm7, %v4030_v39, %v4125_v46  ;;  %v7377_v56 = vmul.f32 %v10367_v33, %v13155_v10 }
 0xa34   : > { %4128 = vst.msk [vmem:[%s11256_s29 + $0x10] sm:$0xf] %vm4119_vm5, %v4032_v36  ;;  %v10371_v47 = vpop.eup %10370  ;;  %4127 = vst [vmem:[%s11256_s29 + $0xc] sm:$0x1] %v4126_v9  ;;  %v7393_v63 = vpack.c.bf16 %v7374_v22, %v7373_v18  ;;  %v7379_v4 = vmul.f32 %v10369_v14, %v13145_v58  ;;  %v4131_v58 = vld [vmem:[%s11256_s29 + $0x1c] sm:$0x1] }
 0xa35   : > { %v7378_v42 = vmul.f32 %v10371_v47, %v13169_v8 }
 0xa36   : > { %9645 = vmatprep.mubr.msk.bf16.mxu0 %vm438_vm0, %v7393_v63  ;;  %v4034_v2 = vpop.permute.xlu1 %4033  ;;  %v7396_v32 = vpack.c.bf16 %v7380_v15, %v7379_v4 }
 0xa37   : > { %v4036_v38 = vpop.permute.xlu0 %4035  ;;  %4129 = vst.msk [vmem:[%s11256_s29 + $0x14] sm:$0xf] %vm4119_vm5, %v4034_v2  ;;  %9646 = vmatmul.mubr.msk.bf16.vlgmr.msra.gmra.mxu0 %vm438_vm0, %v7394_v40  ;;  %v7395_v10 = vpack.c.bf16 %v7378_v42, %v7377_v56 }
 0xa38   : > { %4130 = vst.msk [vmem:[%s11256_s29 + $0x18] sm:$0xf] %vm4119_vm5, %v4036_v38 }
 0xa39   : > { %9653 = vmatprep.mubr.msk.bf16.mxu1 %vm438_vm0, %v7395_v10 }
 0xa3a   : > { %v4038_v8 = vpop.permute.xlu1 %4037  ;;  %9654 = vmatmul.mubr.msk.bf16.vlgmr.msra.gmra.mxu1 %vm438_vm0, %v7396_v32 }
 0xa3b   : > { %v4040_v13 = vpop.permute.xlu0 %4039  ;;  %v4132_v54 = vsel %vm13433_vm7, %v4038_v8, %v4131_v58  ;;  %v6144_v50 = vld [vmem:[%s11256_s29 + $0xc] sm:$0x1] }
 0xa3c   : > { %4134 = vst.msk [vmem:[%s11256_s29 + $0x20] sm:$0xf] %vm4119_vm5, %v4040_v13  ;;  %4133 = vst [vmem:[%s11256_s29 + $0x1c] sm:$0x1] %v4132_v54 }
 0xa3e   : > { %v4042_v34 = vpop.permute.xlu1 %4041 }
 0xa3f   : > { %v4046_v27 = vpop.permute.xlu0 %4045  ;;  %4135 = vst.msk [vmem:[%s11256_s29 + $0x24] sm:$0xf] %vm4119_vm5, %v4042_v34 }
 0xa40   : > { %v4138_v25 = vsel %vm13433_vm7, %v4046_v27, %v4137_v19 }
 0xa41   : > { %4139 = vst [vmem:[%s11256_s29 + $0x2c] sm:$0x1] %v4138_v25 }
 0xa42   : > { %v4054_v31 = vpop.permute.xlu1 %4053 }
 0xa43   : > { %v4044_v7 = vpop.permute.xlu0 %4043  ;;  %v4144_v5 = vsel %vm13433_vm7, %v4054_v31, %v4143_v55  ;;  %v6150_v45 = vld [vmem:[%s11256_s29 + $0x1c] sm:$0x1] }
 0xa44   : > { %4136 = vst.msk [vmem:[%s11256_s29 + $0x28] sm:$0xf] %vm4119_vm5, %v4044_v7  ;;  %4145 = vst [vmem:[%s11256_s29 + $0x3c] sm:$0x1] %v4144_v5 }
 0xa46   : > { %v4048_v44 = vpop.permute.xlu1 %4047 }
 0xa47   : > { %v4062_v28 = vpop.permute.xlu0 %4061  ;;  %4140 = vst.msk [vmem:[%s11256_s29 + $0x30] sm:$0xf] %vm4119_vm5, %v4048_v44 }
 0xa48   : > { %v4150_v12 = vsel %vm13433_vm7, %v4062_v28, %v4149_v6  ;;  %v6156_v1 = vld [vmem:[%s11256_s29 + $0x2c] sm:$0x1] }
 0xa49   : > { %4151 = vst [vmem:[%s11256_s29 + $0x4c] sm:$0x1] %v4150_v12 }
 0xa4a   : > { %v4070_v23 = vpop.permute.xlu1 %4069 }
 0xa4b   : > { %v4078_v60 = vpop.permute.xlu0 %4077  ;;  %v4156_v48 = vsel %vm13433_vm7, %v4070_v23, %v4155_v52  ;;  %v6162_v21 = vld [vmem:[%s11256_s29 + $0x3c] sm:$0x1] }
 0xa4c   : > { %v4162_v57 = vsel %vm13433_vm7, %v4078_v60, %v4161_v11  ;;  %4157 = vst [vmem:[%s11256_s29 + $0x5c] sm:$0x1] %v4156_v48 }
 0xa4d   : > { %4163 = vst [vmem:[%s11256_s29 + $0x6c] sm:$0x1] %v4162_v57 }
 0xa4e   : > { %v4086_v0 = vpop.permute.xlu1 %4085 }
 0xa4f   : > { %v4050_v30 = vpop.permute.xlu0 %4049  ;;  %v4168_v37 = vsel %vm13433_vm7, %v4086_v0, %v4167_v62 }
 0xa50   : > { %4141 = vst.msk [vmem:[%s11256_s29 + $0x34] sm:$0xf] %vm4119_vm5, %v4050_v30  ;;  %4169 = vst [vmem:[%s11256_s29 + $0x7c] sm:$0x1] %v4168_v37  ;;  %v6168_v35 = vld [vmem:[%s11256_s29 + $0x4c] sm:$0x1] }
 0xa52   : > { %v6049_v17 = vpop.permute.xlu1 %6048 }
 0xa53   : > { %v6057_v41 = vpop.permute.xlu0 %6056  ;;  %v6145_v49 = vsel %vm13499_vm9, %v6049_v17, %v6144_v50  ;;  %v6174_v29 = vld [vmem:[%s11256_s29 + $0x5c] sm:$0x1] }
 0xa54   : > { %6146 = vst [vmem:[%s11256_s29 + $0xc] sm:$0x1] %v6145_v49  ;;  %v6151_v20 = vsel %vm13499_vm9, %v6057_v41, %v6150_v45  ;;  %v6180_v36 = vld [vmem:[%s11256_s29 + $0x6c] sm:$0x1] }
 0xa55   : > { %6152 = vst [vmem:[%s11256_s29 + $0x1c] sm:$0x1] %v6151_v20 }
 0xa56   : > { %v6065_v51 = vpop.permute.xlu1 %6064 }
 0xa57   : > { %v6073_v53 = vpop.permute.xlu0 %6072  ;;  %v6157_v59 = vsel %vm13499_vm9, %v6065_v51, %v6156_v1  ;;  %v6186_v22 = vld [vmem:[%s11256_s29 + $0x7c] sm:$0x1] }
 0xa58   : > { %6158 = vst [vmem:[%s11256_s29 + $0x2c] sm:$0x1] %v6157_v59  ;;  %v6163_v24 = vsel %vm13499_vm9, %v6073_v53, %v6162_v21 }
 0xa59   : > { %6164 = vst [vmem:[%s11256_s29 + $0x3c] sm:$0x1] %v6163_v24 }
 0xa5a   : > { %v6081_v3 = vpop.permute.xlu1 %6080 }
 0xa5b   : > { %v6089_v43 = vpop.permute.xlu0 %6088  ;;  %v6169_v61 = vsel %vm13499_vm9, %v6081_v3, %v6168_v35 }
 0xa5c   : > { %6170 = vst [vmem:[%s11256_s29 + $0x4c] sm:$0x1] %v6169_v61  ;;  %v6175_v33 = vsel %vm13499_vm9, %v6089_v43, %v6174_v29 }
 0xa5d   : > { %6176 = vst [vmem:[%s11256_s29 + $0x5c] sm:$0x1] %v6175_v33 }
 0xa5e   : > { %v6097_v46 = vpop.permute.xlu1 %6096 }
 0xa5f   : > { %v6105_v39 = vpop.permute.xlu0 %6104  ;;  %v6181_v18 = vsel %vm13499_vm9, %v6097_v46, %v6180_v36 }
 0xa60   : > { %6182 = vst [vmem:[%s11256_s29 + $0x6c] sm:$0x1] %v6181_v18  ;;  %v6187_v14 = vsel %vm13499_vm9, %v6105_v39, %v6186_v22 }
 0xa61   : > { %6188 = vst [vmem:[%s11256_s29 + $0x7c] sm:$0x1] %v6187_v14 }
 0xa62   : > { %v4052_v16 = vpop.permute.xlu1 %4051 }
 0xa63   : > { %v4056_v9 = vpop.permute.xlu0 %4055  ;;  %4142 = vst.msk [vmem:[%s11256_s29 + $0x38] sm:$0xf] %vm4119_vm5, %v4052_v16 }
 0xa64   : > { %4146 = vst.msk [vmem:[%s11256_s29 + $0x40] sm:$0xf] %vm4119_vm5, %v4056_v9 }
 0xa66   : > { %v4058_v47 = vpop.permute.xlu1 %4057 }
 0xa67   : > { %v4060_v15 = vpop.permute.xlu0 %4059  ;;  %4147 = vst.msk [vmem:[%s11256_s29 + $0x44] sm:$0xf] %vm4119_vm5, %v4058_v47 }
 0xa68   : > { %4148 = vst.msk [vmem:[%s11256_s29 + $0x48] sm:$0xf] %vm4119_vm5, %v4060_v15 }
 0xa6a   : > { %v4064_v63 = vpop.permute.xlu1 %4063 }
 0xa6b   : > { %v4066_v40 = vpop.permute.xlu0 %4065  ;;  %4152 = vst.msk [vmem:[%s11256_s29 + $0x50] sm:$0xf] %vm4119_vm5, %v4064_v63 }
 0xa6c   : > { %4153 = vst.msk [vmem:[%s11256_s29 + $0x54] sm:$0xf] %vm4119_vm5, %v4066_v40 }
 0xa6e   : > { %v4068_v56 = vpop.permute.xlu1 %4067 }
 0xa6f   : > { %v4072_v42 = vpop.permute.xlu0 %4071  ;;  %4154 = vst.msk [vmem:[%s11256_s29 + $0x58] sm:$0xf] %vm4119_vm5, %v4068_v56 }
 0xa70   : > { %4158 = vst.msk [vmem:[%s11256_s29 + $0x60] sm:$0xf] %vm4119_vm5, %v4072_v42 }
 0xa72   : > { %v4074_v4 = vpop.permute.xlu1 %4073 }
 0xa73   : > { %v4076_v2 = vpop.permute.xlu0 %4075  ;;  %4159 = vst.msk [vmem:[%s11256_s29 + $0x64] sm:$0xf] %vm4119_vm5, %v4074_v4 }
 0xa74   : > { %4160 = vst.msk [vmem:[%s11256_s29 + $0x68] sm:$0xf] %vm4119_vm5, %v4076_v2 }
 0xa76   : > { %v4080_v38 = vpop.permute.xlu1 %4079 }
 0xa77   : > { %v4082_v10 = vpop.permute.xlu0 %4081  ;;  %4164 = vst.msk [vmem:[%s11256_s29 + $0x70] sm:$0xf] %vm4119_vm5, %v4080_v38 }
 0xa78   : > { %4165 = vst.msk [vmem:[%s11256_s29 + $0x74] sm:$0xf] %vm4119_vm5, %v4082_v10 }
 0xa7a   : > { %v4084_v32 = vpop.permute.xlu1 %4083 }
 0xa7b   : > { %v6043_v58 = vpop.permute.xlu0 %6042  ;;  %4166 = vst.msk [vmem:[%s11256_s29 + $0x78] sm:$0xf] %vm4119_vm5, %v4084_v32 }
 0xa7c   : > { %6139 = vst.msk [vmem:[%s11256_s29] sm:$0xf] %vm6138_vm10, %v6043_v58 }
 0xa7e   : > { %v6045_v8 = vpop.permute.xlu1 %6044 }
 0xa7f   : > { %v6047_v13 = vpop.permute.xlu0 %6046  ;;  %6140 = vst.msk [vmem:[%s11256_s29 + $0x4] sm:$0xf] %vm6138_vm10, %v6045_v8 }
 0xa80   : > { %6141 = vst.msk [vmem:[%s11256_s29 + $0x8] sm:$0xf] %vm6138_vm10, %v6047_v13 }
 0xa82   : > { %v6051_v54 = vpop.permute.xlu1 %6050 }
 0xa83   : > { %v6053_v34 = vpop.permute.xlu0 %6052  ;;  %6147 = vst.msk [vmem:[%s11256_s29 + $0x10] sm:$0xf] %vm6138_vm10, %v6051_v54 }
 0xa84   : > { %6148 = vst.msk [vmem:[%s11256_s29 + $0x14] sm:$0xf] %vm6138_vm10, %v6053_v34 }
 0xa86   : > { %v6055_v19 = vpop.permute.xlu1 %6054 }
 0xa87   : > { %v6059_v27 = vpop.permute.xlu0 %6058  ;;  %6149 = vst.msk [vmem:[%s11256_s29 + $0x18] sm:$0xf] %vm6138_vm10, %v6055_v19 }
 0xa88   : > { %6153 = vst.msk [vmem:[%s11256_s29 + $0x20] sm:$0xf] %vm6138_vm10, %v6059_v27 }
 0xa8a   : > { %v6061_v25 = vpop.permute.xlu1 %6060 }
 0xa8b   : > { %v6063_v55 = vpop.permute.xlu0 %6062  ;;  %6154 = vst.msk [vmem:[%s11256_s29 + $0x24] sm:$0xf] %vm6138_vm10, %v6061_v25 }
 0xa8c   : > { %6155 = vst.msk [vmem:[%s11256_s29 + $0x28] sm:$0xf] %vm6138_vm10, %v6063_v55 }
 0xa8e   : > { %v6067_v31 = vpop.permute.xlu1 %6066 }
 0xa8f   : > { %v6069_v7 = vpop.permute.xlu0 %6068  ;;  %6159 = vst.msk [vmem:[%s11256_s29 + $0x30] sm:$0xf] %vm6138_vm10, %v6067_v31 }
 0xa90   : > { %6160 = vst.msk [vmem:[%s11256_s29 + $0x34] sm:$0xf] %vm6138_vm10, %v6069_v7 }
 0xa92   : > { %v6071_v5 = vpop.permute.xlu1 %6070 }
 0xa93   : > { %v6075_v44 = vpop.permute.xlu0 %6074  ;;  %6161 = vst.msk [vmem:[%s11256_s29 + $0x38] sm:$0xf] %vm6138_vm10, %v6071_v5 }
 0xa94   : > { %6165 = vst.msk [vmem:[%s11256_s29 + $0x40] sm:$0xf] %vm6138_vm10, %v6075_v44 }
 0xa96   : > { %v6077_v6 = vpop.permute.xlu1 %6076 }
 0xa97   : > { %v6079_v28 = vpop.permute.xlu0 %6078  ;;  %6166 = vst.msk [vmem:[%s11256_s29 + $0x44] sm:$0xf] %vm6138_vm10, %v6077_v6 }
 0xa98   : > { %6167 = vst.msk [vmem:[%s11256_s29 + $0x48] sm:$0xf] %vm6138_vm10, %v6079_v28 }
 0xa9a   : > { %v6083_v12 = vpop.permute.xlu1 %6082 }
 0xa9b   : > { %v6085_v52 = vpop.permute.xlu0 %6084  ;;  %6171 = vst.msk [vmem:[%s11256_s29 + $0x50] sm:$0xf] %vm6138_vm10, %v6083_v12 }
 0xa9c   : > { %6172 = vst.msk [vmem:[%s11256_s29 + $0x54] sm:$0xf] %vm6138_vm10, %v6085_v52 }
 0xa9e   : > { %v6087_v23 = vpop.permute.xlu1 %6086 }
 0xa9f   : > { %v6091_v11 = vpop.permute.xlu0 %6090  ;;  %6173 = vst.msk [vmem:[%s11256_s29 + $0x58] sm:$0xf] %vm6138_vm10, %v6087_v23 }
 0xaa0   : > { %6177 = vst.msk [vmem:[%s11256_s29 + $0x60] sm:$0xf] %vm6138_vm10, %v6091_v11 }
 0xaa2   : > { %v6093_v60 = vpop.permute.xlu1 %6092 }
 0xaa3   : > { %v6095_v48 = vpop.permute.xlu0 %6094  ;;  %6178 = vst.msk [vmem:[%s11256_s29 + $0x64] sm:$0xf] %vm6138_vm10, %v6093_v60 }
 0xaa4   : > { %6179 = vst.msk [vmem:[%s11256_s29 + $0x68] sm:$0xf] %vm6138_vm10, %v6095_v48 }
 0xaa6   : > { %v6099_v57 = vpop.permute.xlu1 %6098 }
 0xaa7   : > { %v6101_v62 = vpop.permute.xlu0 %6100  ;;  %6183 = vst.msk [vmem:[%s11256_s29 + $0x70] sm:$0xf] %vm6138_vm10, %v6099_v57 }
 0xaa8   : > { %6184 = vst.msk [vmem:[%s11256_s29 + $0x74] sm:$0xf] %vm6138_vm10, %v6101_v62 }
 0xaaa   : > { %v6103_v0 = vpop.permute.xlu1 %6102 }
 0xaab   : > { %6185 = vst.msk [vmem:[%s11256_s29 + $0x78] sm:$0xf] %vm6138_vm10, %v6103_v0 }
 0xabe   : > { %v9599_v30 = vpop.f32.mrf.mxu0 }
 0xabf   : > { %v8859_v37 = vpack.c.bf16 %v9599_v30, %v9599_v30 }
 0xac0   : > { %v7453_v26 = vpop.f32.mrf.mxu0 }
 0xac1   : > { %8065 = vrot.lane.b32.xlu0 %v8859_v37, %s10476_s26  ;;  %v8857_v17 = vpack.c.bf16 %v7453_v26, %v7453_v26 }
 0xac2   : > { %v9607_v50 = vpop.f32.mrf.mxu1  ;;  %v9600_v41 = vpop.f32.mrf.mxu0 }
 0xac3   : > { %v8863_v49 = vpack.c.bf16 %v9607_v50, %v9607_v50  ;;  %v8860_v20 = vpack.c.bf16 %v9600_v41, %v9600_v41  ;;  %v8163_v50 = vld [vmem:[%s11256_s29 + $0xc] sm:$0x1] }
 0xac4   : > { %v7524_v45 = vpop.f32.mrf.mxu1  ;;  %v7456_v24 = vpop.f32.mrf.mxu0 }
 0xac5   : > { %8061 = vrot.lane.b32.xlu0 %v8857_v17, %s10476_s26  ;;  %8073 = vrot.lane.b32.xlu1 %v8863_v49, %s10476_s26  ;;  %v8861_v1 = vpack.c.bf16 %v7524_v45, %v7524_v45  ;;  %v8858_v3 = vpack.c.bf16 %v7456_v24, %v7456_v24 }
 0xac6   : > { %v9608_v51 = vpop.f32.mrf.mxu1 }
 0xac7   : > { %v8864_v21 = vpack.c.bf16 %v9608_v51, %v9608_v51 }
 0xac8   : > { %v7527_v53 = vpop.f32.mrf.mxu1 }
 0xac9   : > { %8067 = vrot.lane.b32.xlu0 %v8860_v20, %s10476_s26  ;;  %8069 = vrot.lane.b32.xlu1 %v8861_v1, %s10476_s26  ;;  %v8862_v59 = vpack.c.bf16 %v7527_v53, %v7527_v53  ;;  %v8169_v1 = vld [vmem:[%s11256_s29 + $0x1c] sm:$0x1] }
 0xacd   : > { %8071 = vrot.lane.b32.xlu0 %v8862_v59, %s10476_s26  ;;  %8075 = vrot.lane.b32.xlu1 %v8864_v21, %s10476_s26 }
 0xacf   : > { %v9615_v43 = vpop.f32.mrf.mxu0 }
 0xad0   : > { %v8867_v35 = vpack.c.bf16 %v9615_v43, %v9615_v43 }
 0xad1   : > { %v7595_v61 = vpop.f32.mrf.mxu0  ;;  %8063 = vrot.lane.b32.xlu1 %v8858_v3, %s10476_s26 }
 0xad2   : > { %8081 = vrot.lane.b32.xlu0 %v8867_v35, %s10476_s26  ;;  %v8865_v33 = vpack.c.bf16 %v7595_v61, %v7595_v61  ;;  %v8175_v35 = vld [vmem:[%s11256_s29 + $0x2c] sm:$0x1] }
 0xad3   : > { %v9623_v29 = vpop.f32.mrf.mxu1  ;;  %v9616_v39 = vpop.f32.mrf.mxu0 }
 0xad4   : > { %v8871_v46 = vpack.c.bf16 %v9623_v29, %v9623_v29  ;;  %v8868_v22 = vpack.c.bf16 %v9616_v39, %v9616_v39 }
 0xad5   : > { %v7666_v36 = vpop.f32.mrf.mxu1  ;;  %v7598_v15 = vpop.f32.mrf.mxu0 }
 0xad6   : > { %8077 = vrot.lane.b32.xlu0 %v8865_v33, %s10476_s26  ;;  %8089 = vrot.lane.b32.xlu1 %v8871_v46, %s10476_s26  ;;  %v8869_v14 = vpack.c.bf16 %v7666_v36, %v7666_v36  ;;  %v8866_v40 = vpack.c.bf16 %v7598_v15, %v7598_v15  ;;  %v8181_v46 = vld [vmem:[%s11256_s29 + $0x3c] sm:$0x1] }
 0xad7   : > { %v9624_v18 = vpop.f32.mrf.mxu1 }
 0xad8   : > { %v8872_v9 = vpack.c.bf16 %v9624_v18, %v9624_v18 }
 0xad9   : > { %v7669_v16 = vpop.f32.mrf.mxu1 }
 0xada   : > { %8083 = vrot.lane.b32.xlu0 %v8868_v22, %s10476_s26  ;;  %8085 = vrot.lane.b32.xlu1 %v8869_v14, %s10476_s26  ;;  %v8870_v47 = vpack.c.bf16 %v7669_v16, %v7669_v16 }
 0xade   : > { %8091 = vrot.lane.b32.xlu1 %v8872_v9, %s10476_s26  ;;  %8087 = vrot.lane.b32.xlu0 %v8870_v47, %s10476_s26  ;;  %v8187_v47 = vld [vmem:[%s11256_s29 + $0x4c] sm:$0x1] }
 0xadf   : > { %v9631_v63 = vpop.f32.mrf.mxu0 }
 0xae0   : > { %v8875_v56 = vpack.c.bf16 %v9631_v63, %v9631_v63 }
 0xae1   : > { %v7737_v42 = vpop.f32.mrf.mxu0 }
 0xae2   : > { %8079 = vrot.lane.b32.xlu1 %v8866_v40, %s10476_s26  ;;  %8097 = vrot.lane.b32.xlu0 %v8875_v56, %s10476_s26  ;;  %v8873_v2 = vpack.c.bf16 %v7737_v42, %v7737_v42  ;;  %v8193_v56 = vld [vmem:[%s11256_s29 + $0x5c] sm:$0x1] }
 0xae3   : > { %v9639_v4 = vpop.f32.mrf.mxu1  ;;  %v9632_v10 = vpop.f32.mrf.mxu0 }
 0xae4   : > { %v8879_v38 = vpack.c.bf16 %v9639_v4, %v9639_v4  ;;  %v8876_v8 = vpack.c.bf16 %v9632_v10, %v9632_v10 }
 0xae5   : > { %v7808_v32 = vpop.f32.mrf.mxu1  ;;  %v7740_v27 = vpop.f32.mrf.mxu0 }
 0xae6   : > { %8093 = vrot.lane.b32.xlu0 %v8873_v2, %s10476_s26  ;;  %8105 = vrot.lane.b32.xlu1 %v8879_v38, %s10476_s26  ;;  %v8877_v13 = vpack.c.bf16 %v7808_v32, %v7808_v32  ;;  %v8874_v25 = vpack.c.bf16 %v7740_v27, %v7740_v27 }
 0xae7   : > { %v9640_v58 = vpop.f32.mrf.mxu1 }
 0xae8   : > { %v8880_v34 = vpack.c.bf16 %v9640_v58, %v9640_v58  ;;  %v8199_v58 = vld [vmem:[%s11256_s29 + $0x6c] sm:$0x1] }
 0xae9   : > { %v7811_v54 = vpop.f32.mrf.mxu1 }
 0xaea   : > { %8099 = vrot.lane.b32.xlu0 %v8876_v8, %s10476_s26  ;;  %8101 = vrot.lane.b32.xlu1 %v8877_v13, %s10476_s26  ;;  %v8878_v19 = vpack.c.bf16 %v7811_v54, %v7811_v54 }
 0xaee   : > { %8107 = vrot.lane.b32.xlu1 %v8880_v34, %s10476_s26  ;;  %8103 = vrot.lane.b32.xlu0 %v8878_v19, %s10476_s26  ;;  %v8205_v34 = vld [vmem:[%s11256_s29 + $0x7c] sm:$0x1] }
 0xaf2   : > { %8095 = vrot.lane.b32.xlu1 %v8874_v25, %s10476_s26 }
 0xaf7   : > { %v9647_v55 = vpop.f32.mrf.mxu0 }
 0xaf8   : > { %v8883_v31 = vpack.c.bf16 %v9647_v55, %v9647_v55 }
 0xaf9   : > { %v7879_v7 = vpop.f32.mrf.mxu0 }
 0xafa   : > { %8113 = vrot.lane.b32.xlu0 %v8883_v31, %s10476_s26  ;;  %v9655_v5 = vpop.f32.mrf.mxu1  ;;  %v8881_v44 = vpack.c.bf16 %v7879_v7, %v7879_v7 }
 0xafb   : > { %v9648_v28 = vpop.f32.mrf.mxu0  ;;  %v8887_v0 = vpack.c.bf16 %v9655_v5, %v9655_v5 }
 0xafc   : > { %v7950_v6 = vpop.f32.mrf.mxu1  ;;  %v8884_v23 = vpack.c.bf16 %v9648_v28, %v9648_v28 }
 0xafd   : > { %v8885_v12 = vpack.c.bf16 %v7950_v6, %v7950_v6  ;;  %v7882_v48 = vpop.f32.mrf.mxu0 }
 0xafe   : > { %8109 = vrot.lane.b32.xlu0 %v8881_v44, %s10476_s26  ;;  %v9656_v52 = vpop.f32.mrf.mxu1  ;;  %v8882_v62 = vpack.c.bf16 %v7882_v48, %v7882_v48 }
 0xaff   : > { %8117 = vrot.lane.b32.xlu1 %v8885_v12, %s10476_s26  ;;  %v8888_v11 = vpack.c.bf16 %v9656_v52, %v9656_v52 }
 0xb00   : > { %v7953_v60 = vpop.f32.mrf.mxu1 }
 0xb01   : > { %v8886_v57 = vpack.c.bf16 %v7953_v60, %v7953_v60 }
 0xb02   : > { %8115 = vrot.lane.b32.xlu0 %v8884_v23, %s10476_s26 }
 0xb03   : > { %8123 = vrot.lane.b32.xlu1 %v8888_v11, %s10476_s26 }
 0xb06   : > { %8119 = vrot.lane.b32.xlu0 %v8886_v57, %s10476_s26 }
 0xb07   : > { %8111 = vrot.lane.b32.xlu1 %v8882_v62, %s10476_s26 }
 0xb0b   : > { %8121 = vrot.lane.b32.xlu1 %v8887_v0, %s10476_s26 }
 0xb33   : > { %v8066_v30 = vpop.permute.xlu0 %8065 }
 0xb34   : > { %8160 = vst.msk [vmem:[%s11256_s29 + $0x8] sm:$0xf] %vm8157_vm11, %v8066_v30 }
 0xb37   : > { %v8062_v37 = vpop.permute.xlu0 %8061  ;;  %v8074_v26 = vpop.permute.xlu1 %8073 }
 0xb38   : > { %8158 = vst.msk [vmem:[%s11256_s29] sm:$0xf] %vm8157_vm11, %v8062_v37  ;;  %8168 = vst.msk [vmem:[%s11256_s29 + $0x18] sm:$0xf] %vm8157_vm11, %v8074_v26 }
 0xb3b   : > { %v8068_v41 = vpop.permute.xlu0 %8067  ;;  %v8070_v49 = vpop.permute.xlu1 %8069 }
 0xb3c   : > { %v8164_v45 = vsel %vm13648_vm13, %v8068_v41, %v8163_v50  ;;  %8166 = vst.msk [vmem:[%s11256_s29 + $0x10] sm:$0xf] %vm8157_vm11, %v8070_v49 }
 0xb3d   : > { %8165 = vst [vmem:[%s11256_s29 + $0xc] sm:$0x1] %v8164_v45 }
 0xb3f   : > { %v8072_v20 = vpop.permute.xlu0 %8071  ;;  %v8076_v51 = vpop.permute.xlu1 %8075 }
 0xb40   : > { %8167 = vst.msk [vmem:[%s11256_s29 + $0x14] sm:$0xf] %vm8157_vm11, %v8072_v20  ;;  %v8170_v53 = vsel %vm13648_vm13, %v8076_v51, %v8169_v1 }
 0xb41   : > { %8171 = vst [vmem:[%s11256_s29 + $0x1c] sm:$0x1] %v8170_v53 }
 0xb43   : > { %v8064_v59 = vpop.permute.xlu1 %8063 }
 0xb44   : > { %8159 = vst.msk [vmem:[%s11256_s29 + $0x4] sm:$0xf] %vm8157_vm11, %v8064_v59  ;;  %v8082_v21 = vpop.permute.xlu0 %8081 }
 0xb45   : > { %8174 = vst.msk [vmem:[%s11256_s29 + $0x28] sm:$0xf] %vm8157_vm11, %v8082_v21 }
 0xb48   : > { %v8090_v24 = vpop.permute.xlu1 %8089  ;;  %v8078_v3 = vpop.permute.xlu0 %8077 }
 0xb49   : > { %8180 = vst.msk [vmem:[%s11256_s29 + $0x38] sm:$0xf] %vm8157_vm11, %v8090_v24  ;;  %8172 = vst.msk [vmem:[%s11256_s29 + $0x20] sm:$0xf] %vm8157_vm11, %v8078_v3 }
 0xb4c   : > { %v8086_v43 = vpop.permute.xlu1 %8085  ;;  %v8084_v61 = vpop.permute.xlu0 %8083 }
 0xb4d   : > { %8178 = vst.msk [vmem:[%s11256_s29 + $0x30] sm:$0xf] %vm8157_vm11, %v8086_v43  ;;  %v8176_v29 = vsel %vm13648_vm13, %v8084_v61, %v8175_v35 }
 0xb4e   : > { %8177 = vst [vmem:[%s11256_s29 + $0x2c] sm:$0x1] %v8176_v29 }
 0xb50   : > { %v8092_v33 = vpop.permute.xlu1 %8091  ;;  %v8088_v39 = vpop.permute.xlu0 %8087 }
 0xb51   : > { %v8182_v36 = vsel %vm13648_vm13, %v8092_v33, %v8181_v46  ;;  %8179 = vst.msk [vmem:[%s11256_s29 + $0x34] sm:$0xf] %vm8157_vm11, %v8088_v39 }
 0xb52   : > { %8183 = vst [vmem:[%s11256_s29 + $0x3c] sm:$0x1] %v8182_v36 }
 0xb54   : > { %v8080_v18 = vpop.permute.xlu1 %8079  ;;  %v8098_v22 = vpop.permute.xlu0 %8097 }
 0xb55   : > { %8173 = vst.msk [vmem:[%s11256_s29 + $0x24] sm:$0xf] %vm8157_vm11, %v8080_v18  ;;  %8186 = vst.msk [vmem:[%s11256_s29 + $0x48] sm:$0xf] %vm8157_vm11, %v8098_v22 }
 0xb58   : > { %v8106_v14 = vpop.permute.xlu1 %8105  ;;  %v8094_v16 = vpop.permute.xlu0 %8093 }
 0xb59   : > { %8192 = vst.msk [vmem:[%s11256_s29 + $0x58] sm:$0xf] %vm8157_vm11, %v8106_v14  ;;  %8184 = vst.msk [vmem:[%s11256_s29 + $0x40] sm:$0xf] %vm8157_vm11, %v8094_v16 }
 0xb5c   : > { %v8102_v9 = vpop.permute.xlu1 %8101  ;;  %v8100_v15 = vpop.permute.xlu0 %8099 }
 0xb5d   : > { %8190 = vst.msk [vmem:[%s11256_s29 + $0x50] sm:$0xf] %vm8157_vm11, %v8102_v9  ;;  %v8188_v63 = vsel %vm13648_vm13, %v8100_v15, %v8187_v47 }
 0xb5e   : > { %8189 = vst [vmem:[%s11256_s29 + $0x4c] sm:$0x1] %v8188_v63 }
 0xb60   : > { %v8108_v40 = vpop.permute.xlu1 %8107  ;;  %v8104_v42 = vpop.permute.xlu0 %8103 }
 0xb61   : > { %v8194_v4 = vsel %vm13648_vm13, %v8108_v40, %v8193_v56  ;;  %8191 = vst.msk [vmem:[%s11256_s29 + $0x54] sm:$0xf] %vm8157_vm11, %v8104_v42 }
 0xb62   : > { %8195 = vst [vmem:[%s11256_s29 + $0x5c] sm:$0x1] %v8194_v4 }
 0xb64   : > { %v8096_v2 = vpop.permute.xlu1 %8095 }
 0xb65   : > { %8185 = vst.msk [vmem:[%s11256_s29 + $0x44] sm:$0xf] %vm8157_vm11, %v8096_v2 }
 0xb6c   : > { %v8114_v38 = vpop.permute.xlu0 %8113 }
 0xb6d   : > { %8198 = vst.msk [vmem:[%s11256_s29 + $0x68] sm:$0xf] %vm8157_vm11, %v8114_v38 }
 0xb70   : > { %v8110_v10 = vpop.permute.xlu0 %8109 }
 0xb71   : > { %8196 = vst.msk [vmem:[%s11256_s29 + $0x60] sm:$0xf] %vm8157_vm11, %v8110_v10  ;;  %v8118_v32 = vpop.permute.xlu1 %8117 }
 0xb72   : > { %8202 = vst.msk [vmem:[%s11256_s29 + $0x70] sm:$0xf] %vm8157_vm11, %v8118_v32 }
 0xb74   : > { %v8116_v8 = vpop.permute.xlu0 %8115 }
 0xb75   : > { %v8200_v13 = vsel %vm13648_vm13, %v8116_v8, %v8199_v58  ;;  %v8124_v54 = vpop.permute.xlu1 %8123 }
 0xb76   : > { %8201 = vst [vmem:[%s11256_s29 + $0x6c] sm:$0x1] %v8200_v13  ;;  %v8206_v19 = vsel %vm13648_vm13, %v8124_v54, %v8205_v34 }
 0xb77   : > { %8207 = vst [vmem:[%s11256_s29 + $0x7c] sm:$0x1] %v8206_v19 }
 0xb78   : > { %v8120_v27 = vpop.permute.xlu0 %8119 }
 0xb79   : > { %8203 = vst.msk [vmem:[%s11256_s29 + $0x74] sm:$0xf] %vm8157_vm11, %v8120_v27  ;;  %v8112_v25 = vpop.permute.xlu1 %8111 }
 0xb7a   : > { %8197 = vst.msk [vmem:[%s11256_s29 + $0x64] sm:$0xf] %vm8157_vm11, %v8112_v25 }
 0xb7d   : > { %v8122_v55 = vpop.permute.xlu1 %8121 }
 0xb7e   : > { %8204 = vst.msk [vmem:[%s11256_s29 + $0x78] sm:$0xf] %vm8157_vm11, %v8122_v55 }
 0xb7f PF: > { %s14_s15 = sadd.s32 1, %s10474_s15  }
 0xb80   : > { %p11_p4 = scmp.ge.s32.totalorder %s14_s15, 4  }
 0xb82   :  { %13 = sbr.rel (!%p11_p4) target bundleno = 1 (0x1), region = 72 }

// kernel: sub.56
= control target key start
LH: loop header
LB: loop body
LE: loop exit
PB: predicated region body
PF: predicated region fallthrough
CT: control target
= control target key end

     0   :  { %s45_s8 = smov 20   ;;  %s46_s13 = smov 10   ;;  %vm3_vm0 = vcmask 39936   ;;  %vm9_vm1 = vcmask 203936   ;;  %vm15_vm2 = vcmask 162936   ;;  %vm21_vm3 = vcmask 121936   ;;  %s77_s0 = inlined_call_operand.vmem [shape: f32[1,2,2,5,5,1], index: 0, kind: input, shape index: {}]   ;;  %s78_s1 = inlined_call_operand.vmem [shape: f32[4,25], index: 1, kind: output, shape index: {}]  }
   0x1   :  { %v37_v0 = vld [vmem:[%s77_s0 + $0x4] ss:$8 sm:$0xf]   ;;  %v39_v1 = vld [vmem:[%s77_s0 + $0x2] ss:$8 sm:$0xf]  }
   0x2   :  { %7 = vrot.lane.b32.xlu0 %v37_v0, %s45_s8  ;;  %v38_v2 = vld [vmem:[%s77_s0 + $0x3] ss:$8 sm:$0xf]   ;;  %19 = vrot.lane.b32.xlu1 %v39_v1, %s46_s13  ;;  %v40_v3 = vld [vmem:[%s77_s0 + $0x1] ss:$8 sm:$0xf]  }
   0x3   :  { %v2_v4 = vld [vmem:[%s77_s0] ss:$8 sm:$0xf]   ;;  %s47_s0 = smov 15   ;;  %s48_s18 = smov 5   ;;  %vm27_vm4 = vcmask 80936  }
   0x4   :  { %4 = vst.msk [vmem:[#allocation0] sm:$0xf] %vm3_vm0, %v2_v4  }
   0x6   :  { %13 = vrot.lane.b32.xlu0 %v38_v2, %s47_s0  ;;  %25 = vrot.lane.b32.xlu1 %v40_v3, %s48_s18 }
  0x74   :  { %v8_v5 = vpop.permute.xlu0 %7   ;;  %v20_v6 = vpop.permute.xlu1 %19  }
  0x75   :  { %10 = vst.msk [vmem:[#allocation0] sm:$0xf] %vm9_vm1, %v8_v5  }
  0x78   :  { %v14_v7 = vpop.permute.xlu0 %13   ;;  %v26_v8 = vpop.permute.xlu1 %25  }
  0x79   :  { %16 = vst.msk [vmem:[#allocation0] sm:$0xf] %vm15_vm2, %v14_v7  }
  0x7a   :  { %22 = vst.msk [vmem:[#allocation0] sm:$0xf] %vm21_vm3, %v20_v6  }
  0x7b   :  { %28 = vst.msk [vmem:[#allocation0] sm:$0xf] %vm27_vm4, %v26_v8  }
  0x82   :  { %v33_v9 = vld [vmem:[#allocation0] sm:$0xf] }
  0x83   :  { %36 = vst [vmem:[%s78_s1] sm:$0xf] %v33_v9 }

</bundles_post_ra>
